<compile_context>
chip_gen: v6e
topology: v6e:2x2x1
jax: 0.10.0
libtpu: 0.0.40
codegen_flags: <defaults>
</compile_context>

<pallas_src>
import functools

import jax
import jax.numpy as jnp
from jax.experimental import pallas as pl
from jax.experimental.pallas import tpu as pltpu

LANE = 128


def _round_up(x, m):
    return (x + m - 1) // m * m


def _pick_tm(m):
    """Block size along M: prefer >=2 blocks (v7x has 2 TensorCores), <=512."""
    for tm in (512, 256, 128, 64, 32, 16, 8):
        if m % tm == 0 and m // tm >= 2:
            return tm
    return m  # single whole-M block (block == full dim waives 8-divisibility)


# --------------------------------------------------------------------------
# Pallas kernel 1: fused matmul + bias (+ ReLU)
#   out[m, n] = relu?( (A @ W)[m, n] + bias[n] ),  A/W bf16, f32 accumulate
# --------------------------------------------------------------------------
def _matmul_bias_kernel(a_ref, w_ref, b_ref, o_ref, *, apply_relu):
    acc = jnp.dot(a_ref[...], w_ref[...], preferred_element_type=jnp.float32)
    acc = acc + b_ref[...]
    if apply_relu:
        acc = jnp.maximum(acc, 0.0)
    o_ref[...] = acc.astype(o_ref.dtype)


def fused_matmul_bias(a, w, b, *, apply_relu, out_dtype=jnp.bfloat16):
    """a: [M, Kp] bf16; w: [Kp, 128] bf16 (BN scale folded); b: [1, 128] f32."""
    m, kp = a.shape
    _, n = w.shape
    tm = _pick_tm(m)
    kernel = functools.partial(_matmul_bias_kernel, apply_relu=apply_relu)
    return pl.pallas_call(
        kernel,
        out_shape=jax.ShapeDtypeStruct((m, n), out_dtype),
        grid_spec=pltpu.PrefetchScalarGridSpec(
            num_scalar_prefetch=0,
            grid=(m // tm,),
            in_specs=[
                pl.BlockSpec((tm, kp), lambda i: (i, 0)),
                pl.BlockSpec((kp, n), lambda i: (0, 0)),
                pl.BlockSpec((1, n), lambda i: (0, 0)),
            ],
            out_specs=pl.BlockSpec((tm, n), lambda i: (i, 0)),
        ),
        compiler_params=pltpu.CompilerParams(dimension_semantics=("parallel",)),
    )(a, w, b)


# --------------------------------------------------------------------------
# Pallas kernel 2: conv1 (+BN+ReLU) and conv2 (1x1x1) fused as chained matmuls
#   h = relu(A @ W1 + b1);  out = h @ W2 + b2       (lane-dense 128-wide output)
# --------------------------------------------------------------------------
def _double_matmul_kernel(a_ref, w1_ref, b1_ref, w2_ref, b2_ref, o_ref):
    h = jnp.dot(a_ref[...], w1_ref[...], preferred_element_type=jnp.float32)
    h = jnp.maximum(h + b1_ref[...], 0.0)                       # conv1 + BN + ReLU
    out = jnp.dot(h.astype(jnp.bfloat16), w2_ref[...],
                  preferred_element_type=jnp.float32) + b2_ref[...]   # conv2 1x1x1
    o_ref[...] = out.astype(o_ref.dtype)


def fused_double_matmul(a, w1, b1, w2, b2, *, out_dtype=jnp.float32):
    m, kp = a.shape
    n = w1.shape[1]
    tm = _pick_tm(m)
    return pl.pallas_call(
        _double_matmul_kernel,
        out_shape=jax.ShapeDtypeStruct((m, n), out_dtype),
        grid_spec=pltpu.PrefetchScalarGridSpec(
            num_scalar_prefetch=0,
            grid=(m // tm,),
            in_specs=[
                pl.BlockSpec((tm, kp), lambda i: (i, 0)),
                pl.BlockSpec((kp, n), lambda i: (0, 0)),
                pl.BlockSpec((1, n), lambda i: (0, 0)),
                pl.BlockSpec((n, n), lambda i: (0, 0)),
                pl.BlockSpec((1, n), lambda i: (0, 0)),
            ],
            out_specs=pl.BlockSpec((tm, n), lambda i: (i, 0)),
        ),
        compiler_params=pltpu.CompilerParams(dimension_semantics=("parallel",)),
    )(a, w1, b1, w2, b2)


# --------------------------------------------------------------------------
# Pallas kernel 3: ECA attention on a lane-dense (padded-to-128) channel axis
#   pooled = mean_S(x); y = pooled @ band + cb; out = x * sigmoid(y)
# --------------------------------------------------------------------------
def _eca_kernel(x_ref, band_ref, cb_ref, o_ref, *, inv_s):
    x = x_ref[0]                                            # (S, 128) f32
    pooled = jnp.sum(x, axis=0, keepdims=True) * inv_s      # (1, 128)
    y = jnp.dot(pooled, band_ref[...],
                preferred_element_type=jnp.float32) + cb_ref[...]
    # sigmoid: exp on EUP, divide as EUP reciprocal (exp overflow -> gate 0, benign)
    gate = pl.reciprocal(1.0 + jnp.exp(-y), approx=True)
    o_ref[0] = (x * gate).astype(o_ref.dtype)


def eca_apply(x, band, cb):
    """x: [B, S, 128] f32 (lanes >= real C are zero); band: [128,128]; cb: [1,128]."""
    b, s, c = x.shape
    kernel = functools.partial(_eca_kernel, inv_s=1.0 / float(s))
    return pl.pallas_call(
        kernel,
        out_shape=jax.ShapeDtypeStruct((b, s, c), jnp.float32),
        grid_spec=pltpu.PrefetchScalarGridSpec(
            num_scalar_prefetch=0,
            grid=(b,),
            in_specs=[
                pl.BlockSpec((1, s, c), lambda i: (i, 0, 0)),
                pl.BlockSpec((c, c), lambda i: (0, 0)),
                pl.BlockSpec((1, c), lambda i: (0, 0)),
            ],
            out_specs=pl.BlockSpec((1, s, c), lambda i: (i, 0, 0)),
        ),
        compiler_params=pltpu.CompilerParams(dimension_semantics=("parallel",)),
    )(x, band, cb)


# --------------------------------------------------------------------------
# im2col glue (plain JAX, bf16, K padded in one shot) + conv wrappers
# --------------------------------------------------------------------------
def _im2col(x, ksize, stride, pad, k_pad_to):
    """x: [N,D,H,W,C] bf16. Returns [N*Do*Ho*Wo, k_pad_to] patches
    (K ordered (kd, kh, kw, C), zero-padded to k_pad_to in the same concat)."""
    kd, kh, kw = ksize
    sd, sh, sw = stride
    xp = jnp.pad(x, ((0, 0), pad[0], pad[1], pad[2], (0, 0)))
    n, dp, hp, wp, c = xp.shape
    do = (dp - kd) // sd + 1
    ho = (hp - kh) // sh + 1
    wo = (wp - kw) // sw + 1
    cols = []
    for i in range(kd):
        for j in range(kh):
            for k in range(kw):
                cols.append(
                    xp[:, i:i + (do - 1) * sd + 1:sd,
                          j:j + (ho - 1) * sh + 1:sh,
                          k:k + (wo - 1) * sw + 1:sw, :])
    kk = kd * kh * kw * c
    if k_pad_to > kk:
        cols.append(jnp.zeros((n, do, ho, wo, k_pad_to - kk), xp.dtype))
    patches = jnp.concatenate(cols, axis=-1)
    return patches.reshape(n * do * ho * wo, k_pad_to), (n, do, ho, wo)


def conv3d_fused(x, w, b, *, ksize, stride, padding, cout):
    """Conv3d + folded BN + ReLU. x: [N,D,H,W,Cin] bf16; w: [Kp,128] bf16."""
    pd, ph, pw = padding
    a, (n, do, ho, wo) = _im2col(x, ksize, stride,
                                 ((pd, pd), (ph, ph), (pw, pw)), w.shape[0])
    out = fused_matmul_bias(a, w, b, apply_relu=True)
    return out[:, :cout].reshape(n, do, ho, wo, cout)


def conv_transpose3d_fused(x, w, b, *, ksize, stride, padding, output_padding, cout):
    """ConvTranspose3d + folded BN + ReLU (weights pre-flipped at build time)."""
    kd, kh, kw = ksize
    sd, sh, sw = stride
    pd, ph, pw = padding
    od, oh, ow = output_padding
    n, d, h, w_sp, c = x.shape
    # zero-dilate the input by the stride, then convolve with the flipped kernel
    xd = jnp.zeros((n, (d - 1) * sd + 1, (h - 1) * sh + 1,
                    (w_sp - 1) * sw + 1, c), x.dtype)
    xd = xd.at[:, ::sd, ::sh, ::sw, :].set(x)
    pad = ((kd - 1 - pd, kd - 1 - pd + od),
           (kh - 1 - ph, kh - 1 - ph + oh),
           (kw - 1 - pw, kw - 1 - pw + ow))
    a, (n, do, ho, wo) = _im2col(xd, ksize, (1, 1, 1), pad, w.shape[0])
    out = fused_matmul_bias(a, w, b, apply_relu=True)
    return out[:, :cout].reshape(n, do, ho, wo, cout)


# --------------------------------------------------------------------------
# Parameter construction (deterministic, synthetic) -- all weight folding /
# reshaping / flipping / padding happens here, once, outside the forward pass.
# --------------------------------------------------------------------------
def _fold_bn(conv_bias, bn_p, eps=1e-5):
    gamma, beta, mean, var = bn_p
    scale = gamma / jnp.sqrt(var + eps)
    return scale, (conv_bias - mean) * scale + beta


def _prep_w_conv(w_pt, scale):
    # PyTorch Conv3d weight [Cout, Cin, kd, kh, kw] -> [Kp, 128] bf16, scale folded.
    cout = w_pt.shape[0]
    w = jnp.transpose(w_pt, (2, 3, 4, 1, 0)).reshape(-1, cout) * scale[None, :]
    kp = _round_up(w.shape[0], LANE)
    w = jnp.pad(w, ((0, kp - w.shape[0]), (0, LANE - cout)))
    return w.astype(jnp.bfloat16)


def _prep_w_convT(w_pt, scale):
    # PyTorch ConvTranspose3d weight [Cin, Cout, kd, kh, kw] -> flip -> [Kp, 128].
    cout = w_pt.shape[1]
    w = jnp.flip(w_pt, axis=(2, 3, 4))
    w = jnp.transpose(w, (2, 3, 4, 0, 1)).reshape(-1, cout) * scale[None, :]
    kp = _round_up(w.shape[0], LANE)
    w = jnp.pad(w, ((0, kp - w.shape[0]), (0, LANE - cout)))
    return w.astype(jnp.bfloat16)


def _prep_bias(b):
    return jnp.pad(b.astype(jnp.float32), (0, LANE - b.shape[0])).reshape(1, LANE)


def build_params(key, out_channel=12):
    keys = iter(jax.random.split(key, 128))

    def convT_raw(cin, cout, ksz):
        w = jax.random.normal(next(keys), (cin, cout) + ksz, jnp.float32) * 0.05
        bz = jax.random.normal(next(keys), (cout,), jnp.float32) * 0.05
        return w, bz

    def conv_raw(cin, cout, ksz):
        w = jax.random.normal(next(keys), (cout, cin) + ksz, jnp.float32) * 0.05
        bz = jax.random.normal(next(keys), (cout,), jnp.float32) * 0.05
        return w, bz

    def bn(c):
        gamma = 1.0 + 0.1 * jax.random.normal(next(keys), (c,), jnp.float32)
        beta = 0.1 * jax.random.normal(next(keys), (c,), jnp.float32)
        mean = 0.1 * jax.random.normal(next(keys), (c,), jnp.float32)
        var = 1.0 + 0.1 * jnp.abs(jax.random.normal(next(keys), (c,), jnp.float32))
        return gamma, beta, mean, var

    def convT_bn(cin, cout, ksz):
        w, bz = convT_raw(cin, cout, ksz)
        s, b = _fold_bn(bz, bn(cout))
        return _prep_w_convT(w, s), _prep_bias(b)

    def conv_bn(cin, cout, ksz):
        w, bz = conv_raw(cin, cout, ksz)
        s, b = _fold_bn(bz, bn(cout))
        return _prep_w_conv(w, s), _prep_bias(b)

    p = {}
    # x6 path
    p["ct6_1"] = convT_bn(64, 16, (1, 5, 5))
    p["ct6_2"] = convT_bn(16, 16, (1, 5, 5))
    p["ct6_3"] = convT_bn(16, 16, (1, 5, 5))
    p["c6"] = conv_bn(16, 16, (3, 3, 3))
    # x7 path
    p["ct7_1"] = convT_bn(32, 16, (1, 3, 3))
    p["ct7_2"] = convT_bn(16, 16, (1, 3, 3))
    p["c7"] = conv_bn(16, 16, (3, 3, 3))
    # x8 path
    p["ct8_1"] = convT_bn(16, 16, (1, 3, 3))
    p["c8"] = conv_bn(16, 16, (3, 3, 3))
    # final stack: Conv3d(16, out_ch, 3, 1, 1)+BN+ReLU then Conv3d(out_ch, out_ch, 1)
    p["conv1"] = conv_bn(16, out_channel, (3, 3, 3))
    w2, b2 = conv_raw(out_channel, out_channel, (1, 1, 1))
    p["conv2"] = (_prep_w_conv(w2, jnp.ones((out_channel,), jnp.float32)),
                  _prep_bias(b2))
    # ECA: Conv1d(1, 1, 3, padding=1) over the channel axis as a banded matrix
    wk = jax.random.normal(next(keys), (3,), jnp.float32) * 0.3
    cb = jax.random.normal(next(keys), (1,), jnp.float32) * 0.1
    band = (jnp.diag(jnp.full((out_channel,), wk[1]))
            + jnp.diag(jnp.full((out_channel - 1,), wk[0]), k=1)
            + jnp.diag(jnp.full((out_channel - 1,), wk[2]), k=-1))
    p["eca_band"] = jnp.pad(
        band, ((0, LANE - out_channel), (0, LANE - out_channel))).astype(jnp.float32)
    p["eca_bias"] = jnp.pad(jnp.full((out_channel,), cb[0], jnp.float32),
                            (0, LANE - out_channel)).reshape(1, LANE)
    return p


# --------------------------------------------------------------------------
# OutConv forward (inputs / outputs in PyTorch NCDHW layout)
# --------------------------------------------------------------------------
def outconv_forward(params, x6, x7, x8, x9, out_channel=12):
    to_cl = lambda t: jnp.transpose(t, (0, 2, 3, 4, 1)).astype(jnp.bfloat16)
    p = params

    x6 = to_cl(x6)
    x6 = conv_transpose3d_fused(x6, *p["ct6_1"], ksize=(1, 5, 5), stride=(1, 2, 2),
                                padding=(0, 2, 2), output_padding=(0, 0, 0), cout=16)
    x6 = conv_transpose3d_fused(x6, *p["ct6_2"], ksize=(1, 5, 5), stride=(1, 2, 2),
                                padding=(0, 1, 1), output_padding=(0, 0, 0), cout=16)
    x6 = conv_transpose3d_fused(x6, *p["ct6_3"], ksize=(1, 5, 5), stride=(1, 2, 2),
                                padding=(0, 1, 1), output_padding=(0, 1, 1), cout=16)
    x6 = conv3d_fused(x6, *p["c6"], ksize=(3, 3, 3), stride=(1, 1, 1),
                      padding=(1, 1, 1), cout=16)

    x7 = to_cl(x7)
    x7 = conv_transpose3d_fused(x7, *p["ct7_1"], ksize=(1, 3, 3), stride=(1, 2, 2),
                                padding=(0, 1, 1), output_padding=(0, 1, 1), cout=16)
    x7 = conv_transpose3d_fused(x7, *p["ct7_2"], ksize=(1, 3, 3), stride=(1, 2, 2),
                                padding=(0, 1, 1), output_padding=(0, 1, 1), cout=16)
    x7 = conv3d_fused(x7, *p["c7"], ksize=(3, 3, 3), stride=(1, 1, 1),
                      padding=(1, 1, 1), cout=16)

    x8 = to_cl(x8)
    x8 = conv_transpose3d_fused(x8, *p["ct8_1"], ksize=(1, 3, 3), stride=(1, 2, 2),
                                padding=(0, 1, 1), output_padding=(0, 1, 1), cout=16)
    x8 = conv3d_fused(x8, *p["c8"], ksize=(3, 3, 3), stride=(1, 1, 1),
                      padding=(1, 1, 1), cout=16)

    x9 = to_cl(x9)
    # torch.cat dim=2 (depth in NCDHW) == axis 1 in NDHWC
    x_last = jnp.concatenate([x6, x7, x8, x9], axis=1)

    # conv1 (3x3x3 + folded BN + ReLU) fused with conv2 (1x1x1) in one kernel;
    # output stays lane-dense (128 channels, zeros beyond out_channel).
    a, (n, do, ho, wo) = _im2col(x_last, (3, 3, 3), (1, 1, 1),
                                 ((1, 1), (1, 1), (1, 1)), p["conv1"][0].shape[0])
    y = fused_double_matmul(a, p["conv1"][0], p["conv1"][1],
                            p["conv2"][0], p["conv2"][1])       # [M, 128] f32
    y = y.reshape(n, do * ho * wo, LANE)

    # ECA attention on the padded-channel tensor; slice to out_channel only once.
    y = eca_apply(y, p["eca_band"], p["eca_bias"])
    y = y[..., :out_channel].reshape(n, do, ho, wo, out_channel)
    return jnp.transpose(y, (0, 4, 1, 2, 3))                    # NDHWC -> NCDHW


if __name__ == "__main__":
    out_channel = 12  # OutConv(out_channel=12, kernel_size=3, stride=1, padding=1)
    kp, k6, k7, k8, k9 = jax.random.split(jax.random.PRNGKey(0), 5)
    params = build_params(kp, out_channel=out_channel)

    # Spatial sizes chosen so the 3x/2x/1x transpose-conv upsamplings land on 16x16.
    x6 = jax.random.normal(k6, (1, 64, 2, 2, 2), jnp.float32)     # -> 16 ch, 16x16
    x7 = jax.random.normal(k7, (1, 32, 2, 4, 4), jnp.float32)     # -> 16 ch, 16x16
    x8 = jax.random.normal(k8, (1, 16, 2, 8, 8), jnp.float32)     # -> 16 ch, 16x16
    x9 = jax.random.normal(k9, (1, 16, 2, 16, 16), jnp.float32)   # passthrough

    out = jax.jit(outconv_forward)(params, x6, x7, x8, x9)
    out = jax.block_until_ready(out)

    assert out.shape == (1, out_channel, 8, 16, 16), out.shape
    assert bool(jnp.all(jnp.isfinite(out)))
    print("KERNEL_OK")
</pallas_src>

<mosaic_0001>
module attributes {stable_mosaic.version = 11 : i64} {
  func.func @_matmul_bias_kernel(%arg0: i32, %arg1: memref<18x1664xbf16, #tpu.memory_space<vmem>>, %arg2: memref<1664x128xbf16, #tpu.memory_space<vmem>>, %arg3: memref<1x128xf32, #tpu.memory_space<vmem>>, %arg4: memref<18x128xbf16, #tpu.memory_space<vmem>>) attributes {dimension_semantics = [#tpu.dimension_semantics<parallel>], iteration_bounds = array<i64: 1>, scalar_prefetch = 0 : i64, scratch_operands = 0 : i64, tpu.core_type = #tpu.core_type<tc>, window_params = [{transform_indices = @transform_0, window_bounds = array<i64: 18, 1664>}, {pipeline_mode = #tpu.pipeline_mode<synchronous>, transform_indices = @transform_1, window_bounds = array<i64: 1664, 128>}, {pipeline_mode = #tpu.pipeline_mode<synchronous>, transform_indices = @transform_2, window_bounds = array<i64: 1, 128>}, {transform_indices = @transform_3, window_bounds = array<i64: 18, 128>}]} {
    %c0 = arith.constant 0 : index
    %c0_0 = arith.constant 0 : index
    %0 = vector.load %arg1[%c0, %c0_0] : memref<18x1664xbf16, #tpu.memory_space<vmem>>, vector<18x1664xbf16>
    %c0_1 = arith.constant 0 : index
    %c0_2 = arith.constant 0 : index
    %1 = vector.load %arg2[%c0_1, %c0_2] : memref<1664x128xbf16, #tpu.memory_space<vmem>>, vector<1664x128xbf16>
    %cst = arith.constant dense<0.000000e+00> : vector<18x128xf32>
    %2 = tpu.matmul %0, %1, %cst {dimension_numbers = #tpu.dot_dimension_numbers<[1], [0], [0], [1], [0, 0, 1, 1], [], []>} : vector<18x1664xbf16>, vector<1664x128xbf16>, vector<18x128xf32> -> vector<18x128xf32>
    %c0_3 = arith.constant 0 : index
    %c0_4 = arith.constant 0 : index
    %3 = vector.load %arg3[%c0_3, %c0_4] : memref<1x128xf32, #tpu.memory_space<vmem>>, vector<1x128xf32>
    %4 = vector.broadcast %3 : vector<1x128xf32> to vector<18x128xf32>
    %5 = arith.addf %2, %4 : vector<18x128xf32>
    %cst_5 = arith.constant 0.000000e+00 : f32
    %6 = vector.broadcast %cst_5 : f32 to vector<18x128xf32>
    %7 = arith.maximumf %5, %6 : vector<18x128xf32>
    %8 = arith.truncf %7 : vector<18x128xf32> to vector<18x128xbf16>
    %c0_6 = arith.constant 0 : index
    %c0_7 = arith.constant 0 : index
    %9 = vector.load %arg4[%c0_6, %c0_7] : memref<18x128xbf16, #tpu.memory_space<vmem>>, vector<18x128xbf16>
    tpu.vector_store %arg4[%c0_6, %c0_7], %8 {strides = array<i32>} : memref<18x128xbf16, #tpu.memory_space<vmem>>, vector<18x128xbf16>,
    return
  }
  func.func @transform_0(%arg0: i32) -> (i32, i32) {
    %c0_i32 = arith.constant 0 : i32
    %c0_i32_0 = arith.constant 0 : i32
    return %arg0, %c0_i32 : i32, i32
  }
  func.func @transform_1(%arg0: i32) -> (i32, i32) {
    %c0_i32 = arith.constant 0 : i32
    %c0_i32_0 = arith.constant 0 : i32
    %c0_i32_1 = arith.constant 0 : i32
    return %c0_i32, %c0_i32_0 : i32, i32
  }
  func.func @transform_2(%arg0: i32) -> (i32, i32) {
    %c0_i32 = arith.constant 0 : i32
    %c0_i32_0 = arith.constant 0 : i32
    %c0_i32_1 = arith.constant 0 : i32
    return %c0_i32, %c0_i32_0 : i32, i32
  }
  func.func @transform_3(%arg0: i32) -> (i32, i32) {
    %c0_i32 = arith.constant 0 : i32
    %c0_i32_0 = arith.constant 0 : i32
    return %arg0, %c0_i32 : i32, i32
  }
}

module attributes {stable_mosaic.version = 11 : i64} {
  func.func @_matmul_bias_kernel(%arg0: i32, %arg1: memref<64x384xbf16, #tpu.memory_space<vmem>>, %arg2: memref<384x128xbf16, #tpu.memory_space<vmem>>, %arg3: memref<1x128xf32, #tpu.memory_space<vmem>>, %arg4: memref<64x128xbf16, #tpu.memory_space<vmem>>) attributes {dimension_semantics = [#tpu.dimension_semantics<parallel>], iteration_bounds = array<i64: 2>, scalar_prefetch = 0 : i64, scratch_operands = 0 : i64, tpu.core_type = #tpu.core_type<tc>, window_params = [{transform_indices = @transform_0, window_bounds = array<i64: 64, 384>}, {pipeline_mode = #tpu.pipeline_mode<synchronous>, transform_indices = @transform_1, window_bounds = array<i64: 384, 128>}, {pipeline_mode = #tpu.pipeline_mode<synchronous>, transform_indices = @transform_2, window_bounds = array<i64: 1, 128>}, {transform_indices = @transform_3, window_bounds = array<i64: 64, 128>}]} {
    %c0 = arith.constant 0 : index
    %c0_0 = arith.constant 0 : index
    %0 = vector.load %arg1[%c0, %c0_0] : memref<64x384xbf16, #tpu.memory_space<vmem>>, vector<64x384xbf16>
    %c0_1 = arith.constant 0 : index
    %c0_2 = arith.constant 0 : index
    %1 = vector.load %arg2[%c0_1, %c0_2] : memref<384x128xbf16, #tpu.memory_space<vmem>>, vector<384x128xbf16>
    %cst = arith.constant dense<0.000000e+00> : vector<64x128xf32>
    %2 = tpu.matmul %0, %1, %cst {dimension_numbers = #tpu.dot_dimension_numbers<[1], [0], [0], [1], [0, 0, 1, 1], [], []>} : vector<64x384xbf16>, vector<384x128xbf16>, vector<64x128xf32> -> vector<64x128xf32>
    %c0_3 = arith.constant 0 : index
    %c0_4 = arith.constant 0 : index
    %3 = vector.load %arg3[%c0_3, %c0_4] : memref<1x128xf32, #tpu.memory_space<vmem>>, vector<1x128xf32>
    %4 = vector.broadcast %3 : vector<1x128xf32> to vector<64x128xf32>
    %5 = arith.addf %2, %4 : vector<64x128xf32>
    %cst_5 = arith.constant 0.000000e+00 : f32
    %6 = vector.broadcast %cst_5 : f32 to vector<64x128xf32>
    %7 = arith.maximumf %5, %6 : vector<64x128xf32>
    %8 = arith.truncf %7 : vector<64x128xf32> to vector<64x128xbf16>
    %c0_6 = arith.constant 0 : index
    %c0_7 = arith.constant 0 : index
    %9 = vector.load %arg4[%c0_6, %c0_7] : memref<64x128xbf16, #tpu.memory_space<vmem>>, vector<64x128xbf16>
    tpu.vector_store %arg4[%c0_6, %c0_7], %8 {strides = array<i32>} : memref<64x128xbf16, #tpu.memory_space<vmem>>, vector<64x128xbf16>,
    return
  }
  func.func @transform_0(%arg0: i32) -> (i32, i32) {
    %c0_i32 = arith.constant 0 : i32
    %c0_i32_0 = arith.constant 0 : i32
    return %arg0, %c0_i32 : i32, i32
  }
  func.func @transform_1(%arg0: i32) -> (i32, i32) {
    %c0_i32 = arith.constant 0 : i32
    %c0_i32_0 = arith.constant 0 : i32
    %c0_i32_1 = arith.constant 0 : i32
    return %c0_i32, %c0_i32_0 : i32, i32
  }
  func.func @transform_2(%arg0: i32) -> (i32, i32) {
    %c0_i32 = arith.constant 0 : i32
    %c0_i32_0 = arith.constant 0 : i32
    %c0_i32_1 = arith.constant 0 : i32
    return %c0_i32, %c0_i32_0 : i32, i32
  }
  func.func @transform_3(%arg0: i32) -> (i32, i32) {
    %c0_i32 = arith.constant 0 : i32
    %c0_i32_0 = arith.constant 0 : i32
    return %arg0, %c0_i32 : i32, i32
  }
}

module attributes {stable_mosaic.version = 11 : i64} {
  func.func @_matmul_bias_kernel(%arg0: i32, %arg1: memref<98x512xbf16, #tpu.memory_space<vmem>>, %arg2: memref<512x128xbf16, #tpu.memory_space<vmem>>, %arg3: memref<1x128xf32, #tpu.memory_space<vmem>>, %arg4: memref<98x128xbf16, #tpu.memory_space<vmem>>) attributes {dimension_semantics = [#tpu.dimension_semantics<parallel>], iteration_bounds = array<i64: 1>, scalar_prefetch = 0 : i64, scratch_operands = 0 : i64, tpu.core_type = #tpu.core_type<tc>, window_params = [{transform_indices = @transform_0, window_bounds = array<i64: 98, 512>}, {pipeline_mode = #tpu.pipeline_mode<synchronous>, transform_indices = @transform_1, window_bounds = array<i64: 512, 128>}, {pipeline_mode = #tpu.pipeline_mode<synchronous>, transform_indices = @transform_2, window_bounds = array<i64: 1, 128>}, {transform_indices = @transform_3, window_bounds = array<i64: 98, 128>}]} {
    %c0 = arith.constant 0 : index
    %c0_0 = arith.constant 0 : index
    %0 = vector.load %arg1[%c0, %c0_0] : memref<98x512xbf16, #tpu.memory_space<vmem>>, vector<98x512xbf16>
    %c0_1 = arith.constant 0 : index
    %c0_2 = arith.constant 0 : index
    %1 = vector.load %arg2[%c0_1, %c0_2] : memref<512x128xbf16, #tpu.memory_space<vmem>>, vector<512x128xbf16>
    %cst = arith.constant dense<0.000000e+00> : vector<98x128xf32>
    %2 = tpu.matmul %0, %1, %cst {dimension_numbers = #tpu.dot_dimension_numbers<[1], [0], [0], [1], [0, 0, 1, 1], [], []>} : vector<98x512xbf16>, vector<512x128xbf16>, vector<98x128xf32> -> vector<98x128xf32>
    %c0_3 = arith.constant 0 : index
    %c0_4 = arith.constant 0 : index
    %3 = vector.load %arg3[%c0_3, %c0_4] : memref<1x128xf32, #tpu.memory_space<vmem>>, vector<1x128xf32>
    %4 = vector.broadcast %3 : vector<1x128xf32> to vector<98x128xf32>
    %5 = arith.addf %2, %4 : vector<98x128xf32>
    %cst_5 = arith.constant 0.000000e+00 : f32
    %6 = vector.broadcast %cst_5 : f32 to vector<98x128xf32>
    %7 = arith.maximumf %5, %6 : vector<98x128xf32>
    %8 = arith.truncf %7 : vector<98x128xf32> to vector<98x128xbf16>
    %c0_6 = arith.constant 0 : index
    %c0_7 = arith.constant 0 : index
    %9 = vector.load %arg4[%c0_6, %c0_7] : memref<98x128xbf16, #tpu.memory_space<vmem>>, vector<98x128xbf16>
    tpu.vector_store %arg4[%c0_6, %c0_7], %8 {strides = array<i32>} : memref<98x128xbf16, #tpu.memory_space<vmem>>, vector<98x128xbf16>,
    return
  }
  func.func @transform_0(%arg0: i32) -> (i32, i32) {
    %c0_i32 = arith.constant 0 : i32
    %c0_i32_0 = arith.constant 0 : i32
    return %arg0, %c0_i32 : i32, i32
  }
  func.func @transform_1(%arg0: i32) -> (i32, i32) {
    %c0_i32 = arith.constant 0 : i32
    %c0_i32_0 = arith.constant 0 : i32
    %c0_i32_1 = arith.constant 0 : i32
    return %c0_i32, %c0_i32_0 : i32, i32
  }
  func.func @transform_2(%arg0: i32) -> (i32, i32) {
    %c0_i32 = arith.constant 0 : i32
    %c0_i32_0 = arith.constant 0 : i32
    %c0_i32_1 = arith.constant 0 : i32
    return %c0_i32, %c0_i32_0 : i32, i32
  }
  func.func @transform_3(%arg0: i32) -> (i32, i32) {
    %c0_i32 = arith.constant 0 : i32
    %c0_i32_0 = arith.constant 0 : i32
    return %arg0, %c0_i32 : i32, i32
  }
}

module attributes {stable_mosaic.version = 11 : i64} {
  func.func @_matmul_bias_kernel(%arg0: i32, %arg1: memref<256x256xbf16, #tpu.memory_space<vmem>>, %arg2: memref<256x128xbf16, #tpu.memory_space<vmem>>, %arg3: memref<1x128xf32, #tpu.memory_space<vmem>>, %arg4: memref<256x128xbf16, #tpu.memory_space<vmem>>) attributes {dimension_semantics = [#tpu.dimension_semantics<parallel>], iteration_bounds = array<i64: 2>, scalar_prefetch = 0 : i64, scratch_operands = 0 : i64, tpu.core_type = #tpu.core_type<tc>, window_params = [{transform_indices = @transform_0, window_bounds = array<i64: 256, 256>}, {pipeline_mode = #tpu.pipeline_mode<synchronous>, transform_indices = @transform_1, window_bounds = array<i64: 256, 128>}, {pipeline_mode = #tpu.pipeline_mode<synchronous>, transform_indices = @transform_2, window_bounds = array<i64: 1, 128>}, {transform_indices = @transform_3, window_bounds = array<i64: 256, 128>}]} {
    %c0 = arith.constant 0 : index
    %c0_0 = arith.constant 0 : index
    %0 = vector.load %arg1[%c0, %c0_0] : memref<256x256xbf16, #tpu.memory_space<vmem>>, vector<256x256xbf16>
    %c0_1 = arith.constant 0 : index
    %c0_2 = arith.constant 0 : index
    %1 = vector.load %arg2[%c0_1, %c0_2] : memref<256x128xbf16, #tpu.memory_space<vmem>>, vector<256x128xbf16>
    %cst = arith.constant dense<0.000000e+00> : vector<256x128xf32>
    %2 = tpu.matmul %0, %1, %cst {dimension_numbers = #tpu.dot_dimension_numbers<[1], [0], [0], [1], [0, 0, 1, 1], [], []>} : vector<256x256xbf16>, vector<256x128xbf16>, vector<256x128xf32> -> vector<256x128xf32>
    %c0_3 = arith.constant 0 : index
    %c0_4 = arith.constant 0 : index
    %3 = vector.load %arg3[%c0_3, %c0_4] : memref<1x128xf32, #tpu.memory_space<vmem>>, vector<1x128xf32>
    %4 = vector.broadcast %3 : vector<1x128xf32> to vector<256x128xf32>
    %5 = arith.addf %2, %4 : vector<256x128xf32>
    %cst_5 = arith.constant 0.000000e+00 : f32
    %6 = vector.broadcast %cst_5 : f32 to vector<256x128xf32>
    %7 = arith.maximumf %5, %6 : vector<256x128xf32>
    %8 = arith.truncf %7 : vector<256x128xf32> to vector<256x128xbf16>
    %c0_6 = arith.constant 0 : index
    %c0_7 = arith.constant 0 : index
    %9 = vector.load %arg4[%c0_6, %c0_7] : memref<256x128xbf16, #tpu.memory_space<vmem>>, vector<256x128xbf16>
    tpu.vector_store %arg4[%c0_6, %c0_7], %8 {strides = array<i32>} : memref<256x128xbf16, #tpu.memory_space<vmem>>, vector<256x128xbf16>,
    return
  }
  func.func @transform_0(%arg0: i32) -> (i32, i32) {
    %c0_i32 = arith.constant 0 : i32
    %c0_i32_0 = arith.constant 0 : i32
    return %arg0, %c0_i32 : i32, i32
  }
  func.func @transform_1(%arg0: i32) -> (i32, i32) {
    %c0_i32 = arith.constant 0 : i32
    %c0_i32_0 = arith.constant 0 : i32
    %c0_i32_1 = arith.constant 0 : i32
    return %c0_i32, %c0_i32_0 : i32, i32
  }
  func.func @transform_2(%arg0: i32) -> (i32, i32) {
    %c0_i32 = arith.constant 0 : i32
    %c0_i32_0 = arith.constant 0 : i32
    %c0_i32_1 = arith.constant 0 : i32
    return %c0_i32, %c0_i32_0 : i32, i32
  }
  func.func @transform_3(%arg0: i32) -> (i32, i32) {
    %c0_i32 = arith.constant 0 : i32
    %c0_i32_0 = arith.constant 0 : i32
    return %arg0, %c0_i32 : i32, i32
  }
}

module attributes {stable_mosaic.version = 11 : i64} {
  func.func @_matmul_bias_kernel(%arg0: i32, %arg1: memref<256x512xbf16, #tpu.memory_space<vmem>>, %arg2: memref<512x128xbf16, #tpu.memory_space<vmem>>, %arg3: memref<1x128xf32, #tpu.memory_space<vmem>>, %arg4: memref<256x128xbf16, #tpu.memory_space<vmem>>) attributes {dimension_semantics = [#tpu.dimension_semantics<parallel>], iteration_bounds = array<i64: 2>, scalar_prefetch = 0 : i64, scratch_operands = 0 : i64, tpu.core_type = #tpu.core_type<tc>, window_params = [{transform_indices = @transform_0, window_bounds = array<i64: 256, 512>}, {pipeline_mode = #tpu.pipeline_mode<synchronous>, transform_indices = @transform_1, window_bounds = array<i64: 512, 128>}, {pipeline_mode = #tpu.pipeline_mode<synchronous>, transform_indices = @transform_2, window_bounds = array<i64: 1, 128>}, {transform_indices = @transform_3, window_bounds = array<i64: 256, 128>}]} {
    %c0 = arith.constant 0 : index
    %c0_0 = arith.constant 0 : index
    %0 = vector.load %arg1[%c0, %c0_0] : memref<256x512xbf16, #tpu.memory_space<vmem>>, vector<256x512xbf16>
    %c0_1 = arith.constant 0 : index
    %c0_2 = arith.constant 0 : index
    %1 = vector.load %arg2[%c0_1, %c0_2] : memref<512x128xbf16, #tpu.memory_space<vmem>>, vector<512x128xbf16>
    %cst = arith.constant dense<0.000000e+00> : vector<256x128xf32>
    %2 = tpu.matmul %0, %1, %cst {dimension_numbers = #tpu.dot_dimension_numbers<[1], [0], [0], [1], [0, 0, 1, 1], [], []>} : vector<256x512xbf16>, vector<512x128xbf16>, vector<256x128xf32> -> vector<256x128xf32>
    %c0_3 = arith.constant 0 : index
    %c0_4 = arith.constant 0 : index
    %3 = vector.load %arg3[%c0_3, %c0_4] : memref<1x128xf32, #tpu.memory_space<vmem>>, vector<1x128xf32>
    %4 = vector.broadcast %3 : vector<1x128xf32> to vector<256x128xf32>
    %5 = arith.addf %2, %4 : vector<256x128xf32>
    %cst_5 = arith.constant 0.000000e+00 : f32
    %6 = vector.broadcast %cst_5 : f32 to vector<256x128xf32>
    %7 = arith.maximumf %5, %6 : vector<256x128xf32>
    %8 = arith.truncf %7 : vector<256x128xf32> to vector<256x128xbf16>
    %c0_6 = arith.constant 0 : index
    %c0_7 = arith.constant 0 : index
    %9 = vector.load %arg4[%c0_6, %c0_7] : memref<256x128xbf16, #tpu.memory_space<vmem>>, vector<256x128xbf16>
    tpu.vector_store %arg4[%c0_6, %c0_7], %8 {strides = array<i32>} : memref<256x128xbf16, #tpu.memory_space<vmem>>, vector<256x128xbf16>,
    return
  }
  func.func @transform_0(%arg0: i32) -> (i32, i32) {
    %c0_i32 = arith.constant 0 : i32
    %c0_i32_0 = arith.constant 0 : i32
    return %arg0, %c0_i32 : i32, i32
  }
  func.func @transform_1(%arg0: i32) -> (i32, i32) {
    %c0_i32 = arith.constant 0 : i32
    %c0_i32_0 = arith.constant 0 : i32
    %c0_i32_1 = arith.constant 0 : i32
    return %c0_i32, %c0_i32_0 : i32, i32
  }
  func.func @transform_2(%arg0: i32) -> (i32, i32) {
    %c0_i32 = arith.constant 0 : i32
    %c0_i32_0 = arith.constant 0 : i32
    %c0_i32_1 = arith.constant 0 : i32
    return %c0_i32, %c0_i32_0 : i32, i32
  }
  func.func @transform_3(%arg0: i32) -> (i32, i32) {
    %c0_i32 = arith.constant 0 : i32
    %c0_i32_0 = arith.constant 0 : i32
    return %arg0, %c0_i32 : i32, i32
  }
}

module attributes {stable_mosaic.version = 11 : i64} {
  func.func @_double_matmul_kernel(%arg0: i32, %arg1: memref<512x512xbf16, #tpu.memory_space<vmem>>, %arg2: memref<512x128xbf16, #tpu.memory_space<vmem>>, %arg3: memref<1x128xf32, #tpu.memory_space<vmem>>, %arg4: memref<128x128xbf16, #tpu.memory_space<vmem>>, %arg5: memref<1x128xf32, #tpu.memory_space<vmem>>, %arg6: memref<512x128xf32, #tpu.memory_space<vmem>>) attributes {dimension_semantics = [#tpu.dimension_semantics<parallel>], iteration_bounds = array<i64: 4>, scalar_prefetch = 0 : i64, scratch_operands = 0 : i64, tpu.core_type = #tpu.core_type<tc>, window_params = [{transform_indices = @transform_0, window_bounds = array<i64: 512, 512>}, {pipeline_mode = #tpu.pipeline_mode<synchronous>, transform_indices = @transform_1, window_bounds = array<i64: 512, 128>}, {pipeline_mode = #tpu.pipeline_mode<synchronous>, transform_indices = @transform_2, window_bounds = array<i64: 1, 128>}, {pipeline_mode = #tpu.pipeline_mode<synchronous>, transform_indices = @transform_3, window_bounds = array<i64: 128, 128>}, {pipeline_mode = #tpu.pipeline_mode<synchronous>, transform_indices = @transform_4, window_bounds = array<i64: 1, 128>}, {transform_indices = @transform_5, window_bounds = array<i64: 512, 128>}]} {
    %c0 = arith.constant 0 : index
    %c0_0 = arith.constant 0 : index
    %0 = vector.load %arg1[%c0, %c0_0] : memref<512x512xbf16, #tpu.memory_space<vmem>>, vector<512x512xbf16>
    %c0_1 = arith.constant 0 : index
    %c0_2 = arith.constant 0 : index
    %1 = vector.load %arg2[%c0_1, %c0_2] : memref<512x128xbf16, #tpu.memory_space<vmem>>, vector<512x128xbf16>
    %cst = arith.constant dense<0.000000e+00> : vector<512x128xf32>
    %2 = tpu.matmul %0, %1, %cst {dimension_numbers = #tpu.dot_dimension_numbers<[1], [0], [0], [1], [0, 0, 1, 1], [], []>} : vector<512x512xbf16>, vector<512x128xbf16>, vector<512x128xf32> -> vector<512x128xf32>
    %c0_3 = arith.constant 0 : index
    %c0_4 = arith.constant 0 : index
    %3 = vector.load %arg3[%c0_3, %c0_4] : memref<1x128xf32, #tpu.memory_space<vmem>>, vector<1x128xf32>
    %4 = vector.broadcast %3 : vector<1x128xf32> to vector<512x128xf32>
    %5 = arith.addf %2, %4 : vector<512x128xf32>
    %cst_5 = arith.constant 0.000000e+00 : f32
    %6 = vector.broadcast %cst_5 : f32 to vector<512x128xf32>
    %7 = arith.maximumf %5, %6 : vector<512x128xf32>
    %8 = arith.truncf %7 : vector<512x128xf32> to vector<512x128xbf16>
    %c0_6 = arith.constant 0 : index
    %c0_7 = arith.constant 0 : index
    %9 = vector.load %arg4[%c0_6, %c0_7] : memref<128x128xbf16, #tpu.memory_space<vmem>>, vector<128x128xbf16>
    %cst_8 = arith.constant dense<0.000000e+00> : vector<512x128xf32>
    %10 = tpu.matmul %8, %9, %cst_8 {dimension_numbers = #tpu.dot_dimension_numbers<[1], [0], [0], [1], [0, 0, 1, 1], [], []>} : vector<512x128xbf16>, vector<128x128xbf16>, vector<512x128xf32> -> vector<512x128xf32>
    %c0_9 = arith.constant 0 : index
    %c0_10 = arith.constant 0 : index
    %11 = vector.load %arg5[%c0_9, %c0_10] : memref<1x128xf32, #tpu.memory_space<vmem>>, vector<1x128xf32>
    %12 = vector.broadcast %11 : vector<1x128xf32> to vector<512x128xf32>
    %13 = arith.addf %10, %12 : vector<512x128xf32>
    %c0_11 = arith.constant 0 : index
    %c0_12 = arith.constant 0 : index
    %14 = vector.load %arg6[%c0_11, %c0_12] : memref<512x128xf32, #tpu.memory_space<vmem>>, vector<512x128xf32>
    tpu.vector_store %arg6[%c0_11, %c0_12], %13 {strides = array<i32>} : memref<512x128xf32, #tpu.memory_space<vmem>>, vector<512x128xf32>,
    return
  }
  func.func @transform_0(%arg0: i32) -> (i32, i32) {
    %c0_i32 = arith.constant 0 : i32
    %c0_i32_0 = arith.constant 0 : i32
    return %arg0, %c0_i32 : i32, i32
  }
  func.func @transform_1(%arg0: i32) -> (i32, i32) {
    %c0_i32 = arith.constant 0 : i32
    %c0_i32_0 = arith.constant 0 : i32
    %c0_i32_1 = arith.constant 0 : i32
    return %c0_i32, %c0_i32_0 : i32, i32
  }
  func.func @transform_2(%arg0: i32) -> (i32, i32) {
    %c0_i32 = arith.constant 0 : i32
    %c0_i32_0 = arith.constant 0 : i32
    %c0_i32_1 = arith.constant 0 : i32
    return %c0_i32, %c0_i32_0 : i32, i32
  }
  func.func @transform_3(%arg0: i32) -> (i32, i32) {
    %c0_i32 = arith.constant 0 : i32
    %c0_i32_0 = arith.constant 0 : i32
    %c0_i32_1 = arith.constant 0 : i32
    return %c0_i32, %c0_i32_0 : i32, i32
  }
  func.func @transform_4(%arg0: i32) -> (i32, i32) {
    %c0_i32 = arith.constant 0 : i32
    %c0_i32_0 = arith.constant 0 : i32
    %c0_i32_1 = arith.constant 0 : i32
    return %c0_i32, %c0_i32_0 : i32, i32
  }
  func.func @transform_5(%arg0: i32) -> (i32, i32) {
    %c0_i32 = arith.constant 0 : i32
    %c0_i32_0 = arith.constant 0 : i32
    return %arg0, %c0_i32 : i32, i32
  }
}

module attributes {stable_mosaic.version = 11 : i64} {
  func.func @_eca_kernel(%arg0: i32, %arg1: memref<1x2048x128xf32, #tpu.memory_space<vmem>>, %arg2: memref<128x128xf32, #tpu.memory_space<vmem>>, %arg3: memref<1x128xf32, #tpu.memory_space<vmem>>, %arg4: memref<1x2048x128xf32, #tpu.memory_space<vmem>>) attributes {dimension_semantics = [#tpu.dimension_semantics<parallel>], iteration_bounds = array<i64: 1>, scalar_prefetch = 0 : i64, scratch_operands = 0 : i64, tpu.core_type = #tpu.core_type<tc>, window_params = [{transform_indices = @transform_0, window_bounds = array<i64: 1, 2048, 128>}, {pipeline_mode = #tpu.pipeline_mode<synchronous>, transform_indices = @transform_1, window_bounds = array<i64: 128, 128>}, {pipeline_mode = #tpu.pipeline_mode<synchronous>, transform_indices = @transform_2, window_bounds = array<i64: 1, 128>}, {transform_indices = @transform_3, window_bounds = array<i64: 1, 2048, 128>}]} {
    %c0 = arith.constant 0 : index
    %c0_0 = arith.constant 0 : index
    %c0_1 = arith.constant 0 : index
    %0 = vector.load %arg1[%c0, %c0_0, %c0_1] : memref<1x2048x128xf32, #tpu.memory_space<vmem>>, vector<1x2048x128xf32>
    %1 = vector.shape_cast %0 : vector<1x2048x128xf32> to vector<2048x128xf32>
    %cst = arith.constant dense<0.000000e+00> : vector<128xf32>
    %2 = vector.multi_reduction <add>, %1, %cst [0] : vector<2048x128xf32> to vector<128xf32>
    %3 = vector.shape_cast %2 : vector<128xf32> to vector<1x128xf32>
    %cst_2 = arith.constant 4.8828125E-4 : f32
    %4 = vector.broadcast %cst_2 : f32 to vector<1x128xf32>
    %5 = arith.mulf %3, %4 : vector<1x128xf32>
    %c0_3 = arith.constant 0 : index
    %c0_4 = arith.constant 0 : index
    %6 = vector.load %arg2[%c0_3, %c0_4] : memref<128x128xf32, #tpu.memory_space<vmem>>, vector<128x128xf32>
    %cst_5 = arith.constant dense<0.000000e+00> : vector<1x128xf32>
    %7 = tpu.matmul %5, %6, %cst_5 {dimension_numbers = #tpu.dot_dimension_numbers<[1], [0], [0], [1], [0, 0, 1, 1], [], []>} : vector<1x128xf32>, vector<128x128xf32>, vector<1x128xf32> -> vector<1x128xf32>
    %c0_6 = arith.constant 0 : index
    %c0_7 = arith.constant 0 : index
    %8 = vector.load %arg3[%c0_6, %c0_7] : memref<1x128xf32, #tpu.memory_space<vmem>>, vector<1x128xf32>
    %9 = arith.addf %7, %8 : vector<1x128xf32>
    %cst_8 = arith.constant 0.000000e+00 : f32
    %10 = vector.broadcast %cst_8 : f32 to vector<1x128xf32>
    %11 = arith.subf %10, %9 : vector<1x128xf32>
    %12 = math.exp %11 : vector<1x128xf32>
    %cst_9 = arith.constant 1.000000e+00 : f32
    %13 = vector.broadcast %cst_9 : f32 to vector<1x128xf32>
    %14 = arith.addf %13, %12 : vector<1x128xf32>
    %15 = tpu.reciprocal %14 {approx = true} : vector<1x128xf32> -> vector<1x128xf32>
    %16 = vector.broadcast %15 : vector<1x128xf32> to vector<2048x128xf32>
    %17 = arith.mulf %1, %16 : vector<2048x128xf32>
    %c0_10 = arith.constant 0 : index
    %c0_11 = arith.constant 0 : index
    %c0_12 = arith.constant 0 : index
    %18 = vector.load %arg4[%c0_10, %c0_11, %c0_12] : memref<1x2048x128xf32, #tpu.memory_space<vmem>>, vector<1x2048x128xf32>
    %19 = vector.shape_cast %18 : vector<1x2048x128xf32> to vector<2048x128xf32>
    %20 = vector.shape_cast %17 : vector<2048x128xf32> to vector<1x2048x128xf32>
    tpu.vector_store %arg4[%c0_10, %c0_11, %c0_12], %20 {strides = array<i32>} : memref<1x2048x128xf32, #tpu.memory_space<vmem>>, vector<1x2048x128xf32>,
    return
  }
  func.func @transform_0(%arg0: i32) -> (i32, i32, i32) {
    %c0_i32 = arith.constant 0 : i32
    %c0_i32_0 = arith.constant 0 : i32
    %c0_i32_1 = arith.constant 0 : i32
    return %arg0, %c0_i32, %c0_i32_0 : i32, i32, i32
  }
  func.func @transform_1(%arg0: i32) -> (i32, i32) {
    %c0_i32 = arith.constant 0 : i32
    %c0_i32_0 = arith.constant 0 : i32
    %c0_i32_1 = arith.constant 0 : i32
    return %c0_i32, %c0_i32_0 : i32, i32
  }
  func.func @transform_2(%arg0: i32) -> (i32, i32) {
    %c0_i32 = arith.constant 0 : i32
    %c0_i32_0 = arith.constant 0 : i32
    %c0_i32_1 = arith.constant 0 : i32
    return %c0_i32, %c0_i32_0 : i32, i32
  }
  func.func @transform_3(%arg0: i32) -> (i32, i32, i32) {
    %c0_i32 = arith.constant 0 : i32
    %c0_i32_0 = arith.constant 0 : i32
    %c0_i32_1 = arith.constant 0 : i32
    return %arg0, %c0_i32, %c0_i32_0 : i32, i32, i32
  }
}

</mosaic_0001>

<bundles_post_ra>
// kernel: outconv_forward.11
= control target key start
LH: loop header
LB: loop body
LE: loop exit
PB: predicated region body
PF: predicated region fallthrough
CT: control target
= control target key end

     0   :  { %8 = vsyncpa [#allocation3], 0  ;;  %s1994_s0 = inlined_call_operand.vmem [shape: bf16[18,1664], index: 0, kind: input, shape index: {}]   ;;  %s1995_s1 = inlined_call_operand.hbm [shape: bf16[1664,128], index: 1, kind: input, shape index: {}]   ;;  %s1996_s2 = inlined_call_operand.hbm [shape: f32[1,128], index: 2, kind: input, shape index: {}]   ;;  %s1997_s3 = inlined_call_operand.vmem [shape: bf16[18,128], index: 3, kind: output, shape index: {}]  }
   0x1   :  { %9 = vsyncpa [#allocation5], 0  ;;  %s1898_s12 = smov [#allocation2]  }
   0x2   :  { %s17_s13 = sshll.u32 %s1898_s12, 4  ;;  %s18_s13 = int_to_ptr.vmem [resolvable:$true] %s17_s13 }
   0x3   :  { %s1862_s14 = scalar_lea.vmem %s18_s13, 13312  ;;  %p1867_p1 = scmp.lt.s32.totalorder %s18_s13, %s18_s13 }
   0x4   :  { %p1863_p0 = scmp.ne.s32.totalorder %s18_s13, %s1862_s14  ;;  %p1868_p2 = scmp.lt.s32.totalorder %s1862_s14, %s1862_s14 }
   0x6   :  { %p1869_p3 = por %p1868_p2, %p1867_p1 }
   0x8   :  { %p1870_p4 = pnand %p1869_p3, %p1863_p0 }
   0xa   :  { %1873 = shalt.err (!%p1870_p4)
}
   0xb   :  { %s1899_s15 = smov 64   ;;  %s1900_s16 = smov 4  }
   0xc   :  { %23 = dma.hbm_to_vmem [thread:$0]  %s1995_s1, 13312, %s18_s13, [#allocation3], %s1899_s15, %s1899_s15, %s1900_s16  }
   0xd   :  { %s1901_s19 = smov [#allocation4]  }
   0xe   :  { %s30_s20 = sshll.u32 %s1901_s19, 4  ;;  %s31_s20 = int_to_ptr.vmem [resolvable:$true] %s30_s20 }
   0xf   :  { %s1882_s21 = scalar_lea.vmem %s31_s20, 16  ;;  %s1886_s22 = scalar_lea.vmem %s31_s20, 32 }
  0x10   :  { %p1883_p5 = scmp.ne.s32.totalorder %s31_s20, %s1882_s21  ;;  %p1887_p6 = scmp.lt.s32.totalorder %s31_s20, %s31_s20 }
  0x11   :  { %p1888_p7 = scmp.lt.s32.totalorder %s1886_s22, %s1882_s21 }
  0x13   :  { %p1889_p8 = por %p1888_p7, %p1887_p6 }
  0x15   :  { %p1890_p9 = pnand %p1889_p8, %p1883_p5 }
  0x17   :  { %1893 = shalt.err (!%p1890_p9)
}
  0x18   :  { %33 = dma.hbm_to_vmem [thread:$0]  %s1996_s2, 16, %s31_s20, [#allocation5]  }
  0x19   :  { %1894 = dma.done.wait [#allocation3], 13312  }
  0x1a   :  { %1895 = vsyncadd [#allocation3], 4294953984 }
  0x1b   :  { %1896 = dma.done.wait [#allocation5], 16  }
  0x1c   :  { %1897 = vsyncadd [#allocation5], 4294967280  ;;  %v1718_v0 = vld [vmem:[#allocation2 + $0x78] sm:$0xff]   ;;  %v1722_v4 = vld [vmem:[#allocation2 + $0x70] sm:$0xff]  }
  0x1d   :  { %v1719_v1 = vld [vmem:[#allocation2 + $0x38] sm:$0xff]   ;;  %1516 = vmatprep.subr.bf16.mxu0 %v1718_v0  ;;  %v1723_v5 = vld [vmem:[#allocation2 + $0x30] sm:$0xff]   ;;  %v1726_v8 = vld [vmem:[#allocation2 + $0x68] sm:$0xff]  }
  0x1e   :  { %v1720_v2 = vld [vmem:[#allocation2 + $0xf8] sm:$0xff]   ;;  %1517 = vmatpush3.bf16.msra.mxu0 %v1719_v1  ;;  %v1724_v6 = vld [vmem:[#allocation2 + $0xf0] sm:$0xff]   ;;  %v1727_v9 = vld [vmem:[#allocation2 + $0x28] sm:$0xff]  }
  0x1f   :  { %v1721_v3 = vld [vmem:[#allocation2 + $0xb8] sm:$0xff]   ;;  %1544 = vmatprep.subr.bf16.mxu1 %v1720_v2  ;;  %1518 = vmatprep.subr.bf16.mxu0 %v1722_v4  ;;  %v1725_v7 = vld [vmem:[#allocation2 + $0xb0] sm:$0xff]   ;;  %v1728_v10 = vld [vmem:[#allocation2 + $0xe8] sm:$0xff]  }
  0x20   :  { %1545 = vmatpush3.bf16.msra.mxu1 %v1721_v3  ;;  %v1729_v11 = vld [vmem:[#allocation2 + $0xa8] sm:$0xff]   ;;  %v1730_v12 = vld [vmem:[#allocation2 + $0x60] sm:$0xff]   ;;  %v1734_v16 = vld [vmem:[#allocation2 + $0x58] sm:$0xff]  }
  0x21   :  { %1546 = vmatprep.subr.bf16.mxu1 %v1724_v6  ;;  %v1731_v13 = vld [vmem:[#allocation2 + $0x20] sm:$0xff]   ;;  %v1735_v17 = vld [vmem:[#allocation2 + $0x18] sm:$0xff]   ;;  %v1738_v20 = vld [vmem:[#allocation2 + $0x50] sm:$0xff]  }
  0x22   :  { %1519 = vmatpush3.bf16.msra.mxu0 %v1723_v5  ;;  %v1732_v14 = vld [vmem:[#allocation2 + $0xe0] sm:$0xff]   ;;  %v1736_v18 = vld [vmem:[#allocation2 + $0xd8] sm:$0xff]   ;;  %v1739_v21 = vld [vmem:[#allocation2 + $0x10] sm:$0xff]  }
  0x23   :  { %1520 = vmatprep.subr.bf16.mxu0 %v1726_v8  ;;  %v1733_v15 = vld [vmem:[#allocation2 + $0xa0] sm:$0xff]   ;;  %v1737_v19 = vld [vmem:[#allocation2 + $0x98] sm:$0xff]   ;;  %v1740_v22 = vld [vmem:[#allocation2 + $0xd0] sm:$0xff]  }
  0x24   :  { %1547 = vmatpush3.bf16.msra.mxu1 %v1725_v7  ;;  %v1741_v23 = vld [vmem:[#allocation2 + $0x90] sm:$0xff]   ;;  %v1742_v24 = vld [vmem:[#allocation2 + $0x48] sm:$0xff]   ;;  %v1746_v28 = vld [vmem:[#allocation2 + $0x40] sm:$0xff]  }
  0x25   :  { %1548 = vmatprep.subr.bf16.mxu1 %v1728_v10  ;;  %v1743_v25 = vld [vmem:[#allocation2 + $0x8] sm:$0xff]   ;;  %v1747_v29 = vld [vmem:[#allocation2] sm:$0xff]   ;;  %v1753_v34 = vld [vmem:[#allocation2 + $0x178] sm:$0xff]  }
  0x26   :  { %1521 = vmatpush3.bf16.msra.mxu0 %v1727_v9  ;;  %v1744_v26 = vld [vmem:[#allocation2 + $0xc8] sm:$0xff]   ;;  %v1748_v30 = vld [vmem:[#allocation2 + $0xc0] sm:$0xff]   ;;  %v1757_v37 = vld [vmem:[#allocation2 + $0x138] sm:$0xff]  }
  0x27   :  { %1522 = vmatprep.subr.bf16.mxu0 %v1730_v12  ;;  %v1745_v27 = vld [vmem:[#allocation2 + $0x88] sm:$0xff]   ;;  %v1749_v31 = vld [vmem:[%s1994_s0] ss:$52 sps:$4 sm:$0xff]   ;;  %v1751_v32 = vld [vmem:[%s1994_s0 + $0x4] ss:$52 sps:$4 sm:$0xff]  }
  0x28   :  { %1549 = vmatpush3.bf16.msra.mxu1 %v1729_v11  ;;  %v1752_v33 = vld [vmem:[#allocation2 + $0x80] sm:$0xff]   ;;  %1045 = vmatprep.mubr.bf16.mxu0 %v1751_v32  ;;  %v1754_v35 = vld [vmem:[%s1994_s0 + $0x8] ss:$52 sps:$4 sm:$0xff]   ;;  %v1760_v40 = vld [vmem:[#allocation2 + $0x170] sm:$0xff]  }
  0x29   :  { %1550 = vmatprep.subr.bf16.mxu1 %v1732_v14  ;;  %v1756_v36 = vld [vmem:[%s1994_s0 + $0xc] ss:$52 sps:$4 sm:$0xff]   ;;  %v1758_v38 = vld [vmem:[#allocation2 + $0x1f8] sm:$0xff]   ;;  %v1761_v41 = vld [vmem:[#allocation2 + $0x130] sm:$0xff]  }
  0x2a   :  { %1523 = vmatpush3.bf16.msra.mxu0 %v1731_v13  ;;  %1093 = vmatprep.mubr.bf16.mxu1 %v1756_v36  ;;  %v1759_v39 = vld [vmem:[#allocation2 + $0x1b8] sm:$0xff]   ;;  %v1762_v42 = vld [vmem:[#allocation2 + $0x1f0] sm:$0xff]   ;;  %v1764_v44 = vld [vmem:[#allocation2 + $0x168] sm:$0xff]  }
  0x2b   :  { %1524 = vmatprep.subr.bf16.mxu0 %v1734_v16  ;;  %v1763_v43 = vld [vmem:[#allocation2 + $0x1b0] sm:$0xff]   ;;  %v1765_v45 = vld [vmem:[#allocation2 + $0x128] sm:$0xff]   ;;  %v1768_v48 = vld [vmem:[#allocation2 + $0x160] sm:$0xff]  }
  0x2c   :  { %1551 = vmatpush3.bf16.msra.mxu1 %v1733_v15  ;;  %v1766_v46 = vld [vmem:[#allocation2 + $0x1e8] sm:$0xff]   ;;  %v1769_v49 = vld [vmem:[#allocation2 + $0x120] sm:$0xff]   ;;  %v1772_v52 = vld [vmem:[#allocation2 + $0x158] sm:$0xff]  }
  0x2d   :  { %1552 = vmatprep.subr.bf16.mxu1 %v1736_v18  ;;  %v1767_v47 = vld [vmem:[#allocation2 + $0x1a8] sm:$0xff]   ;;  %v1770_v50 = vld [vmem:[#allocation2 + $0x1e0] sm:$0xff]   ;;  %v1773_v53 = vld [vmem:[#allocation2 + $0x118] sm:$0xff]  }
  0x2e   :  { %1525 = vmatpush3.bf16.msra.mxu0 %v1735_v17  ;;  %v1771_v51 = vld [vmem:[#allocation2 + $0x1a0] sm:$0xff]   ;;  %v55_v54 = vld [vmem:[%s1994_s0 + $0x68] sm:$0x11]  ;;  %v1775_v56 = vld [vmem:[#allocation2 + $0x1d8] sm:$0xff]  }
  0x2f   :  { %1526 = vmatprep.subr.bf16.mxu0 %v1738_v20  ;;  %v1389_v55 = vcombine.high %v55_v54, %v55_v54  ;;  %v1388_v57 = vcombine.low %v55_v54, %v55_v54  ;;  %v1777_v58 = vld [vmem:[#allocation2 + $0x198] sm:$0xff]   ;;  %v1778_v59 = vld [vmem:[#allocation2 + $0x150] sm:$0xff]   ;;  %v1783_v1 = vld [vmem:[#allocation2 + $0x148] sm:$0xff]  }
  0x30   :  { %1553 = vmatpush3.bf16.msra.mxu1 %v1737_v19  ;;  %v1779_v60 = vld [vmem:[#allocation2 + $0x110] sm:$0xff]   ;;  %v1785_v3 = vld [vmem:[#allocation2 + $0x108] sm:$0xff]   ;;  %v1788_v6 = vld [vmem:[#allocation2 + $0x140] sm:$0xff]  }
  0x31   :  { %1554 = vmatprep.subr.bf16.mxu1 %v1740_v22  ;;  %v1780_v61 = vld [vmem:[#allocation2 + $0x1d0] sm:$0xff]   ;;  %v1786_v4 = vld [vmem:[#allocation2 + $0x1c8] sm:$0xff]   ;;  %v1789_v7 = vld [vmem:[#allocation2 + $0x100] sm:$0xff]  }
  0x32   :  { %1527 = vmatpush3.bf16.msra.mxu0 %v1739_v21  ;;  %v1781_v62 = vld [vmem:[#allocation2 + $0x190] sm:$0xff]   ;;  %v1787_v5 = vld [vmem:[#allocation2 + $0x188] sm:$0xff]   ;;  %v1790_v8 = vld [vmem:[#allocation2 + $0x1c0] sm:$0xff]  }
  0x33   :  { %1528 = vmatprep.subr.bf16.mxu0 %v1742_v24  ;;  %v56_v63 = vld [vmem:[%s1994_s0 + $0x70] sm:$0x11]  ;;  %v1794_v11 = vld [vmem:[#allocation2 + $0x180] sm:$0xff]   ;;  %v1795_v12 = vld [vmem:[#allocation2 + $0x278] sm:$0xff]  }
  0x34   :  { %1555 = vmatpush3.bf16.msra.mxu1 %v1741_v23  ;;  %v1391_v0 = vcombine.high %v56_v63, %v56_v63  ;;  %v1390_v2 = vcombine.low %v56_v63, %v56_v63  ;;  %v1791_v9 = vld [vmem:[%s1994_s0 + $0x10] ss:$52 sps:$4 sm:$0xff]   ;;  %v1793_v10 = vld [vmem:[%s1994_s0 + $0x14] ss:$52 sps:$4 sm:$0xff]   ;;  %v1796_v13 = vld [vmem:[%s1994_s0 + $0x18] ss:$52 sps:$4 sm:$0xff]  }
  0x35   :  { %1556 = vmatprep.subr.bf16.mxu1 %v1744_v26  ;;  %v1798_v14 = vld [vmem:[%s1994_s0 + $0x1c] ss:$52 sps:$4 sm:$0xff]   ;;  %v58_v26 = vld [vmem:[%s1994_s0 + $0x80] sm:$0x11] }
  0x36   :  { %1529 = vmatpush3.bf16.msra.mxu0 %v1743_v25  ;;  %v1799_v15 = vld [vmem:[#allocation2 + $0x238] sm:$0xff]   ;;  %v1802_v18 = vld [vmem:[#allocation2 + $0x270] sm:$0xff]   ;;  %v1808_v25 = vld [vmem:[#allocation2 + $0x268] sm:$0xff]  }
  0x37   :  { %1530 = vmatprep.subr.bf16.mxu0 %v1746_v28  ;;  %v1800_v16 = vld [vmem:[#allocation2 + $0x2f8] sm:$0xff]   ;;  %v1803_v19 = vld [vmem:[#allocation2 + $0x230] sm:$0xff]   ;;  %v1810_v28 = vld [vmem:[#allocation2 + $0x228] sm:$0xff]  }
  0x38   :  { %1557 = vmatpush3.bf16.msra.mxu1 %v1745_v27  ;;  %v1801_v17 = vld [vmem:[#allocation2 + $0x2b8] sm:$0xff]   ;;  %v1804_v20 = vld [vmem:[#allocation2 + $0x2f0] sm:$0xff]   ;;  %v1395_v27 = vcombine.high %v58_v26, %v58_v26  ;;  %v1814_v32 = vld [vmem:[#allocation2 + $0x260] sm:$0xff]  }
  0x39   :  { %1558 = vmatprep.subr.bf16.mxu1 %v1748_v30  ;;  %v57_v21 = vld [vmem:[%s1994_s0 + $0x78] sm:$0x11]  ;;  %v1806_v23 = vld [vmem:[#allocation2 + $0x2b0] sm:$0xff]   ;;  %v1812_v30 = vld [vmem:[#allocation2 + $0x2e8] sm:$0xff]  }
  0x3a   :  { %1531 = vmatpush3.bf16.msra.mxu0 %v1747_v29  ;;  %v1393_v22 = vcombine.high %v57_v21, %v57_v21  ;;  %v1392_v24 = vcombine.low %v57_v21, %v57_v21  ;;  %v1394_v29 = vcombine.low %v58_v26, %v58_v26  ;;  %v1818_v36 = vld [vmem:[#allocation2 + $0x258] sm:$0xff]  }
  0x3b   :  { %1572 = vmatprep.subr.bf16.mxu0 %v1753_v34  ;;  %v1816_v34 = vld [vmem:[#allocation2 + $0x2e0] sm:$0xff]   ;;  %v1837_v54 = vld [vmem:[#allocation2 + $0x338] sm:$0xff]  }
  0x3c   :  { %1559 = vmatpush3.bf16.msra.mxu1 %v1752_v33  ;;  %v1815_v33 = vld [vmem:[#allocation2 + $0x220] sm:$0xff]  }
  0x3d   :  { %1046 = vmatmul.mubr.bf16.vlgmr.msra.gmra.mxu0 %v1749_v31  ;;  %1600 = vmatprep.subr.bf16.mxu1 %v1758_v38  ;;  %v1813_v31 = vld [vmem:[#allocation2 + $0x2a8] sm:$0xff]   ;;  %v1820_v38 = vld [vmem:[#allocation2 + $0x2d8] sm:$0xff]  }
  0x3e   :  { %1573 = vmatpush3.bf16.msra.mxu0 %v1757_v37  ;;  %1053 = vmatprep.mubr.bf16.mxu0 %v1389_v55  ;;  %v1819_v37 = vld [vmem:[#allocation2 + $0x218] sm:$0xff]  }
  0x3f   :  { %1094 = vmatmul.mubr.bf16.vlgmr.msra.gmra.mxu1 %v1754_v35  ;;  %1574 = vmatprep.subr.bf16.mxu0 %v1760_v40  ;;  %v1817_v35 = vld [vmem:[#allocation2 + $0x2a0] sm:$0xff]   ;;  %v1822_v40 = vld [vmem:[#allocation2 + $0x250] sm:$0xff]   ;;  %v1838_v55 = vld [vmem:[%s1994_s0 + $0x28] ss:$52 sps:$4 sm:$0xff]  }
  0x40   :  { %1601 = vmatpush3.bf16.msra.mxu1 %v1759_v39  ;;  %1101 = vmatprep.mubr.bf16.mxu1 %v1391_v0  ;;  %v1821_v39 = vld [vmem:[#allocation2 + $0x298] sm:$0xff]   ;;  %v1847_v0 = vld [vmem:[#allocation2 + $0x320] sm:$0xff]  }
  0x41   :  { %1602 = vmatprep.subr.bf16.mxu1 %v1762_v42  ;;  %v1824_v42 = vld [vmem:[#allocation2 + $0x2d0] sm:$0xff]  }
  0x42   :  { %1575 = vmatpush3.bf16.msra.mxu0 %v1761_v41  ;;  %v1823_v41 = vld [vmem:[#allocation2 + $0x210] sm:$0xff]  }
  0x43   :  { %1576 = vmatprep.subr.bf16.mxu0 %v1764_v44  ;;  %v1826_v44 = vld [vmem:[#allocation2 + $0x248] sm:$0xff]  }
  0x44   :  { %1603 = vmatpush3.bf16.msra.mxu1 %v1763_v43  ;;  %v1825_v43 = vld [vmem:[#allocation2 + $0x290] sm:$0xff]  }
  0x45   :  { %1604 = vmatprep.subr.bf16.mxu1 %v1766_v46  ;;  %1054 = vmatmul.mubr.bf16.gmra.mxu0 %v1388_v57  ;;  %v1828_v46 = vld [vmem:[#allocation2 + $0x2c8] sm:$0xff]   ;;  %v1841_v57 = vld [vmem:[#allocation2 + $0x330] sm:$0xff]  }
  0x46   :  { %1577 = vmatpush3.bf16.msra.mxu0 %v1765_v45  ;;  %1141 = vmatprep.mubr.bf16.mxu0 %v1793_v10  ;;  %v1827_v45 = vld [vmem:[#allocation2 + $0x208] sm:$0xff]  }
  0x47   :  { %1578 = vmatprep.subr.bf16.mxu0 %v1768_v48  ;;  %1102 = vmatmul.mubr.bf16.gmra.mxu1 %v1390_v2  ;;  %v1830_v48 = vld [vmem:[#allocation2 + $0x240] sm:$0xff]  }
  0x48   :  { %1605 = vmatpush3.bf16.msra.mxu1 %v1767_v47  ;;  %1189 = vmatprep.mubr.bf16.mxu1 %v1798_v14  ;;  %v1829_v47 = vld [vmem:[#allocation2 + $0x288] sm:$0xff]   ;;  %v1852_v2 = vld [vmem:[%s1994_s0 + $0x30] ss:$52 sps:$4 sm:$0xff]  }
  0x49   :  { %1606 = vmatprep.subr.bf16.mxu1 %v1770_v50  ;;  %v1832_v50 = vld [vmem:[#allocation2 + $0x2c0] sm:$0xff]  }
  0x4a   :  { %1579 = vmatpush3.bf16.msra.mxu0 %v1769_v49  ;;  %v1831_v49 = vld [vmem:[#allocation2 + $0x200] sm:$0xff]  }
  0x4b   :  { %1580 = vmatprep.subr.bf16.mxu0 %v1772_v52  ;;  %v1835_v52 = vld [vmem:[%s1994_s0 + $0x24] ss:$52 sps:$4 sm:$0xff]  }
  0x4c   :  { %1607 = vmatpush3.bf16.msra.mxu1 %v1771_v51  ;;  %v1833_v51 = vld [vmem:[%s1994_s0 + $0x20] ss:$52 sps:$4 sm:$0xff]  }
  0x4d   :  { %1608 = vmatprep.subr.bf16.mxu1 %v1775_v56  ;;  %v1840_v56 = vld [vmem:[%s1994_s0 + $0x2c] ss:$52 sps:$4 sm:$0xff]  }
  0x4e   :  { %1581 = vmatpush3.bf16.msra.mxu0 %v1773_v53  ;;  %v1836_v53 = vld [vmem:[#allocation2 + $0x280] sm:$0xff]  }
  0x4f   :  { %1582 = vmatprep.subr.bf16.mxu0 %v1778_v59 }
  0x50   :  { %1609 = vmatpush3.bf16.msra.mxu1 %v1777_v58  ;;  %v59_v58 = vld [vmem:[%s1994_s0 + $0x88] sm:$0x11] }
  0x51   :  { %1610 = vmatprep.subr.bf16.mxu1 %v1780_v61  ;;  %v1397_v59 = vcombine.high %v59_v58, %v59_v58  ;;  %v60_v61 = vld [vmem:[%s1994_s0 + $0x90] sm:$0x11] }
  0x52   :  { %1583 = vmatpush3.bf16.msra.mxu0 %v1779_v60  ;;  %v1844_v60 = vld [vmem:[#allocation2 + $0x328] sm:$0xff]   ;;  %v1399_v63 = vcombine.high %v60_v61, %v60_v61 }
  0x53   :  { %1584 = vmatprep.subr.bf16.mxu0 %v1783_v1  ;;  %v1398_v1 = vcombine.low %v60_v61, %v60_v61 }
  0x54   :  { %1611 = vmatpush3.bf16.msra.mxu1 %v1781_v62  ;;  %v1396_v62 = vcombine.low %v59_v58, %v59_v58 }
  0x55   :  { %1612 = vmatprep.subr.bf16.mxu1 %v1786_v4  ;;  %v1849_v4 = vld [vmem:[#allocation2 + $0x310] sm:$0xff]  }
  0x56   :  { %1585 = vmatpush3.bf16.msra.mxu0 %v1785_v3  ;;  %v1848_v3 = vld [vmem:[#allocation2 + $0x318] sm:$0xff]  }
  0x57   :  { %1586 = vmatprep.subr.bf16.mxu0 %v1788_v6  ;;  %v1851_v6 = vld [vmem:[#allocation2 + $0x300] sm:$0xff]  }
  0x58   :  { %1613 = vmatpush3.bf16.msra.mxu1 %v1787_v5  ;;  %v1850_v5 = vld [vmem:[#allocation2 + $0x308] sm:$0xff]  }
  0x59   :  { %1614 = vmatprep.subr.bf16.mxu1 %v1790_v8 }
  0x5a   :  { %1587 = vmatpush3.bf16.msra.mxu0 %v1789_v7  ;;  %v1853_v7 = vld [vmem:[%s1994_s0 + $0x98] ss:$0 sps:$4 sm:$0x11]  }
  0x5b   :  { %1628 = vmatprep.subr.bf16.mxu0 %v1795_v12 }
  0x5c   :  { %1615 = vmatpush3.bf16.msra.mxu1 %v1794_v11 }
  0x5d   :  { %1142 = vmatmul.mubr.bf16.vlgmr.msra.gmra.mxu0 %v1791_v9  ;;  %1656 = vmatprep.subr.bf16.mxu1 %v1800_v16  ;;  %v1374_v9 = vld [vmem:[#allocation4] ss:$0 sm:$0xff] }
  0x5e   :  { %1629 = vmatpush3.bf16.msra.mxu0 %v1799_v15  ;;  %1149 = vmatprep.mubr.bf16.mxu0 %v1393_v22 }
  0x5f   :  { %1190 = vmatmul.mubr.bf16.vlgmr.msra.gmra.mxu1 %v1796_v13  ;;  %1630 = vmatprep.subr.bf16.mxu0 %v1802_v18 }
  0x60   :  { %1657 = vmatpush3.bf16.msra.mxu1 %v1801_v17  ;;  %1197 = vmatprep.mubr.bf16.mxu1 %v1395_v27 }
  0x61   :  { %1658 = vmatprep.subr.bf16.mxu1 %v1804_v20 }
  0x62   :  { %1631 = vmatpush3.bf16.msra.mxu0 %v1803_v19 }
  0x63   :  { %1632 = vmatprep.subr.bf16.mxu0 %v1808_v25 }
  0x64   :  { %1659 = vmatpush3.bf16.msra.mxu1 %v1806_v23 }
  0x65   :  { %1150 = vmatmul.mubr.bf16.gmra.mxu0 %v1392_v24  ;;  %1660 = vmatprep.subr.bf16.mxu1 %v1812_v30 }
  0x66   :  { %1633 = vmatpush3.bf16.msra.mxu0 %v1810_v28  ;;  %1237 = vmatprep.mubr.bf16.mxu0 %v1835_v52 }
  0x67   :  { %1198 = vmatmul.mubr.bf16.gmra.mxu1 %v1394_v29  ;;  %1634 = vmatprep.subr.bf16.mxu0 %v1814_v32 }
  0x68   :  { %1661 = vmatpush3.bf16.msra.mxu1 %v1813_v31  ;;  %1285 = vmatprep.mubr.bf16.mxu1 %v1840_v56 }
  0x69   :  { %1662 = vmatprep.subr.bf16.mxu1 %v1816_v34 }
  0x6a   :  { %1635 = vmatpush3.bf16.msra.mxu0 %v1815_v33 }
  0x6b   :  { %1636 = vmatprep.subr.bf16.mxu0 %v1818_v36 }
  0x6c   :  { %1663 = vmatpush3.bf16.msra.mxu1 %v1817_v35 }
  0x6d   :  { %1664 = vmatprep.subr.bf16.mxu1 %v1820_v38 }
  0x6e   :  { %1637 = vmatpush3.bf16.msra.mxu0 %v1819_v37 }
  0x6f   :  { %1638 = vmatprep.subr.bf16.mxu0 %v1822_v40 }
  0x70   :  { %1665 = vmatpush3.bf16.msra.mxu1 %v1821_v39 }
  0x71   :  { %1666 = vmatprep.subr.bf16.mxu1 %v1824_v42 }
  0x72   :  { %1639 = vmatpush3.bf16.msra.mxu0 %v1823_v41 }
  0x73   :  { %1640 = vmatprep.subr.bf16.mxu0 %v1826_v44 }
  0x74   :  { %1667 = vmatpush3.bf16.msra.mxu1 %v1825_v43 }
  0x75   :  { %1668 = vmatprep.subr.bf16.mxu1 %v1828_v46 }
  0x76   :  { %1641 = vmatpush3.bf16.msra.mxu0 %v1827_v45 }
  0x77   :  { %1642 = vmatprep.subr.bf16.mxu0 %v1830_v48 }
  0x78   :  { %1669 = vmatpush3.bf16.msra.mxu1 %v1829_v47 }
  0x79   :  { %1670 = vmatprep.subr.bf16.mxu1 %v1832_v50 }
  0x7a   :  { %1643 = vmatpush3.bf16.msra.mxu0 %v1831_v49 }
  0x7b   :  { %1694 = vmatprep.subr.bf16.mxu0 %v1837_v54 }
  0x7c   :  { %1671 = vmatpush3.bf16.msra.mxu1 %v1836_v53 }
  0x7d   :  { %1238 = vmatmul.mubr.bf16.vlgmr.msra.gmra.mxu0 %v1833_v51 }
  0x7e   :  { %1695 = vmatpush3.bf16.msra.mxu0 %v1837_v54  ;;  %1245 = vmatprep.mubr.bf16.mxu0 %v1397_v59 }
  0x7f   :  { %1286 = vmatmul.mubr.bf16.vlgmr.msra.gmra.mxu1 %v1838_v55  ;;  %1696 = vmatprep.subr.bf16.mxu0 %v1841_v57 }
  0x80   :  { %1293 = vmatprep.mubr.bf16.mxu1 %v1399_v63 }
  0x82   :  { %1697 = vmatpush3.bf16.msra.mxu0 %v1841_v57 }
  0x83   :  { %1698 = vmatprep.subr.bf16.mxu0 %v1844_v60 }
  0x85   :  { %1246 = vmatmul.mubr.bf16.gmra.mxu0 %v1396_v62 }
  0x86   :  { %1699 = vmatpush3.bf16.msra.mxu0 %v1844_v60  ;;  %1710 = vmatprep.mubr.bf16.mxu0 %v1852_v2 }
  0x87   :  { %1700 = vmatprep.subr.bf16.mxu0 %v1847_v0  ;;  %1294 = vmatmul.mubr.bf16.gmra.mxu1 %v1398_v1 }
  0x8a   :  { %1701 = vmatpush3.bf16.msra.mxu0 %v1847_v0 }
  0x8b   :  { %1702 = vmatprep.subr.bf16.mxu0 %v1848_v3 }
  0x8e   :  { %1703 = vmatpush3.bf16.msra.mxu0 %v1848_v3 }
  0x8f   :  { %1704 = vmatprep.subr.bf16.mxu0 %v1849_v4 }
  0x92   :  { %1705 = vmatpush3.bf16.msra.mxu0 %v1849_v4 }
  0x93   :  { %1706 = vmatprep.subr.bf16.mxu0 %v1850_v5 }
  0x96   :  { %1707 = vmatpush3.bf16.msra.mxu0 %v1850_v5 }
  0x97   :  { %1708 = vmatprep.subr.bf16.mxu0 %v1851_v6 }
  0x9a   :  { %1709 = vmatpush3.bf16.msra.mxu0 %v1851_v6 }
  0x9d   :  { %1711 = vmatmul.mubr.bf16.vlgmr.msra.gmra.mxu0 %v1853_v7 }
  0xfd   :  { %v1532_v8 = vpop.f32.mrf.mxu0 }
  0xff   :  { %v1533_v10 = vpop.f32.mrf.mxu0  ;;  %v1560_v12 = vpop.f32.mrf.mxu1 }
 0x100   :  { %v1534_v11 = vadd.f32 %v1533_v10, %v1532_v8 }
 0x101   :  { %v1535_v13 = vpop.f32.mrf.mxu0  ;;  %v1561_v15 = vpop.f32.mrf.mxu1 }
 0x102   :  { %v1048_v14 = vadd.f32 %v1534_v11, %v1374_v9  ;;  %v1562_v16 = vadd.f32 %v1561_v15, %v1560_v12 }
 0x103   :  { %v1536_v17 = vpop.f32.mrf.mxu0  ;;  %v1563_v19 = vpop.f32.mrf.mxu1 }
 0x104   :  { %v1537_v18 = vadd.f32 %v1536_v17, %v1535_v13  ;;  %v1096_v20 = vadd.f32 %v1562_v16, %v1048_v14 }
 0x105   :  { %v1564_v22 = vpop.f32.mrf.mxu1  ;;  %v1538_v25 = vpop.f32.mrf.mxu0 }
 0x106   :  { %v1051_v21 = vadd.f32 %v1537_v18, %v1374_v9  ;;  %v1565_v23 = vadd.f32 %v1564_v22, %v1563_v19 }
 0x107   :  { %v1539_v26 = vpop.f32.mrf.mxu0  ;;  %v1566_v30 = vpop.f32.mrf.mxu1 }
 0x108   :  { %v1099_v24 = vadd.f32 %v1565_v23, %v1051_v21  ;;  %v1540_v27 = vadd.f32 %v1539_v26, %v1538_v25 }
 0x109   :  { %v1541_v28 = vpop.f32.mrf.mxu0  ;;  %v1567_v31 = vpop.f32.mrf.mxu1 }
 0x10a   :  { %v1056_v0 = vadd.f32 %v1540_v27, %v1374_v9  ;;  %v1568_v1 = vadd.f32 %v1567_v31, %v1566_v30 }
 0x10b   :  { %v1542_v29 = vpop.f32.mrf.mxu0  ;;  %v1569_v32 = vpop.f32.mrf.mxu1 }
 0x10c   :  { %v1104_v5 = vadd.f32 %v1568_v1, %v1056_v0 }
 0x10d   :  { %v1570_v33 = vpop.f32.mrf.mxu1 }
 0x11d   :  { %v1588_v34 = vpop.f32.mrf.mxu0 }
 0x11f   :  { %v1589_v35 = vpop.f32.mrf.mxu0  ;;  %v1616_v36 = vpop.f32.mrf.mxu1 }
 0x120   :  { %v1590_v6 = vadd.f32 %v1589_v35, %v1588_v34 }
 0x121   :  { %v1591_v37 = vpop.f32.mrf.mxu0  ;;  %v1617_v38 = vpop.f32.mrf.mxu1 }
 0x122   :  { %v1144_v12 = vadd.f32 %v1590_v6, %v1096_v20  ;;  %v1618_v13 = vadd.f32 %v1617_v38, %v1616_v36 }
 0x123   :  { %v1592_v39 = vpop.f32.mrf.mxu0  ;;  %v1619_v40 = vpop.f32.mrf.mxu1 }
 0x124   :  { %v1593_v10 = vadd.f32 %v1592_v39, %v1591_v37  ;;  %v1192_v21 = vadd.f32 %v1618_v13, %v1144_v12 }
 0x125   :  { %v1620_v41 = vpop.f32.mrf.mxu1  ;;  %v1594_v42 = vpop.f32.mrf.mxu0 }
 0x126   :  { %v1147_v15 = vadd.f32 %v1593_v10, %v1099_v24  ;;  %v1621_v16 = vadd.f32 %v1620_v41, %v1619_v40 }
 0x127   :  { %v1595_v43 = vpop.f32.mrf.mxu0  ;;  %v1622_v44 = vpop.f32.mrf.mxu1 }
 0x128   :  { %v1596_v3 = vadd.f32 %v1595_v43, %v1594_v42  ;;  %v1195_v22 = vadd.f32 %v1621_v16, %v1147_v15 }
 0x129   :  { %v1623_v45 = vpop.f32.mrf.mxu1  ;;  %v1597_v46 = vpop.f32.mrf.mxu0 }
 0x12a   :  { %v1152_v7 = vadd.f32 %v1596_v3, %v1104_v5  ;;  %v1624_v8 = vadd.f32 %v1623_v45, %v1622_v44 }
 0x12b   :  { %v1598_v47 = vpop.f32.mrf.mxu0  ;;  %v1625_v48 = vpop.f32.mrf.mxu1 }
 0x12c   :  { %v1200_v14 = vadd.f32 %v1624_v8, %v1152_v7 }
 0x12d   :  { %v1626_v49 = vpop.f32.mrf.mxu1 }
 0x13d   :  { %v1644_v50 = vpop.f32.mrf.mxu0 }
 0x13f   :  { %v1645_v51 = vpop.f32.mrf.mxu0  ;;  %v1672_v52 = vpop.f32.mrf.mxu1 }
 0x140   :  { %v1646_v17 = vadd.f32 %v1645_v51, %v1644_v50 }
 0x141   :  { %v1647_v53 = vpop.f32.mrf.mxu0  ;;  %v1673_v54 = vpop.f32.mrf.mxu1 }
 0x142   :  { %v1240_v23 = vadd.f32 %v1646_v17, %v1192_v21  ;;  %v1674_v25 = vadd.f32 %v1673_v54, %v1672_v52 }
 0x143   :  { %v1648_v55 = vpop.f32.mrf.mxu0  ;;  %v1675_v56 = vpop.f32.mrf.mxu1 }
 0x144   :  { %v1649_v9 = vadd.f32 %v1648_v55, %v1647_v53  ;;  %v1288_v20 = vadd.f32 %v1674_v25, %v1240_v23 }
 0x145   :  { %v1650_v57 = vpop.f32.mrf.mxu0  ;;  %v1676_v58 = vpop.f32.mrf.mxu1 }
 0x146   :  { %v1243_v28 = vadd.f32 %v1649_v9, %v1195_v22  ;;  %v1677_v29 = vadd.f32 %v1676_v58, %v1675_v56 }
 0x147   :  { %v1651_v59 = vpop.f32.mrf.mxu0  ;;  %v1678_v60 = vpop.f32.mrf.mxu1 }
 0x148   :  { %v1652_v11 = vadd.f32 %v1651_v59, %v1650_v57  ;;  %v1291_v35 = vadd.f32 %v1677_v29, %v1243_v28 }
 0x149   :  { %v1653_v61 = vpop.f32.mrf.mxu0  ;;  %v1679_v62 = vpop.f32.mrf.mxu1 }
 0x14a   :  { %v1248_v18 = vadd.f32 %v1652_v11, %v1200_v14  ;;  %v1680_v19 = vadd.f32 %v1679_v62, %v1678_v60 }
 0x14b   :  { %v1654_v63 = vpop.f32.mrf.mxu0  ;;  %v1681_v2 = vpop.f32.mrf.mxu1 }
 0x14c   :  { %v1296_v26 = vadd.f32 %v1680_v19, %v1248_v18 }
 0x14d   :  { %v1682_v4 = vpop.f32.mrf.mxu1 }
 0x15d   :  { %v1712_v27 = vpop.f32.mrf.mxu0 }
 0x15e   :  { %v1344_v30 = vadd.f32 %v1712_v27, %v1296_v26 }
 0x15f   :  { %v1335_v31 = vpop.f32.mrf.mxu0 }
 0x160   :  { %v1351_v32 = vmax.f32 %v1344_v30, 0.0  ;;  %v1336_v24 = vadd.f32 %v1335_v31, %v1288_v20 }
 0x161   :  { %v1713_v33 = vpop.f32.mrf.mxu0 }
 0x162   :  { %v1510_v34 = vpack.c.bf16 %v1351_v32, %v1351_v32  ;;  %v1349_v38 = vmax.f32 %v1336_v24, 0.0 }
 0x163   :  { %v1338_v36 = vpop.f32.mrf.mxu0 }
 0x164   :  { %1367 = vst [vmem:[%s1997_s3 + $0x8] sm:$0x1] %v1510_v34  ;;  %v1339_v37 = vadd.f32 %v1338_v36, %v1291_v35 }
 0x166   :  { %v1350_v39 = vmax.f32 %v1339_v37, 0.0 }
 0x168   :  { %v1514_v40 = vpack.c.bf16 %v1350_v39, %v1349_v38 }
 0x16a   :  { %1515 = vst [vmem:[%s1997_s3] sm:$0xff] %v1514_v40  }
 0x16b   :  { %1372 = vsyncpa [#allocation3], 1 }
 0x16c   :  { %1373 = vsyncpa [#allocation5], 1 }

// kernel: outconv_forward.15
= control target key start
LH: loop header
LB: loop body
LE: loop exit
PB: predicated region body
PF: predicated region fallthrough
CT: control target
= control target key end

     0   :  { %s931_s12 = smov 0   ;;  %s1047_s0 = inlined_call_operand.vmem [shape: bf16[128,384], index: 0, kind: input, shape index: {}]   ;;  %s1048_s1 = inlined_call_operand.vmem [shape: bf16[384,128], index: 1, kind: input, shape index: {}]   ;;  %s1049_s2 = inlined_call_operand.vmem [shape: f32[1,128], index: 2, kind: input, shape index: {}]   ;;  %s1050_s3 = inlined_call_operand.vmem [shape: bf16[128,128], index: 3, kind: output, shape index: {}]  }
   0x1 LB: > { %s691_s13 = sadd.s32 4294967295, %s909_s12   ;;  %p695_p0 = scmp.ge.s32.totalorder %s909_s12, 1  ;;  %s909_s12 = sphi %s931_s12, %s13_s12  }
   0x2   : > { %p139_p1 = scmp.lt.s32.totalorder %s909_s12, 3 }
   0x4   : > { %p140_p2 = pnand %p695_p0, %p139_p1 }
   0x5   : > { %s696_s28 = sshll.u32 (!%p140_p2), %s691_s13, 3 }
   0x6   : > { %143 = sbr.rel (%p140_p2) target bundleno = 278 (0x116), region = 32  ;;  %p165_p3 = scmp.lt.s32.totalorder (!%p140_p2), %s696_s28, 15 }
   0xb   : > { %v863_v0 = vld [vmem:[%s1048_s1 + $0x78] sm:$0xff]   ;;  %v865_v2 = vld [vmem:[%s1048_s1 + $0x70] sm:$0xff]   ;;  %v868_v5 = vld [vmem:[%s1048_s1 + $0x68] sm:$0xff]   ;;  %s1052_s28 = smov (!%p165_p3, %s696_s28), 15 }
   0xc   : > { %v864_v1 = vld [vmem:[%s1048_s1 + $0x38] sm:$0xff]   ;;  %778 = vmatprep.subr.bf16.mxu0 %v863_v0  ;;  %v867_v4 = vld [vmem:[%s1048_s1 + $0x30] sm:$0xff]   ;;  %v870_v7 = vld [vmem:[%s1048_s1 + $0x28] sm:$0xff]   ;;  %s854_s21 = smul.u32 12, %s1052_s28  ;;  %s699_s18 = sshll.u32 %s1052_s28, 2 }
   0xd   : > { %779 = vmatpush3.bf16.msra.mxu0 %v864_v1  ;;  %v866_v3 = vld [vmem:[%s1048_s1 + $0xb8] sm:$0xff]   ;;  %v869_v6 = vld [vmem:[%s1048_s1 + $0xb0] sm:$0xff]   ;;  %v871_v8 = vld [vmem:[%s1048_s1 + $0x60] sm:$0xff]  }
   0xe   : > { %780 = vmatprep.subr.bf16.mxu0 %v865_v2  ;;  %830 = vmatprep.subr.bf16.mxu1 %v866_v3  ;;  %v872_v9 = vld [vmem:[%s1048_s1 + $0xa8] sm:$0xff]   ;;  %v873_v10 = vld [vmem:[%s1048_s1 + $0x20] sm:$0xff]   ;;  %v874_v11 = vld [vmem:[%s1048_s1 + $0x58] sm:$0xff]   ;;  %s1005_s6 = scalar_lea.vmem %s1047_s0, %s854_s21  ;;  %s1038_s21 = scalar_lea.vmem %s1050_s3, %s699_s18 }
   0xf   : > { %831 = vmatpush3.bf16.msra.mxu1 %v866_v3  ;;  %v875_v12 = vld [vmem:[%s1048_s1 + $0xa0] sm:$0xff]   ;;  %v876_v13 = vld [vmem:[%s1048_s1 + $0x18] sm:$0xff]   ;;  %v877_v15 = vld [vmem:[%s1048_s1 + $0x50] sm:$0xff]  }
  0x10   : > { %832 = vmatprep.subr.bf16.mxu1 %v869_v6  ;;  %v878_v14 = vld [vmem:[%s1048_s1 + $0x98] sm:$0xff]   ;;  %v879_v16 = vld [vmem:[%s1048_s1 + $0x10] sm:$0xff]   ;;  %v880_v18 = vld [vmem:[%s1048_s1 + $0x48] sm:$0xff]  }
  0x11   : > { %781 = vmatpush3.bf16.msra.mxu0 %v867_v4  ;;  %v881_v17 = vld [vmem:[%s1048_s1 + $0x90] sm:$0xff]   ;;  %v882_v19 = vld [vmem:[%s1048_s1 + $0x8] sm:$0xff]   ;;  %v883_v20 = vld [vmem:[%s1048_s1 + $0x40] sm:$0xff]  }
  0x12   : > { %782 = vmatprep.subr.bf16.mxu0 %v868_v5  ;;  %v884_v21 = vld [vmem:[%s1048_s1 + $0x88] sm:$0xff]   ;;  %v888_v22 = vld [vmem:[%s1005_s6 + $0x4] ss:$12 sps:$4 sm:$0xff]   ;;  %v895_v31 = vld [vmem:[%s1005_s6 + $0x34] ss:$12 sps:$4 sm:$0xff]  }
  0x13   : > { %833 = vmatpush3.bf16.msra.mxu1 %v869_v6  ;;  %v885_v23 = vld [vmem:[%s1048_s1] sm:$0xff]   ;;  %489 = vmatprep.mubr.bf16.mxu0 %v888_v22  ;;  %v890_v24 = vld [vmem:[%s1005_s6 + $0x8] ss:$12 sps:$4 sm:$0xff]   ;;  %v899_v32 = vld [vmem:[%s1005_s6 + $0x50] ss:$12 sps:$4 sm:$0xff]  }
  0x14   : > { %834 = vmatprep.subr.bf16.mxu1 %v872_v9  ;;  %v889_v25 = vld [vmem:[%s1048_s1 + $0x80] sm:$0xff]   ;;  %846 = vmatprep.mubr.bf16.mxu1 %v890_v24  ;;  %v892_v27 = vld [vmem:[%s1005_s6 + $0x1c] ss:$12 sps:$4 sm:$0xff]   ;;  %v900_v34 = vld [vmem:[%s1005_s6 + $0x4c] ss:$12 sps:$4 sm:$0xff]  }
  0x15   : > { %783 = vmatpush3.bf16.msra.mxu0 %v870_v7  ;;  %v886_v26 = vld [vmem:[%s1005_s6] ss:$12 sps:$4 sm:$0xff]   ;;  %v898_v29 = vld [vmem:[%s1005_s6 + $0x38] ss:$12 sps:$4 sm:$0xff]   ;;  %v897_v33 = vld [vmem:[%s1005_s6 + $0x30] ss:$12 sps:$4 sm:$0xff]  }
  0x16   : > { %784 = vmatprep.subr.bf16.mxu0 %v871_v8  ;;  %v891_v28 = vld [vmem:[%s1005_s6 + $0x20] ss:$12 sps:$4 sm:$0xff]   ;;  %v894_v30 = vld [vmem:[%s1005_s6 + $0x18] ss:$12 sps:$4 sm:$0xff]   ;;  %v902_v35 = vld [vmem:[%s1005_s6 + $0x48] ss:$12 sps:$4 sm:$0xff]  }
  0x17   : > { %835 = vmatpush3.bf16.msra.mxu1 %v872_v9  ;;  %v700_v38 = vld [vmem:[%s1049_s2] ss:$0 sm:$0xff] }
  0x18   : > { %836 = vmatprep.subr.bf16.mxu1 %v875_v12 }
  0x19   : > { %785 = vmatpush3.bf16.msra.mxu0 %v873_v10 }
  0x1a   : > { %786 = vmatprep.subr.bf16.mxu0 %v874_v11 }
  0x1b   : > { %837 = vmatpush3.bf16.msra.mxu1 %v875_v12 }
  0x1c   : > { %838 = vmatprep.subr.bf16.mxu1 %v878_v14 }
  0x1d   : > { %787 = vmatpush3.bf16.msra.mxu0 %v876_v13 }
  0x1e   : > { %788 = vmatprep.subr.bf16.mxu0 %v877_v15 }
  0x1f   : > { %839 = vmatpush3.bf16.msra.mxu1 %v878_v14 }
  0x20   : > { %840 = vmatprep.subr.bf16.mxu1 %v881_v17 }
  0x21   : > { %789 = vmatpush3.bf16.msra.mxu0 %v879_v16 }
  0x22   : > { %790 = vmatprep.subr.bf16.mxu0 %v880_v18 }
  0x23   : > { %841 = vmatpush3.bf16.msra.mxu1 %v881_v17 }
  0x24   : > { %842 = vmatprep.subr.bf16.mxu1 %v884_v21 }
  0x25   : > { %791 = vmatpush3.bf16.msra.mxu0 %v882_v19 }
  0x26   : > { %792 = vmatprep.subr.bf16.mxu0 %v883_v20 }
  0x27   : > { %843 = vmatpush3.bf16.msra.mxu1 %v884_v21 }
  0x28   : > { %844 = vmatprep.subr.bf16.mxu1 %v889_v25 }
  0x29   : > { %793 = vmatpush3.bf16.msra.mxu0 %v885_v23 }
  0x2b   : > { %845 = vmatpush3.bf16.msra.mxu1 %v889_v25 }
  0x2c   : > { %490 = vmatmul.mubr.bf16.vlgmr.msra.gmra.mxu0 %v886_v26 }
  0x2d   : > { %497 = vmatprep.mubr.bf16.mxu0 %v892_v27 }
  0x2e   : > { %847 = vmatmul.mubr.bf16.vlgmr.msra.gmra.mxu1 %v891_v28 }
  0x2f   : > { %850 = vmatprep.mubr.bf16.mxu1 %v898_v29 }
  0x34   : > { %498 = vmatmul.mubr.bf16.gmra.mxu0 %v894_v30 }
  0x35   : > { %505 = vmatprep.mubr.bf16.mxu0 %v895_v31 }
  0x36   : > { %851 = vmatmul.mubr.bf16.gmra.mxu1 %v899_v32 }
  0x3c   : > { %506 = vmatmul.mubr.bf16.gmra.mxu0 %v897_v33 }
  0x3d   : > { %513 = vmatprep.mubr.bf16.mxu0 %v900_v34 }
  0x44   : > { %514 = vmatmul.mubr.bf16.gmra.mxu0 %v902_v35 }
  0xec   : > { %v794_v36 = vpop.f32.mrf.mxu0 }
  0xee   : > { %v795_v37 = vpop.f32.mrf.mxu0  ;;  %v848_v40 = vpop.f32.mrf.mxu1 }
  0xef   : > { %v796_v39 = vadd.f32 %v795_v37, %v794_v36 }
  0xf0   : > { %v797_v41 = vpop.f32.mrf.mxu0  ;;  %v556_v43 = vpop.f32.mrf.mxu1 }
  0xf1   : > { %v492_v42 = vadd.f32 %v796_v39, %v700_v38 }
  0xf2   : > { %v798_v44 = vpop.f32.mrf.mxu0  ;;  %v849_v46 = vpop.f32.mrf.mxu1 }
  0xf3   : > { %v799_v45 = vadd.f32 %v798_v44, %v797_v41  ;;  %v557_v48 = vadd.f32 %v556_v43, %v492_v42 }
  0xf4   : > { %v800_v47 = vpop.f32.mrf.mxu0  ;;  %v559_v50 = vpop.f32.mrf.mxu1 }
  0xf5   : > { %v495_v49 = vadd.f32 %v799_v45, %v700_v38  ;;  %v587_v56 = vmax.f32 %v557_v48, 0.0 }
  0xf6   : > { %v801_v51 = vpop.f32.mrf.mxu0  ;;  %v852_v55 = vpop.f32.mrf.mxu1 }
  0xf7   : > { %v802_v52 = vadd.f32 %v801_v51, %v800_v47  ;;  %v560_v53 = vadd.f32 %v559_v50, %v495_v49 }
  0xf8   : > { %v803_v54 = vpop.f32.mrf.mxu0  ;;  %v572_v63 = vpop.f32.mrf.mxu1 }
  0xf9   : > { %v500_v57 = vadd.f32 %v802_v52, %v700_v38  ;;  %v588_v58 = vmax.f32 %v560_v53, 0.0 }
  0xfa   : > { %v804_v59 = vpop.f32.mrf.mxu0  ;;  %v853_v6 = vpop.f32.mrf.mxu1 }
  0xfb   : > { %v758_v60 = vpack.c.bf16 %v588_v58, %v587_v56  ;;  %v805_v61 = vadd.f32 %v804_v59, %v803_v54  ;;  %v565_v0 = vadd.f32 %v848_v40, %v500_v57 }
  0xfc   : > { %v806_v62 = vpop.f32.mrf.mxu0  ;;  %v575_v14 = vpop.f32.mrf.mxu1 }
  0xfd   : > { %759 = vst [vmem:[%s1038_s21] sm:$0xff] %v758_v60   ;;  %v503_v1 = vadd.f32 %v805_v61, %v700_v38  ;;  %v589_v7 = vmax.f32 %v565_v0, 0.0 }
  0xfe   : > { %v807_v2 = vpop.f32.mrf.mxu0 }
  0xff   : > { %v568_v3 = vadd.f32 %v849_v46, %v503_v1  ;;  %v808_v4 = vadd.f32 %v807_v2, %v806_v62 }
 0x100   : > { %v809_v5 = vpop.f32.mrf.mxu0 }
 0x101   : > { %v590_v8 = vmax.f32 %v568_v3, 0.0  ;;  %v508_v9 = vadd.f32 %v808_v4, %v700_v38 }
 0x102   : > { %v810_v10 = vpop.f32.mrf.mxu0 }
 0x103   : > { %v763_v11 = vpack.c.bf16 %v590_v8, %v589_v7  ;;  %v811_v12 = vadd.f32 %v810_v10, %v809_v5  ;;  %v573_v15 = vadd.f32 %v572_v63, %v508_v9 }
 0x104   : > { %v812_v13 = vpop.f32.mrf.mxu0 }
 0x105   : > { %775 = vst [vmem:[%s1038_s21 + $0x8] sm:$0xff] %v763_v11   ;;  %v511_v16 = vadd.f32 %v811_v12, %v700_v38  ;;  %v591_v21 = vmax.f32 %v573_v15, 0.0 }
 0x106   : > { %v813_v17 = vpop.f32.mrf.mxu0 }
 0x107   : > { %v814_v18 = vadd.f32 %v813_v17, %v812_v13  ;;  %v576_v19 = vadd.f32 %v575_v14, %v511_v16 }
 0x108   : > { %v815_v20 = vpop.f32.mrf.mxu0 }
 0x109   : > { %v516_v22 = vadd.f32 %v814_v18, %v700_v38  ;;  %v592_v23 = vmax.f32 %v576_v19, 0.0 }
 0x10a   : > { %v816_v24 = vpop.f32.mrf.mxu0 }
 0x10b   : > { %v768_v25 = vpack.c.bf16 %v592_v23, %v591_v21  ;;  %v817_v26 = vadd.f32 %v816_v24, %v815_v20  ;;  %v581_v27 = vadd.f32 %v852_v55, %v516_v22 }
 0x10d   : > { %776 = vst [vmem:[%s1038_s21 + $0x10] sm:$0xff] %v768_v25   ;;  %v519_v28 = vadd.f32 %v817_v26, %v700_v38  ;;  %v593_v30 = vmax.f32 %v581_v27, 0.0 }
 0x10f   : > { %v584_v29 = vadd.f32 %v853_v6, %v519_v28 }
 0x111   : > { %v594_v31 = vmax.f32 %v584_v29, 0.0 }
 0x113   : > { %v773_v32 = vpack.c.bf16 %v594_v31, %v593_v30 }
 0x115   : > { %777 = vst [vmem:[%s1038_s21 + $0x18] sm:$0xff] %v773_v32  }
 0x116 PF: > { %s13_s12 = sadd.s32 1, %s909_s12  }
 0x117   : > { %p10_p4 = scmp.ge.s32.totalorder %s13_s12, 4  }
 0x119   :  { %12 = sbr.rel (!%p10_p4) target bundleno = 1 (0x1), region = 62 }

// kernel: outconv_forward.12
= control target key start
LH: loop header
LB: loop body
LE: loop exit
PB: predicated region body
PF: predicated region fallthrough
CT: control target
= control target key end

     0   :  { %s1240_s1 = inlined_call_operand.vmem [shape: bf16[512,128], index: 1, kind: input, shape index: {}]   ;;  %s1241_s0 = inlined_call_operand.vmem [shape: bf16[98,512], index: 0, kind: input, shape index: {}]   ;;  %s1242_s2 = inlined_call_operand.vmem [shape: f32[1,128], index: 2, kind: input, shape index: {}]   ;;  %s1243_s3 = inlined_call_operand.vmem [shape: bf16[98,128], index: 3, kind: output, shape index: {}]  }
   0x1   :  { %v935_v0 = vld [vmem:[%s1240_s1 + $0x78] sm:$0xff]   ;;  %v939_v4 = vld [vmem:[%s1240_s1 + $0x70] sm:$0xff]   ;;  %v943_v8 = vld [vmem:[%s1240_s1 + $0x68] sm:$0xff]  }
   0x2   :  { %v936_v1 = vld [vmem:[%s1240_s1 + $0xf8] sm:$0xff]   ;;  %819 = vmatprep.subr.bf16.mxu0 %v935_v0  ;;  %v940_v5 = vld [vmem:[%s1240_s1 + $0xf0] sm:$0xff]   ;;  %v944_v9 = vld [vmem:[%s1240_s1 + $0xe8] sm:$0xff]  }
   0x3   :  { %v937_v2 = vld [vmem:[%s1240_s1 + $0x38] sm:$0xff]   ;;  %877 = vmatprep.subr.bf16.mxu1 %v936_v1  ;;  %v941_v6 = vld [vmem:[%s1240_s1 + $0x30] sm:$0xff]   ;;  %v945_v10 = vld [vmem:[%s1240_s1 + $0x28] sm:$0xff]  }
   0x4   :  { %v938_v3 = vld [vmem:[%s1240_s1 + $0xb8] sm:$0xff]   ;;  %820 = vmatpush3.bf16.msra.mxu0 %v937_v2  ;;  %v942_v7 = vld [vmem:[%s1240_s1 + $0xb0] sm:$0xff]   ;;  %v946_v11 = vld [vmem:[%s1240_s1 + $0xa8] sm:$0xff]  }
   0x5   :  { %878 = vmatpush3.bf16.msra.mxu1 %v938_v3  ;;  %821 = vmatprep.subr.bf16.mxu0 %v939_v4  ;;  %v947_v12 = vld [vmem:[%s1240_s1 + $0x60] sm:$0xff]   ;;  %v951_v16 = vld [vmem:[%s1240_s1 + $0x58] sm:$0xff]   ;;  %v955_v20 = vld [vmem:[%s1240_s1 + $0x50] sm:$0xff]  }
   0x6   :  { %879 = vmatprep.subr.bf16.mxu1 %v940_v5  ;;  %v948_v13 = vld [vmem:[%s1240_s1 + $0xe0] sm:$0xff]   ;;  %v952_v17 = vld [vmem:[%s1240_s1 + $0xd8] sm:$0xff]   ;;  %v956_v21 = vld [vmem:[%s1240_s1 + $0xd0] sm:$0xff]  }
   0x7   :  { %v949_v14 = vld [vmem:[%s1240_s1 + $0x20] sm:$0xff]   ;;  %v953_v18 = vld [vmem:[%s1240_s1 + $0x18] sm:$0xff]   ;;  %v957_v22 = vld [vmem:[%s1240_s1 + $0x10] sm:$0xff]  }
   0x8   :  { %822 = vmatpush3.bf16.msra.mxu0 %v941_v6  ;;  %v950_v15 = vld [vmem:[%s1240_s1 + $0xa0] sm:$0xff]   ;;  %v954_v19 = vld [vmem:[%s1240_s1 + $0x98] sm:$0xff]   ;;  %v958_v23 = vld [vmem:[%s1240_s1 + $0x90] sm:$0xff]  }
   0x9   :  { %880 = vmatpush3.bf16.msra.mxu1 %v942_v7  ;;  %823 = vmatprep.subr.bf16.mxu0 %v943_v8  ;;  %v959_v24 = vld [vmem:[%s1240_s1 + $0x48] sm:$0xff]   ;;  %v963_v28 = vld [vmem:[%s1240_s1 + $0x40] sm:$0xff]  }
   0xa   :  { %881 = vmatprep.subr.bf16.mxu1 %v944_v9  ;;  %v960_v25 = vld [vmem:[%s1240_s1 + $0xc8] sm:$0xff]   ;;  %v964_v29 = vld [vmem:[%s1240_s1 + $0xc0] sm:$0xff]  }
   0xb   :  { %v961_v26 = vld [vmem:[%s1240_s1 + $0x8] sm:$0xff]   ;;  %v965_v30 = vld [vmem:[%s1240_s1] sm:$0xff]  }
   0xc   :  { %824 = vmatpush3.bf16.msra.mxu0 %v945_v10  ;;  %v962_v27 = vld [vmem:[%s1240_s1 + $0x88] sm:$0xff]   ;;  %v966_v31 = vld [vmem:[%s1240_s1 + $0x80] sm:$0xff]  }
   0xd   :  { %882 = vmatpush3.bf16.msra.mxu1 %v946_v11  ;;  %825 = vmatprep.subr.bf16.mxu0 %v947_v12  ;;  %v967_v32 = vld [vmem:[%s1241_s0] ss:$16 sps:$4 sm:$0xff]   ;;  %v969_v33 = vld [vmem:[%s1241_s0 + $0x4] ss:$16 sps:$4 sm:$0xff]   ;;  %v970_v34 = vld [vmem:[%s1241_s0 + $0x8] ss:$16 sps:$4 sm:$0xff]  }
   0xe   :  { %883 = vmatprep.subr.bf16.mxu1 %v948_v13  ;;  %v972_v35 = vld [vmem:[%s1241_s0 + $0xc] ss:$16 sps:$4 sm:$0xff]   ;;  %470 = vmatprep.mubr.bf16.mxu0 %v969_v33  ;;  %v973_v36 = vld [vmem:[%s1241_s0 + $0x24] ss:$16 sps:$4 sm:$0xff]   ;;  %v977_v38 = vld [vmem:[%s1241_s0 + $0x20] ss:$16 sps:$4 sm:$0xff]  }
   0xf   :  { %558 = vmatprep.mubr.bf16.mxu1 %v972_v35  ;;  %v975_v37 = vld [vmem:[%s1241_s0 + $0x2c] ss:$16 sps:$4 sm:$0xff]   ;;  %v978_v39 = vld [vmem:[%s1241_s0 + $0x28] ss:$16 sps:$4 sm:$0xff]   ;;  %v979_v40 = vld [vmem:[%s1241_s0 + $0x44] ss:$16 sps:$4 sm:$0xff]  }
  0x10   :  { %826 = vmatpush3.bf16.msra.mxu0 %v949_v14  ;;  %v981_v41 = vld [vmem:[%s1241_s0 + $0x4c] ss:$16 sps:$4 sm:$0xff]   ;;  %v983_v42 = vld [vmem:[%s1241_s0 + $0x40] ss:$16 sps:$4 sm:$0xff]   ;;  %v984_v43 = vld [vmem:[%s1241_s0 + $0x48] ss:$16 sps:$4 sm:$0xff]  }
  0x11   :  { %884 = vmatpush3.bf16.msra.mxu1 %v950_v15  ;;  %827 = vmatprep.subr.bf16.mxu0 %v951_v16  ;;  %v985_v44 = vld [vmem:[%s1241_s0 + $0x64] ss:$16 sps:$4 sm:$0xff]   ;;  %v987_v45 = vld [vmem:[%s1241_s0 + $0x6c] ss:$16 sps:$4 sm:$0xff]   ;;  %v989_v46 = vld [vmem:[%s1241_s0 + $0x60] ss:$16 sps:$4 sm:$0xff]  }
  0x12   :  { %885 = vmatprep.subr.bf16.mxu1 %v952_v17  ;;  %v990_v47 = vld [vmem:[%s1241_s0 + $0x68] ss:$16 sps:$4 sm:$0xff]   ;;  %v991_v48 = vld [vmem:[%s1241_s0 + $0x84] ss:$16 sps:$4 sm:$0xff]   ;;  %v993_v49 = vld [vmem:[%s1241_s0 + $0x8c] ss:$16 sps:$4 sm:$0xff]  }
  0x13   :  { %v995_v50 = vld [vmem:[%s1241_s0 + $0x80] ss:$16 sps:$4 sm:$0xff]   ;;  %v996_v51 = vld [vmem:[%s1241_s0 + $0x88] ss:$16 sps:$4 sm:$0xff]   ;;  %v997_v52 = vld [vmem:[%s1241_s0 + $0xa4] ss:$16 sps:$4 sm:$0xff]  }
  0x14   :  { %828 = vmatpush3.bf16.msra.mxu0 %v953_v18  ;;  %v999_v53 = vld [vmem:[%s1241_s0 + $0xac] ss:$16 sps:$4 sm:$0xff]   ;;  %v39_v54 = vld [vmem:[%s1241_s0 + $0xc0] sm:$0x11]  ;;  %v1002_v57 = vld [vmem:[%s1241_s0 + $0xa8] ss:$16 sps:$4 sm:$0xff]  }
  0x15   :  { %886 = vmatpush3.bf16.msra.mxu1 %v954_v19  ;;  %829 = vmatprep.subr.bf16.mxu0 %v955_v20  ;;  %v40_v55 = vld [vmem:[%s1241_s0 + $0xc8] sm:$0x11]  ;;  %v1001_v56 = vld [vmem:[%s1241_s0 + $0xa0] ss:$16 sps:$4 sm:$0xff]   ;;  %v723_v58 = vcombine.high %v39_v54, %v39_v54  ;;  %v722_v60 = vcombine.low %v39_v54, %v39_v54 }
  0x16   :  { %887 = vmatprep.subr.bf16.mxu1 %v956_v21  ;;  %v725_v59 = vcombine.high %v40_v55, %v40_v55  ;;  %v724_v61 = vcombine.low %v40_v55, %v40_v55  ;;  %v1204_v0 = vld [vmem:[%s1242_s2] ss:$0 sm:$0xff] }
  0x18   :  { %830 = vmatpush3.bf16.msra.mxu0 %v957_v22 }
  0x19   :  { %888 = vmatpush3.bf16.msra.mxu1 %v958_v23  ;;  %831 = vmatprep.subr.bf16.mxu0 %v959_v24 }
  0x1a   :  { %889 = vmatprep.subr.bf16.mxu1 %v960_v25 }
  0x1c   :  { %832 = vmatpush3.bf16.msra.mxu0 %v961_v26 }
  0x1d   :  { %890 = vmatpush3.bf16.msra.mxu1 %v962_v27  ;;  %833 = vmatprep.subr.bf16.mxu0 %v963_v28 }
  0x1e   :  { %891 = vmatprep.subr.bf16.mxu1 %v964_v29 }
  0x20   :  { %834 = vmatpush3.bf16.msra.mxu0 %v965_v30 }
  0x21   :  { %892 = vmatpush3.bf16.msra.mxu1 %v966_v31 }
  0x23   :  { %471 = vmatmul.mubr.bf16.vlgmr.msra.gmra.mxu0 %v967_v32 }
  0x24   :  { %559 = vmatmul.mubr.bf16.vlgmr.msra.gmra.mxu1 %v970_v34  ;;  %478 = vmatprep.mubr.bf16.mxu0 %v973_v36 }
  0x25   :  { %566 = vmatprep.mubr.bf16.mxu1 %v975_v37 }
  0x2b   :  { %479 = vmatmul.mubr.bf16.gmra.mxu0 %v977_v38 }
  0x2c   :  { %567 = vmatmul.mubr.bf16.gmra.mxu1 %v978_v39  ;;  %486 = vmatprep.mubr.bf16.mxu0 %v979_v40 }
  0x2d   :  { %574 = vmatprep.mubr.bf16.mxu1 %v981_v41 }
  0x33   :  { %487 = vmatmul.mubr.bf16.gmra.mxu0 %v983_v42 }
  0x34   :  { %575 = vmatmul.mubr.bf16.gmra.mxu1 %v984_v43  ;;  %494 = vmatprep.mubr.bf16.mxu0 %v985_v44 }
  0x35   :  { %582 = vmatprep.mubr.bf16.mxu1 %v987_v45 }
  0x3b   :  { %495 = vmatmul.mubr.bf16.gmra.mxu0 %v989_v46 }
  0x3c   :  { %583 = vmatmul.mubr.bf16.gmra.mxu1 %v990_v47  ;;  %502 = vmatprep.mubr.bf16.mxu0 %v991_v48 }
  0x3d   :  { %590 = vmatprep.mubr.bf16.mxu1 %v993_v49 }
  0x43   :  { %503 = vmatmul.mubr.bf16.gmra.mxu0 %v995_v50 }
  0x44   :  { %591 = vmatmul.mubr.bf16.gmra.mxu1 %v996_v51  ;;  %510 = vmatprep.mubr.bf16.mxu0 %v997_v52 }
  0x45   :  { %598 = vmatprep.mubr.bf16.mxu1 %v999_v53 }
  0x4b   :  { %511 = vmatmul.mubr.bf16.gmra.mxu0 %v1001_v56 }
  0x4c   :  { %599 = vmatmul.mubr.bf16.gmra.mxu1 %v1002_v57  ;;  %518 = vmatprep.mubr.bf16.mxu0 %v723_v58 }
  0x4d   :  { %606 = vmatprep.mubr.bf16.mxu1 %v725_v59 }
  0x53   :  { %519 = vmatmul.mubr.bf16.gmra.mxu0 %v722_v60 }
  0x54   :  { %607 = vmatmul.mubr.bf16.gmra.mxu1 %v724_v61 }
  0xe3   :  { %v835_v62 = vpop.f32.mrf.mxu0 }
  0xe4   :  { %v893_v63 = vpop.f32.mrf.mxu1 }
  0xe5   :  { %v836_v1 = vpop.f32.mrf.mxu0 }
  0xe6   :  { %v837_v2 = vadd.f32 %v836_v1, %v835_v62  ;;  %v894_v3 = vpop.f32.mrf.mxu1 }
  0xe7   :  { %v838_v4 = vpop.f32.mrf.mxu0  ;;  %v895_v8 = vadd.f32 %v894_v3, %v893_v63 }
  0xe8   :  { %v473_v5 = vadd.f32 %v837_v2, %v1204_v0  ;;  %v896_v6 = vpop.f32.mrf.mxu1 }
  0xe9   :  { %v839_v7 = vpop.f32.mrf.mxu0 }
  0xea   :  { %v840_v9 = vadd.f32 %v839_v7, %v838_v4  ;;  %v897_v10 = vpop.f32.mrf.mxu1  ;;  %v561_v12 = vadd.f32 %v895_v8, %v473_v5 }
  0xeb   :  { %v841_v11 = vpop.f32.mrf.mxu0  ;;  %v898_v14 = vadd.f32 %v897_v10, %v896_v6 }
  0xec   :  { %v476_v13 = vadd.f32 %v840_v9, %v1204_v0  ;;  %v899_v15 = vpop.f32.mrf.mxu1  ;;  %v614_v21 = vmax.f32 %v561_v12, 0.0 }
  0xed   :  { %v842_v16 = vpop.f32.mrf.mxu0 }
  0xee   :  { %v564_v17 = vadd.f32 %v898_v14, %v476_v13  ;;  %v843_v18 = vadd.f32 %v842_v16, %v841_v11  ;;  %v900_v19 = vpop.f32.mrf.mxu1 }
  0xef   :  { %v844_v20 = vpop.f32.mrf.mxu0  ;;  %v901_v27 = vadd.f32 %v900_v19, %v899_v15 }
  0xf0   :  { %v615_v22 = vmax.f32 %v564_v17, 0.0  ;;  %v481_v23 = vadd.f32 %v843_v18, %v1204_v0  ;;  %v902_v24 = vpop.f32.mrf.mxu1 }
  0xf1   :  { %v845_v25 = vpop.f32.mrf.mxu0 }
  0xf2   :  { %v787_v26 = vpack.c.bf16 %v615_v22, %v614_v21  ;;  %v846_v28 = vadd.f32 %v845_v25, %v844_v20  ;;  %v903_v29 = vpop.f32.mrf.mxu1  ;;  %v569_v31 = vadd.f32 %v901_v27, %v481_v23 }
  0xf3   :  { %v847_v30 = vpop.f32.mrf.mxu0  ;;  %v904_v33 = vadd.f32 %v903_v29, %v902_v24 }
  0xf4   :  { %788 = vst [vmem:[%s1243_s3] sm:$0xff] %v787_v26   ;;  %v484_v32 = vadd.f32 %v846_v28, %v1204_v0  ;;  %v905_v34 = vpop.f32.mrf.mxu1  ;;  %v616_v40 = vmax.f32 %v569_v31, 0.0 }
  0xf5   :  { %v848_v35 = vpop.f32.mrf.mxu0 }
  0xf6   :  { %v572_v36 = vadd.f32 %v904_v33, %v484_v32  ;;  %v849_v37 = vadd.f32 %v848_v35, %v847_v30  ;;  %v906_v38 = vpop.f32.mrf.mxu1 }
  0xf7   :  { %v850_v39 = vpop.f32.mrf.mxu0  ;;  %v907_v46 = vadd.f32 %v906_v38, %v905_v34 }
  0xf8   :  { %v617_v41 = vmax.f32 %v572_v36, 0.0  ;;  %v489_v42 = vadd.f32 %v849_v37, %v1204_v0  ;;  %v908_v43 = vpop.f32.mrf.mxu1 }
  0xf9   :  { %v851_v44 = vpop.f32.mrf.mxu0 }
  0xfa   :  { %v792_v45 = vpack.c.bf16 %v617_v41, %v616_v40  ;;  %v852_v47 = vadd.f32 %v851_v44, %v850_v39  ;;  %v909_v48 = vpop.f32.mrf.mxu1  ;;  %v577_v50 = vadd.f32 %v907_v46, %v489_v42 }
  0xfb   :  { %v853_v49 = vpop.f32.mrf.mxu0  ;;  %v910_v52 = vadd.f32 %v909_v48, %v908_v43 }
  0xfc   :  { %814 = vst [vmem:[%s1243_s3 + $0x8] sm:$0xff] %v792_v45   ;;  %v492_v51 = vadd.f32 %v852_v47, %v1204_v0  ;;  %v911_v53 = vpop.f32.mrf.mxu1  ;;  %v618_v59 = vmax.f32 %v577_v50, 0.0 }
  0xfd   :  { %v854_v54 = vpop.f32.mrf.mxu0 }
  0xfe   :  { %v580_v55 = vadd.f32 %v910_v52, %v492_v51  ;;  %v855_v56 = vadd.f32 %v854_v54, %v853_v49  ;;  %v912_v57 = vpop.f32.mrf.mxu1 }
  0xff   :  { %v856_v58 = vpop.f32.mrf.mxu0  ;;  %v913_v2 = vadd.f32 %v912_v57, %v911_v53 }
 0x100   :  { %v619_v60 = vmax.f32 %v580_v55, 0.0  ;;  %v497_v61 = vadd.f32 %v855_v56, %v1204_v0  ;;  %v914_v62 = vpop.f32.mrf.mxu1 }
 0x101   :  { %v857_v63 = vpop.f32.mrf.mxu0 }
 0x102   :  { %v797_v1 = vpack.c.bf16 %v619_v60, %v618_v59  ;;  %v858_v3 = vadd.f32 %v857_v63, %v856_v58  ;;  %v915_v4 = vpop.f32.mrf.mxu1  ;;  %v585_v6 = vadd.f32 %v913_v2, %v497_v61 }
 0x103   :  { %v859_v5 = vpop.f32.mrf.mxu0  ;;  %v916_v8 = vadd.f32 %v915_v4, %v914_v62 }
 0x104   :  { %815 = vst [vmem:[%s1243_s3 + $0x10] sm:$0xff] %v797_v1   ;;  %v500_v7 = vadd.f32 %v858_v3, %v1204_v0  ;;  %v917_v9 = vpop.f32.mrf.mxu1  ;;  %v620_v15 = vmax.f32 %v585_v6, 0.0 }
 0x105   :  { %v860_v10 = vpop.f32.mrf.mxu0 }
 0x106   :  { %v588_v11 = vadd.f32 %v916_v8, %v500_v7  ;;  %v861_v12 = vadd.f32 %v860_v10, %v859_v5  ;;  %v918_v13 = vpop.f32.mrf.mxu1 }
 0x107   :  { %v862_v14 = vpop.f32.mrf.mxu0  ;;  %v919_v21 = vadd.f32 %v918_v13, %v917_v9 }
 0x108   :  { %v621_v16 = vmax.f32 %v588_v11, 0.0  ;;  %v505_v17 = vadd.f32 %v861_v12, %v1204_v0  ;;  %v920_v18 = vpop.f32.mrf.mxu1 }
 0x109   :  { %v863_v19 = vpop.f32.mrf.mxu0 }
 0x10a   :  { %v802_v20 = vpack.c.bf16 %v621_v16, %v620_v15  ;;  %v864_v22 = vadd.f32 %v863_v19, %v862_v14  ;;  %v921_v23 = vpop.f32.mrf.mxu1  ;;  %v593_v25 = vadd.f32 %v919_v21, %v505_v17 }
 0x10b   :  { %v865_v24 = vpop.f32.mrf.mxu0  ;;  %v922_v27 = vadd.f32 %v921_v23, %v920_v18 }
 0x10c   :  { %816 = vst [vmem:[%s1243_s3 + $0x18] sm:$0xff] %v802_v20   ;;  %v508_v26 = vadd.f32 %v864_v22, %v1204_v0  ;;  %v923_v28 = vpop.f32.mrf.mxu1  ;;  %v622_v34 = vmax.f32 %v593_v25, 0.0 }
 0x10d   :  { %v866_v29 = vpop.f32.mrf.mxu0 }
 0x10e   :  { %v596_v30 = vadd.f32 %v922_v27, %v508_v26  ;;  %v867_v31 = vadd.f32 %v866_v29, %v865_v24  ;;  %v924_v32 = vpop.f32.mrf.mxu1 }
 0x10f   :  { %v868_v33 = vpop.f32.mrf.mxu0  ;;  %v925_v40 = vadd.f32 %v924_v32, %v923_v28 }
 0x110   :  { %v623_v35 = vmax.f32 %v596_v30, 0.0  ;;  %v513_v36 = vadd.f32 %v867_v31, %v1204_v0  ;;  %v926_v37 = vpop.f32.mrf.mxu1 }
 0x111   :  { %v869_v38 = vpop.f32.mrf.mxu0 }
 0x112   :  { %v807_v39 = vpack.c.bf16 %v623_v35, %v622_v34  ;;  %v870_v41 = vadd.f32 %v869_v38, %v868_v33  ;;  %v927_v42 = vpop.f32.mrf.mxu1  ;;  %v601_v44 = vadd.f32 %v925_v40, %v513_v36 }
 0x113   :  { %v871_v43 = vpop.f32.mrf.mxu0  ;;  %v928_v46 = vadd.f32 %v927_v42, %v926_v37 }
 0x114   :  { %817 = vst [vmem:[%s1243_s3 + $0x20] sm:$0xff] %v807_v39   ;;  %v516_v45 = vadd.f32 %v870_v41, %v1204_v0  ;;  %v929_v47 = vpop.f32.mrf.mxu1  ;;  %v624_v53 = vmax.f32 %v601_v44, 0.0 }
 0x115   :  { %v872_v48 = vpop.f32.mrf.mxu0 }
 0x116   :  { %v604_v49 = vadd.f32 %v928_v46, %v516_v45  ;;  %v873_v50 = vadd.f32 %v872_v48, %v871_v43  ;;  %v930_v51 = vpop.f32.mrf.mxu1 }
 0x117   :  { %v874_v52 = vpop.f32.mrf.mxu0  ;;  %v931_v56 = vadd.f32 %v930_v51, %v929_v47 }
 0x118   :  { %v625_v54 = vmax.f32 %v604_v49, 0.0  ;;  %v521_v55 = vadd.f32 %v873_v50, %v1204_v0  ;;  %v932_v57 = vpop.f32.mrf.mxu1 }
 0x119   :  { %v875_v58 = vpop.f32.mrf.mxu0 }
 0x11a   :  { %v812_v59 = vpack.c.bf16 %v625_v54, %v624_v53  ;;  %v609_v60 = vadd.f32 %v931_v56, %v521_v55  ;;  %v933_v61 = vpop.f32.mrf.mxu1 }
 0x11c   :  { %818 = vst [vmem:[%s1243_s3 + $0x28] sm:$0xff] %v812_v59   ;;  %v626_v62 = vmax.f32 %v609_v60, 0.0 }
 0x11e   :  { %v783_v63 = vpack.c.bf16 %v626_v62, %v626_v62 }
 0x120   :  { %692 = vst [vmem:[%s1243_s3 + $0x30] sm:$0x1] %v783_v63 }

// kernel: outconv_forward.16
= control target key start
LH: loop header
LB: loop body
LE: loop exit
PB: predicated region body
PF: predicated region fallthrough
CT: control target
= control target key end

     0   :  { %s1363_s12 = smov 0   ;;  %s1521_s0 = inlined_call_operand.vmem [shape: bf16[512,256], index: 0, kind: input, shape index: {}]   ;;  %s1522_s1 = inlined_call_operand.vmem [shape: bf16[256,128], index: 1, kind: input, shape index: {}]   ;;  %s1523_s2 = inlined_call_operand.vmem [shape: f32[1,128], index: 2, kind: input, shape index: {}]   ;;  %s1524_s3 = inlined_call_operand.vmem [shape: bf16[512,128], index: 3, kind: output, shape index: {}]  }
   0x1 LB: > { %s914_s13 = sadd.s32 4294967295, %s1341_s12   ;;  %p918_p0 = scmp.ge.s32.totalorder %s1341_s12, 1  ;;  %s1341_s12 = sphi %s1363_s12, %s13_s12  }
   0x2   : > { %p139_p1 = scmp.lt.s32.totalorder %s1341_s12, 3 }
   0x4   : > { %p140_p2 = pnand %p918_p0, %p139_p1 }
   0x5   : > { %s919_s16 = sshll.u32 (!%p140_p2), %s914_s13, 5 }
   0x6   : > { %143 = sbr.rel (%p140_p2) target bundleno = 308 (0x134), region = 32  ;;  %p165_p3 = scmp.lt.s32.totalorder (!%p140_p2), %s919_s16, 63 }
   0xb   : > { %v1271_v0 = vld [vmem:[%s1522_s1 + $0x78] sm:$0xff]   ;;  %v1273_v2 = vld [vmem:[%s1522_s1 + $0x70] sm:$0xff]   ;;  %v1275_v4 = vld [vmem:[%s1522_s1 + $0x68] sm:$0xff]   ;;  %s1526_s16 = smov (!%p165_p3, %s919_s16), 63 }
   0xc   : > { %v1272_v1 = vld [vmem:[%s1522_s1 + $0x38] sm:$0xff]   ;;  %1135 = vmatprep.subr.bf16.mxu0 %v1271_v0  ;;  %1247 = vmatprep.subr.bf16.mxu1 %v1271_v0  ;;  %v1274_v3 = vld [vmem:[%s1522_s1 + $0x30] sm:$0xff]   ;;  %v1276_v5 = vld [vmem:[%s1522_s1 + $0x28] sm:$0xff]   ;;  %s1007_s4 = sshll.u32 %s1526_s16, 3  ;;  %s923_s28 = sshll.u32 %s1526_s16, 2 }
   0xd   : > { %1136 = vmatpush3.bf16.msra.mxu0 %v1272_v1  ;;  %1255 = vmatpush3.bf16.msra.mxu1 %v1272_v1  ;;  %v1277_v6 = vld [vmem:[%s1522_s1 + $0x60] sm:$0xff]   ;;  %v1279_v8 = vld [vmem:[%s1522_s1 + $0x58] sm:$0xff]   ;;  %s1404_s9 = scalar_lea.vmem %s1521_s0, %s1007_s4  ;;  %v1281_v10 = vld [vmem:[%s1522_s1 + $0x50] sm:$0xff]   ;;  %s1472_s4 = scalar_lea.vmem %s1524_s3, %s923_s28 }
   0xe   : > { %1137 = vmatprep.subr.bf16.mxu0 %v1273_v2  ;;  %1248 = vmatprep.subr.bf16.mxu1 %v1273_v2  ;;  %v1278_v7 = vld [vmem:[%s1522_s1 + $0x20] sm:$0xff]   ;;  %v1280_v9 = vld [vmem:[%s1522_s1 + $0x18] sm:$0xff]   ;;  %v1282_v13 = vld [vmem:[%s1522_s1 + $0x10] sm:$0xff]  }
   0xf   : > { %v1289_v11 = vld [vmem:[%s1404_s9 + $0x4] ss:$8 sps:$4 sm:$0xff]   ;;  %v1287_v18 = vld [vmem:[%s1404_s9] ss:$8 sps:$4 sm:$0xff]   ;;  %v1293_v20 = vld [vmem:[%s1404_s9 + $0x14] ss:$8 sps:$4 sm:$0xff]  }
  0x10   : > { %v1292_v12 = vld [vmem:[%s1404_s9 + $0x84] ss:$8 sps:$4 sm:$0xff]   ;;  %537 = vmatprep.mubr.bf16.mxu0 %v1289_v11  ;;  %v1290_v19 = vld [vmem:[%s1404_s9 + $0x80] ss:$8 sps:$4 sm:$0xff]   ;;  %v1295_v21 = vld [vmem:[%s1404_s9 + $0x94] ss:$8 sps:$4 sm:$0xff]  }
  0x11   : > { %1138 = vmatpush3.bf16.msra.mxu0 %v1274_v3  ;;  %1256 = vmatpush3.bf16.msra.mxu1 %v1274_v3  ;;  %v1283_v14 = vld [vmem:[%s1522_s1 + $0x48] sm:$0xff]   ;;  %v1285_v16 = vld [vmem:[%s1522_s1 + $0x40] sm:$0xff]   ;;  %v1297_v22 = vld [vmem:[%s1404_s9 + $0x10] ss:$8 sps:$4 sm:$0xff]  }
  0x12   : > { %1139 = vmatprep.subr.bf16.mxu0 %v1275_v4  ;;  %1249 = vmatprep.subr.bf16.mxu1 %v1275_v4  ;;  %v1284_v15 = vld [vmem:[%s1522_s1 + $0x8] sm:$0xff]   ;;  %v1286_v17 = vld [vmem:[%s1522_s1] sm:$0xff]   ;;  %v1298_v23 = vld [vmem:[%s1404_s9 + $0x90] ss:$8 sps:$4 sm:$0xff]  }
  0x13   : > { %601 = vmatprep.mubr.bf16.mxu1 %v1292_v12  ;;  %v1299_v24 = vld [vmem:[%s1404_s9 + $0x24] ss:$8 sps:$4 sm:$0xff]   ;;  %v1303_v26 = vld [vmem:[%s1404_s9 + $0x20] ss:$8 sps:$4 sm:$0xff]   ;;  %v1305_v28 = vld [vmem:[%s1404_s9 + $0x34] ss:$8 sps:$4 sm:$0xff]  }
  0x14   : > { %v1301_v25 = vld [vmem:[%s1404_s9 + $0xa4] ss:$8 sps:$4 sm:$0xff]   ;;  %v1304_v27 = vld [vmem:[%s1404_s9 + $0xa0] ss:$8 sps:$4 sm:$0xff]   ;;  %v1307_v29 = vld [vmem:[%s1404_s9 + $0xb4] ss:$8 sps:$4 sm:$0xff]  }
  0x15   : > { %1140 = vmatpush3.bf16.msra.mxu0 %v1276_v5  ;;  %1257 = vmatpush3.bf16.msra.mxu1 %v1276_v5  ;;  %v1309_v30 = vld [vmem:[%s1404_s9 + $0x30] ss:$8 sps:$4 sm:$0xff]   ;;  %v1311_v32 = vld [vmem:[%s1404_s9 + $0x44] ss:$8 sps:$4 sm:$0xff]   ;;  %v1315_v34 = vld [vmem:[%s1404_s9 + $0x40] ss:$8 sps:$4 sm:$0xff]  }
  0x16   : > { %1141 = vmatprep.subr.bf16.mxu0 %v1277_v6  ;;  %1250 = vmatprep.subr.bf16.mxu1 %v1277_v6  ;;  %v1310_v31 = vld [vmem:[%s1404_s9 + $0xb0] ss:$8 sps:$4 sm:$0xff]   ;;  %v1313_v33 = vld [vmem:[%s1404_s9 + $0xc4] ss:$8 sps:$4 sm:$0xff]   ;;  %v1316_v35 = vld [vmem:[%s1404_s9 + $0xc0] ss:$8 sps:$4 sm:$0xff]  }
  0x17   : > { %v1317_v36 = vld [vmem:[%s1404_s9 + $0x54] ss:$8 sps:$4 sm:$0xff]   ;;  %v1321_v38 = vld [vmem:[%s1404_s9 + $0x50] ss:$8 sps:$4 sm:$0xff]   ;;  %v1323_v40 = vld [vmem:[%s1404_s9 + $0x64] ss:$8 sps:$4 sm:$0xff]  }
  0x18   : > { %v1319_v37 = vld [vmem:[%s1404_s9 + $0xd4] ss:$8 sps:$4 sm:$0xff]   ;;  %v1322_v39 = vld [vmem:[%s1404_s9 + $0xd0] ss:$8 sps:$4 sm:$0xff]   ;;  %v1325_v41 = vld [vmem:[%s1404_s9 + $0xe4] ss:$8 sps:$4 sm:$0xff]  }
  0x19   : > { %1142 = vmatpush3.bf16.msra.mxu0 %v1278_v7  ;;  %1258 = vmatpush3.bf16.msra.mxu1 %v1278_v7  ;;  %v1327_v42 = vld [vmem:[%s1404_s9 + $0x60] ss:$8 sps:$4 sm:$0xff]   ;;  %v1329_v44 = vld [vmem:[%s1404_s9 + $0x74] ss:$8 sps:$4 sm:$0xff]   ;;  %v1333_v46 = vld [vmem:[%s1404_s9 + $0x70] ss:$8 sps:$4 sm:$0xff]  }
  0x1a   : > { %1143 = vmatprep.subr.bf16.mxu0 %v1279_v8  ;;  %1251 = vmatprep.subr.bf16.mxu1 %v1279_v8  ;;  %v1328_v43 = vld [vmem:[%s1404_s9 + $0xe0] ss:$8 sps:$4 sm:$0xff]   ;;  %v1331_v45 = vld [vmem:[%s1404_s9 + $0xf4] ss:$8 sps:$4 sm:$0xff]   ;;  %v1334_v47 = vld [vmem:[%s1404_s9 + $0xf0] ss:$8 sps:$4 sm:$0xff]  }
  0x1b   : > { %v1462_v52 = vld [vmem:[%s1523_s2] ss:$0 sm:$0xff] }
  0x1d   : > { %1144 = vmatpush3.bf16.msra.mxu0 %v1280_v9  ;;  %1259 = vmatpush3.bf16.msra.mxu1 %v1280_v9 }
  0x1e   : > { %1145 = vmatprep.subr.bf16.mxu0 %v1281_v10  ;;  %1252 = vmatprep.subr.bf16.mxu1 %v1281_v10 }
  0x21   : > { %1146 = vmatpush3.bf16.msra.mxu0 %v1282_v13  ;;  %1260 = vmatpush3.bf16.msra.mxu1 %v1282_v13 }
  0x22   : > { %1147 = vmatprep.subr.bf16.mxu0 %v1283_v14  ;;  %1253 = vmatprep.subr.bf16.mxu1 %v1283_v14 }
  0x25   : > { %1148 = vmatpush3.bf16.msra.mxu0 %v1284_v15  ;;  %1261 = vmatpush3.bf16.msra.mxu1 %v1284_v15 }
  0x26   : > { %1149 = vmatprep.subr.bf16.mxu0 %v1285_v16  ;;  %1254 = vmatprep.subr.bf16.mxu1 %v1285_v16 }
  0x29   : > { %1150 = vmatpush3.bf16.msra.mxu0 %v1286_v17  ;;  %1262 = vmatpush3.bf16.msra.mxu1 %v1286_v17 }
  0x2c   : > { %538 = vmatmul.mubr.bf16.vlgmr.msra.gmra.mxu0 %v1287_v18  ;;  %602 = vmatmul.mubr.bf16.vlgmr.msra.gmra.mxu1 %v1290_v19 }
  0x2d   : > { %545 = vmatprep.mubr.bf16.mxu0 %v1293_v20  ;;  %609 = vmatprep.mubr.bf16.mxu1 %v1295_v21 }
  0x34   : > { %546 = vmatmul.mubr.bf16.gmra.mxu0 %v1297_v22  ;;  %610 = vmatmul.mubr.bf16.gmra.mxu1 %v1298_v23 }
  0x35   : > { %553 = vmatprep.mubr.bf16.mxu0 %v1299_v24  ;;  %617 = vmatprep.mubr.bf16.mxu1 %v1301_v25 }
  0x3c   : > { %554 = vmatmul.mubr.bf16.gmra.mxu0 %v1303_v26  ;;  %618 = vmatmul.mubr.bf16.gmra.mxu1 %v1304_v27 }
  0x3d   : > { %561 = vmatprep.mubr.bf16.mxu0 %v1305_v28  ;;  %625 = vmatprep.mubr.bf16.mxu1 %v1307_v29 }
  0x44   : > { %562 = vmatmul.mubr.bf16.gmra.mxu0 %v1309_v30  ;;  %626 = vmatmul.mubr.bf16.gmra.mxu1 %v1310_v31 }
  0x45   : > { %569 = vmatprep.mubr.bf16.mxu0 %v1311_v32  ;;  %633 = vmatprep.mubr.bf16.mxu1 %v1313_v33 }
  0x4c   : > { %570 = vmatmul.mubr.bf16.gmra.mxu0 %v1315_v34  ;;  %634 = vmatmul.mubr.bf16.gmra.mxu1 %v1316_v35 }
  0x4d   : > { %577 = vmatprep.mubr.bf16.mxu0 %v1317_v36  ;;  %641 = vmatprep.mubr.bf16.mxu1 %v1319_v37 }
  0x54   : > { %578 = vmatmul.mubr.bf16.gmra.mxu0 %v1321_v38  ;;  %642 = vmatmul.mubr.bf16.gmra.mxu1 %v1322_v39 }
  0x55   : > { %585 = vmatprep.mubr.bf16.mxu0 %v1323_v40  ;;  %649 = vmatprep.mubr.bf16.mxu1 %v1325_v41 }
  0x5c   : > { %586 = vmatmul.mubr.bf16.gmra.mxu0 %v1327_v42  ;;  %650 = vmatmul.mubr.bf16.gmra.mxu1 %v1328_v43 }
  0x5d   : > { %593 = vmatprep.mubr.bf16.mxu0 %v1329_v44  ;;  %657 = vmatprep.mubr.bf16.mxu1 %v1331_v45 }
  0x64   : > { %594 = vmatmul.mubr.bf16.gmra.mxu0 %v1333_v46  ;;  %658 = vmatmul.mubr.bf16.gmra.mxu1 %v1334_v47 }
  0xec   : > { %v1151_v48 = vpop.f32.mrf.mxu0  ;;  %v1199_v49 = vpop.f32.mrf.mxu1 }
  0xee   : > { %v1152_v50 = vpop.f32.mrf.mxu0  ;;  %v1200_v51 = vpop.f32.mrf.mxu1 }
  0xef   : > { %v1153_v53 = vadd.f32 %v1152_v50, %v1151_v48  ;;  %v1201_v54 = vadd.f32 %v1200_v51, %v1199_v49 }
  0xf0   : > { %v1154_v55 = vpop.f32.mrf.mxu0  ;;  %v1202_v56 = vpop.f32.mrf.mxu1 }
  0xf1   : > { %v540_v57 = vadd.f32 %v1153_v53, %v1462_v52  ;;  %v604_v58 = vadd.f32 %v1201_v54, %v1462_v52 }
  0xf2   : > { %v1155_v59 = vpop.f32.mrf.mxu0  ;;  %v1203_v60 = vpop.f32.mrf.mxu1 }
  0xf3   : > { %v1156_v61 = vadd.f32 %v1155_v59, %v1154_v55  ;;  %v1204_v62 = vadd.f32 %v1203_v60, %v1202_v56  ;;  %v666_v3 = vmax.f32 %v540_v57, 0.0  ;;  %v682_v4 = vmax.f32 %v604_v58, 0.0 }
  0xf4   : > { %v1157_v63 = vpop.f32.mrf.mxu0  ;;  %v1205_v0 = vpop.f32.mrf.mxu1 }
  0xf5   : > { %v543_v1 = vadd.f32 %v1156_v61, %v1462_v52  ;;  %v607_v2 = vadd.f32 %v1204_v62, %v1462_v52 }
  0xf6   : > { %v1158_v5 = vpop.f32.mrf.mxu0  ;;  %v1206_v6 = vpop.f32.mrf.mxu1 }
  0xf7   : > { %v667_v7 = vmax.f32 %v543_v1, 0.0  ;;  %v683_v8 = vmax.f32 %v607_v2, 0.0  ;;  %v1159_v9 = vadd.f32 %v1158_v5, %v1157_v63  ;;  %v1207_v10 = vadd.f32 %v1206_v6, %v1205_v0 }
  0xf8   : > { %v1160_v11 = vpop.f32.mrf.mxu0  ;;  %v1208_v12 = vpop.f32.mrf.mxu1 }
  0xf9   : > { %v1043_v13 = vpack.c.bf16 %v667_v7, %v666_v3  ;;  %v1083_v14 = vpack.c.bf16 %v683_v8, %v682_v4  ;;  %v548_v15 = vadd.f32 %v1159_v9, %v1462_v52  ;;  %v612_v16 = vadd.f32 %v1207_v10, %v1462_v52 }
  0xfa   : > { %v1161_v17 = vpop.f32.mrf.mxu0  ;;  %v1209_v18 = vpop.f32.mrf.mxu1 }
  0xfb   : > { %1044 = vst [vmem:[%s1472_s4] sm:$0xff] %v1043_v13   ;;  %1127 = vst [vmem:[%s1472_s4 + $0x40] sm:$0xff] %v1083_v14   ;;  %v1162_v19 = vadd.f32 %v1161_v17, %v1160_v11  ;;  %v1210_v20 = vadd.f32 %v1209_v18, %v1208_v12  ;;  %v668_v25 = vmax.f32 %v548_v15, 0.0  ;;  %v684_v26 = vmax.f32 %v612_v16, 0.0 }
  0xfc   : > { %v1163_v21 = vpop.f32.mrf.mxu0  ;;  %v1211_v22 = vpop.f32.mrf.mxu1 }
  0xfd   : > { %v551_v23 = vadd.f32 %v1162_v19, %v1462_v52  ;;  %v615_v24 = vadd.f32 %v1210_v20, %v1462_v52 }
  0xfe   : > { %v1164_v27 = vpop.f32.mrf.mxu0  ;;  %v1212_v28 = vpop.f32.mrf.mxu1 }
  0xff   : > { %v669_v29 = vmax.f32 %v551_v23, 0.0  ;;  %v685_v30 = vmax.f32 %v615_v24, 0.0  ;;  %v1165_v31 = vadd.f32 %v1164_v27, %v1163_v21  ;;  %v1213_v32 = vadd.f32 %v1212_v28, %v1211_v22 }
 0x100   : > { %v1166_v33 = vpop.f32.mrf.mxu0  ;;  %v1214_v34 = vpop.f32.mrf.mxu1 }
 0x101   : > { %v1048_v35 = vpack.c.bf16 %v669_v29, %v668_v25  ;;  %v1088_v36 = vpack.c.bf16 %v685_v30, %v684_v26  ;;  %v556_v37 = vadd.f32 %v1165_v31, %v1462_v52  ;;  %v620_v38 = vadd.f32 %v1213_v32, %v1462_v52 }
 0x102   : > { %v1167_v39 = vpop.f32.mrf.mxu0  ;;  %v1215_v40 = vpop.f32.mrf.mxu1 }
 0x103   : > { %1120 = vst [vmem:[%s1472_s4 + $0x8] sm:$0xff] %v1048_v35   ;;  %1128 = vst [vmem:[%s1472_s4 + $0x48] sm:$0xff] %v1088_v36   ;;  %v1168_v41 = vadd.f32 %v1167_v39, %v1166_v33  ;;  %v1216_v42 = vadd.f32 %v1215_v40, %v1214_v34  ;;  %v670_v47 = vmax.f32 %v556_v37, 0.0  ;;  %v686_v48 = vmax.f32 %v620_v38, 0.0 }
 0x104   : > { %v1169_v43 = vpop.f32.mrf.mxu0  ;;  %v1217_v44 = vpop.f32.mrf.mxu1 }
 0x105   : > { %v559_v45 = vadd.f32 %v1168_v41, %v1462_v52  ;;  %v623_v46 = vadd.f32 %v1216_v42, %v1462_v52 }
 0x106   : > { %v1170_v49 = vpop.f32.mrf.mxu0  ;;  %v1218_v50 = vpop.f32.mrf.mxu1 }
 0x107   : > { %v671_v51 = vmax.f32 %v559_v45, 0.0  ;;  %v687_v53 = vmax.f32 %v623_v46, 0.0  ;;  %v1171_v54 = vadd.f32 %v1170_v49, %v1169_v43  ;;  %v1219_v55 = vadd.f32 %v1218_v50, %v1217_v44 }
 0x108   : > { %v1172_v56 = vpop.f32.mrf.mxu0  ;;  %v1220_v57 = vpop.f32.mrf.mxu1 }
 0x109   : > { %v1053_v58 = vpack.c.bf16 %v671_v51, %v670_v47  ;;  %v1093_v59 = vpack.c.bf16 %v687_v53, %v686_v48  ;;  %v564_v60 = vadd.f32 %v1171_v54, %v1462_v52  ;;  %v628_v61 = vadd.f32 %v1219_v55, %v1462_v52 }
 0x10a   : > { %v1173_v62 = vpop.f32.mrf.mxu0  ;;  %v1221_v63 = vpop.f32.mrf.mxu1 }
 0x10b   : > { %1121 = vst [vmem:[%s1472_s4 + $0x10] sm:$0xff] %v1053_v58   ;;  %1129 = vst [vmem:[%s1472_s4 + $0x50] sm:$0xff] %v1093_v59   ;;  %v1174_v0 = vadd.f32 %v1173_v62, %v1172_v56  ;;  %v1222_v1 = vadd.f32 %v1221_v63, %v1220_v57  ;;  %v672_v6 = vmax.f32 %v564_v60, 0.0  ;;  %v688_v7 = vmax.f32 %v628_v61, 0.0 }
 0x10c   : > { %v1175_v2 = vpop.f32.mrf.mxu0  ;;  %v1223_v3 = vpop.f32.mrf.mxu1 }
 0x10d   : > { %v567_v4 = vadd.f32 %v1174_v0, %v1462_v52  ;;  %v631_v5 = vadd.f32 %v1222_v1, %v1462_v52 }
 0x10e   : > { %v1176_v8 = vpop.f32.mrf.mxu0  ;;  %v1224_v9 = vpop.f32.mrf.mxu1 }
 0x10f   : > { %v673_v10 = vmax.f32 %v567_v4, 0.0  ;;  %v689_v11 = vmax.f32 %v631_v5, 0.0  ;;  %v1177_v12 = vadd.f32 %v1176_v8, %v1175_v2  ;;  %v1225_v13 = vadd.f32 %v1224_v9, %v1223_v3 }
 0x110   : > { %v1178_v14 = vpop.f32.mrf.mxu0  ;;  %v1226_v15 = vpop.f32.mrf.mxu1 }
 0x111   : > { %v1058_v16 = vpack.c.bf16 %v673_v10, %v672_v6  ;;  %v1098_v17 = vpack.c.bf16 %v689_v11, %v688_v7  ;;  %v572_v18 = vadd.f32 %v1177_v12, %v1462_v52  ;;  %v636_v19 = vadd.f32 %v1225_v13, %v1462_v52 }
 0x112   : > { %v1179_v20 = vpop.f32.mrf.mxu0  ;;  %v1227_v21 = vpop.f32.mrf.mxu1 }
 0x113   : > { %1122 = vst [vmem:[%s1472_s4 + $0x18] sm:$0xff] %v1058_v16   ;;  %1130 = vst [vmem:[%s1472_s4 + $0x58] sm:$0xff] %v1098_v17   ;;  %v1180_v22 = vadd.f32 %v1179_v20, %v1178_v14  ;;  %v1228_v23 = vadd.f32 %v1227_v21, %v1226_v15  ;;  %v674_v28 = vmax.f32 %v572_v18, 0.0  ;;  %v690_v29 = vmax.f32 %v636_v19, 0.0 }
 0x114   : > { %v1181_v24 = vpop.f32.mrf.mxu0  ;;  %v1229_v25 = vpop.f32.mrf.mxu1 }
 0x115   : > { %v575_v26 = vadd.f32 %v1180_v22, %v1462_v52  ;;  %v639_v27 = vadd.f32 %v1228_v23, %v1462_v52 }
 0x116   : > { %v1182_v30 = vpop.f32.mrf.mxu0  ;;  %v1230_v31 = vpop.f32.mrf.mxu1 }
 0x117   : > { %v675_v32 = vmax.f32 %v575_v26, 0.0  ;;  %v691_v33 = vmax.f32 %v639_v27, 0.0  ;;  %v1183_v34 = vadd.f32 %v1182_v30, %v1181_v24  ;;  %v1231_v35 = vadd.f32 %v1230_v31, %v1229_v25 }
 0x118   : > { %v1184_v36 = vpop.f32.mrf.mxu0  ;;  %v1232_v37 = vpop.f32.mrf.mxu1 }
 0x119   : > { %v1063_v38 = vpack.c.bf16 %v675_v32, %v674_v28  ;;  %v1103_v39 = vpack.c.bf16 %v691_v33, %v690_v29  ;;  %v580_v40 = vadd.f32 %v1183_v34, %v1462_v52  ;;  %v644_v41 = vadd.f32 %v1231_v35, %v1462_v52 }
 0x11a   : > { %v1185_v42 = vpop.f32.mrf.mxu0  ;;  %v1233_v43 = vpop.f32.mrf.mxu1 }
 0x11b   : > { %1123 = vst [vmem:[%s1472_s4 + $0x20] sm:$0xff] %v1063_v38   ;;  %1131 = vst [vmem:[%s1472_s4 + $0x60] sm:$0xff] %v1103_v39   ;;  %v1186_v44 = vadd.f32 %v1185_v42, %v1184_v36  ;;  %v1234_v45 = vadd.f32 %v1233_v43, %v1232_v37  ;;  %v676_v50 = vmax.f32 %v580_v40, 0.0  ;;  %v692_v51 = vmax.f32 %v644_v41, 0.0 }
 0x11c   : > { %v1187_v46 = vpop.f32.mrf.mxu0  ;;  %v1235_v47 = vpop.f32.mrf.mxu1 }
 0x11d   : > { %v583_v48 = vadd.f32 %v1186_v44, %v1462_v52  ;;  %v647_v49 = vadd.f32 %v1234_v45, %v1462_v52 }
 0x11e   : > { %v1188_v53 = vpop.f32.mrf.mxu0  ;;  %v1236_v54 = vpop.f32.mrf.mxu1 }
 0x11f   : > { %v677_v55 = vmax.f32 %v583_v48, 0.0  ;;  %v693_v56 = vmax.f32 %v647_v49, 0.0  ;;  %v1189_v57 = vadd.f32 %v1188_v53, %v1187_v46  ;;  %v1237_v58 = vadd.f32 %v1236_v54, %v1235_v47 }
 0x120   : > { %v1190_v59 = vpop.f32.mrf.mxu0  ;;  %v1238_v60 = vpop.f32.mrf.mxu1 }
 0x121   : > { %v1068_v61 = vpack.c.bf16 %v677_v55, %v676_v50  ;;  %v1108_v62 = vpack.c.bf16 %v693_v56, %v692_v51  ;;  %v588_v63 = vadd.f32 %v1189_v57, %v1462_v52  ;;  %v652_v0 = vadd.f32 %v1237_v58, %v1462_v52 }
 0x122   : > { %v1191_v1 = vpop.f32.mrf.mxu0  ;;  %v1239_v2 = vpop.f32.mrf.mxu1 }
 0x123   : > { %1124 = vst [vmem:[%s1472_s4 + $0x28] sm:$0xff] %v1068_v61   ;;  %1132 = vst [vmem:[%s1472_s4 + $0x68] sm:$0xff] %v1108_v62   ;;  %v1192_v3 = vadd.f32 %v1191_v1, %v1190_v59  ;;  %v1240_v4 = vadd.f32 %v1239_v2, %v1238_v60  ;;  %v678_v9 = vmax.f32 %v588_v63, 0.0  ;;  %v694_v10 = vmax.f32 %v652_v0, 0.0 }
 0x124   : > { %v1193_v5 = vpop.f32.mrf.mxu0  ;;  %v1241_v6 = vpop.f32.mrf.mxu1 }
 0x125   : > { %v591_v7 = vadd.f32 %v1192_v3, %v1462_v52  ;;  %v655_v8 = vadd.f32 %v1240_v4, %v1462_v52 }
 0x126   : > { %v1194_v11 = vpop.f32.mrf.mxu0  ;;  %v1242_v12 = vpop.f32.mrf.mxu1 }
 0x127   : > { %v679_v13 = vmax.f32 %v591_v7, 0.0  ;;  %v695_v14 = vmax.f32 %v655_v8, 0.0  ;;  %v1195_v15 = vadd.f32 %v1194_v11, %v1193_v5  ;;  %v1243_v16 = vadd.f32 %v1242_v12, %v1241_v6 }
 0x128   : > { %v1196_v17 = vpop.f32.mrf.mxu0  ;;  %v1244_v18 = vpop.f32.mrf.mxu1 }
 0x129   : > { %v1073_v19 = vpack.c.bf16 %v679_v13, %v678_v9  ;;  %v1113_v20 = vpack.c.bf16 %v695_v14, %v694_v10  ;;  %v596_v23 = vadd.f32 %v1195_v15, %v1462_v52  ;;  %v660_v24 = vadd.f32 %v1243_v16, %v1462_v52 }
 0x12a   : > { %v1197_v21 = vpop.f32.mrf.mxu0  ;;  %v1245_v22 = vpop.f32.mrf.mxu1 }
 0x12b   : > { %1125 = vst [vmem:[%s1472_s4 + $0x30] sm:$0xff] %v1073_v19   ;;  %1133 = vst [vmem:[%s1472_s4 + $0x70] sm:$0xff] %v1113_v20   ;;  %v1198_v25 = vadd.f32 %v1197_v21, %v1196_v17  ;;  %v1246_v26 = vadd.f32 %v1245_v22, %v1244_v18  ;;  %v680_v29 = vmax.f32 %v596_v23, 0.0  ;;  %v696_v30 = vmax.f32 %v660_v24, 0.0 }
 0x12d   : > { %v599_v27 = vadd.f32 %v1198_v25, %v1462_v52  ;;  %v663_v28 = vadd.f32 %v1246_v26, %v1462_v52 }
 0x12f   : > { %v681_v31 = vmax.f32 %v599_v27, 0.0  ;;  %v697_v32 = vmax.f32 %v663_v28, 0.0 }
 0x131   : > { %v1078_v33 = vpack.c.bf16 %v681_v31, %v680_v29  ;;  %v1118_v34 = vpack.c.bf16 %v697_v32, %v696_v30 }
 0x133   : > { %1126 = vst [vmem:[%s1472_s4 + $0x38] sm:$0xff] %v1078_v33   ;;  %1134 = vst [vmem:[%s1472_s4 + $0x78] sm:$0xff] %v1118_v34  }
 0x134 PF: > { %s13_s12 = sadd.s32 1, %s1341_s12  }
 0x135   : > { %p10_p4 = scmp.ge.s32.totalorder %s13_s12, 4  }
 0x137   :  { %12 = sbr.rel (!%p10_p4) target bundleno = 1 (0x1), region = 62 }

// kernel: outconv_forward.13
= control target key start
LH: loop header
LB: loop body
LE: loop exit
PB: predicated region body
PF: predicated region fallthrough
CT: control target
= control target key end

     0   :  { %s2052_s12 = smov 0   ;;  %s2292_s0 = inlined_call_operand.vmem [shape: bf16[512,512], index: 0, kind: input, shape index: {}]   ;;  %s2293_s1 = inlined_call_operand.vmem [shape: bf16[512,128], index: 1, kind: input, shape index: {}]   ;;  %s2294_s2 = inlined_call_operand.vmem [shape: f32[1,128], index: 2, kind: input, shape index: {}]   ;;  %s2295_s3 = inlined_call_operand.vmem [shape: bf16[512,128], index: 3, kind: output, shape index: {}]  }
   0x1 LB: > { %s1395_s13 = sadd.s32 4294967295, %s2030_s12   ;;  %p1399_p0 = scmp.ge.s32.totalorder %s2030_s12, 1  ;;  %s2030_s12 = sphi %s2052_s12, %s13_s12  }
   0x2   : > { %p139_p1 = scmp.lt.s32.totalorder %s2030_s12, 3 }
   0x4   : > { %p140_p2 = pnand %p1399_p0, %p139_p1 }
   0x5   : > { %s1400_s21 = sshll.u32 (!%p140_p2), %s1395_s13, 5 }
   0x6   : > { %143 = sbr.rel (%p140_p2) target bundleno = 375 (0x177), region = 32  ;;  %p165_p3 = scmp.lt.s32.totalorder (!%p140_p2), %s1400_s21, 63 }
   0xb   : > { %v1896_v0 = vld [vmem:[%s2293_s1 + $0x78] sm:$0xff]   ;;  %v1900_v4 = vld [vmem:[%s2293_s1 + $0x70] sm:$0xff]   ;;  %v1904_v8 = vld [vmem:[%s2293_s1 + $0x68] sm:$0xff]   ;;  %s2297_s21 = smov (!%p165_p3, %s1400_s21), 63 }
   0xc   : > { %v1897_v1 = vld [vmem:[%s2293_s1 + $0xf8] sm:$0xff]   ;;  %1664 = vmatprep.subr.bf16.mxu0 %v1896_v0  ;;  %v1901_v5 = vld [vmem:[%s2293_s1 + $0xf0] sm:$0xff]   ;;  %v1905_v9 = vld [vmem:[%s2293_s1 + $0xe8] sm:$0xff]   ;;  %s1536_s18 = sshll.u32 %s2297_s21, 4  ;;  %s1404_s7 = sshll.u32 %s2297_s21, 2 }
   0xd   : > { %v1898_v2 = vld [vmem:[%s2293_s1 + $0x38] sm:$0xff]   ;;  %1776 = vmatprep.subr.bf16.mxu1 %v1897_v1  ;;  %v1902_v6 = vld [vmem:[%s2293_s1 + $0x30] sm:$0xff]   ;;  %v1906_v10 = vld [vmem:[%s2293_s1 + $0x28] sm:$0xff]   ;;  %s2158_s28 = scalar_lea.vmem %s2292_s0, %s1536_s18  ;;  %s2242_s10 = scalar_lea.vmem %s2295_s3, %s1404_s7 }
   0xe   : > { %v1899_v3 = vld [vmem:[%s2293_s1 + $0xb8] sm:$0xff]   ;;  %1665 = vmatpush3.bf16.msra.mxu0 %v1898_v2  ;;  %v1903_v7 = vld [vmem:[%s2293_s1 + $0xb0] sm:$0xff]   ;;  %v1907_v11 = vld [vmem:[%s2293_s1 + $0xa8] sm:$0xff]  }
   0xf   : > { %1777 = vmatpush3.bf16.msra.mxu1 %v1899_v3  ;;  %1666 = vmatprep.subr.bf16.mxu0 %v1900_v4  ;;  %v1908_v12 = vld [vmem:[%s2293_s1 + $0x60] sm:$0xff]   ;;  %v1912_v16 = vld [vmem:[%s2293_s1 + $0x58] sm:$0xff]   ;;  %v1916_v20 = vld [vmem:[%s2293_s1 + $0x50] sm:$0xff]  }
  0x10   : > { %1778 = vmatprep.subr.bf16.mxu1 %v1901_v5  ;;  %v1909_v13 = vld [vmem:[%s2293_s1 + $0xe0] sm:$0xff]   ;;  %v1913_v17 = vld [vmem:[%s2293_s1 + $0xd8] sm:$0xff]   ;;  %v1917_v21 = vld [vmem:[%s2293_s1 + $0xd0] sm:$0xff]  }
  0x11   : > { %v1910_v14 = vld [vmem:[%s2293_s1 + $0x20] sm:$0xff]   ;;  %v1914_v18 = vld [vmem:[%s2293_s1 + $0x18] sm:$0xff]   ;;  %v1918_v22 = vld [vmem:[%s2293_s1 + $0x10] sm:$0xff]  }
  0x12   : > { %1667 = vmatpush3.bf16.msra.mxu0 %v1902_v6  ;;  %v1911_v15 = vld [vmem:[%s2293_s1 + $0xa0] sm:$0xff]   ;;  %v1915_v19 = vld [vmem:[%s2293_s1 + $0x98] sm:$0xff]   ;;  %v1919_v23 = vld [vmem:[%s2293_s1 + $0x90] sm:$0xff]  }
  0x13   : > { %1779 = vmatpush3.bf16.msra.mxu1 %v1903_v7  ;;  %1668 = vmatprep.subr.bf16.mxu0 %v1904_v8  ;;  %v1920_v24 = vld [vmem:[%s2293_s1 + $0x48] sm:$0xff]   ;;  %v1924_v28 = vld [vmem:[%s2293_s1 + $0x40] sm:$0xff]  }
  0x14   : > { %1780 = vmatprep.subr.bf16.mxu1 %v1905_v9  ;;  %v1921_v25 = vld [vmem:[%s2293_s1 + $0xc8] sm:$0xff]   ;;  %v1925_v29 = vld [vmem:[%s2293_s1 + $0xc0] sm:$0xff]  }
  0x15   : > { %v1922_v26 = vld [vmem:[%s2293_s1 + $0x8] sm:$0xff]   ;;  %v1926_v30 = vld [vmem:[%s2293_s1] sm:$0xff]  }
  0x16   : > { %1669 = vmatpush3.bf16.msra.mxu0 %v1906_v10  ;;  %v1923_v27 = vld [vmem:[%s2293_s1 + $0x88] sm:$0xff]   ;;  %v1927_v31 = vld [vmem:[%s2293_s1 + $0x80] sm:$0xff]  }
  0x17   : > { %1781 = vmatpush3.bf16.msra.mxu1 %v1907_v11  ;;  %1670 = vmatprep.subr.bf16.mxu0 %v1908_v12  ;;  %v1928_v32 = vld [vmem:[%s2158_s28] ss:$16 sps:$4 sm:$0xff]   ;;  %v1930_v33 = vld [vmem:[%s2158_s28 + $0x4] ss:$16 sps:$4 sm:$0xff]   ;;  %v1931_v34 = vld [vmem:[%s2158_s28 + $0x8] ss:$16 sps:$4 sm:$0xff]  }
  0x18   : > { %1782 = vmatprep.subr.bf16.mxu1 %v1909_v13  ;;  %v1933_v35 = vld [vmem:[%s2158_s28 + $0xc] ss:$16 sps:$4 sm:$0xff]   ;;  %857 = vmatprep.mubr.bf16.mxu0 %v1930_v33  ;;  %v1934_v36 = vld [vmem:[%s2158_s28 + $0x24] ss:$16 sps:$4 sm:$0xff]   ;;  %v1938_v38 = vld [vmem:[%s2158_s28 + $0x20] ss:$16 sps:$4 sm:$0xff]  }
  0x19   : > { %1018 = vmatprep.mubr.bf16.mxu1 %v1933_v35  ;;  %v1936_v37 = vld [vmem:[%s2158_s28 + $0x2c] ss:$16 sps:$4 sm:$0xff]   ;;  %v1939_v39 = vld [vmem:[%s2158_s28 + $0x28] ss:$16 sps:$4 sm:$0xff]   ;;  %v1940_v40 = vld [vmem:[%s2158_s28 + $0x44] ss:$16 sps:$4 sm:$0xff]  }
  0x1a   : > { %1671 = vmatpush3.bf16.msra.mxu0 %v1910_v14  ;;  %v1942_v41 = vld [vmem:[%s2158_s28 + $0x4c] ss:$16 sps:$4 sm:$0xff]   ;;  %v1944_v42 = vld [vmem:[%s2158_s28 + $0x40] ss:$16 sps:$4 sm:$0xff]   ;;  %v1945_v43 = vld [vmem:[%s2158_s28 + $0x48] ss:$16 sps:$4 sm:$0xff]  }
  0x1b   : > { %1783 = vmatpush3.bf16.msra.mxu1 %v1911_v15  ;;  %1672 = vmatprep.subr.bf16.mxu0 %v1912_v16  ;;  %v1946_v44 = vld [vmem:[%s2158_s28 + $0x64] ss:$16 sps:$4 sm:$0xff]   ;;  %v1948_v45 = vld [vmem:[%s2158_s28 + $0x6c] ss:$16 sps:$4 sm:$0xff]   ;;  %v1950_v46 = vld [vmem:[%s2158_s28 + $0x60] ss:$16 sps:$4 sm:$0xff]  }
  0x1c   : > { %1784 = vmatprep.subr.bf16.mxu1 %v1913_v17  ;;  %v1951_v47 = vld [vmem:[%s2158_s28 + $0x68] ss:$16 sps:$4 sm:$0xff]   ;;  %v1952_v48 = vld [vmem:[%s2158_s28 + $0x84] ss:$16 sps:$4 sm:$0xff]   ;;  %v1954_v49 = vld [vmem:[%s2158_s28 + $0x8c] ss:$16 sps:$4 sm:$0xff]  }
  0x1d   : > { %v1956_v50 = vld [vmem:[%s2158_s28 + $0x80] ss:$16 sps:$4 sm:$0xff]   ;;  %v1957_v51 = vld [vmem:[%s2158_s28 + $0x88] ss:$16 sps:$4 sm:$0xff]   ;;  %v1958_v52 = vld [vmem:[%s2158_s28 + $0xa4] ss:$16 sps:$4 sm:$0xff]  }
  0x1e   : > { %1673 = vmatpush3.bf16.msra.mxu0 %v1914_v18  ;;  %v1960_v53 = vld [vmem:[%s2158_s28 + $0xac] ss:$16 sps:$4 sm:$0xff]   ;;  %v1962_v54 = vld [vmem:[%s2158_s28 + $0xa0] ss:$16 sps:$4 sm:$0xff]   ;;  %v1963_v55 = vld [vmem:[%s2158_s28 + $0xa8] ss:$16 sps:$4 sm:$0xff]  }
  0x1f   : > { %1785 = vmatpush3.bf16.msra.mxu1 %v1915_v19  ;;  %1674 = vmatprep.subr.bf16.mxu0 %v1916_v20  ;;  %v1964_v56 = vld [vmem:[%s2158_s28 + $0xc4] ss:$16 sps:$4 sm:$0xff]   ;;  %v1966_v57 = vld [vmem:[%s2158_s28 + $0xcc] ss:$16 sps:$4 sm:$0xff]   ;;  %v1968_v58 = vld [vmem:[%s2158_s28 + $0xc0] ss:$16 sps:$4 sm:$0xff]  }
  0x20   : > { %1786 = vmatprep.subr.bf16.mxu1 %v1917_v21  ;;  %v1969_v59 = vld [vmem:[%s2158_s28 + $0xc8] ss:$16 sps:$4 sm:$0xff]   ;;  %v1970_v60 = vld [vmem:[%s2158_s28 + $0xe4] ss:$16 sps:$4 sm:$0xff]   ;;  %v1972_v61 = vld [vmem:[%s2158_s28 + $0xec] ss:$16 sps:$4 sm:$0xff]  }
  0x21   : > { %v1974_v62 = vld [vmem:[%s2158_s28 + $0xe0] ss:$16 sps:$4 sm:$0xff]   ;;  %v1975_v63 = vld [vmem:[%s2158_s28 + $0xe8] ss:$16 sps:$4 sm:$0xff]   ;;  %v1976_v0 = vld [vmem:[%s2158_s28 + $0x104] ss:$16 sps:$4 sm:$0xff]  }
  0x22   : > { %1675 = vmatpush3.bf16.msra.mxu0 %v1918_v22  ;;  %v1978_v1 = vld [vmem:[%s2158_s28 + $0x10c] ss:$16 sps:$4 sm:$0xff]   ;;  %v1980_v2 = vld [vmem:[%s2158_s28 + $0x100] ss:$16 sps:$4 sm:$0xff]   ;;  %v1981_v3 = vld [vmem:[%s2158_s28 + $0x108] ss:$16 sps:$4 sm:$0xff]  }
  0x23   : > { %1787 = vmatpush3.bf16.msra.mxu1 %v1919_v23  ;;  %1676 = vmatprep.subr.bf16.mxu0 %v1920_v24  ;;  %v1982_v4 = vld [vmem:[%s2158_s28 + $0x124] ss:$16 sps:$4 sm:$0xff]   ;;  %v1984_v5 = vld [vmem:[%s2158_s28 + $0x12c] ss:$16 sps:$4 sm:$0xff]   ;;  %v1986_v6 = vld [vmem:[%s2158_s28 + $0x120] ss:$16 sps:$4 sm:$0xff]  }
  0x24   : > { %1788 = vmatprep.subr.bf16.mxu1 %v1921_v25  ;;  %v1987_v7 = vld [vmem:[%s2158_s28 + $0x128] ss:$16 sps:$4 sm:$0xff]   ;;  %v1988_v8 = vld [vmem:[%s2158_s28 + $0x144] ss:$16 sps:$4 sm:$0xff]   ;;  %v1990_v9 = vld [vmem:[%s2158_s28 + $0x14c] ss:$16 sps:$4 sm:$0xff]  }
  0x25   : > { %v1992_v10 = vld [vmem:[%s2158_s28 + $0x140] ss:$16 sps:$4 sm:$0xff]   ;;  %v1993_v11 = vld [vmem:[%s2158_s28 + $0x148] ss:$16 sps:$4 sm:$0xff]   ;;  %v1994_v12 = vld [vmem:[%s2158_s28 + $0x164] ss:$16 sps:$4 sm:$0xff]  }
  0x26   : > { %1677 = vmatpush3.bf16.msra.mxu0 %v1922_v26  ;;  %v1996_v13 = vld [vmem:[%s2158_s28 + $0x16c] ss:$16 sps:$4 sm:$0xff]   ;;  %v1998_v14 = vld [vmem:[%s2158_s28 + $0x160] ss:$16 sps:$4 sm:$0xff]   ;;  %v1999_v15 = vld [vmem:[%s2158_s28 + $0x168] ss:$16 sps:$4 sm:$0xff]  }
  0x27   : > { %1789 = vmatpush3.bf16.msra.mxu1 %v1923_v27  ;;  %1678 = vmatprep.subr.bf16.mxu0 %v1924_v28  ;;  %v2000_v16 = vld [vmem:[%s2158_s28 + $0x184] ss:$16 sps:$4 sm:$0xff]   ;;  %v2002_v17 = vld [vmem:[%s2158_s28 + $0x18c] ss:$16 sps:$4 sm:$0xff]   ;;  %v2004_v18 = vld [vmem:[%s2158_s28 + $0x180] ss:$16 sps:$4 sm:$0xff]  }
  0x28   : > { %1790 = vmatprep.subr.bf16.mxu1 %v1925_v29  ;;  %v2005_v19 = vld [vmem:[%s2158_s28 + $0x188] ss:$16 sps:$4 sm:$0xff]   ;;  %v2006_v20 = vld [vmem:[%s2158_s28 + $0x1a4] ss:$16 sps:$4 sm:$0xff]   ;;  %v2008_v21 = vld [vmem:[%s2158_s28 + $0x1ac] ss:$16 sps:$4 sm:$0xff]  }
  0x29   : > { %v2010_v22 = vld [vmem:[%s2158_s28 + $0x1a0] ss:$16 sps:$4 sm:$0xff]   ;;  %v2011_v23 = vld [vmem:[%s2158_s28 + $0x1a8] ss:$16 sps:$4 sm:$0xff]   ;;  %v2012_v24 = vld [vmem:[%s2158_s28 + $0x1c4] ss:$16 sps:$4 sm:$0xff]  }
  0x2a   : > { %1679 = vmatpush3.bf16.msra.mxu0 %v1926_v30  ;;  %v2014_v25 = vld [vmem:[%s2158_s28 + $0x1cc] ss:$16 sps:$4 sm:$0xff]   ;;  %v2016_v26 = vld [vmem:[%s2158_s28 + $0x1c0] ss:$16 sps:$4 sm:$0xff]   ;;  %v2017_v27 = vld [vmem:[%s2158_s28 + $0x1c8] ss:$16 sps:$4 sm:$0xff]  }
  0x2b   : > { %1791 = vmatpush3.bf16.msra.mxu1 %v1927_v31  ;;  %v2018_v28 = vld [vmem:[%s2158_s28 + $0x1e4] ss:$16 sps:$4 sm:$0xff]   ;;  %v2020_v29 = vld [vmem:[%s2158_s28 + $0x1ec] ss:$16 sps:$4 sm:$0xff]   ;;  %v2022_v30 = vld [vmem:[%s2158_s28 + $0x1e0] ss:$16 sps:$4 sm:$0xff]  }
  0x2c   : > { %v2023_v31 = vld [vmem:[%s2158_s28 + $0x1e8] ss:$16 sps:$4 sm:$0xff]  }
  0x2d   : > { %858 = vmatmul.mubr.bf16.vlgmr.msra.gmra.mxu0 %v1928_v32 }
  0x2e   : > { %1019 = vmatmul.mubr.bf16.vlgmr.msra.gmra.mxu1 %v1931_v34  ;;  %865 = vmatprep.mubr.bf16.mxu0 %v1934_v36  ;;  %v2233_v34 = vld [vmem:[%s2294_s2] ss:$0 sm:$0xff] }
  0x2f   : > { %1026 = vmatprep.mubr.bf16.mxu1 %v1936_v37 }
  0x35   : > { %866 = vmatmul.mubr.bf16.gmra.mxu0 %v1938_v38 }
  0x36   : > { %1027 = vmatmul.mubr.bf16.gmra.mxu1 %v1939_v39  ;;  %873 = vmatprep.mubr.bf16.mxu0 %v1940_v40 }
  0x37   : > { %1034 = vmatprep.mubr.bf16.mxu1 %v1942_v41 }
  0x3d   : > { %874 = vmatmul.mubr.bf16.gmra.mxu0 %v1944_v42 }
  0x3e   : > { %1035 = vmatmul.mubr.bf16.gmra.mxu1 %v1945_v43  ;;  %881 = vmatprep.mubr.bf16.mxu0 %v1946_v44 }
  0x3f   : > { %1042 = vmatprep.mubr.bf16.mxu1 %v1948_v45 }
  0x45   : > { %882 = vmatmul.mubr.bf16.gmra.mxu0 %v1950_v46 }
  0x46   : > { %1043 = vmatmul.mubr.bf16.gmra.mxu1 %v1951_v47  ;;  %889 = vmatprep.mubr.bf16.mxu0 %v1952_v48 }
  0x47   : > { %1050 = vmatprep.mubr.bf16.mxu1 %v1954_v49 }
  0x4d   : > { %890 = vmatmul.mubr.bf16.gmra.mxu0 %v1956_v50 }
  0x4e   : > { %1051 = vmatmul.mubr.bf16.gmra.mxu1 %v1957_v51  ;;  %897 = vmatprep.mubr.bf16.mxu0 %v1958_v52 }
  0x4f   : > { %1058 = vmatprep.mubr.bf16.mxu1 %v1960_v53 }
  0x55   : > { %898 = vmatmul.mubr.bf16.gmra.mxu0 %v1962_v54 }
  0x56   : > { %1059 = vmatmul.mubr.bf16.gmra.mxu1 %v1963_v55  ;;  %905 = vmatprep.mubr.bf16.mxu0 %v1964_v56 }
  0x57   : > { %1066 = vmatprep.mubr.bf16.mxu1 %v1966_v57 }
  0x5d   : > { %906 = vmatmul.mubr.bf16.gmra.mxu0 %v1968_v58 }
  0x5e   : > { %1067 = vmatmul.mubr.bf16.gmra.mxu1 %v1969_v59  ;;  %913 = vmatprep.mubr.bf16.mxu0 %v1970_v60 }
  0x5f   : > { %1074 = vmatprep.mubr.bf16.mxu1 %v1972_v61 }
  0x65   : > { %914 = vmatmul.mubr.bf16.gmra.mxu0 %v1974_v62 }
  0x66   : > { %1075 = vmatmul.mubr.bf16.gmra.mxu1 %v1975_v63  ;;  %921 = vmatprep.mubr.bf16.mxu0 %v1976_v0 }
  0x67   : > { %1082 = vmatprep.mubr.bf16.mxu1 %v1978_v1 }
  0x6d   : > { %922 = vmatmul.mubr.bf16.gmra.mxu0 %v1980_v2 }
  0x6e   : > { %1083 = vmatmul.mubr.bf16.gmra.mxu1 %v1981_v3  ;;  %929 = vmatprep.mubr.bf16.mxu0 %v1982_v4 }
  0x6f   : > { %1090 = vmatprep.mubr.bf16.mxu1 %v1984_v5 }
  0x75   : > { %930 = vmatmul.mubr.bf16.gmra.mxu0 %v1986_v6 }
  0x76   : > { %1091 = vmatmul.mubr.bf16.gmra.mxu1 %v1987_v7  ;;  %937 = vmatprep.mubr.bf16.mxu0 %v1988_v8 }
  0x77   : > { %1098 = vmatprep.mubr.bf16.mxu1 %v1990_v9 }
  0x7d   : > { %938 = vmatmul.mubr.bf16.gmra.mxu0 %v1992_v10 }
  0x7e   : > { %1099 = vmatmul.mubr.bf16.gmra.mxu1 %v1993_v11  ;;  %945 = vmatprep.mubr.bf16.mxu0 %v1994_v12 }
  0x7f   : > { %1106 = vmatprep.mubr.bf16.mxu1 %v1996_v13 }
  0x85   : > { %946 = vmatmul.mubr.bf16.gmra.mxu0 %v1998_v14 }
  0x86   : > { %1107 = vmatmul.mubr.bf16.gmra.mxu1 %v1999_v15  ;;  %953 = vmatprep.mubr.bf16.mxu0 %v2000_v16 }
  0x87   : > { %1114 = vmatprep.mubr.bf16.mxu1 %v2002_v17 }
  0x8d   : > { %954 = vmatmul.mubr.bf16.gmra.mxu0 %v2004_v18 }
  0x8e   : > { %1115 = vmatmul.mubr.bf16.gmra.mxu1 %v2005_v19  ;;  %961 = vmatprep.mubr.bf16.mxu0 %v2006_v20 }
  0x8f   : > { %1122 = vmatprep.mubr.bf16.mxu1 %v2008_v21 }
  0x95   : > { %962 = vmatmul.mubr.bf16.gmra.mxu0 %v2010_v22 }
  0x96   : > { %1123 = vmatmul.mubr.bf16.gmra.mxu1 %v2011_v23  ;;  %969 = vmatprep.mubr.bf16.mxu0 %v2012_v24 }
  0x97   : > { %1130 = vmatprep.mubr.bf16.mxu1 %v2014_v25 }
  0x9d   : > { %970 = vmatmul.mubr.bf16.gmra.mxu0 %v2016_v26 }
  0x9e   : > { %1131 = vmatmul.mubr.bf16.gmra.mxu1 %v2017_v27  ;;  %977 = vmatprep.mubr.bf16.mxu0 %v2018_v28 }
  0x9f   : > { %1138 = vmatprep.mubr.bf16.mxu1 %v2020_v29 }
  0xa5   : > { %978 = vmatmul.mubr.bf16.gmra.mxu0 %v2022_v30 }
  0xa6   : > { %1139 = vmatmul.mubr.bf16.gmra.mxu1 %v2023_v31 }
  0xed   : > { %v1680_v32 = vpop.f32.mrf.mxu0 }
  0xee   : > { %v1792_v33 = vpop.f32.mrf.mxu1 }
  0xef   : > { %v1681_v35 = vpop.f32.mrf.mxu0 }
  0xf0   : > { %v1682_v36 = vadd.f32 %v1681_v35, %v1680_v32  ;;  %v1793_v37 = vpop.f32.mrf.mxu1 }
  0xf1   : > { %v1683_v38 = vpop.f32.mrf.mxu0  ;;  %v1794_v42 = vadd.f32 %v1793_v37, %v1792_v33 }
  0xf2   : > { %v860_v39 = vadd.f32 %v1682_v36, %v2233_v34  ;;  %v1795_v40 = vpop.f32.mrf.mxu1 }
  0xf3   : > { %v1684_v41 = vpop.f32.mrf.mxu0 }
  0xf4   : > { %v1685_v43 = vadd.f32 %v1684_v41, %v1683_v38  ;;  %v1796_v44 = vpop.f32.mrf.mxu1  ;;  %v1021_v46 = vadd.f32 %v1794_v42, %v860_v39 }
  0xf5   : > { %v1686_v45 = vpop.f32.mrf.mxu0  ;;  %v1797_v48 = vadd.f32 %v1796_v44, %v1795_v40 }
  0xf6   : > { %v863_v47 = vadd.f32 %v1685_v43, %v2233_v34  ;;  %v1798_v49 = vpop.f32.mrf.mxu1  ;;  %v1147_v55 = vmax.f32 %v1021_v46, 0.0 }
  0xf7   : > { %v1687_v50 = vpop.f32.mrf.mxu0 }
  0xf8   : > { %v1024_v51 = vadd.f32 %v1797_v48, %v863_v47  ;;  %v1688_v52 = vadd.f32 %v1687_v50, %v1686_v45  ;;  %v1799_v53 = vpop.f32.mrf.mxu1 }
  0xf9   : > { %v1689_v54 = vpop.f32.mrf.mxu0  ;;  %v1800_v61 = vadd.f32 %v1799_v53, %v1798_v49 }
  0xfa   : > { %v1148_v56 = vmax.f32 %v1024_v51, 0.0  ;;  %v868_v57 = vadd.f32 %v1688_v52, %v2233_v34  ;;  %v1801_v58 = vpop.f32.mrf.mxu1 }
  0xfb   : > { %v1690_v59 = vpop.f32.mrf.mxu0 }
  0xfc   : > { %v1572_v60 = vpack.c.bf16 %v1148_v56, %v1147_v55  ;;  %v1691_v62 = vadd.f32 %v1690_v59, %v1689_v54  ;;  %v1802_v63 = vpop.f32.mrf.mxu1  ;;  %v1029_v1 = vadd.f32 %v1800_v61, %v868_v57 }
  0xfd   : > { %v1692_v0 = vpop.f32.mrf.mxu0  ;;  %v1803_v3 = vadd.f32 %v1802_v63, %v1801_v58 }
  0xfe   : > { %1573 = vst [vmem:[%s2242_s10] sm:$0xff] %v1572_v60   ;;  %v871_v2 = vadd.f32 %v1691_v62, %v2233_v34  ;;  %v1804_v4 = vpop.f32.mrf.mxu1  ;;  %v1149_v10 = vmax.f32 %v1029_v1, 0.0 }
  0xff   : > { %v1693_v5 = vpop.f32.mrf.mxu0 }
 0x100   : > { %v1032_v6 = vadd.f32 %v1803_v3, %v871_v2  ;;  %v1694_v7 = vadd.f32 %v1693_v5, %v1692_v0  ;;  %v1805_v8 = vpop.f32.mrf.mxu1 }
 0x101   : > { %v1695_v9 = vpop.f32.mrf.mxu0  ;;  %v1806_v16 = vadd.f32 %v1805_v8, %v1804_v4 }
 0x102   : > { %v1150_v11 = vmax.f32 %v1032_v6, 0.0  ;;  %v876_v12 = vadd.f32 %v1694_v7, %v2233_v34  ;;  %v1807_v13 = vpop.f32.mrf.mxu1 }
 0x103   : > { %v1696_v14 = vpop.f32.mrf.mxu0 }
 0x104   : > { %v1577_v15 = vpack.c.bf16 %v1150_v11, %v1149_v10  ;;  %v1697_v17 = vadd.f32 %v1696_v14, %v1695_v9  ;;  %v1808_v18 = vpop.f32.mrf.mxu1  ;;  %v1037_v20 = vadd.f32 %v1806_v16, %v876_v12 }
 0x105   : > { %v1698_v19 = vpop.f32.mrf.mxu0  ;;  %v1809_v22 = vadd.f32 %v1808_v18, %v1807_v13 }
 0x106   : > { %1649 = vst [vmem:[%s2242_s10 + $0x8] sm:$0xff] %v1577_v15   ;;  %v879_v21 = vadd.f32 %v1697_v17, %v2233_v34  ;;  %v1810_v23 = vpop.f32.mrf.mxu1  ;;  %v1151_v29 = vmax.f32 %v1037_v20, 0.0 }
 0x107   : > { %v1699_v24 = vpop.f32.mrf.mxu0 }
 0x108   : > { %v1040_v25 = vadd.f32 %v1809_v22, %v879_v21  ;;  %v1700_v26 = vadd.f32 %v1699_v24, %v1698_v19  ;;  %v1811_v27 = vpop.f32.mrf.mxu1 }
 0x109   : > { %v1701_v28 = vpop.f32.mrf.mxu0  ;;  %v1812_v36 = vadd.f32 %v1811_v27, %v1810_v23 }
 0x10a   : > { %v1152_v30 = vmax.f32 %v1040_v25, 0.0  ;;  %v884_v31 = vadd.f32 %v1700_v26, %v2233_v34  ;;  %v1813_v32 = vpop.f32.mrf.mxu1 }
 0x10b   : > { %v1702_v33 = vpop.f32.mrf.mxu0 }
 0x10c   : > { %v1582_v35 = vpack.c.bf16 %v1152_v30, %v1151_v29  ;;  %v1703_v37 = vadd.f32 %v1702_v33, %v1701_v28  ;;  %v1814_v38 = vpop.f32.mrf.mxu1  ;;  %v1045_v40 = vadd.f32 %v1812_v36, %v884_v31 }
 0x10d   : > { %v1704_v39 = vpop.f32.mrf.mxu0  ;;  %v1815_v42 = vadd.f32 %v1814_v38, %v1813_v32 }
 0x10e   : > { %1650 = vst [vmem:[%s2242_s10 + $0x10] sm:$0xff] %v1582_v35   ;;  %v887_v41 = vadd.f32 %v1703_v37, %v2233_v34  ;;  %v1816_v43 = vpop.f32.mrf.mxu1  ;;  %v1153_v49 = vmax.f32 %v1045_v40, 0.0 }
 0x10f   : > { %v1705_v44 = vpop.f32.mrf.mxu0 }
 0x110   : > { %v1048_v45 = vadd.f32 %v1815_v42, %v887_v41  ;;  %v1706_v46 = vadd.f32 %v1705_v44, %v1704_v39  ;;  %v1817_v47 = vpop.f32.mrf.mxu1 }
 0x111   : > { %v1707_v48 = vpop.f32.mrf.mxu0  ;;  %v1818_v55 = vadd.f32 %v1817_v47, %v1816_v43 }
 0x112   : > { %v1154_v50 = vmax.f32 %v1048_v45, 0.0  ;;  %v892_v51 = vadd.f32 %v1706_v46, %v2233_v34  ;;  %v1819_v52 = vpop.f32.mrf.mxu1 }
 0x113   : > { %v1708_v53 = vpop.f32.mrf.mxu0 }
 0x114   : > { %v1587_v54 = vpack.c.bf16 %v1154_v50, %v1153_v49  ;;  %v1709_v56 = vadd.f32 %v1708_v53, %v1707_v48  ;;  %v1820_v57 = vpop.f32.mrf.mxu1  ;;  %v1053_v59 = vadd.f32 %v1818_v55, %v892_v51 }
 0x115   : > { %v1710_v58 = vpop.f32.mrf.mxu0  ;;  %v1821_v61 = vadd.f32 %v1820_v57, %v1819_v52 }
 0x116   : > { %1651 = vst [vmem:[%s2242_s10 + $0x18] sm:$0xff] %v1587_v54   ;;  %v895_v60 = vadd.f32 %v1709_v56, %v2233_v34  ;;  %v1822_v62 = vpop.f32.mrf.mxu1  ;;  %v1155_v4 = vmax.f32 %v1053_v59, 0.0 }
 0x117   : > { %v1711_v63 = vpop.f32.mrf.mxu0 }
 0x118   : > { %v1056_v0 = vadd.f32 %v1821_v61, %v895_v60  ;;  %v1712_v1 = vadd.f32 %v1711_v63, %v1710_v58  ;;  %v1823_v2 = vpop.f32.mrf.mxu1 }
 0x119   : > { %v1713_v3 = vpop.f32.mrf.mxu0  ;;  %v1824_v10 = vadd.f32 %v1823_v2, %v1822_v62 }
 0x11a   : > { %v1156_v5 = vmax.f32 %v1056_v0, 0.0  ;;  %v900_v6 = vadd.f32 %v1712_v1, %v2233_v34  ;;  %v1825_v7 = vpop.f32.mrf.mxu1 }
 0x11b   : > { %v1714_v8 = vpop.f32.mrf.mxu0 }
 0x11c   : > { %v1592_v9 = vpack.c.bf16 %v1156_v5, %v1155_v4  ;;  %v1715_v11 = vadd.f32 %v1714_v8, %v1713_v3  ;;  %v1826_v12 = vpop.f32.mrf.mxu1  ;;  %v1061_v14 = vadd.f32 %v1824_v10, %v900_v6 }
 0x11d   : > { %v1716_v13 = vpop.f32.mrf.mxu0  ;;  %v1827_v16 = vadd.f32 %v1826_v12, %v1825_v7 }
 0x11e   : > { %1652 = vst [vmem:[%s2242_s10 + $0x20] sm:$0xff] %v1592_v9   ;;  %v903_v15 = vadd.f32 %v1715_v11, %v2233_v34  ;;  %v1828_v17 = vpop.f32.mrf.mxu1  ;;  %v1157_v23 = vmax.f32 %v1061_v14, 0.0 }
 0x11f   : > { %v1717_v18 = vpop.f32.mrf.mxu0 }
 0x120   : > { %v1064_v19 = vadd.f32 %v1827_v16, %v903_v15  ;;  %v1718_v20 = vadd.f32 %v1717_v18, %v1716_v13  ;;  %v1829_v21 = vpop.f32.mrf.mxu1 }
 0x121   : > { %v1719_v22 = vpop.f32.mrf.mxu0  ;;  %v1830_v29 = vadd.f32 %v1829_v21, %v1828_v17 }
 0x122   : > { %v1158_v24 = vmax.f32 %v1064_v19, 0.0  ;;  %v908_v25 = vadd.f32 %v1718_v20, %v2233_v34  ;;  %v1831_v26 = vpop.f32.mrf.mxu1 }
 0x123   : > { %v1720_v27 = vpop.f32.mrf.mxu0 }
 0x124   : > { %v1597_v28 = vpack.c.bf16 %v1158_v24, %v1157_v23  ;;  %v1721_v30 = vadd.f32 %v1720_v27, %v1719_v22  ;;  %v1832_v31 = vpop.f32.mrf.mxu1  ;;  %v1069_v33 = vadd.f32 %v1830_v29, %v908_v25 }
 0x125   : > { %v1722_v32 = vpop.f32.mrf.mxu0  ;;  %v1833_v36 = vadd.f32 %v1832_v31, %v1831_v26 }
 0x126   : > { %1653 = vst [vmem:[%s2242_s10 + $0x28] sm:$0xff] %v1597_v28   ;;  %v911_v35 = vadd.f32 %v1721_v30, %v2233_v34  ;;  %v1834_v37 = vpop.f32.mrf.mxu1  ;;  %v1159_v43 = vmax.f32 %v1069_v33, 0.0 }
 0x127   : > { %v1723_v38 = vpop.f32.mrf.mxu0 }
 0x128   : > { %v1072_v39 = vadd.f32 %v1833_v36, %v911_v35  ;;  %v1724_v40 = vadd.f32 %v1723_v38, %v1722_v32  ;;  %v1835_v41 = vpop.f32.mrf.mxu1 }
 0x129   : > { %v1725_v42 = vpop.f32.mrf.mxu0  ;;  %v1836_v49 = vadd.f32 %v1835_v41, %v1834_v37 }
 0x12a   : > { %v1160_v44 = vmax.f32 %v1072_v39, 0.0  ;;  %v916_v45 = vadd.f32 %v1724_v40, %v2233_v34  ;;  %v1837_v46 = vpop.f32.mrf.mxu1 }
 0x12b   : > { %v1726_v47 = vpop.f32.mrf.mxu0 }
 0x12c   : > { %v1602_v48 = vpack.c.bf16 %v1160_v44, %v1159_v43  ;;  %v1727_v50 = vadd.f32 %v1726_v47, %v1725_v42  ;;  %v1838_v51 = vpop.f32.mrf.mxu1  ;;  %v1077_v53 = vadd.f32 %v1836_v49, %v916_v45 }
 0x12d   : > { %v1728_v52 = vpop.f32.mrf.mxu0  ;;  %v1839_v55 = vadd.f32 %v1838_v51, %v1837_v46 }
 0x12e   : > { %1654 = vst [vmem:[%s2242_s10 + $0x30] sm:$0xff] %v1602_v48   ;;  %v919_v54 = vadd.f32 %v1727_v50, %v2233_v34  ;;  %v1840_v56 = vpop.f32.mrf.mxu1  ;;  %v1161_v62 = vmax.f32 %v1077_v53, 0.0 }
 0x12f   : > { %v1729_v57 = vpop.f32.mrf.mxu0 }
 0x130   : > { %v1080_v58 = vadd.f32 %v1839_v55, %v919_v54  ;;  %v1730_v59 = vadd.f32 %v1729_v57, %v1728_v52  ;;  %v1841_v60 = vpop.f32.mrf.mxu1 }
 0x131   : > { %v1731_v61 = vpop.f32.mrf.mxu0  ;;  %v1842_v4 = vadd.f32 %v1841_v60, %v1840_v56 }
 0x132   : > { %v1162_v63 = vmax.f32 %v1080_v58, 0.0  ;;  %v924_v0 = vadd.f32 %v1730_v59, %v2233_v34  ;;  %v1843_v1 = vpop.f32.mrf.mxu1 }
 0x133   : > { %v1732_v2 = vpop.f32.mrf.mxu0 }
 0x134   : > { %v1607_v3 = vpack.c.bf16 %v1162_v63, %v1161_v62  ;;  %v1733_v5 = vadd.f32 %v1732_v2, %v1731_v61  ;;  %v1844_v6 = vpop.f32.mrf.mxu1  ;;  %v1085_v8 = vadd.f32 %v1842_v4, %v924_v0 }
 0x135   : > { %v1734_v7 = vpop.f32.mrf.mxu0  ;;  %v1845_v10 = vadd.f32 %v1844_v6, %v1843_v1 }
 0x136   : > { %1655 = vst [vmem:[%s2242_s10 + $0x38] sm:$0xff] %v1607_v3   ;;  %v927_v9 = vadd.f32 %v1733_v5, %v2233_v34  ;;  %v1846_v11 = vpop.f32.mrf.mxu1  ;;  %v1163_v17 = vmax.f32 %v1085_v8, 0.0 }
 0x137   : > { %v1735_v12 = vpop.f32.mrf.mxu0 }
 0x138   : > { %v1088_v13 = vadd.f32 %v1845_v10, %v927_v9  ;;  %v1736_v14 = vadd.f32 %v1735_v12, %v1734_v7  ;;  %v1847_v15 = vpop.f32.mrf.mxu1 }
 0x139   : > { %v1737_v16 = vpop.f32.mrf.mxu0  ;;  %v1848_v23 = vadd.f32 %v1847_v15, %v1846_v11 }
 0x13a   : > { %v1164_v18 = vmax.f32 %v1088_v13, 0.0  ;;  %v932_v19 = vadd.f32 %v1736_v14, %v2233_v34  ;;  %v1849_v20 = vpop.f32.mrf.mxu1 }
 0x13b   : > { %v1738_v21 = vpop.f32.mrf.mxu0 }
 0x13c   : > { %v1612_v22 = vpack.c.bf16 %v1164_v18, %v1163_v17  ;;  %v1739_v24 = vadd.f32 %v1738_v21, %v1737_v16  ;;  %v1850_v25 = vpop.f32.mrf.mxu1  ;;  %v1093_v27 = vadd.f32 %v1848_v23, %v932_v19 }
 0x13d   : > { %v1740_v26 = vpop.f32.mrf.mxu0  ;;  %v1851_v29 = vadd.f32 %v1850_v25, %v1849_v20 }
 0x13e   : > { %1656 = vst [vmem:[%s2242_s10 + $0x40] sm:$0xff] %v1612_v22   ;;  %v935_v28 = vadd.f32 %v1739_v24, %v2233_v34  ;;  %v1852_v30 = vpop.f32.mrf.mxu1  ;;  %v1165_v37 = vmax.f32 %v1093_v27, 0.0 }
 0x13f   : > { %v1741_v31 = vpop.f32.mrf.mxu0 }
 0x140   : > { %v1096_v32 = vadd.f32 %v1851_v29, %v935_v28  ;;  %v1742_v33 = vadd.f32 %v1741_v31, %v1740_v26  ;;  %v1853_v35 = vpop.f32.mrf.mxu1 }
 0x141   : > { %v1743_v36 = vpop.f32.mrf.mxu0  ;;  %v1854_v43 = vadd.f32 %v1853_v35, %v1852_v30 }
 0x142   : > { %v1166_v38 = vmax.f32 %v1096_v32, 0.0  ;;  %v940_v39 = vadd.f32 %v1742_v33, %v2233_v34  ;;  %v1855_v40 = vpop.f32.mrf.mxu1 }
 0x143   : > { %v1744_v41 = vpop.f32.mrf.mxu0 }
 0x144   : > { %v1617_v42 = vpack.c.bf16 %v1166_v38, %v1165_v37  ;;  %v1745_v44 = vadd.f32 %v1744_v41, %v1743_v36  ;;  %v1856_v45 = vpop.f32.mrf.mxu1  ;;  %v1101_v47 = vadd.f32 %v1854_v43, %v940_v39 }
 0x145   : > { %v1746_v46 = vpop.f32.mrf.mxu0  ;;  %v1857_v49 = vadd.f32 %v1856_v45, %v1855_v40 }
 0x146   : > { %1657 = vst [vmem:[%s2242_s10 + $0x48] sm:$0xff] %v1617_v42   ;;  %v943_v48 = vadd.f32 %v1745_v44, %v2233_v34  ;;  %v1858_v50 = vpop.f32.mrf.mxu1  ;;  %v1167_v56 = vmax.f32 %v1101_v47, 0.0 }
 0x147   : > { %v1747_v51 = vpop.f32.mrf.mxu0 }
 0x148   : > { %v1104_v52 = vadd.f32 %v1857_v49, %v943_v48  ;;  %v1748_v53 = vadd.f32 %v1747_v51, %v1746_v46  ;;  %v1859_v54 = vpop.f32.mrf.mxu1 }
 0x149   : > { %v1749_v55 = vpop.f32.mrf.mxu0  ;;  %v1860_v62 = vadd.f32 %v1859_v54, %v1858_v50 }
 0x14a   : > { %v1168_v57 = vmax.f32 %v1104_v52, 0.0  ;;  %v948_v58 = vadd.f32 %v1748_v53, %v2233_v34  ;;  %v1861_v59 = vpop.f32.mrf.mxu1 }
 0x14b   : > { %v1750_v60 = vpop.f32.mrf.mxu0 }
 0x14c   : > { %v1622_v61 = vpack.c.bf16 %v1168_v57, %v1167_v56  ;;  %v1751_v63 = vadd.f32 %v1750_v60, %v1749_v55  ;;  %v1862_v0 = vpop.f32.mrf.mxu1  ;;  %v1109_v2 = vadd.f32 %v1860_v62, %v948_v58 }
 0x14d   : > { %v1752_v1 = vpop.f32.mrf.mxu0  ;;  %v1863_v4 = vadd.f32 %v1862_v0, %v1861_v59 }
 0x14e   : > { %1658 = vst [vmem:[%s2242_s10 + $0x50] sm:$0xff] %v1622_v61   ;;  %v951_v3 = vadd.f32 %v1751_v63, %v2233_v34  ;;  %v1864_v5 = vpop.f32.mrf.mxu1  ;;  %v1169_v11 = vmax.f32 %v1109_v2, 0.0 }
 0x14f   : > { %v1753_v6 = vpop.f32.mrf.mxu0 }
 0x150   : > { %v1112_v7 = vadd.f32 %v1863_v4, %v951_v3  ;;  %v1754_v8 = vadd.f32 %v1753_v6, %v1752_v1  ;;  %v1865_v9 = vpop.f32.mrf.mxu1 }
 0x151   : > { %v1755_v10 = vpop.f32.mrf.mxu0  ;;  %v1866_v17 = vadd.f32 %v1865_v9, %v1864_v5 }
 0x152   : > { %v1170_v12 = vmax.f32 %v1112_v7, 0.0  ;;  %v956_v13 = vadd.f32 %v1754_v8, %v2233_v34  ;;  %v1867_v14 = vpop.f32.mrf.mxu1 }
 0x153   : > { %v1756_v15 = vpop.f32.mrf.mxu0 }
 0x154   : > { %v1627_v16 = vpack.c.bf16 %v1170_v12, %v1169_v11  ;;  %v1757_v18 = vadd.f32 %v1756_v15, %v1755_v10  ;;  %v1868_v19 = vpop.f32.mrf.mxu1  ;;  %v1117_v21 = vadd.f32 %v1866_v17, %v956_v13 }
 0x155   : > { %v1758_v20 = vpop.f32.mrf.mxu0  ;;  %v1869_v23 = vadd.f32 %v1868_v19, %v1867_v14 }
 0x156   : > { %1659 = vst [vmem:[%s2242_s10 + $0x58] sm:$0xff] %v1627_v16   ;;  %v959_v22 = vadd.f32 %v1757_v18, %v2233_v34  ;;  %v1870_v24 = vpop.f32.mrf.mxu1  ;;  %v1171_v30 = vmax.f32 %v1117_v21, 0.0 }
 0x157   : > { %v1759_v25 = vpop.f32.mrf.mxu0 }
 0x158   : > { %v1120_v26 = vadd.f32 %v1869_v23, %v959_v22  ;;  %v1760_v27 = vadd.f32 %v1759_v25, %v1758_v20  ;;  %v1871_v28 = vpop.f32.mrf.mxu1 }
 0x159   : > { %v1761_v29 = vpop.f32.mrf.mxu0  ;;  %v1872_v37 = vadd.f32 %v1871_v28, %v1870_v24 }
 0x15a   : > { %v1172_v31 = vmax.f32 %v1120_v26, 0.0  ;;  %v964_v32 = vadd.f32 %v1760_v27, %v2233_v34  ;;  %v1873_v33 = vpop.f32.mrf.mxu1 }
 0x15b   : > { %v1762_v35 = vpop.f32.mrf.mxu0 }
 0x15c   : > { %v1632_v36 = vpack.c.bf16 %v1172_v31, %v1171_v30  ;;  %v1763_v38 = vadd.f32 %v1762_v35, %v1761_v29  ;;  %v1874_v39 = vpop.f32.mrf.mxu1  ;;  %v1125_v41 = vadd.f32 %v1872_v37, %v964_v32 }
 0x15d   : > { %v1764_v40 = vpop.f32.mrf.mxu0  ;;  %v1875_v43 = vadd.f32 %v1874_v39, %v1873_v33 }
 0x15e   : > { %1660 = vst [vmem:[%s2242_s10 + $0x60] sm:$0xff] %v1632_v36   ;;  %v967_v42 = vadd.f32 %v1763_v38, %v2233_v34  ;;  %v1876_v44 = vpop.f32.mrf.mxu1  ;;  %v1173_v50 = vmax.f32 %v1125_v41, 0.0 }
 0x15f   : > { %v1765_v45 = vpop.f32.mrf.mxu0 }
 0x160   : > { %v1128_v46 = vadd.f32 %v1875_v43, %v967_v42  ;;  %v1766_v47 = vadd.f32 %v1765_v45, %v1764_v40  ;;  %v1877_v48 = vpop.f32.mrf.mxu1 }
 0x161   : > { %v1767_v49 = vpop.f32.mrf.mxu0  ;;  %v1878_v56 = vadd.f32 %v1877_v48, %v1876_v44 }
 0x162   : > { %v1174_v51 = vmax.f32 %v1128_v46, 0.0  ;;  %v972_v52 = vadd.f32 %v1766_v47, %v2233_v34  ;;  %v1879_v53 = vpop.f32.mrf.mxu1 }
 0x163   : > { %v1768_v54 = vpop.f32.mrf.mxu0 }
 0x164   : > { %v1637_v55 = vpack.c.bf16 %v1174_v51, %v1173_v50  ;;  %v1769_v57 = vadd.f32 %v1768_v54, %v1767_v49  ;;  %v1880_v58 = vpop.f32.mrf.mxu1  ;;  %v1133_v60 = vadd.f32 %v1878_v56, %v972_v52 }
 0x165   : > { %v1770_v59 = vpop.f32.mrf.mxu0  ;;  %v1881_v62 = vadd.f32 %v1880_v58, %v1879_v53 }
 0x166   : > { %1661 = vst [vmem:[%s2242_s10 + $0x68] sm:$0xff] %v1637_v55   ;;  %v975_v61 = vadd.f32 %v1769_v57, %v2233_v34  ;;  %v1882_v63 = vpop.f32.mrf.mxu1  ;;  %v1175_v5 = vmax.f32 %v1133_v60, 0.0 }
 0x167   : > { %v1771_v0 = vpop.f32.mrf.mxu0 }
 0x168   : > { %v1136_v1 = vadd.f32 %v1881_v62, %v975_v61  ;;  %v1772_v2 = vadd.f32 %v1771_v0, %v1770_v59  ;;  %v1883_v3 = vpop.f32.mrf.mxu1 }
 0x169   : > { %v1773_v4 = vpop.f32.mrf.mxu0  ;;  %v1884_v11 = vadd.f32 %v1883_v3, %v1882_v63 }
 0x16a   : > { %v1176_v6 = vmax.f32 %v1136_v1, 0.0  ;;  %v980_v7 = vadd.f32 %v1772_v2, %v2233_v34  ;;  %v1885_v8 = vpop.f32.mrf.mxu1 }
 0x16b   : > { %v1774_v9 = vpop.f32.mrf.mxu0 }
 0x16c   : > { %v1642_v10 = vpack.c.bf16 %v1176_v6, %v1175_v5  ;;  %v1775_v12 = vadd.f32 %v1774_v9, %v1773_v4  ;;  %v1886_v13 = vpop.f32.mrf.mxu1  ;;  %v1141_v14 = vadd.f32 %v1884_v11, %v980_v7 }
 0x16d   : > { %v1887_v16 = vadd.f32 %v1886_v13, %v1885_v8 }
 0x16e   : > { %1662 = vst [vmem:[%s2242_s10 + $0x70] sm:$0xff] %v1642_v10   ;;  %v983_v15 = vadd.f32 %v1775_v12, %v2233_v34  ;;  %v1177_v18 = vmax.f32 %v1141_v14, 0.0 }
 0x170   : > { %v1144_v17 = vadd.f32 %v1887_v16, %v983_v15 }
 0x172   : > { %v1178_v19 = vmax.f32 %v1144_v17, 0.0 }
 0x174   : > { %v1647_v20 = vpack.c.bf16 %v1178_v19, %v1177_v18 }
 0x176   : > { %1663 = vst [vmem:[%s2242_s10 + $0x78] sm:$0xff] %v1647_v20  }
 0x177 PF: > { %s13_s12 = sadd.s32 1, %s2030_s12  }
 0x178   : > { %p10_p4 = scmp.ge.s32.totalorder %s13_s12, 4  }
 0x17a   :  { %12 = sbr.rel (!%p10_p4) target bundleno = 1 (0x1), region = 62 }

// kernel: outconv_forward.20
= control target key start
LH: loop header
LB: loop body
LE: loop exit
PB: predicated region body
PF: predicated region fallthrough
CT: control target
= control target key end

     0   :  { %s3032_s18 = smov 0   ;;  %s3747_s0 = inlined_call_operand.vmem [shape: bf16[2048,512], index: 0, kind: input, shape index: {}]   ;;  %s3748_s1 = inlined_call_operand.vmem [shape: bf16[512,128], index: 1, kind: input, shape index: {}]   ;;  %s3749_s2 = inlined_call_operand.vmem [shape: f32[1,128], index: 2, kind: input, shape index: {}]   ;;  %s3750_s3 = inlined_call_operand.vmem [shape: bf16[128,128], index: 3, kind: input, shape index: {}]   ;;  %s3751_s4 = inlined_call_operand.vmem [shape: f32[1,128], index: 4, kind: input, shape index: {}]   ;;  %s3752_s5 = inlined_call_operand.vmem [shape: f32[2048,128], index: 5, kind: output, shape index: {}]  }
   0x1 LB: > { %s2417_s19 = sadd.s32 4294967295, %s2999_s18   ;;  %p2421_p0 = scmp.ge.s32.totalorder %s2999_s18, 1  ;;  %s2999_s18 = sphi %s3032_s18, %s15_s18  }
   0x2   : > { %p189_p1 = scmp.lt.s32.totalorder %s2999_s18, 5 }
   0x4   : > { %p190_p2 = pnand %p2421_p0, %p189_p1 }
   0x5   : > { %s2422_s22 = sshll.u32 (!%p190_p2), %s2417_s19, 6 }
   0x6   : > { %193 = sbr.rel (%p190_p2) target bundleno = 793 (0x319), region = 40  ;;  %p219_p3 = scmp.lt.s32.totalorder (!%p190_p2), %s2422_s22, 255 }
   0xb   : > { %v2761_v0 = vld [vmem:[%s3748_s1 + $0x38] sm:$0xff]   ;;  %v3001_v1 = vmov 0   ;;  %v2762_v2 = vld [vmem:[%s3748_s1 + $0x30] sm:$0xff]   ;;  %v2763_v3 = vld [vmem:[%s3748_s1 + $0x28] sm:$0xff]   ;;  %s3754_s22 = smov (!%p219_p3, %s2422_s22), 255 }
   0xc   : > { %2720 = vmatprep.subr.bf16.mxu1 %v3001_v1  ;;  %1263 = vmatprep.subr.bf16.mxu0 %v3001_v1  ;;  %v2764_v4 = vld [vmem:[%s3748_s1 + $0x20] sm:$0xff]   ;;  %s2599_s29 = sshll.u32 %s3754_s22, 4  ;;  %v2765_v5 = vld [vmem:[%s3748_s1 + $0x18] sm:$0xff]   ;;  %v2766_v7 = vld [vmem:[%s3748_s1 + $0x10] sm:$0xff]  }
   0xd   : > { %2736 = vmatpush1.bf16.msra.mxu1 %v2761_v0  ;;  %1264 = vmatpush1.bf16.msra.mxu0 %v2761_v0  ;;  %s3069_s9 = scalar_lea.vmem %s3747_s0, %s2599_s29  ;;  %v2767_v8 = vld [vmem:[%s3748_s1 + $0x8] sm:$0xff]   ;;  %v2768_v9 = vld [vmem:[%s3748_s1] sm:$0xff]   ;;  %v2769_v10 = vld [vmem:[%s3748_s1 + $0x78] sm:$0xff]  }
   0xe   : > { %2721 = vmatprep.subr.bf16.mxu1 %v3001_v1  ;;  %1265 = vmatprep.subr.bf16.mxu0 %v3001_v1  ;;  %v2779_v6 = vld [vmem:[%s3069_s9 + $0x304] ss:$16 sps:$4 sm:$0xff]   ;;  %v2771_v12 = vld [vmem:[%s3748_s1 + $0x68] sm:$0xff]   ;;  %v2773_v15 = vld [vmem:[%s3748_s1 + $0x58] sm:$0xff]  }
   0xf   : > { %1487 = vmatprep.mubr.bf16.mxu1 %v2779_v6  ;;  %v2770_v11 = vld [vmem:[%s3748_s1 + $0x70] sm:$0xff]   ;;  %v2772_v13 = vld [vmem:[%s3748_s1 + $0x60] sm:$0xff]   ;;  %v2775_v17 = vld [vmem:[%s3748_s1 + $0x48] sm:$0xff]  }
  0x10   : > { %v2818_v14 = vld [vmem:[%s3069_s9 + $0x4] ss:$16 sps:$4 sm:$0xff]   ;;  %v2777_v19 = vld [vmem:[%s3069_s9 + $0x300] ss:$16 sps:$4 sm:$0xff]   ;;  %v2780_v21 = vld [vmem:[%s3748_s1 + $0xb8] sm:$0xff]  }
  0x11   : > { %2737 = vmatpush1.bf16.msra.mxu1 %v2762_v2  ;;  %1266 = vmatpush1.bf16.msra.mxu0 %v2762_v2  ;;  %v2774_v16 = vld [vmem:[%s3748_s1 + $0x50] sm:$0xff]   ;;  %v2776_v18 = vld [vmem:[%s3748_s1 + $0x40] sm:$0xff]   ;;  %v2785_v26 = vld [vmem:[%s3748_s1 + $0xa8] sm:$0xff]  }
  0x12   : > { %2722 = vmatprep.subr.bf16.mxu1 %v3001_v1  ;;  %1267 = vmatprep.subr.bf16.mxu0 %v3001_v1  ;;  %v2816_v20 = vld [vmem:[%s3069_s9] ss:$16 sps:$4 sm:$0xff]   ;;  %v2782_v22 = vld [vmem:[%s3069_s9 + $0x324] ss:$16 sps:$4 sm:$0xff]   ;;  %v2790_v33 = vld [vmem:[%s3748_s1 + $0x98] sm:$0xff]  }
  0x13   : > { %1295 = vmatprep.mubr.bf16.mxu0 %v2818_v14  ;;  %v2823_v23 = vld [vmem:[%s3069_s9 + $0x24] ss:$16 sps:$4 sm:$0xff]   ;;  %v2784_v25 = vld [vmem:[%s3069_s9 + $0x320] ss:$16 sps:$4 sm:$0xff]   ;;  %v2795_v39 = vld [vmem:[%s3748_s1 + $0x88] sm:$0xff]  }
  0x14   : > { %v2781_v24 = vld [vmem:[%s3748_s1 + $0xb0] sm:$0xff]   ;;  %v2786_v30 = vld [vmem:[%s3748_s1 + $0xa0] sm:$0xff]   ;;  %v2800_v45 = vld [vmem:[%s3748_s1 + $0xf8] sm:$0xff]  }
  0x15   : > { %2738 = vmatpush1.bf16.msra.mxu1 %v2763_v3  ;;  %1268 = vmatpush1.bf16.msra.mxu0 %v2763_v3  ;;  %v2787_v27 = vld [vmem:[%s3069_s9 + $0x344] ss:$16 sps:$4 sm:$0xff]   ;;  %v2825_v28 = vld [vmem:[%s3069_s9 + $0x20] ss:$16 sps:$4 sm:$0xff]   ;;  %v2805_v51 = vld [vmem:[%s3748_s1 + $0xe8] sm:$0xff]  }
  0x16   : > { %2723 = vmatprep.subr.bf16.mxu1 %v3001_v1  ;;  %1269 = vmatprep.subr.bf16.mxu0 %v3001_v1  ;;  %v2829_v29 = vld [vmem:[%s3069_s9 + $0x44] ss:$16 sps:$4 sm:$0xff]   ;;  %v2789_v31 = vld [vmem:[%s3069_s9 + $0x340] ss:$16 sps:$4 sm:$0xff]   ;;  %v2810_v57 = vld [vmem:[%s3748_s1 + $0xd8] sm:$0xff]  }
  0x17   : > { %v2831_v32 = vld [vmem:[%s3069_s9 + $0x40] ss:$16 sps:$4 sm:$0xff]   ;;  %v2792_v34 = vld [vmem:[%s3069_s9 + $0x364] ss:$16 sps:$4 sm:$0xff]   ;;  %v2815_v63 = vld [vmem:[%s3748_s1 + $0xc8] sm:$0xff]  }
  0x18   : > { %v2835_v35 = vld [vmem:[%s3069_s9 + $0x64] ss:$16 sps:$4 sm:$0xff]   ;;  %v2794_v37 = vld [vmem:[%s3069_s9 + $0x360] ss:$16 sps:$4 sm:$0xff]   ;;  %v2822_v0 = vld [vmem:[%s3069_s9 + $0xc] ss:$16 sps:$4 sm:$0xff]  }
  0x19   : > { %2739 = vmatpush1.bf16.msra.mxu1 %v2764_v4  ;;  %1270 = vmatpush1.bf16.msra.mxu0 %v2764_v4  ;;  %v2791_v36 = vld [vmem:[%s3748_s1 + $0x90] sm:$0xff]   ;;  %v2796_v42 = vld [vmem:[%s3748_s1 + $0x80] sm:$0xff]   ;;  %v2820_v4 = vld [vmem:[%s3069_s9 + $0x8] ss:$16 sps:$4 sm:$0xff]  }
  0x1a   : > { %2724 = vmatprep.subr.bf16.mxu1 %v3001_v1  ;;  %1271 = vmatprep.subr.bf16.mxu0 %v3001_v1  ;;  %v2837_v38 = vld [vmem:[%s3069_s9 + $0x60] ss:$16 sps:$4 sm:$0xff]   ;;  %v2797_v40 = vld [vmem:[%s3069_s9 + $0x384] ss:$16 sps:$4 sm:$0xff]   ;;  %v2826_v6 = vld [vmem:[%s3069_s9 + $0x2c] ss:$16 sps:$4 sm:$0xff]  }
  0x1b   : > { %v2841_v41 = vld [vmem:[%s3069_s9 + $0x84] ss:$16 sps:$4 sm:$0xff]   ;;  %v2799_v43 = vld [vmem:[%s3069_s9 + $0x380] ss:$16 sps:$4 sm:$0xff]   ;;  %v2838_v14 = vld [vmem:[%s3069_s9 + $0x6c] ss:$16 sps:$4 sm:$0xff]  }
  0x1c   : > { %v2843_v44 = vld [vmem:[%s3069_s9 + $0x80] ss:$16 sps:$4 sm:$0xff]   ;;  %v2802_v46 = vld [vmem:[%s3069_s9 + $0x3a4] ss:$16 sps:$4 sm:$0xff]  }
  0x1d   : > { %2740 = vmatpush1.bf16.msra.mxu1 %v2765_v5  ;;  %1272 = vmatpush1.bf16.msra.mxu0 %v2765_v5  ;;  %v2847_v47 = vld [vmem:[%s3069_s9 + $0xa4] ss:$16 sps:$4 sm:$0xff]   ;;  %v2804_v49 = vld [vmem:[%s3069_s9 + $0x3a0] ss:$16 sps:$4 sm:$0xff]  }
  0x1e   : > { %2725 = vmatprep.subr.bf16.mxu1 %v3001_v1  ;;  %1273 = vmatprep.subr.bf16.mxu0 %v3001_v1  ;;  %v2801_v48 = vld [vmem:[%s3748_s1 + $0xf0] sm:$0xff]   ;;  %v2806_v54 = vld [vmem:[%s3748_s1 + $0xe0] sm:$0xff]  }
  0x1f   : > { %v2849_v50 = vld [vmem:[%s3069_s9 + $0xa0] ss:$16 sps:$4 sm:$0xff]   ;;  %v2807_v52 = vld [vmem:[%s3069_s9 + $0x3c4] ss:$16 sps:$4 sm:$0xff]  }
  0x20   : > { %v2853_v53 = vld [vmem:[%s3069_s9 + $0xc4] ss:$16 sps:$4 sm:$0xff]   ;;  %v2809_v55 = vld [vmem:[%s3069_s9 + $0x3c0] ss:$16 sps:$4 sm:$0xff]  }
  0x21   : > { %2741 = vmatpush1.bf16.msra.mxu1 %v2766_v7  ;;  %1274 = vmatpush1.bf16.msra.mxu0 %v2766_v7  ;;  %v2855_v56 = vld [vmem:[%s3069_s9 + $0xc0] ss:$16 sps:$4 sm:$0xff]   ;;  %v2812_v58 = vld [vmem:[%s3069_s9 + $0x3e4] ss:$16 sps:$4 sm:$0xff]  }
  0x22   : > { %2726 = vmatprep.subr.bf16.mxu1 %v3001_v1  ;;  %1275 = vmatprep.subr.bf16.mxu0 %v3001_v1  ;;  %v2859_v59 = vld [vmem:[%s3069_s9 + $0xe4] ss:$16 sps:$4 sm:$0xff]   ;;  %v2814_v61 = vld [vmem:[%s3069_s9 + $0x3e0] ss:$16 sps:$4 sm:$0xff]  }
  0x23   : > { %v2811_v60 = vld [vmem:[%s3748_s1 + $0xd0] sm:$0xff]   ;;  %v2819_v3 = vld [vmem:[%s3748_s1 + $0xc0] sm:$0xff]  }
  0x24   : > { %v2861_v62 = vld [vmem:[%s3069_s9 + $0xe0] ss:$16 sps:$4 sm:$0xff]   ;;  %v2865_v2 = vld [vmem:[%s3069_s9 + $0x104] ss:$16 sps:$4 sm:$0xff]  }
  0x25   : > { %2742 = vmatpush1.bf16.msra.mxu1 %v2767_v8  ;;  %1276 = vmatpush1.bf16.msra.mxu0 %v2767_v8  ;;  %v2867_v5 = vld [vmem:[%s3069_s9 + $0x100] ss:$16 sps:$4 sm:$0xff]   ;;  %v2871_v7 = vld [vmem:[%s3069_s9 + $0x124] ss:$16 sps:$4 sm:$0xff]   ;;  %v2828_v8 = vld [vmem:[%s3069_s9 + $0x28] ss:$16 sps:$4 sm:$0xff]  }
  0x26   : > { %2727 = vmatprep.subr.bf16.mxu1 %v3001_v1  ;;  %1277 = vmatprep.subr.bf16.mxu0 %v3001_v1 }
  0x29   : > { %2743 = vmatpush1.bf16.msra.mxu1 %v2768_v9  ;;  %1278 = vmatpush1.bf16.msra.mxu0 %v2768_v9  ;;  %v2873_v9 = vld [vmem:[%s3069_s9 + $0x120] ss:$16 sps:$4 sm:$0xff]  }
  0x2a   : > { %2728 = vmatprep.subr.bf16.mxu1 %v3001_v1  ;;  %1279 = vmatprep.subr.bf16.mxu0 %v3001_v1 }
  0x2d   : > { %2744 = vmatpush2.bf16.msra.mxu1 %v2769_v10  ;;  %1280 = vmatpush2.bf16.msra.mxu0 %v2769_v10  ;;  %v2832_v10 = vld [vmem:[%s3069_s9 + $0x4c] ss:$16 sps:$4 sm:$0xff]  }
  0x2e   : > { %2729 = vmatprep.subr.bf16.mxu1 %v3001_v1  ;;  %1281 = vmatprep.subr.bf16.mxu0 %v3001_v1 }
  0x31   : > { %2745 = vmatpush2.bf16.msra.mxu1 %v2770_v11  ;;  %1282 = vmatpush2.bf16.msra.mxu0 %v2770_v11  ;;  %v2877_v11 = vld [vmem:[%s3069_s9 + $0x144] ss:$16 sps:$4 sm:$0xff]  }
  0x32   : > { %2730 = vmatprep.subr.bf16.mxu1 %v3001_v1  ;;  %1283 = vmatprep.subr.bf16.mxu0 %v3001_v1 }
  0x35   : > { %2746 = vmatpush2.bf16.msra.mxu1 %v2771_v12  ;;  %1284 = vmatpush2.bf16.msra.mxu0 %v2771_v12  ;;  %v2834_v12 = vld [vmem:[%s3069_s9 + $0x48] ss:$16 sps:$4 sm:$0xff]  }
  0x36   : > { %2731 = vmatprep.subr.bf16.mxu1 %v3001_v1  ;;  %1285 = vmatprep.subr.bf16.mxu0 %v3001_v1 }
  0x39   : > { %2747 = vmatpush2.bf16.msra.mxu1 %v2772_v13  ;;  %1286 = vmatpush2.bf16.msra.mxu0 %v2772_v13  ;;  %v2879_v13 = vld [vmem:[%s3069_s9 + $0x140] ss:$16 sps:$4 sm:$0xff]  }
  0x3a   : > { %2732 = vmatprep.subr.bf16.mxu1 %v3001_v1  ;;  %1287 = vmatprep.subr.bf16.mxu0 %v3001_v1 }
  0x3d   : > { %2748 = vmatpush2.bf16.msra.mxu1 %v2773_v15  ;;  %1288 = vmatpush2.bf16.msra.mxu0 %v2773_v15  ;;  %v2883_v15 = vld [vmem:[%s3069_s9 + $0x164] ss:$16 sps:$4 sm:$0xff]  }
  0x3e   : > { %2733 = vmatprep.subr.bf16.mxu1 %v3001_v1  ;;  %1289 = vmatprep.subr.bf16.mxu0 %v3001_v1 }
  0x41   : > { %2749 = vmatpush2.bf16.msra.mxu1 %v2774_v16  ;;  %1290 = vmatpush2.bf16.msra.mxu0 %v2774_v16  ;;  %v2840_v16 = vld [vmem:[%s3069_s9 + $0x68] ss:$16 sps:$4 sm:$0xff]  }
  0x42   : > { %2734 = vmatprep.subr.bf16.mxu1 %v3001_v1  ;;  %1291 = vmatprep.subr.bf16.mxu0 %v3001_v1 }
  0x45   : > { %2750 = vmatpush2.bf16.msra.mxu1 %v2775_v17  ;;  %1292 = vmatpush2.bf16.msra.mxu0 %v2775_v17  ;;  %v2885_v17 = vld [vmem:[%s3069_s9 + $0x160] ss:$16 sps:$4 sm:$0xff]  }
  0x46   : > { %2735 = vmatprep.subr.bf16.mxu1 %v3001_v1  ;;  %1293 = vmatprep.subr.bf16.mxu0 %v3001_v1 }
  0x49   : > { %2751 = vmatpush2.bf16.msra.mxu1 %v2776_v18  ;;  %1294 = vmatpush2.bf16.msra.mxu0 %v2776_v18  ;;  %v2844_v18 = vld [vmem:[%s3069_s9 + $0x8c] ss:$16 sps:$4 sm:$0xff]  }
  0x4a   : > { %1552 = vmatprep.subr.bf16.mxu1 %v3001_v1 }
  0x4c   : > { %1488 = vmatmul.mubr.bf16.vlgmr.msra.gmra.mxu1 %v2777_v19  ;;  %1296 = vmatmul.mubr.bf16.vlgmr.msra.gmra.mxu0 %v2816_v20  ;;  %v2889_v19 = vld [vmem:[%s3069_s9 + $0x184] ss:$16 sps:$4 sm:$0xff]   ;;  %v2846_v20 = vld [vmem:[%s3069_s9 + $0x88] ss:$16 sps:$4 sm:$0xff]  }
  0x4d   : > { %1553 = vmatpush1.bf16.msra.mxu1 %v2780_v21  ;;  %1495 = vmatprep.mubr.bf16.mxu1 %v2782_v22  ;;  %v2891_v21 = vld [vmem:[%s3069_s9 + $0x180] ss:$16 sps:$4 sm:$0xff]   ;;  %v2850_v22 = vld [vmem:[%s3069_s9 + $0xac] ss:$16 sps:$4 sm:$0xff]  }
  0x4e   : > { %1554 = vmatprep.subr.bf16.mxu1 %v3001_v1  ;;  %1303 = vmatprep.mubr.bf16.mxu0 %v2823_v23  ;;  %v2895_v23 = vld [vmem:[%s3069_s9 + $0x1a4] ss:$16 sps:$4 sm:$0xff]  }
  0x51   : > { %1555 = vmatpush1.bf16.msra.mxu1 %v2781_v24  ;;  %v2944_v24 = vld [vmem:[%s3750_s3 + $0x30] sm:$0xff]  }
  0x52   : > { %1556 = vmatprep.subr.bf16.mxu1 %v3001_v1 }
  0x54   : > { %1496 = vmatmul.mubr.bf16.gmra.mxu1 %v2784_v25  ;;  %1304 = vmatmul.mubr.bf16.gmra.mxu0 %v2825_v28  ;;  %v2852_v25 = vld [vmem:[%s3069_s9 + $0xa8] ss:$16 sps:$4 sm:$0xff]   ;;  %v2901_v28 = vld [vmem:[%s3069_s9 + $0x1c4] ss:$16 sps:$4 sm:$0xff]  }
  0x55   : > { %1557 = vmatpush1.bf16.msra.mxu1 %v2785_v26  ;;  %1503 = vmatprep.mubr.bf16.mxu1 %v2787_v27  ;;  %v2897_v26 = vld [vmem:[%s3069_s9 + $0x1a0] ss:$16 sps:$4 sm:$0xff]   ;;  %v2856_v27 = vld [vmem:[%s3069_s9 + $0xcc] ss:$16 sps:$4 sm:$0xff]  }
  0x56   : > { %1558 = vmatprep.subr.bf16.mxu1 %v3001_v1  ;;  %1311 = vmatprep.mubr.bf16.mxu0 %v2829_v29  ;;  %v2858_v29 = vld [vmem:[%s3069_s9 + $0xc8] ss:$16 sps:$4 sm:$0xff]  }
  0x59   : > { %1559 = vmatpush1.bf16.msra.mxu1 %v2786_v30  ;;  %v2903_v30 = vld [vmem:[%s3069_s9 + $0x1c0] ss:$16 sps:$4 sm:$0xff]  }
  0x5a   : > { %1560 = vmatprep.subr.bf16.mxu1 %v3001_v1 }
  0x5c   : > { %1504 = vmatmul.mubr.bf16.gmra.mxu1 %v2789_v31  ;;  %1312 = vmatmul.mubr.bf16.gmra.mxu0 %v2831_v32  ;;  %v2862_v31 = vld [vmem:[%s3069_s9 + $0xec] ss:$16 sps:$4 sm:$0xff]   ;;  %v2907_v32 = vld [vmem:[%s3069_s9 + $0x1e4] ss:$16 sps:$4 sm:$0xff]  }
  0x5d   : > { %1561 = vmatpush1.bf16.msra.mxu1 %v2790_v33  ;;  %1511 = vmatprep.mubr.bf16.mxu1 %v2792_v34  ;;  %v2864_v33 = vld [vmem:[%s3069_s9 + $0xe8] ss:$16 sps:$4 sm:$0xff]   ;;  %v2909_v34 = vld [vmem:[%s3069_s9 + $0x1e0] ss:$16 sps:$4 sm:$0xff]  }
  0x5e   : > { %1562 = vmatprep.subr.bf16.mxu1 %v3001_v1  ;;  %1319 = vmatprep.mubr.bf16.mxu0 %v2835_v35  ;;  %v2868_v35 = vld [vmem:[%s3069_s9 + $0x10c] ss:$16 sps:$4 sm:$0xff]  }
  0x61   : > { %1563 = vmatpush1.bf16.msra.mxu1 %v2791_v36  ;;  %v2913_v36 = vld [vmem:[%s3069_s9 + $0x204] ss:$16 sps:$4 sm:$0xff]  }
  0x62   : > { %1564 = vmatprep.subr.bf16.mxu1 %v3001_v1 }
  0x64   : > { %1512 = vmatmul.mubr.bf16.gmra.mxu1 %v2794_v37  ;;  %1320 = vmatmul.mubr.bf16.gmra.mxu0 %v2837_v38  ;;  %v2963_v37 = vld [vmem:[%s3750_s3 + $0x28] sm:$0xff]  }
  0x65   : > { %1565 = vmatpush1.bf16.msra.mxu1 %v2795_v39  ;;  %1519 = vmatprep.mubr.bf16.mxu1 %v2797_v40  ;;  %v2870_v38 = vld [vmem:[%s3069_s9 + $0x108] ss:$16 sps:$4 sm:$0xff]   ;;  %v2915_v39 = vld [vmem:[%s3069_s9 + $0x200] ss:$16 sps:$4 sm:$0xff]   ;;  %v2874_v40 = vld [vmem:[%s3069_s9 + $0x12c] ss:$16 sps:$4 sm:$0xff]  }
  0x66   : > { %1566 = vmatprep.subr.bf16.mxu1 %v3001_v1  ;;  %1327 = vmatprep.mubr.bf16.mxu0 %v2841_v41  ;;  %v2919_v41 = vld [vmem:[%s3069_s9 + $0x224] ss:$16 sps:$4 sm:$0xff]  }
  0x69   : > { %1567 = vmatpush1.bf16.msra.mxu1 %v2796_v42  ;;  %v2967_v42 = vld [vmem:[%s3750_s3 + $0x20] sm:$0xff]  }
  0x6a   : > { %1568 = vmatprep.subr.bf16.mxu1 %v3001_v1 }
  0x6c   : > { %1520 = vmatmul.mubr.bf16.gmra.mxu1 %v2799_v43  ;;  %1328 = vmatmul.mubr.bf16.gmra.mxu0 %v2843_v44  ;;  %v2968_v43 = vld [vmem:[%s3750_s3 + $0x18] sm:$0xff]  }
  0x6d   : > { %1569 = vmatpush2.bf16.msra.mxu1 %v2800_v45  ;;  %1527 = vmatprep.mubr.bf16.mxu1 %v2802_v46  ;;  %v2876_v44 = vld [vmem:[%s3069_s9 + $0x128] ss:$16 sps:$4 sm:$0xff]   ;;  %v2921_v45 = vld [vmem:[%s3069_s9 + $0x220] ss:$16 sps:$4 sm:$0xff]   ;;  %v2880_v46 = vld [vmem:[%s3069_s9 + $0x14c] ss:$16 sps:$4 sm:$0xff]  }
  0x6e   : > { %1570 = vmatprep.subr.bf16.mxu1 %v3001_v1  ;;  %1335 = vmatprep.mubr.bf16.mxu0 %v2847_v47  ;;  %v2926_v47 = vld [vmem:[%s3069_s9 + $0x244] ss:$16 sps:$4 sm:$0xff]  }
  0x71   : > { %1571 = vmatpush2.bf16.msra.mxu1 %v2801_v48  ;;  %v2972_v48 = vld [vmem:[%s3750_s3 + $0x10] sm:$0xff]  }
  0x72   : > { %1572 = vmatprep.subr.bf16.mxu1 %v3001_v1 }
  0x74   : > { %1528 = vmatmul.mubr.bf16.gmra.mxu1 %v2804_v49  ;;  %1336 = vmatmul.mubr.bf16.gmra.mxu0 %v2849_v50  ;;  %v2973_v49 = vld [vmem:[%s3750_s3 + $0x8] sm:$0xff]  }
  0x75   : > { %1573 = vmatpush2.bf16.msra.mxu1 %v2805_v51  ;;  %1535 = vmatprep.mubr.bf16.mxu1 %v2807_v52  ;;  %v2882_v50 = vld [vmem:[%s3069_s9 + $0x148] ss:$16 sps:$4 sm:$0xff]   ;;  %v2928_v51 = vld [vmem:[%s3069_s9 + $0x240] ss:$16 sps:$4 sm:$0xff]   ;;  %v2886_v52 = vld [vmem:[%s3069_s9 + $0x16c] ss:$16 sps:$4 sm:$0xff]  }
  0x76   : > { %1574 = vmatprep.subr.bf16.mxu1 %v3001_v1  ;;  %1343 = vmatprep.mubr.bf16.mxu0 %v2853_v53  ;;  %v2932_v53 = vld [vmem:[%s3069_s9 + $0x264] ss:$16 sps:$4 sm:$0xff]  }
  0x79   : > { %1575 = vmatpush2.bf16.msra.mxu1 %v2806_v54  ;;  %v2977_v54 = vld [vmem:[%s3750_s3] sm:$0xff]  }
  0x7a   : > { %1576 = vmatprep.subr.bf16.mxu1 %v3001_v1 }
  0x7c   : > { %1536 = vmatmul.mubr.bf16.gmra.mxu1 %v2809_v55  ;;  %1344 = vmatmul.mubr.bf16.gmra.mxu0 %v2855_v56  ;;  %v2888_v55 = vld [vmem:[%s3069_s9 + $0x168] ss:$16 sps:$4 sm:$0xff]   ;;  %v2934_v56 = vld [vmem:[%s3069_s9 + $0x260] ss:$16 sps:$4 sm:$0xff]  }
  0x7d   : > { %1577 = vmatpush2.bf16.msra.mxu1 %v2810_v57  ;;  %1543 = vmatprep.mubr.bf16.mxu1 %v2812_v58  ;;  %v2892_v57 = vld [vmem:[%s3069_s9 + $0x18c] ss:$16 sps:$4 sm:$0xff]   ;;  %v2938_v58 = vld [vmem:[%s3069_s9 + $0x284] ss:$16 sps:$4 sm:$0xff]  }
  0x7e   : > { %1578 = vmatprep.subr.bf16.mxu1 %v3001_v1  ;;  %1351 = vmatprep.mubr.bf16.mxu0 %v2859_v59  ;;  %v2894_v59 = vld [vmem:[%s3069_s9 + $0x188] ss:$16 sps:$4 sm:$0xff]  }
  0x81   : > { %1579 = vmatpush2.bf16.msra.mxu1 %v2811_v60  ;;  %v2940_v60 = vld [vmem:[%s3069_s9 + $0x280] ss:$16 sps:$4 sm:$0xff]  }
  0x82   : > { %1580 = vmatprep.subr.bf16.mxu1 %v3001_v1 }
  0x84   : > { %1544 = vmatmul.mubr.bf16.gmra.mxu1 %v2814_v61  ;;  %1352 = vmatmul.mubr.bf16.gmra.mxu0 %v2861_v62  ;;  %v2898_v61 = vld [vmem:[%s3069_s9 + $0x1ac] ss:$16 sps:$4 sm:$0xff]   ;;  %v2945_v62 = vld [vmem:[%s3069_s9 + $0x2a4] ss:$16 sps:$4 sm:$0xff]  }
  0x85   : > { %1581 = vmatpush2.bf16.msra.mxu1 %v2815_v63  ;;  %1584 = vmatprep.mubr.bf16.mxu1 %v2822_v0  ;;  %v2900_v63 = vld [vmem:[%s3069_s9 + $0x1a8] ss:$16 sps:$4 sm:$0xff]   ;;  %v2947_v0 = vld [vmem:[%s3069_s9 + $0x2a0] ss:$16 sps:$4 sm:$0xff]  }
  0x86   : > { %1582 = vmatprep.subr.bf16.mxu1 %v3001_v1  ;;  %1359 = vmatprep.mubr.bf16.mxu0 %v2865_v2  ;;  %v2925_v1 = vld [vmem:[%s3750_s3 + $0x38] sm:$0xff]  }
  0x87   : > { %2640 = vmatprep.subr.bf16.mxu0 %v2925_v1  ;;  %v2904_v2 = vld [vmem:[%s3069_s9 + $0x1cc] ss:$16 sps:$4 sm:$0xff]  }
  0x88   : > { %2641 = vmatpush3.bf16.msra.mxu0 %v2925_v1  ;;  %v2922_v1 = vld [vmem:[%s3069_s9 + $0x22c] ss:$16 sps:$4 sm:$0xff]  }
  0x89   : > { %1583 = vmatpush2.bf16.msra.mxu1 %v2819_v3  ;;  %2642 = vmatprep.subr.bf16.mxu0 %v2944_v24  ;;  %v2951_v3 = vld [vmem:[%s3069_s9 + $0x2c4] ss:$16 sps:$4 sm:$0xff]  }
  0x8c   : > { %1585 = vmatmul.mubr.bf16.vlgmr.msra.gmra.mxu1 %v2820_v4  ;;  %1360 = vmatmul.mubr.bf16.gmra.mxu0 %v2867_v5  ;;  %v2906_v4 = vld [vmem:[%s3069_s9 + $0x1c8] ss:$16 sps:$4 sm:$0xff]   ;;  %v2953_v5 = vld [vmem:[%s3069_s9 + $0x2c0] ss:$16 sps:$4 sm:$0xff]  }
  0x8d   : > { %1592 = vmatprep.mubr.bf16.mxu1 %v2826_v6  ;;  %1367 = vmatprep.mubr.bf16.mxu0 %v2871_v7  ;;  %v2910_v6 = vld [vmem:[%s3069_s9 + $0x1ec] ss:$16 sps:$4 sm:$0xff]   ;;  %v2957_v7 = vld [vmem:[%s3069_s9 + $0x2e4] ss:$16 sps:$4 sm:$0xff]  }
  0x8e   : > { %2643 = vmatpush3.bf16.msra.mxu0 %v2944_v24 }
  0x8f   : > { %2644 = vmatprep.subr.bf16.mxu0 %v2963_v37 }
  0x92   : > { %2645 = vmatpush3.bf16.msra.mxu0 %v2963_v37  ;;  %v2937_v37 = vld [vmem:[%s3069_s9 + $0x268] ss:$16 sps:$4 sm:$0xff]  }
  0x93   : > { %2646 = vmatprep.subr.bf16.mxu0 %v2967_v42 }
  0x94   : > { %1593 = vmatmul.mubr.bf16.gmra.mxu1 %v2828_v8  ;;  %1368 = vmatmul.mubr.bf16.gmra.mxu0 %v2873_v9  ;;  %v2912_v8 = vld [vmem:[%s3069_s9 + $0x1e8] ss:$16 sps:$4 sm:$0xff]   ;;  %v2959_v9 = vld [vmem:[%s3069_s9 + $0x2e0] ss:$16 sps:$4 sm:$0xff]  }
  0x95   : > { %1600 = vmatprep.mubr.bf16.mxu1 %v2832_v10  ;;  %1375 = vmatprep.mubr.bf16.mxu0 %v2877_v11  ;;  %v2916_v10 = vld [vmem:[%s3069_s9 + $0x20c] ss:$16 sps:$4 sm:$0xff]   ;;  %v2918_v11 = vld [vmem:[%s3069_s9 + $0x208] ss:$16 sps:$4 sm:$0xff]  }
  0x96   : > { %2647 = vmatpush3.bf16.msra.mxu0 %v2967_v42 }
  0x97   : > { %2648 = vmatprep.subr.bf16.mxu0 %v2968_v43 }
  0x9a   : > { %2649 = vmatpush3.bf16.msra.mxu0 %v2968_v43 }
  0x9b   : > { %2650 = vmatprep.subr.bf16.mxu0 %v2972_v48 }
  0x9c   : > { %1601 = vmatmul.mubr.bf16.gmra.mxu1 %v2834_v12  ;;  %1376 = vmatmul.mubr.bf16.gmra.mxu0 %v2879_v13 }
  0x9d   : > { %1608 = vmatprep.mubr.bf16.mxu1 %v2838_v14  ;;  %1383 = vmatprep.mubr.bf16.mxu0 %v2883_v15 }
  0x9e   : > { %2651 = vmatpush3.bf16.msra.mxu0 %v2972_v48 }
  0x9f   : > { %2652 = vmatprep.subr.bf16.mxu0 %v2973_v49 }
  0xa2   : > { %2653 = vmatpush3.bf16.msra.mxu0 %v2973_v49  ;;  %v2950_v49 = vld [vmem:[%s3069_s9 + $0x2ac] ss:$16 sps:$4 sm:$0xff]  }
  0xa3   : > { %2654 = vmatprep.subr.bf16.mxu0 %v2977_v54 }
  0xa4   : > { %1609 = vmatmul.mubr.bf16.gmra.mxu1 %v2840_v16  ;;  %1384 = vmatmul.mubr.bf16.gmra.mxu0 %v2885_v17  ;;  %v2924_v17 = vld [vmem:[%s3069_s9 + $0x228] ss:$16 sps:$4 sm:$0xff]  }
  0xa5   : > { %1616 = vmatprep.mubr.bf16.mxu1 %v2844_v18  ;;  %1391 = vmatprep.mubr.bf16.mxu0 %v2889_v19  ;;  %v2929_v19 = vld [vmem:[%s3069_s9 + $0x24c] ss:$16 sps:$4 sm:$0xff]  }
  0xa6   : > { %2655 = vmatpush3.bf16.msra.mxu0 %v2977_v54 }
  0xac   : > { %1617 = vmatmul.mubr.bf16.gmra.mxu1 %v2846_v20  ;;  %1392 = vmatmul.mubr.bf16.gmra.mxu0 %v2891_v21 }
  0xad   : > { %1624 = vmatprep.mubr.bf16.mxu1 %v2850_v22  ;;  %1399 = vmatprep.mubr.bf16.mxu0 %v2895_v23 }
  0xb4   : > { %1625 = vmatmul.mubr.bf16.gmra.mxu1 %v2852_v25  ;;  %1400 = vmatmul.mubr.bf16.gmra.mxu0 %v2897_v26 }
  0xb5   : > { %1632 = vmatprep.mubr.bf16.mxu1 %v2856_v27  ;;  %1407 = vmatprep.mubr.bf16.mxu0 %v2901_v28  ;;  %v2931_v27 = vld [vmem:[%s3069_s9 + $0x248] ss:$16 sps:$4 sm:$0xff]  }
  0xbc   : > { %1633 = vmatmul.mubr.bf16.gmra.mxu1 %v2858_v29  ;;  %1408 = vmatmul.mubr.bf16.gmra.mxu0 %v2903_v30  ;;  %v2935_v29 = vld [vmem:[%s3069_s9 + $0x26c] ss:$16 sps:$4 sm:$0xff]  }
  0xbd   : > { %1640 = vmatprep.mubr.bf16.mxu1 %v2862_v31  ;;  %1415 = vmatprep.mubr.bf16.mxu0 %v2907_v32 }
  0xc4   : > { %1641 = vmatmul.mubr.bf16.gmra.mxu1 %v2864_v33  ;;  %1416 = vmatmul.mubr.bf16.gmra.mxu0 %v2909_v34 }
  0xc5   : > { %1648 = vmatprep.mubr.bf16.mxu1 %v2868_v35  ;;  %1423 = vmatprep.mubr.bf16.mxu0 %v2913_v36 }
  0xcc   : > { %1649 = vmatmul.mubr.bf16.gmra.mxu1 %v2870_v38  ;;  %1424 = vmatmul.mubr.bf16.gmra.mxu0 %v2915_v39  ;;  %v2943_v39 = vld [vmem:[%s3069_s9 + $0x28c] ss:$16 sps:$4 sm:$0xff]  }
  0xcd   : > { %1656 = vmatprep.mubr.bf16.mxu1 %v2874_v40  ;;  %1431 = vmatprep.mubr.bf16.mxu0 %v2919_v41 }
  0xd4   : > { %1657 = vmatmul.mubr.bf16.gmra.mxu1 %v2876_v44  ;;  %1432 = vmatmul.mubr.bf16.gmra.mxu0 %v2921_v45 }
  0xd5   : > { %1664 = vmatprep.mubr.bf16.mxu1 %v2880_v46  ;;  %1439 = vmatprep.mubr.bf16.mxu0 %v2926_v47  ;;  %v2941_v47 = vld [vmem:[%s3069_s9 + $0x288] ss:$16 sps:$4 sm:$0xff]  }
  0xdc   : > { %1665 = vmatmul.mubr.bf16.gmra.mxu1 %v2882_v50  ;;  %1440 = vmatmul.mubr.bf16.gmra.mxu0 %v2928_v51 }
  0xdd   : > { %1672 = vmatprep.mubr.bf16.mxu1 %v2886_v52  ;;  %1447 = vmatprep.mubr.bf16.mxu0 %v2932_v53 }
  0xe4   : > { %1673 = vmatmul.mubr.bf16.gmra.mxu1 %v2888_v55  ;;  %1448 = vmatmul.mubr.bf16.gmra.mxu0 %v2934_v56 }
  0xe5   : > { %1680 = vmatprep.mubr.bf16.mxu1 %v2892_v57  ;;  %1455 = vmatprep.mubr.bf16.mxu0 %v2938_v58  ;;  %v2948_v57 = vld [vmem:[%s3069_s9 + $0x2a8] ss:$16 sps:$4 sm:$0xff]  }
  0xec   : > { %1681 = vmatmul.mubr.bf16.gmra.mxu1 %v2894_v59  ;;  %1456 = vmatmul.mubr.bf16.gmra.mxu0 %v2940_v60  ;;  %v2956_v59 = vld [vmem:[%s3069_s9 + $0x2cc] ss:$16 sps:$4 sm:$0xff]  }
  0xed   : > { %1688 = vmatprep.mubr.bf16.mxu1 %v2898_v61  ;;  %1463 = vmatprep.mubr.bf16.mxu0 %v2945_v62 }
  0xf4   : > { %1689 = vmatmul.mubr.bf16.gmra.mxu1 %v2900_v63  ;;  %1464 = vmatmul.mubr.bf16.gmra.mxu0 %v2947_v0 }
  0xf5   : > { %1696 = vmatprep.mubr.bf16.mxu1 %v2904_v2  ;;  %1471 = vmatprep.mubr.bf16.mxu0 %v2951_v3 }
  0xfc   : > { %1697 = vmatmul.mubr.bf16.gmra.mxu1 %v2906_v4  ;;  %1472 = vmatmul.mubr.bf16.gmra.mxu0 %v2953_v5  ;;  %v2954_v4 = vld [vmem:[%s3069_s9 + $0x2c8] ss:$16 sps:$4 sm:$0xff]  }
  0xfd   : > { %1704 = vmatprep.mubr.bf16.mxu1 %v2910_v6  ;;  %1479 = vmatprep.mubr.bf16.mxu0 %v2957_v7  ;;  %v2962_v6 = vld [vmem:[%s3069_s9 + $0x2ec] ss:$16 sps:$4 sm:$0xff]  }
 0x104   : > { %1705 = vmatmul.mubr.bf16.gmra.mxu1 %v2912_v8  ;;  %1480 = vmatmul.mubr.bf16.gmra.mxu0 %v2959_v9 }
 0x105   : > { %1712 = vmatprep.mubr.bf16.mxu1 %v2916_v10 }
 0x10c   : > { %v3315_v12 = vpop.f32.mrf.mxu1  ;;  %1713 = vmatmul.mubr.bf16.gmra.mxu1 %v2918_v11  ;;  %v3317_v13 = vpop.f32.mrf.mxu0 }
 0x10d   : > { %1720 = vmatprep.mubr.bf16.mxu1 %v2922_v1 }
 0x10e   : > { %v1491_v14 = vpop.f32.mrf.mxu1  ;;  %v1299_v15 = vpop.f32.mrf.mxu0 }
 0x10f   : > { %v2960_v15 = vld [vmem:[%s3069_s9 + $0x2e8] ss:$16 sps:$4 sm:$0xff]  }
 0x110   : > { %v3319_v16 = vpop.f32.mrf.mxu1  ;;  %v3322_v18 = vpop.f32.mrf.mxu0 }
 0x112   : > { %v1494_v20 = vpop.f32.mrf.mxu1  ;;  %v1302_v21 = vpop.f32.mrf.mxu0 }
 0x114   : > { %v3325_v22 = vpop.f32.mrf.mxu1  ;;  %1721 = vmatmul.mubr.bf16.gmra.mxu1 %v2924_v17  ;;  %v3327_v23 = vpop.f32.mrf.mxu0 }
 0x115   : > { %1728 = vmatprep.mubr.bf16.mxu1 %v2929_v19  ;;  %v2966_v19 = vld [vmem:[%s3069_s9 + $0x30c] ss:$16 sps:$4 sm:$0xff]  }
 0x116   : > { %v1499_v24 = vpop.f32.mrf.mxu1  ;;  %v1307_v25 = vpop.f32.mrf.mxu0 }
 0x118   : > { %v3329_v26 = vpop.f32.mrf.mxu1  ;;  %v3332_v28 = vpop.f32.mrf.mxu0 }
 0x11a   : > { %v1502_v30 = vpop.f32.mrf.mxu1  ;;  %v1310_v31 = vpop.f32.mrf.mxu0 }
 0x11b   : > { %v2964_v31 = vld [vmem:[%s3069_s9 + $0x308] ss:$16 sps:$4 sm:$0xff]  }
 0x11c   : > { %v3335_v32 = vpop.f32.mrf.mxu1  ;;  %1729 = vmatmul.mubr.bf16.gmra.mxu1 %v2931_v27  ;;  %v3337_v33 = vpop.f32.mrf.mxu0 }
 0x11d   : > { %1736 = vmatprep.mubr.bf16.mxu1 %v2935_v29 }
 0x11e   : > { %v1507_v34 = vpop.f32.mrf.mxu1  ;;  %v1315_v35 = vpop.f32.mrf.mxu0 }
 0x11f   : > { %v2971_v35 = vld [vmem:[%s3069_s9 + $0x32c] ss:$16 sps:$4 sm:$0xff]  }
 0x120   : > { %v3339_v36 = vpop.f32.mrf.mxu1  ;;  %v3342_v38 = vpop.f32.mrf.mxu0 }
 0x122   : > { %v1510_v40 = vpop.f32.mrf.mxu1  ;;  %v1318_v41 = vpop.f32.mrf.mxu0 }
 0x124   : > { %v3345_v42 = vpop.f32.mrf.mxu1  ;;  %1737 = vmatmul.mubr.bf16.gmra.mxu1 %v2937_v37  ;;  %v3347_v43 = vpop.f32.mrf.mxu0  ;;  %v3398_v37 = vld [vmem:[%s3749_s2] ss:$0 sm:$0xff] }
 0x125   : > { %1744 = vmatprep.mubr.bf16.mxu1 %v2943_v39  ;;  %v1298_v41 = vadd.f32 %v3398_v37, %v3317_v13 }
 0x126   : > { %v1515_v44 = vpop.f32.mrf.mxu1  ;;  %v1323_v45 = vpop.f32.mrf.mxu0 }
 0x128   : > { %v3349_v46 = vpop.f32.mrf.mxu1  ;;  %v3352_v48 = vpop.f32.mrf.mxu0 }
 0x12a   : > { %v1518_v50 = vpop.f32.mrf.mxu1  ;;  %v1326_v51 = vpop.f32.mrf.mxu0 }
 0x12c   : > { %v3355_v52 = vpop.f32.mrf.mxu1  ;;  %1745 = vmatmul.mubr.bf16.gmra.mxu1 %v2941_v47  ;;  %v3357_v53 = vpop.f32.mrf.mxu0  ;;  %v1301_v47 = vadd.f32 %v3398_v37, %v3322_v18 }
 0x12d   : > { %1752 = vmatprep.mubr.bf16.mxu1 %v2950_v49 }
 0x12e   : > { %v1523_v54 = vpop.f32.mrf.mxu1  ;;  %v1331_v55 = vpop.f32.mrf.mxu0 }
 0x12f   : > { %v2969_v55 = vld [vmem:[%s3069_s9 + $0x328] ss:$16 sps:$4 sm:$0xff]  }
 0x130   : > { %v3359_v56 = vpop.f32.mrf.mxu1  ;;  %v3362_v58 = vpop.f32.mrf.mxu0 }
 0x132   : > { %v1526_v60 = vpop.f32.mrf.mxu1  ;;  %v1334_v61 = vpop.f32.mrf.mxu0 }
 0x133   : > { %v2976_v60 = vld [vmem:[%s3069_s9 + $0x34c] ss:$16 sps:$4 sm:$0xff]  }
 0x134   : > { %v3365_v62 = vpop.f32.mrf.mxu1  ;;  %1753 = vmatmul.mubr.bf16.gmra.mxu1 %v2948_v57  ;;  %v3367_v63 = vpop.f32.mrf.mxu0 }
 0x135   : > { %1760 = vmatprep.mubr.bf16.mxu1 %v2956_v59 }
 0x136   : > { %v1531_v0 = vpop.f32.mrf.mxu1  ;;  %v1339_v2 = vpop.f32.mrf.mxu0 }
 0x138   : > { %v3369_v3 = vpop.f32.mrf.mxu1  ;;  %v3372_v5 = vpop.f32.mrf.mxu0 }
 0x13a   : > { %v1534_v7 = vpop.f32.mrf.mxu1  ;;  %v1342_v8 = vpop.f32.mrf.mxu0 }
 0x13b   : > { %v1309_v8 = vadd.f32 %v3398_v37, %v3332_v28  ;;  %v1314_v28 = vadd.f32 %v3398_v37, %v3337_v33 }
 0x13c   : > { %v3375_v9 = vpop.f32.mrf.mxu1  ;;  %1761 = vmatmul.mubr.bf16.gmra.mxu1 %v2954_v4  ;;  %v3377_v10 = vpop.f32.mrf.mxu0  ;;  %v1306_v4 = vadd.f32 %v3398_v37, %v3327_v23 }
 0x13d   : > { %1768 = vmatprep.mubr.bf16.mxu1 %v2962_v6 }
 0x13e   : > { %v1539_v11 = vpop.f32.mrf.mxu1  ;;  %v1347_v1 = vpop.f32.mrf.mxu0 }
 0x140   : > { %v3379_v14 = vpop.f32.mrf.mxu1  ;;  %v3382_v17 = vpop.f32.mrf.mxu0 }
 0x142   : > { %v1542_v20 = vpop.f32.mrf.mxu1  ;;  %v1350_v21 = vpop.f32.mrf.mxu0 }
 0x143   : > { %v2974_v20 = vld [vmem:[%s3069_s9 + $0x348] ss:$16 sps:$4 sm:$0xff]  }
 0x144   : > { %v3385_v24 = vpop.f32.mrf.mxu1  ;;  %1769 = vmatmul.mubr.bf16.gmra.mxu1 %v2960_v15  ;;  %v3387_v25 = vpop.f32.mrf.mxu0 }
 0x145   : > { %1776 = vmatprep.mubr.bf16.mxu1 %v2966_v19 }
 0x146   : > { %v1547_v27 = vpop.f32.mrf.mxu1  ;;  %v1355_v29 = vpop.f32.mrf.mxu0 }
 0x147   : > { %v2980_v29 = vld [vmem:[%s3069_s9 + $0x36c] ss:$16 sps:$4 sm:$0xff]  }
 0x148   : > { %v3389_v30 = vpop.f32.mrf.mxu1  ;;  %v3392_v34 = vpop.f32.mrf.mxu0 }
 0x14a   : > { %v1550_v39 = vpop.f32.mrf.mxu1  ;;  %v1358_v40 = vpop.f32.mrf.mxu0 }
 0x14c   : > { %v1586_v44 = vpop.f32.mrf.mxu1  ;;  %1777 = vmatmul.mubr.bf16.gmra.mxu1 %v2964_v31  ;;  %v3402_v45 = vpop.f32.mrf.mxu0 }
 0x14d   : > { %1784 = vmatprep.mubr.bf16.mxu1 %v2971_v35  ;;  %v1587_v51 = vadd.f32 %v1586_v44, %v1298_v41 }
 0x14e   : > { %v1588_v49 = vpop.f32.mrf.mxu1  ;;  %v1363_v50 = vpop.f32.mrf.mxu0 }
 0x14f   : > { %v1841_v0 = vmax.f32 %v1587_v51, 0.0 }
 0x150   : > { %v1589_v54 = vpop.f32.mrf.mxu1  ;;  %v3407_v57 = vpop.f32.mrf.mxu0 }
 0x151   : > { %v1590_v59 = vadd.f32 %v1589_v54, %v1301_v47  ;;  %v1317_v47 = vadd.f32 %v3398_v37, %v3342_v38  ;;  %v1322_v38 = vadd.f32 %v3398_v37, %v3347_v43 }
 0x152   : > { %v1591_v61 = vpop.f32.mrf.mxu1  ;;  %v1366_v13 = vpop.f32.mrf.mxu0 }
 0x153   : > { %v1842_v2 = vmax.f32 %v1590_v59, 0.0  ;;  %v2983_v61 = vld [vmem:[%s3069_s9 + $0x38c] ss:$16 sps:$4 sm:$0xff]  }
 0x154   : > { %v1594_v18 = vpop.f32.mrf.mxu1  ;;  %1785 = vmatmul.mubr.bf16.gmra.mxu1 %v2969_v55  ;;  %v3412_v6 = vpop.f32.mrf.mxu0  ;;  %v2978_v55 = vld [vmem:[%s3069_s9 + $0x368] ss:$16 sps:$4 sm:$0xff]  }
 0x155   : > { %v1905_v7 = vpack.c.bf16 %v1842_v2, %v1841_v0  ;;  %1792 = vmatprep.mubr.bf16.mxu1 %v2976_v60  ;;  %v1595_v15 = vadd.f32 %v1594_v18, %v1306_v4 }
 0x156   : > { %v1596_v11 = vpop.f32.mrf.mxu1  ;;  %v1371_v1 = vpop.f32.mrf.mxu0 }
 0x157   : > { %2656 = vmatprep.mubr.bf16.mxu0 %v1905_v7  ;;  %v1843_v35 = vmax.f32 %v1595_v15, 0.0 }
 0x158   : > { %v1597_v19 = vpop.f32.mrf.mxu1  ;;  %v3417_v21 = vpop.f32.mrf.mxu0 }
 0x159   : > { %v1598_v27 = vadd.f32 %v1597_v19, %v1309_v8  ;;  %v1325_v8 = vadd.f32 %v3398_v37, %v3352_v48  ;;  %v1330_v48 = vadd.f32 %v3398_v37, %v3357_v53 }
 0x15a   : > { %v1599_v23 = vpop.f32.mrf.mxu1  ;;  %v1374_v31 = vpop.f32.mrf.mxu0 }
 0x15b   : > { %v1844_v39 = vmax.f32 %v1598_v27, 0.0  ;;  %v2986_v23 = vld [vmem:[%s3069_s9 + $0x3ac] ss:$16 sps:$4 sm:$0xff]  }
 0x15c   : > { %v1602_v40 = vpop.f32.mrf.mxu1  ;;  %1793 = vmatmul.mubr.bf16.gmra.mxu1 %v2974_v20  ;;  %v3422_v41 = vpop.f32.mrf.mxu0  ;;  %v2981_v20 = vld [vmem:[%s3069_s9 + $0x388] ss:$16 sps:$4 sm:$0xff]  }
 0x15d   : > { %v1906_v44 = vpack.c.bf16 %v1844_v39, %v1843_v35  ;;  %1800 = vmatprep.mubr.bf16.mxu1 %v2980_v29  ;;  %v1603_v51 = vadd.f32 %v1602_v40, %v1314_v28 }
 0x15e   : > { %v1604_v49 = vpop.f32.mrf.mxu1  ;;  %v1379_v50 = vpop.f32.mrf.mxu0 }
 0x15f   : > { %2657 = vmatmul.mubr.bf16.vlgmr.msra.gmra.mxu0 %v1906_v44  ;;  %v1845_v0 = vmax.f32 %v1603_v51, 0.0 }
 0x160   : > { %v1605_v54 = vpop.f32.mrf.mxu1  ;;  %v3427_v59 = vpop.f32.mrf.mxu0 }
 0x161   : > { %v1606_v60 = vadd.f32 %v1605_v54, %v1317_v47  ;;  %v1333_v47 = vadd.f32 %v3398_v37, %v3362_v58  ;;  %v1338_v58 = vadd.f32 %v3398_v37, %v3367_v63 }
 0x162   : > { %v1607_v33 = vpop.f32.mrf.mxu1  ;;  %v1382_v13 = vpop.f32.mrf.mxu0 }
 0x163   : > { %v1846_v2 = vmax.f32 %v1606_v60, 0.0  ;;  %v2989_v33 = vld [vmem:[%s3069_s9 + $0x3cc] ss:$16 sps:$4 sm:$0xff]  }
 0x164   : > { %v1610_v4 = vpop.f32.mrf.mxu1  ;;  %1801 = vmatmul.mubr.bf16.gmra.mxu1 %v2978_v55  ;;  %v3432_v18 = vpop.f32.mrf.mxu0  ;;  %v2984_v55 = vld [vmem:[%s3069_s9 + $0x3a8] ss:$16 sps:$4 sm:$0xff]  }
 0x165   : > { %v1907_v7 = vpack.c.bf16 %v1846_v2, %v1845_v0  ;;  %1808 = vmatprep.mubr.bf16.mxu1 %v2983_v61  ;;  %v1611_v15 = vadd.f32 %v1610_v4, %v1322_v38 }
 0x166   : > { %v1612_v11 = vpop.f32.mrf.mxu1  ;;  %v1387_v1 = vpop.f32.mrf.mxu0 }
 0x167   : > { %2660 = vmatprep.mubr.bf16.mxu0 %v1907_v7  ;;  %v1847_v35 = vmax.f32 %v1611_v15, 0.0 }
 0x168   : > { %v1613_v19 = vpop.f32.mrf.mxu1  ;;  %v3437_v27 = vpop.f32.mrf.mxu0 }
 0x169   : > { %v1614_v29 = vadd.f32 %v1613_v19, %v1325_v8  ;;  %v1341_v8 = vadd.f32 %v3398_v37, %v3372_v5 }
 0x16a   : > { %v1615_v43 = vpop.f32.mrf.mxu1  ;;  %v1390_v31 = vpop.f32.mrf.mxu0 }
 0x16b   : > { %v1848_v39 = vmax.f32 %v1614_v29, 0.0  ;;  %v2992_v43 = vld [vmem:[%s3069_s9 + $0x3ec] ss:$16 sps:$4 sm:$0xff]  }
 0x16c   : > { %v1618_v28 = vpop.f32.mrf.mxu1  ;;  %1809 = vmatmul.mubr.bf16.gmra.mxu1 %v2981_v20  ;;  %v3442_v40 = vpop.f32.mrf.mxu0  ;;  %v2987_v20 = vld [vmem:[%s3069_s9 + $0x3c8] ss:$16 sps:$4 sm:$0xff]  }
 0x16d   : > { %v1908_v44 = vpack.c.bf16 %v1848_v39, %v1847_v35  ;;  %1816 = vmatprep.mubr.bf16.mxu1 %v2986_v23  ;;  %v1619_v51 = vadd.f32 %v1618_v28, %v1330_v48  ;;  %v1346_v48 = vadd.f32 %v3398_v37, %v3377_v10 }
 0x16e   : > { %v1620_v49 = vpop.f32.mrf.mxu1  ;;  %v1395_v50 = vpop.f32.mrf.mxu0 }
 0x16f   : > { %2661 = vmatmul.mubr.bf16.gmra.mxu0 %v1908_v44  ;;  %v1849_v0 = vmax.f32 %v1619_v51, 0.0 }
 0x170   : > { %v1621_v54 = vpop.f32.mrf.mxu1  ;;  %v3447_v60 = vpop.f32.mrf.mxu0 }
 0x171   : > { %v1622_v61 = vadd.f32 %v1621_v54, %v1333_v47  ;;  %v1349_v47 = vadd.f32 %v3398_v37, %v3382_v17 }
 0x172   : > { %v1623_v53 = vpop.f32.mrf.mxu1  ;;  %v1398_v13 = vpop.f32.mrf.mxu0 }
 0x173   : > { %v1850_v2 = vmax.f32 %v1622_v61, 0.0 }
 0x174   : > { %v1626_v38 = vpop.f32.mrf.mxu1  ;;  %1817 = vmatmul.mubr.bf16.gmra.mxu1 %v2984_v55  ;;  %v3452_v4 = vpop.f32.mrf.mxu0  ;;  %v2990_v55 = vld [vmem:[%s3069_s9 + $0x3e8] ss:$16 sps:$4 sm:$0xff]   ;;  %s2426_s9 = sshll.u32 %s3754_s22, 3 }
 0x175   : > { %v1909_v7 = vpack.c.bf16 %v1850_v2, %v1849_v0  ;;  %1824 = vmatprep.mubr.bf16.mxu1 %v2989_v33  ;;  %v1627_v15 = vadd.f32 %v1626_v38, %v1338_v58  ;;  %v1354_v2 = vadd.f32 %v3398_v37, %v3387_v25  ;;  %s3594_s21 = scalar_lea.vmem %s3752_s5, %s2426_s9 }
 0x176   : > { %v1628_v11 = vpop.f32.mrf.mxu1  ;;  %v1403_v1 = vpop.f32.mrf.mxu0 }
 0x177   : > { %2664 = vmatprep.mubr.bf16.mxu0 %v1909_v7  ;;  %v1851_v35 = vmax.f32 %v1627_v15, 0.0  ;;  %v1357_v7 = vadd.f32 %v3398_v37, %v3392_v34  ;;  %v1365_v34 = vadd.f32 %v3398_v37, %v3407_v57  ;;  %v1373_v57 = vadd.f32 %v3398_v37, %v3417_v21 }
 0x178   : > { %v1629_v19 = vpop.f32.mrf.mxu1  ;;  %v3457_v29 = vpop.f32.mrf.mxu0  ;;  %v1381_v21 = vadd.f32 %v3398_v37, %v3427_v59  ;;  %v1389_v59 = vadd.f32 %v3398_v37, %v3437_v27  ;;  %v1397_v27 = vadd.f32 %v3398_v37, %v3447_v60 }
 0x179   : > { %v1630_v23 = vadd.f32 %v1629_v19, %v1341_v8  ;;  %v1405_v60 = vadd.f32 %v3398_v37, %v3457_v29 }
 0x17a   : > { %v1631_v63 = vpop.f32.mrf.mxu1  ;;  %v1406_v31 = vpop.f32.mrf.mxu0 }
 0x17b   : > { %v1852_v39 = vmax.f32 %v1630_v23, 0.0  ;;  %v1362_v31 = vadd.f32 %v3398_v37, %v3402_v45  ;;  %v1370_v45 = vadd.f32 %v3398_v37, %v3412_v6  ;;  %v1378_v6 = vadd.f32 %v3398_v37, %v3422_v41 }
 0x17c   : > { %v1634_v5 = vpop.f32.mrf.mxu1  ;;  %1825 = vmatmul.mubr.bf16.gmra.mxu1 %v2987_v20  ;;  %v3462_v28 = vpop.f32.mrf.mxu0  ;;  %v1386_v41 = vadd.f32 %v3398_v37, %v3432_v18  ;;  %v1394_v18 = vadd.f32 %v3398_v37, %v3442_v40  ;;  %v1402_v40 = vadd.f32 %v3398_v37, %v3452_v4 }
 0x17d   : > { %v1910_v44 = vpack.c.bf16 %v1852_v39, %v1851_v35  ;;  %1832 = vmatprep.mubr.bf16.mxu1 %v2992_v43  ;;  %v1635_v51 = vadd.f32 %v1634_v5, %v1346_v48  ;;  %v1410_v4 = vadd.f32 %v3398_v37, %v3462_v28 }
 0x17e   : > { %v1636_v49 = vpop.f32.mrf.mxu1  ;;  %v1411_v50 = vpop.f32.mrf.mxu0 }
 0x17f   : > { %2665 = vmatmul.mubr.bf16.gmra.mxu0 %v1910_v44  ;;  %v1853_v13 = vmax.f32 %v1635_v51, 0.0 }
 0x180   : > { %v1637_v54 = vpop.f32.mrf.mxu1  ;;  %v3467_v61 = vpop.f32.mrf.mxu0 }
 0x181   : > { %v1638_v33 = vadd.f32 %v1637_v54, %v1349_v47  ;;  %v1413_v29 = vadd.f32 %v3398_v37, %v3467_v61 }
 0x182   : > { %v1639_v53 = vpop.f32.mrf.mxu1  ;;  %v1414_v10 = vpop.f32.mrf.mxu0 }
 0x183   : > { %v1854_v0 = vmax.f32 %v1638_v33, 0.0 }
 0x184   : > { %v1642_v58 = vpop.f32.mrf.mxu1  ;;  %1833 = vmatmul.mubr.bf16.gmra.mxu1 %v2990_v55  ;;  %v3471_v17 = vpop.f32.mrf.mxu0 }
 0x185   : > { %v1911_v38 = vpack.c.bf16 %v1854_v0, %v1853_v13  ;;  %v1643_v1 = vadd.f32 %v1642_v58, %v1354_v2  ;;  %v1418_v28 = vadd.f32 %v3398_v37, %v3471_v17 }
 0x186   : > { %v1644_v8 = vpop.f32.mrf.mxu1  ;;  %v1419_v11 = vpop.f32.mrf.mxu0 }
 0x187   : > { %2668 = vmatprep.mubr.bf16.mxu0 %v1911_v38  ;;  %v1855_v63 = vmax.f32 %v1643_v1, 0.0 }
 0x188   : > { %v1645_v15 = vpop.f32.mrf.mxu1  ;;  %v3475_v19 = vpop.f32.mrf.mxu0 }
 0x189   : > { %v1646_v20 = vadd.f32 %v1645_v15, %v1357_v7  ;;  %v1421_v61 = vadd.f32 %v3398_v37, %v3475_v19 }
 0x18a   : > { %v1647_v23 = vpop.f32.mrf.mxu1  ;;  %v1422_v43 = vpop.f32.mrf.mxu0 }
 0x18b   : > { %v1856_v25 = vmax.f32 %v1646_v20, 0.0 }
 0x18c   : > { %v1650_v35 = vpop.f32.mrf.mxu1  ;;  %v3479_v39 = vpop.f32.mrf.mxu0 }
 0x18d   : > { %v1912_v48 = vpack.c.bf16 %v1856_v25, %v1855_v63  ;;  %v1651_v47 = vadd.f32 %v1650_v35, %v1362_v31  ;;  %v1426_v17 = vadd.f32 %v3398_v37, %v3479_v39 }
 0x18e   : > { %v1652_v5 = vpop.f32.mrf.mxu1  ;;  %v1427_v44 = vpop.f32.mrf.mxu0 }
 0x18f   : > { %2669 = vmatmul.mubr.bf16.gmra.mxu0 %v1912_v48  ;;  %v1857_v33 = vmax.f32 %v1651_v47, 0.0 }
 0x190   : > { %v1653_v49 = vpop.f32.mrf.mxu1  ;;  %v3483_v50 = vpop.f32.mrf.mxu0 }
 0x191   : > { %v1654_v51 = vadd.f32 %v1653_v49, %v1365_v34  ;;  %v1429_v19 = vadd.f32 %v3398_v37, %v3483_v50 }
 0x192   : > { %v1655_v54 = vpop.f32.mrf.mxu1  ;;  %v1430_v55 = vpop.f32.mrf.mxu0 }
 0x193   : > { %v1858_v53 = vmax.f32 %v1654_v51, 0.0 }
 0x194   : > { %v1658_v10 = vpop.f32.mrf.mxu1  ;;  %v3487_v13 = vpop.f32.mrf.mxu0 }
 0x195   : > { %v1913_v0 = vpack.c.bf16 %v1858_v53, %v1857_v33  ;;  %v1659_v38 = vadd.f32 %v1658_v10, %v1370_v45 }
 0x196   : > { %v1660_v2 = vpop.f32.mrf.mxu1  ;;  %v1435_v58 = vpop.f32.mrf.mxu0 }
 0x197   : > { %2672 = vmatprep.mubr.bf16.mxu0 %v1913_v0  ;;  %v1859_v20 = vmax.f32 %v1659_v38, 0.0 }
 0x198   : > { %v1661_v7 = vpop.f32.mrf.mxu1  ;;  %v3491_v8 = vpop.f32.mrf.mxu0 }
 0x199   : > { %v1662_v11 = vadd.f32 %v1661_v7, %v1373_v57  ;;  %v1437_v39 = vadd.f32 %v3398_v37, %v3491_v8 }
 0x19a   : > { %v1663_v1 = vpop.f32.mrf.mxu1  ;;  %v1438_v15 = vpop.f32.mrf.mxu0 }
 0x19b   : > { %v1860_v23 = vmax.f32 %v1662_v11, 0.0 }
 0x19c   : > { %v1666_v43 = vpop.f32.mrf.mxu1  ;;  %v3495_v63 = vpop.f32.mrf.mxu0 }
 0x19d   : > { %v1914_v25 = vpack.c.bf16 %v1860_v23, %v1859_v20  ;;  %v1667_v48 = vadd.f32 %v1666_v43, %v1378_v6 }
 0x19e   : > { %v1668_v31 = vpop.f32.mrf.mxu1  ;;  %v1443_v35 = vpop.f32.mrf.mxu0 }
 0x19f   : > { %2673 = vmatmul.mubr.bf16.gmra.mxu0 %v1914_v25  ;;  %v1861_v51 = vmax.f32 %v1667_v48, 0.0 }
 0x1a0   : > { %v1669_v34 = vpop.f32.mrf.mxu1  ;;  %v3499_v5 = vpop.f32.mrf.mxu0 }
 0x1a1   : > { %v1670_v44 = vadd.f32 %v1669_v34, %v1381_v21 }
 0x1a2   : > { %v1671_v47 = vpop.f32.mrf.mxu1  ;;  %v1446_v49 = vpop.f32.mrf.mxu0 }
 0x1a3   : > { %v1862_v54 = vmax.f32 %v1670_v44, 0.0 }
 0x1a4   : > { %v1674_v55 = vpop.f32.mrf.mxu1  ;;  %v3503_v33 = vpop.f32.mrf.mxu0 }
 0x1a5   : > { %v1915_v53 = vpack.c.bf16 %v1862_v54, %v1861_v51  ;;  %v1675_v0 = vadd.f32 %v1674_v55, %v1386_v41 }
 0x1a6   : > { %v1676_v45 = vpop.f32.mrf.mxu1  ;;  %v1451_v10 = vpop.f32.mrf.mxu0 }
 0x1a7   : > { %2676 = vmatprep.mubr.bf16.mxu0 %v1915_v53  ;;  %v1863_v11 = vmax.f32 %v1675_v0, 0.0 }
 0x1a8   : > { %v1677_v57 = vpop.f32.mrf.mxu1  ;;  %v3507_v2 = vpop.f32.mrf.mxu0 }
 0x1a9   : > { %v1678_v58 = vadd.f32 %v1677_v57, %v1389_v59 }
 0x1aa   : > { %v1679_v38 = vpop.f32.mrf.mxu1  ;;  %v1454_v7 = vpop.f32.mrf.mxu0 }
 0x1ab   : > { %v1864_v1 = vmax.f32 %v1678_v58, 0.0 }
 0x1ac   : > { %v1682_v15 = vpop.f32.mrf.mxu1  ;;  %v3511_v20 = vpop.f32.mrf.mxu0 }
 0x1ad   : > { %v1916_v23 = vpack.c.bf16 %v1864_v1, %v1863_v11  ;;  %v1683_v25 = vadd.f32 %v1682_v15, %v1394_v18 }
 0x1ae   : > { %v1684_v6 = vpop.f32.mrf.mxu1  ;;  %v1459_v43 = vpop.f32.mrf.mxu0 }
 0x1af   : > { %2677 = vmatmul.mubr.bf16.gmra.mxu0 %v1916_v23  ;;  %v1865_v44 = vmax.f32 %v1683_v25, 0.0 }
 0x1b0   : > { %v1685_v21 = vpop.f32.mrf.mxu1  ;;  %v3515_v31 = vpop.f32.mrf.mxu0 }
 0x1b1   : > { %v1686_v35 = vadd.f32 %v1685_v21, %v1397_v27 }
 0x1b2   : > { %v1687_v48 = vpop.f32.mrf.mxu1  ;;  %v1462_v34 = vpop.f32.mrf.mxu0 }
 0x1b3   : > { %v1866_v47 = vmax.f32 %v1686_v35, 0.0 }
 0x1b4   : > { %v1690_v49 = vpop.f32.mrf.mxu1  ;;  %v3519_v51 = vpop.f32.mrf.mxu0 }
 0x1b5   : > { %v1917_v54 = vpack.c.bf16 %v1866_v47, %v1865_v44  ;;  %v1691_v53 = vadd.f32 %v1690_v49, %v1402_v40 }
 0x1b6   : > { %v1692_v41 = vpop.f32.mrf.mxu1  ;;  %v1467_v55 = vpop.f32.mrf.mxu0 }
 0x1b7   : > { %2680 = vmatprep.mubr.bf16.mxu0 %v1917_v54  ;;  %v1867_v58 = vmax.f32 %v1691_v53, 0.0 }
 0x1b8   : > { %v1693_v59 = vpop.f32.mrf.mxu1  ;;  %v3523_v45 = vpop.f32.mrf.mxu0 }
 0x1b9   : > { %v1694_v10 = vadd.f32 %v1693_v59, %v1405_v60 }
 0x1ba   : > { %v1695_v0 = vpop.f32.mrf.mxu1  ;;  %v1470_v57 = vpop.f32.mrf.mxu0 }
 0x1bb   : > { %v1868_v38 = vmax.f32 %v1694_v10, 0.0 }
 0x1bc   : > { %v1698_v7 = vpop.f32.mrf.mxu1  ;;  %v3527_v11 = vpop.f32.mrf.mxu0 }
 0x1bd   : > { %v1918_v1 = vpack.c.bf16 %v1868_v38, %v1867_v58  ;;  %v1699_v23 = vadd.f32 %v1698_v7, %v1410_v4 }
 0x1be   : > { %v1700_v18 = vpop.f32.mrf.mxu1  ;;  %v1475_v15 = vpop.f32.mrf.mxu0 }
 0x1bf   : > { %2681 = vmatmul.mubr.bf16.gmra.mxu0 %v1918_v1  ;;  %v1869_v35 = vmax.f32 %v1699_v23, 0.0  ;;  %v1434_v23 = vadd.f32 %v3398_v37, %v3487_v13  ;;  %v1445_v13 = vadd.f32 %v3398_v37, %v3499_v5 }
 0x1c0   : > { %v1701_v27 = vpop.f32.mrf.mxu1  ;;  %v3531_v6 = vpop.f32.mrf.mxu0 }
 0x1c1   : > { %v1702_v43 = vadd.f32 %v1701_v27, %v1413_v29 }
 0x1c2   : > { %v1703_v25 = vpop.f32.mrf.mxu1  ;;  %v1478_v21 = vpop.f32.mrf.mxu0 }
 0x1c3   : > { %v1870_v48 = vmax.f32 %v1702_v43, 0.0 }
 0x1c4   : > { %v1706_v34 = vpop.f32.mrf.mxu1  ;;  %v3535_v44 = vpop.f32.mrf.mxu0 }
 0x1c5   : > { %v1919_v47 = vpack.c.bf16 %v1870_v48, %v1869_v35  ;;  %v1707_v54 = vadd.f32 %v1706_v34, %v1418_v28 }
 0x1c6   : > { %v1708_v40 = vpop.f32.mrf.mxu1  ;;  %v1483_v49 = vpop.f32.mrf.mxu0 }
 0x1c7   : > { %2684 = vmatprep.mubr.bf16.mxu0 %v1919_v47  ;;  %v1871_v10 = vmax.f32 %v1707_v54, 0.0  ;;  %v1442_v47 = vadd.f32 %v3398_v37, %v3495_v63  ;;  %v1453_v63 = vadd.f32 %v3398_v37, %v3507_v2 }
 0x1c8   : > { %v1709_v60 = vpop.f32.mrf.mxu1  ;;  %v3539_v41 = vpop.f32.mrf.mxu0 }
 0x1c9   : > { %v1710_v55 = vadd.f32 %v1709_v60, %v1421_v61 }
 0x1ca   : > { %v1711_v53 = vpop.f32.mrf.mxu1  ;;  %v1486_v59 = vpop.f32.mrf.mxu0 }
 0x1cb   : > { %v1872_v0 = vmax.f32 %v1710_v55, 0.0 }
 0x1cc   : > { %v1714_v57 = vpop.f32.mrf.mxu1 }
 0x1cd   : > { %v1920_v58 = vpack.c.bf16 %v1872_v0, %v1871_v10  ;;  %v1715_v4 = vadd.f32 %v1714_v57, %v1426_v17  ;;  %v1450_v10 = vadd.f32 %v3398_v37, %v3503_v33  ;;  %v1461_v33 = vadd.f32 %v3398_v37, %v3515_v31 }
 0x1ce   : > { %v1716_v38 = vpop.f32.mrf.mxu1 }
 0x1cf   : > { %2685 = vmatmul.mubr.bf16.gmra.mxu0 %v1920_v58  ;;  %v1873_v18 = vmax.f32 %v1715_v4, 0.0 }
 0x1d0   : > { %v1717_v7 = vpop.f32.mrf.mxu1 }
 0x1d1   : > { %v1718_v1 = vadd.f32 %v1717_v7, %v1429_v19 }
 0x1d2   : > { %v1719_v29 = vpop.f32.mrf.mxu1 }
 0x1d3   : > { %v1874_v15 = vmax.f32 %v1718_v1, 0.0  ;;  %v1458_v1 = vadd.f32 %v3398_v37, %v3511_v20  ;;  %v1469_v20 = vadd.f32 %v3398_v37, %v3523_v45 }
 0x1d4   : > { %v1722_v27 = vpop.f32.mrf.mxu1 }
 0x1d5   : > { %v1921_v43 = vpack.c.bf16 %v1874_v15, %v1873_v18  ;;  %v1723_v21 = vadd.f32 %v1722_v27, %v1434_v23 }
 0x1d6   : > { %v1724_v25 = vpop.f32.mrf.mxu1 }
 0x1d7   : > { %2688 = vmatprep.mubr.bf16.mxu0 %v1921_v43  ;;  %v1875_v28 = vmax.f32 %v1723_v21, 0.0  ;;  %v1466_v21 = vadd.f32 %v3398_v37, %v3519_v51  ;;  %v1477_v51 = vadd.f32 %v3398_v37, %v3531_v6 }
 0x1d8   : > { %v1725_v50 = vpop.f32.mrf.mxu1 }
 0x1d9   : > { %v1726_v35 = vadd.f32 %v1725_v50, %v1437_v39 }
 0x1da   : > { %v1727_v48 = vpop.f32.mrf.mxu1 }
 0x1db   : > { %v1876_v34 = vmax.f32 %v1726_v35, 0.0 }
 0x1dc   : > { %v1730_v61 = vpop.f32.mrf.mxu1 }
 0x1dd   : > { %v1922_v40 = vpack.c.bf16 %v1876_v34, %v1875_v28  ;;  %v1731_v54 = vadd.f32 %v1730_v61, %v1442_v47 }
 0x1de   : > { %v1732_v49 = vpop.f32.mrf.mxu1 }
 0x1df   : > { %2689 = vmatmul.mubr.bf16.gmra.mxu0 %v1922_v40  ;;  %v1877_v53 = vmax.f32 %v1731_v54, 0.0 }
 0x1e0   : > { %v1733_v8 = vpop.f32.mrf.mxu1 }
 0x1e1   : > { %v1734_v60 = vadd.f32 %v1733_v8, %v1445_v13  ;;  %v1474_v13 = vadd.f32 %v3398_v37, %v3527_v11  ;;  %v1485_v11 = vadd.f32 %v3398_v37, %v3539_v41 }
 0x1e2   : > { %v1735_v55 = vpop.f32.mrf.mxu1 }
 0x1e3   : > { %v1878_v59 = vmax.f32 %v1734_v60, 0.0 }
 0x1e4   : > { %v1738_v0 = vpop.f32.mrf.mxu1 }
 0x1e5   : > { %v1923_v17 = vpack.c.bf16 %v1878_v59, %v1877_v53  ;;  %v1739_v58 = vadd.f32 %v1738_v0, %v1450_v10  ;;  %v1482_v0 = vadd.f32 %v3398_v37, %v3535_v44  ;;  %v1493_v44 = vadd.f32 %v3398_v37, %v3319_v16 }
 0x1e6   : > { %v1740_v57 = vpop.f32.mrf.mxu1 }
 0x1e7   : > { %2692 = vmatprep.mubr.bf16.mxu0 %v1923_v17  ;;  %v1879_v4 = vmax.f32 %v1739_v58, 0.0 }
 0x1e8   : > { %v1741_v5 = vpop.f32.mrf.mxu1 }
 0x1e9   : > { %v1742_v19 = vadd.f32 %v1741_v5, %v1453_v63 }
 0x1ea   : > { %v1743_v38 = vpop.f32.mrf.mxu1 }
 0x1eb   : > { %v1880_v7 = vmax.f32 %v1742_v19, 0.0 }
 0x1ec   : > { %v1746_v29 = vpop.f32.mrf.mxu1 }
 0x1ed   : > { %v1924_v18 = vpack.c.bf16 %v1880_v7, %v1879_v4  ;;  %v1747_v23 = vadd.f32 %v1746_v29, %v1458_v1  ;;  %v1490_v1 = vadd.f32 %v3398_v37, %v3315_v12  ;;  %v1501_v12 = vadd.f32 %v3398_v37, %v3329_v26 }
 0x1ee   : > { %v1748_v15 = vpop.f32.mrf.mxu1  ;;  %v1509_v26 = vadd.f32 %v3398_v37, %v3339_v36 }
 0x1ef   : > { %2693 = vmatmul.mubr.bf16.gmra.mxu0 %v1924_v18  ;;  %v1881_v39 = vmax.f32 %v1747_v23, 0.0 }
 0x1f0   : > { %v1749_v2 = vpop.f32.mrf.mxu1 }
 0x1f1   : > { %v1750_v27 = vadd.f32 %v1749_v2, %v1461_v33 }
 0x1f2   : > { %v1751_v43 = vpop.f32.mrf.mxu1 }
 0x1f3   : > { %v1882_v25 = vmax.f32 %v1750_v27, 0.0 }
 0x1f4   : > { %v1754_v50 = vpop.f32.mrf.mxu1 }
 0x1f5   : > { %v1925_v35 = vpack.c.bf16 %v1882_v25, %v1881_v39  ;;  %v1755_v28 = vadd.f32 %v1754_v50, %v1466_v21  ;;  %v1498_v39 = vadd.f32 %v3398_v37, %v3325_v22  ;;  %v3587_v22 = vld [vmem:[%s3751_s4] ss:$0 sm:$0xff] }
 0x1f6   : > { %v1756_v48 = vpop.f32.mrf.mxu1 }
 0x1f7   : > { %2696 = vmatprep.mubr.bf16.mxu0 %v1925_v35  ;;  %v1883_v61 = vmax.f32 %v1755_v28, 0.0 }
 0x1f8   : > { %v1757_v31 = vpop.f32.mrf.mxu1 }
 0x1f9   : > { %v1758_v34 = vadd.f32 %v1757_v31, %v1469_v20 }
 0x1fa   : > { %v1759_v47 = vpop.f32.mrf.mxu1 }
 0x1fb   : > { %v1884_v40 = vmax.f32 %v1758_v34, 0.0  ;;  %v1506_v34 = vadd.f32 %v3398_v37, %v3335_v32 }
 0x1fc   : > { %v1762_v49 = vpop.f32.mrf.mxu1 }
 0x1fd   : > { %v1926_v54 = vpack.c.bf16 %v1884_v40, %v1883_v61  ;;  %v1763_v60 = vadd.f32 %v1762_v49, %v1474_v13 }
 0x1fe   : > { %v1764_v8 = vpop.f32.mrf.mxu1 }
 0x1ff   : > { %2697 = vmatmul.mubr.bf16.gmra.mxu0 %v1926_v54  ;;  %v1885_v59 = vmax.f32 %v1763_v60, 0.0 }
 0x200   : > { %v1765_v45 = vpop.f32.mrf.mxu1 }
 0x201   : > { %v1766_v55 = vadd.f32 %v1765_v45, %v1477_v51 }
 0x202   : > { %v1767_v53 = vpop.f32.mrf.mxu1 }
 0x203   : > { %v1886_v10 = vmax.f32 %v1766_v55, 0.0 }
 0x204   : > { %v1770_v17 = vpop.f32.mrf.mxu1 }
 0x205   : > { %v1927_v63 = vpack.c.bf16 %v1886_v10, %v1885_v59  ;;  %v1771_v58 = vadd.f32 %v1770_v17, %v1482_v0  ;;  %v1514_v10 = vadd.f32 %v3398_v37, %v3345_v42  ;;  %v1522_v42 = vadd.f32 %v3398_v37, %v3355_v52 }
 0x206   : > { %v1772_v57 = vpop.f32.mrf.mxu1 }
 0x207   : > { %2700 = vmatprep.mubr.bf16.mxu0 %v1927_v63  ;;  %v1887_v38 = vmax.f32 %v1771_v58, 0.0  ;;  %v1517_v57 = vadd.f32 %v3398_v37, %v3349_v46 }
 0x208   : > { %v1773_v6 = vpop.f32.mrf.mxu1 }
 0x209   : > { %v1774_v5 = vadd.f32 %v1773_v6, %v1485_v11 }
 0x20a   : > { %v1775_v19 = vpop.f32.mrf.mxu1 }
 0x20b   : > { %v1888_v4 = vmax.f32 %v1774_v5, 0.0 }
 0x20c   : > { %v1778_v7 = vpop.f32.mrf.mxu1 }
 0x20d   : > { %v1928_v29 = vpack.c.bf16 %v1888_v4, %v1887_v38  ;;  %v1779_v33 = vadd.f32 %v1778_v7, %v1490_v1 }
 0x20e   : > { %v1780_v18 = vpop.f32.mrf.mxu1 }
 0x20f   : > { %2701 = vmatmul.mubr.bf16.gmra.mxu0 %v1928_v29  ;;  %v1889_v2 = vmax.f32 %v1779_v33, 0.0  ;;  %v1525_v18 = vadd.f32 %v3398_v37, %v3359_v56 }
 0x210   : > { %v1781_v41 = vpop.f32.mrf.mxu1 }
 0x211   : > { %v1782_v15 = vadd.f32 %v1781_v41, %v1493_v44 }
 0x212   : > { %v1783_v23 = vpop.f32.mrf.mxu1 }
 0x213   : > { %v1890_v27 = vmax.f32 %v1782_v15, 0.0 }
 0x214   : > { %v1786_v43 = vpop.f32.mrf.mxu1 }
 0x215   : > { %v1929_v25 = vpack.c.bf16 %v1890_v27, %v1889_v2  ;;  %v1787_v50 = vadd.f32 %v1786_v43, %v1498_v39 }
 0x216   : > { %v1788_v21 = vpop.f32.mrf.mxu1 }
 0x217   : > { %2704 = vmatprep.mubr.bf16.mxu0 %v1929_v25  ;;  %v1891_v48 = vmax.f32 %v1787_v50, 0.0  ;;  %v1530_v21 = vadd.f32 %v3398_v37, %v3365_v62  ;;  %v1538_v62 = vadd.f32 %v3398_v37, %v3375_v9 }
 0x218   : > { %v1789_v16 = vpop.f32.mrf.mxu1 }
 0x219   : > { %v1790_v35 = vadd.f32 %v1789_v16, %v1501_v12 }
 0x21a   : > { %v1791_v20 = vpop.f32.mrf.mxu1 }
 0x21b   : > { %v1892_v28 = vmax.f32 %v1790_v35, 0.0  ;;  %v1533_v20 = vadd.f32 %v3398_v37, %v3369_v3 }
 0x21c   : > { %v1794_v31 = vpop.f32.mrf.mxu1 }
 0x21d   : > { %v1930_v47 = vpack.c.bf16 %v1892_v28, %v1891_v48  ;;  %v1795_v40 = vadd.f32 %v1794_v31, %v1506_v34 }
 0x21e   : > { %v1796_v61 = vpop.f32.mrf.mxu1 }
 0x21f   : > { %v2658_v13 = vpop.f32.mrf.mxu0  ;;  %2705 = vmatmul.mubr.bf16.gmra.mxu0 %v1930_v47  ;;  %v1893_v60 = vmax.f32 %v1795_v40, 0.0 }
 0x220   : > { %v2051_v32 = vadd.f32 %v2658_v13, %v3587_v22  ;;  %v1797_v49 = vpop.f32.mrf.mxu1 }
 0x221   : > { %v1798_v54 = vadd.f32 %v1797_v49, %v1509_v26  ;;  %v2042_v51 = vpop.f32.mrf.mxu0 }
 0x222   : > { %2299 = vst [vmem:[%s3594_s21 + $0x10] sm:$0xff] %v2051_v32  ;;  %v2043_v8 = vadd.f32 %v3587_v22, %v2042_v51  ;;  %v1799_v36 = vpop.f32.mrf.mxu1  ;;  %v1541_v32 = vadd.f32 %v3398_v37, %v3379_v14 }
 0x223   : > { %v1894_v45 = vmax.f32 %v1798_v54, 0.0  ;;  %v2659_v55 = vpop.f32.mrf.mxu0 }
 0x224   : > { %2297 = vst [vmem:[%s3594_s21] sm:$0xff] %v2043_v8  ;;  %v2054_v53 = vadd.f32 %v2659_v55, %v3587_v22  ;;  %v1802_v59 = vpop.f32.mrf.mxu1 }
 0x225   : > { %v1931_v0 = vpack.c.bf16 %v1894_v45, %v1893_v60  ;;  %v2045_v17 = vpop.f32.mrf.mxu0  ;;  %v1803_v58 = vadd.f32 %v1802_v59, %v1514_v10  ;;  %v1546_v10 = vadd.f32 %v3398_v37, %v3385_v24 }
 0x226   : > { %2300 = vst [vmem:[%s3594_s21 + $0x18] sm:$0xff] %v2054_v53  ;;  %v2046_v63 = vadd.f32 %v3587_v22, %v2045_v17  ;;  %v1804_v11 = vpop.f32.mrf.mxu1 }
 0x227   : > { %2708 = vmatprep.mubr.bf16.mxu0 %v1931_v0  ;;  %v1895_v38 = vmax.f32 %v1803_v58, 0.0 }
 0x228   : > { %2298 = vst [vmem:[%s3594_s21 + $0x8] sm:$0xff] %v2046_v63  ;;  %v1805_v6 = vpop.f32.mrf.mxu1 }
 0x229   : > { %v1806_v5 = vadd.f32 %v1805_v6, %v1517_v57  ;;  %v1549_v57 = vadd.f32 %v3398_v37, %v3389_v30 }
 0x22a   : > { %v1807_v19 = vpop.f32.mrf.mxu1 }
 0x22b   : > { %v1896_v4 = vmax.f32 %v1806_v5, 0.0 }
 0x22c   : > { %v1810_v7 = vpop.f32.mrf.mxu1 }
 0x22d   : > { %v1932_v1 = vpack.c.bf16 %v1896_v4, %v1895_v38  ;;  %v1811_v46 = vadd.f32 %v1810_v7, %v1522_v42 }
 0x22e   : > { %v1812_v29 = vpop.f32.mrf.mxu1 }
 0x22f   : > { %v2662_v44 = vpop.f32.mrf.mxu0  ;;  %2709 = vmatmul.mubr.bf16.gmra.mxu0 %v1932_v1  ;;  %v1897_v52 = vmax.f32 %v1811_v46, 0.0 }
 0x230   : > { %v2067_v33 = vadd.f32 %v2662_v44, %v3587_v22  ;;  %v1813_v41 = vpop.f32.mrf.mxu1 }
 0x231   : > { %v1814_v15 = vadd.f32 %v1813_v41, %v1525_v18  ;;  %v2058_v23 = vpop.f32.mrf.mxu0 }
 0x232   : > { %2303 = vst [vmem:[%s3594_s21 + $0x30] sm:$0xff] %v2067_v33  ;;  %v2059_v2 = vadd.f32 %v3587_v22, %v2058_v23  ;;  %v1815_v27 = vpop.f32.mrf.mxu1 }
 0x233   : > { %v1898_v43 = vmax.f32 %v1814_v15, 0.0  ;;  %v2663_v39 = vpop.f32.mrf.mxu0 }
 0x234   : > { %2301 = vst [vmem:[%s3594_s21 + $0x20] sm:$0xff] %v2059_v2  ;;  %v2070_v56 = vadd.f32 %v2663_v39, %v3587_v22  ;;  %v1818_v25 = vpop.f32.mrf.mxu1 }
 0x235   : > { %v1933_v12 = vpack.c.bf16 %v1898_v43, %v1897_v52  ;;  %v2061_v50 = vpop.f32.mrf.mxu0  ;;  %v1819_v48 = vadd.f32 %v1818_v25, %v1530_v21 }
 0x236   : > { %2304 = vst [vmem:[%s3594_s21 + $0x38] sm:$0xff] %v2070_v56  ;;  %v2062_v16 = vadd.f32 %v3587_v22, %v2061_v50  ;;  %v1820_v35 = vpop.f32.mrf.mxu1 }
 0x237   : > { %2712 = vmatprep.mubr.bf16.mxu0 %v1933_v12  ;;  %v1899_v47 = vmax.f32 %v1819_v48, 0.0 }
 0x238   : > { %2302 = vst [vmem:[%s3594_s21 + $0x28] sm:$0xff] %v2062_v16  ;;  %v1821_v28 = vpop.f32.mrf.mxu1 }
 0x239   : > { %v1822_v31 = vadd.f32 %v1821_v28, %v1533_v20 }
 0x23a   : > { %v1823_v34 = vpop.f32.mrf.mxu1 }
 0x23b   : > { %v1900_v61 = vmax.f32 %v1822_v31, 0.0 }
 0x23c   : > { %v1826_v26 = vpop.f32.mrf.mxu1 }
 0x23d   : > { %v1934_v40 = vpack.c.bf16 %v1900_v61, %v1899_v47  ;;  %v1827_v3 = vadd.f32 %v1826_v26, %v1538_v62 }
 0x23e   : > { %v1828_v13 = vpop.f32.mrf.mxu1 }
 0x23f   : > { %v2666_v49 = vpop.f32.mrf.mxu0  ;;  %2713 = vmatmul.mubr.bf16.gmra.mxu0 %v1934_v40  ;;  %v1901_v9 = vmax.f32 %v1827_v3, 0.0 }
 0x240   : > { %v2083_v54 = vadd.f32 %v2666_v49, %v3587_v22  ;;  %v1829_v51 = vpop.f32.mrf.mxu1 }
 0x241   : > { %v1830_v8 = vadd.f32 %v1829_v51, %v1541_v32  ;;  %v2074_v36 = vpop.f32.mrf.mxu0 }
 0x242   : > { %2307 = vst [vmem:[%s3594_s21 + $0x50] sm:$0xff] %v2083_v54  ;;  %v2075_v60 = vadd.f32 %v3587_v22, %v2074_v36  ;;  %v1831_v45 = vpop.f32.mrf.mxu1 }
 0x243   : > { %v1902_v55 = vmax.f32 %v1830_v8, 0.0  ;;  %v2667_v53 = vpop.f32.mrf.mxu0 }
 0x244   : > { %2305 = vst [vmem:[%s3594_s21 + $0x40] sm:$0xff] %v2075_v60  ;;  %v2086_v14 = vadd.f32 %v2667_v53, %v3587_v22  ;;  %v1834_v59 = vpop.f32.mrf.mxu1 }
 0x245   : > { %v1935_v0 = vpack.c.bf16 %v1902_v55, %v1901_v9  ;;  %v2077_v17 = vpop.f32.mrf.mxu0  ;;  %v1835_v58 = vadd.f32 %v1834_v59, %v1546_v10 }
 0x246   : > { %2308 = vst [vmem:[%s3594_s21 + $0x58] sm:$0xff] %v2086_v14  ;;  %v2078_v63 = vadd.f32 %v3587_v22, %v2077_v17  ;;  %v1836_v11 = vpop.f32.mrf.mxu1 }
 0x247   : > { %2716 = vmatprep.mubr.bf16.mxu0 %v1935_v0  ;;  %v1903_v24 = vmax.f32 %v1835_v58, 0.0 }
 0x248   : > { %2306 = vst [vmem:[%s3594_s21 + $0x48] sm:$0xff] %v2078_v63  ;;  %v1837_v6 = vpop.f32.mrf.mxu1 }
 0x249   : > { %v1838_v5 = vadd.f32 %v1837_v6, %v1549_v57 }
 0x24a   : > { %v1839_v19 = vpop.f32.mrf.mxu1 }
 0x24b   : > { %v1904_v38 = vmax.f32 %v1838_v5, 0.0 }
 0x24d   : > { %v1936_v4 = vpack.c.bf16 %v1904_v38, %v1903_v24 }
 0x24f   : > { %v2670_v7 = vpop.f32.mrf.mxu0  ;;  %2717 = vmatmul.mubr.bf16.gmra.mxu0 %v1936_v4 }
 0x250   : > { %v2099_v42 = vadd.f32 %v2670_v7, %v3587_v22 }
 0x251   : > { %v2090_v1 = vpop.f32.mrf.mxu0 }
 0x252   : > { %2311 = vst [vmem:[%s3594_s21 + $0x70] sm:$0xff] %v2099_v42  ;;  %v2091_v30 = vadd.f32 %v3587_v22, %v2090_v1 }
 0x253   : > { %v2671_v37 = vpop.f32.mrf.mxu0 }
 0x254   : > { %2309 = vst [vmem:[%s3594_s21 + $0x60] sm:$0xff] %v2091_v30  ;;  %v2102_v29 = vadd.f32 %v2671_v37, %v3587_v22 }
 0x255   : > { %v2093_v18 = vpop.f32.mrf.mxu0 }
 0x256   : > { %2312 = vst [vmem:[%s3594_s21 + $0x78] sm:$0xff] %v2102_v29  ;;  %v2094_v46 = vadd.f32 %v3587_v22, %v2093_v18 }
 0x258   : > { %2310 = vst [vmem:[%s3594_s21 + $0x68] sm:$0xff] %v2094_v46 }
 0x25f   : > { %v2674_v44 = vpop.f32.mrf.mxu0 }
 0x260   : > { %v2115_v33 = vadd.f32 %v2674_v44, %v3587_v22 }
 0x261   : > { %v2106_v41 = vpop.f32.mrf.mxu0 }
 0x262   : > { %2315 = vst [vmem:[%s3594_s21 + $0x90] sm:$0xff] %v2115_v33  ;;  %v2107_v15 = vadd.f32 %v3587_v22, %v2106_v41 }
 0x263   : > { %v2675_v23 = vpop.f32.mrf.mxu0 }
 0x264   : > { %2313 = vst [vmem:[%s3594_s21 + $0x80] sm:$0xff] %v2107_v15  ;;  %v2118_v2 = vadd.f32 %v2675_v23, %v3587_v22 }
 0x265   : > { %v2109_v27 = vpop.f32.mrf.mxu0 }
 0x266   : > { %2316 = vst [vmem:[%s3594_s21 + $0x98] sm:$0xff] %v2118_v2  ;;  %v2110_v52 = vadd.f32 %v3587_v22, %v2109_v27 }
 0x268   : > { %2314 = vst [vmem:[%s3594_s21 + $0x88] sm:$0xff] %v2110_v52 }
 0x26f   : > { %v2678_v43 = vpop.f32.mrf.mxu0 }
 0x270   : > { %v2131_v39 = vadd.f32 %v2678_v43, %v3587_v22 }
 0x271   : > { %v2122_v56 = vpop.f32.mrf.mxu0 }
 0x272   : > { %2319 = vst [vmem:[%s3594_s21 + $0xb0] sm:$0xff] %v2131_v39  ;;  %v2123_v25 = vadd.f32 %v3587_v22, %v2122_v56 }
 0x273   : > { %v2679_v21 = vpop.f32.mrf.mxu0 }
 0x274   : > { %2317 = vst [vmem:[%s3594_s21 + $0xa0] sm:$0xff] %v2123_v25  ;;  %v2134_v12 = vadd.f32 %v2679_v21, %v3587_v22 }
 0x275   : > { %v2125_v50 = vpop.f32.mrf.mxu0 }
 0x276   : > { %2320 = vst [vmem:[%s3594_s21 + $0xb8] sm:$0xff] %v2134_v12  ;;  %v2126_v16 = vadd.f32 %v3587_v22, %v2125_v50 }
 0x278   : > { %2318 = vst [vmem:[%s3594_s21 + $0xa8] sm:$0xff] %v2126_v16 }
 0x27f   : > { %v2682_v35 = vpop.f32.mrf.mxu0 }
 0x280   : > { %v2147_v20 = vadd.f32 %v2682_v35, %v3587_v22 }
 0x281   : > { %v2138_v48 = vpop.f32.mrf.mxu0 }
 0x282   : > { %2323 = vst [vmem:[%s3594_s21 + $0xd0] sm:$0xff] %v2147_v20  ;;  %v2139_v28 = vadd.f32 %v3587_v22, %v2138_v48 }
 0x283   : > { %v2683_v31 = vpop.f32.mrf.mxu0 }
 0x284   : > { %2321 = vst [vmem:[%s3594_s21 + $0xc0] sm:$0xff] %v2139_v28  ;;  %v2150_v34 = vadd.f32 %v2683_v31, %v3587_v22 }
 0x285   : > { %v2141_v47 = vpop.f32.mrf.mxu0 }
 0x286   : > { %2324 = vst [vmem:[%s3594_s21 + $0xd8] sm:$0xff] %v2150_v34  ;;  %v2142_v61 = vadd.f32 %v3587_v22, %v2141_v47 }
 0x288   : > { %2322 = vst [vmem:[%s3594_s21 + $0xc8] sm:$0xff] %v2142_v61 }
 0x28f   : > { %v2686_v26 = vpop.f32.mrf.mxu0 }
 0x290   : > { %v2163_v62 = vadd.f32 %v2686_v26, %v3587_v22 }
 0x291   : > { %v2154_v40 = vpop.f32.mrf.mxu0 }
 0x292   : > { %2327 = vst [vmem:[%s3594_s21 + $0xf0] sm:$0xff] %v2163_v62  ;;  %v2155_v13 = vadd.f32 %v3587_v22, %v2154_v40 }
 0x293   : > { %v2687_v32 = vpop.f32.mrf.mxu0 }
 0x294   : > { %2325 = vst [vmem:[%s3594_s21 + $0xe0] sm:$0xff] %v2155_v13  ;;  %v2166_v3 = vadd.f32 %v2687_v32, %v3587_v22 }
 0x295   : > { %v2157_v49 = vpop.f32.mrf.mxu0 }
 0x296   : > { %2328 = vst [vmem:[%s3594_s21 + $0xf8] sm:$0xff] %v2166_v3  ;;  %v2158_v54 = vadd.f32 %v3587_v22, %v2157_v49 }
 0x298   : > { %2326 = vst [vmem:[%s3594_s21 + $0xe8] sm:$0xff] %v2158_v54 }
 0x29f   : > { %v2690_v51 = vpop.f32.mrf.mxu0 }
 0x2a0   : > { %v2179_v8 = vadd.f32 %v2690_v51, %v3587_v22 }
 0x2a1   : > { %v2170_v36 = vpop.f32.mrf.mxu0 }
 0x2a2   : > { %2331 = vst [vmem:[%s3594_s21 + $0x110] sm:$0xff] %v2179_v8  ;;  %v2171_v60 = vadd.f32 %v3587_v22, %v2170_v36 }
 0x2a3   : > { %v2691_v45 = vpop.f32.mrf.mxu0 }
 0x2a4   : > { %2329 = vst [vmem:[%s3594_s21 + $0x100] sm:$0xff] %v2171_v60  ;;  %v2182_v9 = vadd.f32 %v2691_v45, %v3587_v22 }
 0x2a5   : > { %v2173_v55 = vpop.f32.mrf.mxu0 }
 0x2a6   : > { %2332 = vst [vmem:[%s3594_s21 + $0x118] sm:$0xff] %v2182_v9  ;;  %v2174_v53 = vadd.f32 %v3587_v22, %v2173_v55 }
 0x2a8   : > { %2330 = vst [vmem:[%s3594_s21 + $0x108] sm:$0xff] %v2174_v53 }
 0x2af   : > { %v2694_v14 = vpop.f32.mrf.mxu0 }
 0x2b0   : > { %v2195_v59 = vadd.f32 %v2694_v14, %v3587_v22 }
 0x2b1   : > { %v2186_v10 = vpop.f32.mrf.mxu0 }
 0x2b2   : > { %2335 = vst [vmem:[%s3594_s21 + $0x130] sm:$0xff] %v2195_v59  ;;  %v2187_v0 = vadd.f32 %v3587_v22, %v2186_v10 }
 0x2b3   : > { %v2695_v17 = vpop.f32.mrf.mxu0 }
 0x2b4   : > { %2333 = vst [vmem:[%s3594_s21 + $0x120] sm:$0xff] %v2187_v0  ;;  %v2198_v63 = vadd.f32 %v2695_v17, %v3587_v22 }
 0x2b5   : > { %v2189_v11 = vpop.f32.mrf.mxu0 }
 0x2b6   : > { %2336 = vst [vmem:[%s3594_s21 + $0x138] sm:$0xff] %v2198_v63  ;;  %v2190_v57 = vadd.f32 %v3587_v22, %v2189_v11 }
 0x2b8   : > { %2334 = vst [vmem:[%s3594_s21 + $0x128] sm:$0xff] %v2190_v57 }
 0x2bf   : > { %v2698_v58 = vpop.f32.mrf.mxu0 }
 0x2c0   : > { %v2211_v6 = vadd.f32 %v2698_v58, %v3587_v22 }
 0x2c1   : > { %v2202_v5 = vpop.f32.mrf.mxu0 }
 0x2c2   : > { %2339 = vst [vmem:[%s3594_s21 + $0x150] sm:$0xff] %v2211_v6  ;;  %v2203_v19 = vadd.f32 %v3587_v22, %v2202_v5 }
 0x2c3   : > { %v2699_v24 = vpop.f32.mrf.mxu0 }
 0x2c4   : > { %2337 = vst [vmem:[%s3594_s21 + $0x140] sm:$0xff] %v2203_v19  ;;  %v2214_v38 = vadd.f32 %v2699_v24, %v3587_v22 }
 0x2c5   : > { %v2205_v4 = vpop.f32.mrf.mxu0 }
 0x2c6   : > { %2340 = vst [vmem:[%s3594_s21 + $0x158] sm:$0xff] %v2214_v38  ;;  %v2206_v7 = vadd.f32 %v3587_v22, %v2205_v4 }
 0x2c8   : > { %2338 = vst [vmem:[%s3594_s21 + $0x148] sm:$0xff] %v2206_v7 }
 0x2cf   : > { %v2702_v42 = vpop.f32.mrf.mxu0 }
 0x2d0   : > { %v2227_v1 = vadd.f32 %v2702_v42, %v3587_v22 }
 0x2d1   : > { %v2218_v30 = vpop.f32.mrf.mxu0 }
 0x2d2   : > { %2343 = vst [vmem:[%s3594_s21 + $0x170] sm:$0xff] %v2227_v1  ;;  %v2219_v37 = vadd.f32 %v3587_v22, %v2218_v30 }
 0x2d3   : > { %v2703_v29 = vpop.f32.mrf.mxu0 }
 0x2d4   : > { %2341 = vst [vmem:[%s3594_s21 + $0x160] sm:$0xff] %v2219_v37  ;;  %v2230_v18 = vadd.f32 %v2703_v29, %v3587_v22 }
 0x2d5   : > { %v2221_v46 = vpop.f32.mrf.mxu0 }
 0x2d6   : > { %2344 = vst [vmem:[%s3594_s21 + $0x178] sm:$0xff] %v2230_v18  ;;  %v2222_v44 = vadd.f32 %v3587_v22, %v2221_v46 }
 0x2d8   : > { %2342 = vst [vmem:[%s3594_s21 + $0x168] sm:$0xff] %v2222_v44 }
 0x2df   : > { %v2706_v33 = vpop.f32.mrf.mxu0 }
 0x2e0   : > { %v2243_v41 = vadd.f32 %v2706_v33, %v3587_v22 }
 0x2e1   : > { %v2234_v15 = vpop.f32.mrf.mxu0 }
 0x2e2   : > { %2347 = vst [vmem:[%s3594_s21 + $0x190] sm:$0xff] %v2243_v41  ;;  %v2235_v23 = vadd.f32 %v3587_v22, %v2234_v15 }
 0x2e3   : > { %v2707_v2 = vpop.f32.mrf.mxu0 }
 0x2e4   : > { %2345 = vst [vmem:[%s3594_s21 + $0x180] sm:$0xff] %v2235_v23  ;;  %v2246_v27 = vadd.f32 %v2707_v2, %v3587_v22 }
 0x2e5   : > { %v2237_v52 = vpop.f32.mrf.mxu0 }
 0x2e6   : > { %2348 = vst [vmem:[%s3594_s21 + $0x198] sm:$0xff] %v2246_v27  ;;  %v2238_v43 = vadd.f32 %v3587_v22, %v2237_v52 }
 0x2e8   : > { %2346 = vst [vmem:[%s3594_s21 + $0x188] sm:$0xff] %v2238_v43 }
 0x2ef   : > { %v2710_v39 = vpop.f32.mrf.mxu0 }
 0x2f0   : > { %v2259_v56 = vadd.f32 %v2710_v39, %v3587_v22 }
 0x2f1   : > { %v2250_v25 = vpop.f32.mrf.mxu0 }
 0x2f2   : > { %2351 = vst [vmem:[%s3594_s21 + $0x1b0] sm:$0xff] %v2259_v56  ;;  %v2251_v21 = vadd.f32 %v3587_v22, %v2250_v25 }
 0x2f3   : > { %v2711_v12 = vpop.f32.mrf.mxu0 }
 0x2f4   : > { %2349 = vst [vmem:[%s3594_s21 + $0x1a0] sm:$0xff] %v2251_v21  ;;  %v2262_v50 = vadd.f32 %v2711_v12, %v3587_v22 }
 0x2f5   : > { %v2253_v16 = vpop.f32.mrf.mxu0 }
 0x2f6   : > { %2352 = vst [vmem:[%s3594_s21 + $0x1b8] sm:$0xff] %v2262_v50  ;;  %v2254_v35 = vadd.f32 %v3587_v22, %v2253_v16 }
 0x2f8   : > { %2350 = vst [vmem:[%s3594_s21 + $0x1a8] sm:$0xff] %v2254_v35 }
 0x2ff   : > { %v2714_v20 = vpop.f32.mrf.mxu0 }
 0x300   : > { %v2275_v48 = vadd.f32 %v2714_v20, %v3587_v22 }
 0x301   : > { %v2266_v28 = vpop.f32.mrf.mxu0 }
 0x302   : > { %2355 = vst [vmem:[%s3594_s21 + $0x1d0] sm:$0xff] %v2275_v48  ;;  %v2267_v31 = vadd.f32 %v3587_v22, %v2266_v28 }
 0x303   : > { %v2715_v34 = vpop.f32.mrf.mxu0 }
 0x304   : > { %2353 = vst [vmem:[%s3594_s21 + $0x1c0] sm:$0xff] %v2267_v31  ;;  %v2278_v47 = vadd.f32 %v2715_v34, %v3587_v22 }
 0x305   : > { %v2269_v61 = vpop.f32.mrf.mxu0 }
 0x306   : > { %2356 = vst [vmem:[%s3594_s21 + $0x1d8] sm:$0xff] %v2278_v47  ;;  %v2270_v26 = vadd.f32 %v3587_v22, %v2269_v61 }
 0x308   : > { %2354 = vst [vmem:[%s3594_s21 + $0x1c8] sm:$0xff] %v2270_v26 }
 0x30f   : > { %v2718_v62 = vpop.f32.mrf.mxu0 }
 0x310   : > { %v2291_v40 = vadd.f32 %v2718_v62, %v3587_v22 }
 0x311   : > { %v2282_v13 = vpop.f32.mrf.mxu0 }
 0x312   : > { %2359 = vst [vmem:[%s3594_s21 + $0x1f0] sm:$0xff] %v2291_v40  ;;  %v2283_v32 = vadd.f32 %v3587_v22, %v2282_v13 }
 0x313   : > { %v2719_v3 = vpop.f32.mrf.mxu0 }
 0x314   : > { %2357 = vst [vmem:[%s3594_s21 + $0x1e0] sm:$0xff] %v2283_v32  ;;  %v2294_v49 = vadd.f32 %v2719_v3, %v3587_v22 }
 0x315   : > { %v2285_v54 = vpop.f32.mrf.mxu0 }
 0x316   : > { %2360 = vst [vmem:[%s3594_s21 + $0x1f8] sm:$0xff] %v2294_v49  ;;  %v2286_v51 = vadd.f32 %v3587_v22, %v2285_v54 }
 0x318   : > { %2358 = vst [vmem:[%s3594_s21 + $0x1e8] sm:$0xff] %v2286_v51 }
 0x319 PF: > { %s15_s18 = sadd.s32 1, %s2999_s18  }
 0x31a   : > { %p12_p4 = scmp.ge.s32.totalorder %s15_s18, 6  }
 0x31c   :  { %14 = sbr.rel (!%p12_p4) target bundleno = 1 (0x1), region = 70 }

// kernel: outconv_forward.21
= control target key start
LH: loop header
LB: loop body
LE: loop exit
PB: predicated region body
PF: predicated region fallthrough
CT: control target
= control target key end

     0   :  { %v1458_v0 = vmov 0.0   ;;  %vm1459_vm0 = vmmov 0   ;;  %s4110_s1 = inlined_call_operand.vmem [shape: f32[128,128], index: 1, kind: input, shape index: {}]   ;;  %s4111_s0 = inlined_call_operand.vmem [shape: f32[1,2048,128], index: 0, kind: input, shape index: {}]   ;;  %s4112_s2 = inlined_call_operand.vmem [shape: f32[1,128], index: 2, kind: input, shape index: {}]   ;;  %s4113_s3 = inlined_call_operand.vmem [shape: f32[1,2048,128], index: 3, kind: output, shape index: {}]  }
   0x1   :  { %1161 = vmatprep.subr.mxu0 %v1458_v0  ;;  %v547_v1 = vld [vmem:[%s4110_s1 + $0x78] sm:$0xff]  ;;  %v546_v2 = vld [vmem:[%s4110_s1 + $0x70] sm:$0xff]  ;;  %1193 = vmatprep.mubr.msk.f32.mxu0 %vm1459_vm0, %v1458_v0  ;;  %v545_v3 = vld [vmem:[%s4110_s1 + $0x68] sm:$0xff] }
   0x2   :  { %1162 = vmatpush3.msra.mxu0 %v547_v1  ;;  %v544_v4 = vld [vmem:[%s4110_s1 + $0x60] sm:$0xff]  ;;  %v15_v6 = vld [vmem:[%s4111_s0 + $0x8] sm:$0xff]  ;;  %v543_v7 = vld [vmem:[%s4110_s1 + $0x58] sm:$0xff] }
   0x3   :  { %1163 = vmatprep.subr.mxu0 %v1458_v0  ;;  %v14_v5 = vld [vmem:[%s4111_s0] sm:$0xff]  ;;  %v16_v8 = vld [vmem:[%s4111_s0 + $0x10] sm:$0xff]  ;;  %v17_v10 = vld [vmem:[%s4111_s0 + $0x18] sm:$0xff] }
   0x4   :  { %1164 = vmatpush3.msra.mxu0 %v546_v2  ;;  %v270_v9 = vadd.f32 %v15_v6, %v14_v5  ;;  %v542_v11 = vld [vmem:[%s4110_s1 + $0x50] sm:$0xff]  ;;  %v18_v13 = vld [vmem:[%s4111_s0 + $0x20] sm:$0xff]  ;;  %v541_v14 = vld [vmem:[%s4110_s1 + $0x48] sm:$0xff] }
   0x5   :  { %1165 = vmatprep.subr.mxu0 %v1458_v0  ;;  %v19_v16 = vld [vmem:[%s4111_s0 + $0x28] sm:$0xff]  ;;  %v540_v17 = vld [vmem:[%s4110_s1 + $0x40] sm:$0xff]  ;;  %v20_v19 = vld [vmem:[%s4111_s0 + $0x30] sm:$0xff] }
   0x6   :  { %1166 = vmatpush3.msra.mxu0 %v545_v3  ;;  %v271_v12 = vadd.f32 %v270_v9, %v16_v8  ;;  %v539_v20 = vld [vmem:[%s4110_s1 + $0x38] sm:$0xff]  ;;  %v538_v23 = vld [vmem:[%s4110_s1 + $0x30] sm:$0xff]  ;;  %v22_v25 = vld [vmem:[%s4111_s0 + $0x40] sm:$0xff] }
   0x7   :  { %1167 = vmatprep.subr.mxu0 %v1458_v0  ;;  %v21_v22 = vld [vmem:[%s4111_s0 + $0x38] sm:$0xff]  ;;  %v537_v26 = vld [vmem:[%s4110_s1 + $0x28] sm:$0xff]  ;;  %v536_v29 = vld [vmem:[%s4110_s1 + $0x20] sm:$0xff] }
   0x8   :  { %1168 = vmatpush3.msra.mxu0 %v544_v4  ;;  %v272_v15 = vadd.f32 %v271_v12, %v17_v10  ;;  %v23_v28 = vld [vmem:[%s4111_s0 + $0x48] sm:$0xff]  ;;  %v24_v31 = vld [vmem:[%s4111_s0 + $0x50] sm:$0xff]  ;;  %v535_v32 = vld [vmem:[%s4110_s1 + $0x18] sm:$0xff] }
   0x9   :  { %1169 = vmatprep.subr.mxu0 %v1458_v0  ;;  %v25_v34 = vld [vmem:[%s4111_s0 + $0x58] sm:$0xff]  ;;  %v534_v35 = vld [vmem:[%s4110_s1 + $0x10] sm:$0xff]  ;;  %v26_v37 = vld [vmem:[%s4111_s0 + $0x60] sm:$0xff] }
   0xa   :  { %1170 = vmatpush3.msra.mxu0 %v543_v7  ;;  %v273_v18 = vadd.f32 %v272_v15, %v18_v13  ;;  %v533_v38 = vld [vmem:[%s4110_s1 + $0x8] sm:$0xff]  ;;  %v532_v41 = vld [vmem:[%s4110_s1] sm:$0xff]  ;;  %v28_v43 = vld [vmem:[%s4111_s0 + $0x70] sm:$0xff] }
   0xb   :  { %1171 = vmatprep.subr.mxu0 %v1458_v0  ;;  %v27_v40 = vld [vmem:[%s4111_s0 + $0x68] sm:$0xff]  ;;  %v29_v45 = vld [vmem:[%s4111_s0 + $0x78] sm:$0xff]  ;;  %v30_v47 = vld [vmem:[%s4111_s0 + $0x80] sm:$0xff] }
   0xc   :  { %1172 = vmatpush3.msra.mxu0 %v542_v11  ;;  %v274_v21 = vadd.f32 %v273_v18, %v19_v16  ;;  %v31_v49 = vld [vmem:[%s4111_s0 + $0x88] sm:$0xff]  ;;  %v32_v51 = vld [vmem:[%s4111_s0 + $0x90] sm:$0xff]  ;;  %v33_v53 = vld [vmem:[%s4111_s0 + $0x98] sm:$0xff] }
   0xd   :  { %1173 = vmatprep.subr.mxu0 %v1458_v0  ;;  %v34_v55 = vld [vmem:[%s4111_s0 + $0xa0] sm:$0xff]  ;;  %v35_v57 = vld [vmem:[%s4111_s0 + $0xa8] sm:$0xff]  ;;  %v36_v59 = vld [vmem:[%s4111_s0 + $0xb0] sm:$0xff] }
   0xe   :  { %1174 = vmatpush3.msra.mxu0 %v541_v14  ;;  %v275_v24 = vadd.f32 %v274_v21, %v20_v19  ;;  %v37_v61 = vld [vmem:[%s4111_s0 + $0xb8] sm:$0xff]  ;;  %v38_v63 = vld [vmem:[%s4111_s0 + $0xc0] sm:$0xff]  ;;  %v39_v1 = vld [vmem:[%s4111_s0 + $0xc8] sm:$0xff] }
   0xf   :  { %1175 = vmatprep.subr.mxu0 %v1458_v0  ;;  %v40_v3 = vld [vmem:[%s4111_s0 + $0xd0] sm:$0xff]  ;;  %v41_v5 = vld [vmem:[%s4111_s0 + $0xd8] sm:$0xff]  ;;  %v42_v7 = vld [vmem:[%s4111_s0 + $0xe0] sm:$0xff] }
  0x10   :  { %1176 = vmatpush3.msra.mxu0 %v540_v17  ;;  %v276_v27 = vadd.f32 %v275_v24, %v21_v22  ;;  %v43_v9 = vld [vmem:[%s4111_s0 + $0xe8] sm:$0xff]  ;;  %v44_v11 = vld [vmem:[%s4111_s0 + $0xf0] sm:$0xff]  ;;  %v45_v13 = vld [vmem:[%s4111_s0 + $0xf8] sm:$0xff] }
  0x11   :  { %1177 = vmatprep.subr.mxu0 %v1458_v0  ;;  %v46_v15 = vld [vmem:[%s4111_s0 + $0x100] sm:$0xff]  ;;  %v47_v17 = vld [vmem:[%s4111_s0 + $0x108] sm:$0xff]  ;;  %v48_v19 = vld [vmem:[%s4111_s0 + $0x110] sm:$0xff] }
  0x12   :  { %1178 = vmatpush3.msra.mxu0 %v539_v20  ;;  %v277_v30 = vadd.f32 %v276_v27, %v22_v25  ;;  %v49_v21 = vld [vmem:[%s4111_s0 + $0x118] sm:$0xff]  ;;  %v51_v25 = vld [vmem:[%s4111_s0 + $0x128] sm:$0xff]  ;;  %v52_v27 = vld [vmem:[%s4111_s0 + $0x130] sm:$0xff] }
  0x13   :  { %1179 = vmatprep.subr.mxu0 %v1458_v0 }
  0x14   :  { %1180 = vmatpush3.msra.mxu0 %v538_v23  ;;  %v278_v33 = vadd.f32 %v277_v30, %v23_v28  ;;  %v50_v23 = vld [vmem:[%s4111_s0 + $0x120] sm:$0xff] }
  0x15   :  { %1181 = vmatprep.subr.mxu0 %v1458_v0 }
  0x16   :  { %1182 = vmatpush3.msra.mxu0 %v537_v26  ;;  %v279_v36 = vadd.f32 %v278_v33, %v24_v31  ;;  %v54_v31 = vld [vmem:[%s4111_s0 + $0x140] sm:$0xff]  ;;  %v55_v33 = vld [vmem:[%s4111_s0 + $0x148] sm:$0xff] }
  0x17   :  { %1183 = vmatprep.subr.mxu0 %v1458_v0 }
  0x18   :  { %1184 = vmatpush3.msra.mxu0 %v536_v29  ;;  %v280_v39 = vadd.f32 %v279_v36, %v25_v34  ;;  %v53_v29 = vld [vmem:[%s4111_s0 + $0x138] sm:$0xff] }
  0x19   :  { %1185 = vmatprep.subr.mxu0 %v1458_v0 }
  0x1a   :  { %1186 = vmatpush3.msra.mxu0 %v535_v32  ;;  %v281_v42 = vadd.f32 %v280_v39, %v26_v37  ;;  %v57_v37 = vld [vmem:[%s4111_s0 + $0x158] sm:$0xff]  ;;  %v58_v39 = vld [vmem:[%s4111_s0 + $0x160] sm:$0xff] }
  0x1b   :  { %1187 = vmatprep.subr.mxu0 %v1458_v0 }
  0x1c   :  { %1188 = vmatpush3.msra.mxu0 %v534_v35  ;;  %v282_v44 = vadd.f32 %v281_v42, %v27_v40  ;;  %v56_v35 = vld [vmem:[%s4111_s0 + $0x150] sm:$0xff] }
  0x1d   :  { %1189 = vmatprep.subr.mxu0 %v1458_v0 }
  0x1e   :  { %1190 = vmatpush3.msra.mxu0 %v533_v38  ;;  %v283_v46 = vadd.f32 %v282_v44, %v28_v43  ;;  %v60_v43 = vld [vmem:[%s4111_s0 + $0x170] sm:$0xff] }
  0x1f   :  { %1191 = vmatprep.subr.mxu0 %v1458_v0 }
  0x20   :  { %1192 = vmatpush3.msra.mxu0 %v532_v41  ;;  %v284_v48 = vadd.f32 %v283_v46, %v29_v45  ;;  %v59_v41 = vld [vmem:[%s4111_s0 + $0x168] sm:$0xff]  ;;  %v61_v45 = vld [vmem:[%s4111_s0 + $0x178] sm:$0xff] }
  0x22   :  { %v285_v50 = vadd.f32 %v284_v48, %v30_v47  ;;  %v62_v47 = vld [vmem:[%s4111_s0 + $0x180] sm:$0xff] }
  0x24   :  { %v286_v52 = vadd.f32 %v285_v50, %v31_v49  ;;  %v63_v49 = vld [vmem:[%s4111_s0 + $0x188] sm:$0xff] }
  0x26   :  { %v287_v54 = vadd.f32 %v286_v52, %v32_v51  ;;  %v64_v51 = vld [vmem:[%s4111_s0 + $0x190] sm:$0xff] }
  0x28   :  { %v288_v56 = vadd.f32 %v287_v54, %v33_v53  ;;  %v65_v53 = vld [vmem:[%s4111_s0 + $0x198] sm:$0xff] }
  0x2a   :  { %v289_v58 = vadd.f32 %v288_v56, %v34_v55  ;;  %v66_v55 = vld [vmem:[%s4111_s0 + $0x1a0] sm:$0xff] }
  0x2c   :  { %v290_v60 = vadd.f32 %v289_v58, %v35_v57  ;;  %v67_v57 = vld [vmem:[%s4111_s0 + $0x1a8] sm:$0xff] }
  0x2e   :  { %v291_v62 = vadd.f32 %v290_v60, %v36_v59  ;;  %v68_v59 = vld [vmem:[%s4111_s0 + $0x1b0] sm:$0xff] }
  0x30   :  { %v292_v0 = vadd.f32 %v291_v62, %v37_v61  ;;  %v69_v61 = vld [vmem:[%s4111_s0 + $0x1b8] sm:$0xff] }
  0x32   :  { %v293_v2 = vadd.f32 %v292_v0, %v38_v63  ;;  %v70_v63 = vld [vmem:[%s4111_s0 + $0x1c0] sm:$0xff] }
  0x34   :  { %v294_v4 = vadd.f32 %v293_v2, %v39_v1  ;;  %v71_v1 = vld [vmem:[%s4111_s0 + $0x1c8] sm:$0xff] }
  0x36   :  { %v295_v6 = vadd.f32 %v294_v4, %v40_v3  ;;  %v72_v3 = vld [vmem:[%s4111_s0 + $0x1d0] sm:$0xff] }
  0x38   :  { %v296_v8 = vadd.f32 %v295_v6, %v41_v5  ;;  %v73_v5 = vld [vmem:[%s4111_s0 + $0x1d8] sm:$0xff] }
  0x3a   :  { %v297_v10 = vadd.f32 %v296_v8, %v42_v7  ;;  %v74_v7 = vld [vmem:[%s4111_s0 + $0x1e0] sm:$0xff] }
  0x3c   :  { %v298_v12 = vadd.f32 %v297_v10, %v43_v9  ;;  %v75_v9 = vld [vmem:[%s4111_s0 + $0x1e8] sm:$0xff] }
  0x3e   :  { %v299_v14 = vadd.f32 %v298_v12, %v44_v11  ;;  %v76_v11 = vld [vmem:[%s4111_s0 + $0x1f0] sm:$0xff] }
  0x40   :  { %v300_v16 = vadd.f32 %v299_v14, %v45_v13  ;;  %v77_v13 = vld [vmem:[%s4111_s0 + $0x1f8] sm:$0xff] }
  0x42   :  { %v301_v18 = vadd.f32 %v300_v16, %v46_v15  ;;  %v78_v15 = vld [vmem:[%s4111_s0 + $0x200] sm:$0xff] }
  0x44   :  { %v302_v20 = vadd.f32 %v301_v18, %v47_v17  ;;  %v79_v17 = vld [vmem:[%s4111_s0 + $0x208] sm:$0xff] }
  0x46   :  { %v303_v22 = vadd.f32 %v302_v20, %v48_v19  ;;  %v80_v19 = vld [vmem:[%s4111_s0 + $0x210] sm:$0xff] }
  0x48   :  { %v304_v24 = vadd.f32 %v303_v22, %v49_v21  ;;  %v81_v21 = vld [vmem:[%s4111_s0 + $0x218] sm:$0xff] }
  0x4a   :  { %v305_v26 = vadd.f32 %v304_v24, %v50_v23  ;;  %v82_v23 = vld [vmem:[%s4111_s0 + $0x220] sm:$0xff] }
  0x4c   :  { %v306_v28 = vadd.f32 %v305_v26, %v51_v25  ;;  %v83_v25 = vld [vmem:[%s4111_s0 + $0x228] sm:$0xff] }
  0x4e   :  { %v307_v30 = vadd.f32 %v306_v28, %v52_v27  ;;  %v84_v27 = vld [vmem:[%s4111_s0 + $0x230] sm:$0xff] }
  0x50   :  { %v308_v32 = vadd.f32 %v307_v30, %v53_v29  ;;  %v85_v29 = vld [vmem:[%s4111_s0 + $0x238] sm:$0xff] }
  0x52   :  { %v309_v34 = vadd.f32 %v308_v32, %v54_v31  ;;  %v86_v31 = vld [vmem:[%s4111_s0 + $0x240] sm:$0xff] }
  0x54   :  { %v310_v36 = vadd.f32 %v309_v34, %v55_v33  ;;  %v87_v33 = vld [vmem:[%s4111_s0 + $0x248] sm:$0xff] }
  0x56   :  { %v311_v38 = vadd.f32 %v310_v36, %v56_v35  ;;  %v88_v35 = vld [vmem:[%s4111_s0 + $0x250] sm:$0xff] }
  0x58   :  { %v312_v40 = vadd.f32 %v311_v38, %v57_v37  ;;  %v89_v37 = vld [vmem:[%s4111_s0 + $0x258] sm:$0xff] }
  0x5a   :  { %v313_v42 = vadd.f32 %v312_v40, %v58_v39  ;;  %v90_v39 = vld [vmem:[%s4111_s0 + $0x260] sm:$0xff] }
  0x5c   :  { %v314_v44 = vadd.f32 %v313_v42, %v59_v41  ;;  %v91_v41 = vld [vmem:[%s4111_s0 + $0x268] sm:$0xff] }
  0x5e   :  { %v315_v46 = vadd.f32 %v314_v44, %v60_v43  ;;  %v92_v43 = vld [vmem:[%s4111_s0 + $0x270] sm:$0xff] }
  0x60   :  { %v316_v48 = vadd.f32 %v315_v46, %v61_v45  ;;  %v93_v45 = vld [vmem:[%s4111_s0 + $0x278] sm:$0xff] }
  0x62   :  { %v317_v50 = vadd.f32 %v316_v48, %v62_v47  ;;  %v94_v47 = vld [vmem:[%s4111_s0 + $0x280] sm:$0xff] }
  0x64   :  { %v318_v52 = vadd.f32 %v317_v50, %v63_v49  ;;  %v95_v49 = vld [vmem:[%s4111_s0 + $0x288] sm:$0xff] }
  0x66   :  { %v319_v54 = vadd.f32 %v318_v52, %v64_v51  ;;  %v96_v51 = vld [vmem:[%s4111_s0 + $0x290] sm:$0xff] }
  0x68   :  { %v320_v56 = vadd.f32 %v319_v54, %v65_v53  ;;  %v97_v53 = vld [vmem:[%s4111_s0 + $0x298] sm:$0xff] }
  0x6a   :  { %v321_v58 = vadd.f32 %v320_v56, %v66_v55  ;;  %v98_v55 = vld [vmem:[%s4111_s0 + $0x2a0] sm:$0xff] }
  0x6c   :  { %v322_v60 = vadd.f32 %v321_v58, %v67_v57  ;;  %v99_v57 = vld [vmem:[%s4111_s0 + $0x2a8] sm:$0xff] }
  0x6e   :  { %v323_v62 = vadd.f32 %v322_v60, %v68_v59  ;;  %v100_v59 = vld [vmem:[%s4111_s0 + $0x2b0] sm:$0xff] }
  0x70   :  { %v324_v0 = vadd.f32 %v323_v62, %v69_v61  ;;  %v101_v61 = vld [vmem:[%s4111_s0 + $0x2b8] sm:$0xff] }
  0x72   :  { %v325_v2 = vadd.f32 %v324_v0, %v70_v63  ;;  %v102_v63 = vld [vmem:[%s4111_s0 + $0x2c0] sm:$0xff] }
  0x74   :  { %v326_v4 = vadd.f32 %v325_v2, %v71_v1  ;;  %v103_v1 = vld [vmem:[%s4111_s0 + $0x2c8] sm:$0xff] }
  0x76   :  { %v327_v6 = vadd.f32 %v326_v4, %v72_v3  ;;  %v104_v3 = vld [vmem:[%s4111_s0 + $0x2d0] sm:$0xff] }
  0x78   :  { %v328_v8 = vadd.f32 %v327_v6, %v73_v5  ;;  %v105_v5 = vld [vmem:[%s4111_s0 + $0x2d8] sm:$0xff] }
  0x7a   :  { %v329_v10 = vadd.f32 %v328_v8, %v74_v7  ;;  %v106_v7 = vld [vmem:[%s4111_s0 + $0x2e0] sm:$0xff] }
  0x7c   :  { %v330_v12 = vadd.f32 %v329_v10, %v75_v9  ;;  %v107_v9 = vld [vmem:[%s4111_s0 + $0x2e8] sm:$0xff] }
  0x7e   :  { %v331_v14 = vadd.f32 %v330_v12, %v76_v11  ;;  %v108_v11 = vld [vmem:[%s4111_s0 + $0x2f0] sm:$0xff] }
  0x80   :  { %v332_v16 = vadd.f32 %v331_v14, %v77_v13  ;;  %v109_v13 = vld [vmem:[%s4111_s0 + $0x2f8] sm:$0xff] }
  0x82   :  { %v333_v18 = vadd.f32 %v332_v16, %v78_v15  ;;  %v110_v15 = vld [vmem:[%s4111_s0 + $0x300] sm:$0xff] }
  0x84   :  { %v334_v20 = vadd.f32 %v333_v18, %v79_v17  ;;  %v111_v17 = vld [vmem:[%s4111_s0 + $0x308] sm:$0xff] }
  0x86   :  { %v335_v22 = vadd.f32 %v334_v20, %v80_v19  ;;  %v112_v19 = vld [vmem:[%s4111_s0 + $0x310] sm:$0xff] }
  0x88   :  { %v336_v24 = vadd.f32 %v335_v22, %v81_v21  ;;  %v113_v21 = vld [vmem:[%s4111_s0 + $0x318] sm:$0xff] }
  0x8a   :  { %v337_v26 = vadd.f32 %v336_v24, %v82_v23  ;;  %v114_v23 = vld [vmem:[%s4111_s0 + $0x320] sm:$0xff] }
  0x8c   :  { %v338_v28 = vadd.f32 %v337_v26, %v83_v25  ;;  %v115_v25 = vld [vmem:[%s4111_s0 + $0x328] sm:$0xff] }
  0x8e   :  { %v339_v30 = vadd.f32 %v338_v28, %v84_v27  ;;  %v116_v27 = vld [vmem:[%s4111_s0 + $0x330] sm:$0xff] }
  0x90   :  { %v340_v32 = vadd.f32 %v339_v30, %v85_v29  ;;  %v117_v29 = vld [vmem:[%s4111_s0 + $0x338] sm:$0xff] }
  0x92   :  { %v341_v34 = vadd.f32 %v340_v32, %v86_v31  ;;  %v118_v31 = vld [vmem:[%s4111_s0 + $0x340] sm:$0xff] }
  0x94   :  { %v342_v36 = vadd.f32 %v341_v34, %v87_v33  ;;  %v119_v33 = vld [vmem:[%s4111_s0 + $0x348] sm:$0xff] }
  0x96   :  { %v343_v38 = vadd.f32 %v342_v36, %v88_v35  ;;  %v120_v35 = vld [vmem:[%s4111_s0 + $0x350] sm:$0xff] }
  0x98   :  { %v344_v40 = vadd.f32 %v343_v38, %v89_v37  ;;  %v121_v37 = vld [vmem:[%s4111_s0 + $0x358] sm:$0xff] }
  0x9a   :  { %v345_v42 = vadd.f32 %v344_v40, %v90_v39  ;;  %v122_v39 = vld [vmem:[%s4111_s0 + $0x360] sm:$0xff] }
  0x9c   :  { %v346_v44 = vadd.f32 %v345_v42, %v91_v41  ;;  %v123_v41 = vld [vmem:[%s4111_s0 + $0x368] sm:$0xff] }
  0x9e   :  { %v347_v46 = vadd.f32 %v346_v44, %v92_v43  ;;  %v124_v43 = vld [vmem:[%s4111_s0 + $0x370] sm:$0xff] }
  0xa0   :  { %v348_v48 = vadd.f32 %v347_v46, %v93_v45  ;;  %v125_v45 = vld [vmem:[%s4111_s0 + $0x378] sm:$0xff] }
  0xa2   :  { %v349_v50 = vadd.f32 %v348_v48, %v94_v47  ;;  %v126_v47 = vld [vmem:[%s4111_s0 + $0x380] sm:$0xff] }
  0xa4   :  { %v350_v52 = vadd.f32 %v349_v50, %v95_v49  ;;  %v127_v49 = vld [vmem:[%s4111_s0 + $0x388] sm:$0xff] }
  0xa6   :  { %v351_v54 = vadd.f32 %v350_v52, %v96_v51  ;;  %v128_v51 = vld [vmem:[%s4111_s0 + $0x390] sm:$0xff] }
  0xa8   :  { %v352_v56 = vadd.f32 %v351_v54, %v97_v53  ;;  %v129_v53 = vld [vmem:[%s4111_s0 + $0x398] sm:$0xff] }
  0xaa   :  { %v353_v58 = vadd.f32 %v352_v56, %v98_v55  ;;  %v130_v55 = vld [vmem:[%s4111_s0 + $0x3a0] sm:$0xff] }
  0xac   :  { %v354_v60 = vadd.f32 %v353_v58, %v99_v57  ;;  %v131_v57 = vld [vmem:[%s4111_s0 + $0x3a8] sm:$0xff] }
  0xae   :  { %v355_v62 = vadd.f32 %v354_v60, %v100_v59  ;;  %v132_v59 = vld [vmem:[%s4111_s0 + $0x3b0] sm:$0xff] }
  0xb0   :  { %v356_v0 = vadd.f32 %v355_v62, %v101_v61  ;;  %v133_v61 = vld [vmem:[%s4111_s0 + $0x3b8] sm:$0xff] }
  0xb2   :  { %v357_v2 = vadd.f32 %v356_v0, %v102_v63  ;;  %v134_v63 = vld [vmem:[%s4111_s0 + $0x3c0] sm:$0xff] }
  0xb4   :  { %v358_v4 = vadd.f32 %v357_v2, %v103_v1  ;;  %v135_v1 = vld [vmem:[%s4111_s0 + $0x3c8] sm:$0xff] }
  0xb6   :  { %v359_v6 = vadd.f32 %v358_v4, %v104_v3  ;;  %v136_v3 = vld [vmem:[%s4111_s0 + $0x3d0] sm:$0xff] }
  0xb8   :  { %v360_v8 = vadd.f32 %v359_v6, %v105_v5  ;;  %v137_v5 = vld [vmem:[%s4111_s0 + $0x3d8] sm:$0xff] }
  0xba   :  { %v361_v10 = vadd.f32 %v360_v8, %v106_v7  ;;  %v138_v7 = vld [vmem:[%s4111_s0 + $0x3e0] sm:$0xff] }
  0xbc   :  { %v362_v12 = vadd.f32 %v361_v10, %v107_v9  ;;  %v139_v9 = vld [vmem:[%s4111_s0 + $0x3e8] sm:$0xff] }
  0xbe   :  { %v363_v14 = vadd.f32 %v362_v12, %v108_v11  ;;  %v140_v11 = vld [vmem:[%s4111_s0 + $0x3f0] sm:$0xff] }
  0xc0   :  { %v364_v16 = vadd.f32 %v363_v14, %v109_v13  ;;  %v141_v13 = vld [vmem:[%s4111_s0 + $0x3f8] sm:$0xff] }
  0xc2   :  { %v365_v18 = vadd.f32 %v364_v16, %v110_v15  ;;  %v142_v15 = vld [vmem:[%s4111_s0 + $0x400] sm:$0xff] }
  0xc4   :  { %v366_v20 = vadd.f32 %v365_v18, %v111_v17  ;;  %v143_v17 = vld [vmem:[%s4111_s0 + $0x408] sm:$0xff] }
  0xc6   :  { %v367_v22 = vadd.f32 %v366_v20, %v112_v19  ;;  %v144_v19 = vld [vmem:[%s4111_s0 + $0x410] sm:$0xff] }
  0xc8   :  { %v368_v24 = vadd.f32 %v367_v22, %v113_v21  ;;  %v145_v21 = vld [vmem:[%s4111_s0 + $0x418] sm:$0xff] }
  0xca   :  { %v369_v26 = vadd.f32 %v368_v24, %v114_v23  ;;  %v146_v23 = vld [vmem:[%s4111_s0 + $0x420] sm:$0xff] }
  0xcc   :  { %v370_v28 = vadd.f32 %v369_v26, %v115_v25  ;;  %v147_v25 = vld [vmem:[%s4111_s0 + $0x428] sm:$0xff] }
  0xce   :  { %v371_v30 = vadd.f32 %v370_v28, %v116_v27  ;;  %v148_v27 = vld [vmem:[%s4111_s0 + $0x430] sm:$0xff] }
  0xd0   :  { %v372_v32 = vadd.f32 %v371_v30, %v117_v29  ;;  %v149_v29 = vld [vmem:[%s4111_s0 + $0x438] sm:$0xff] }
  0xd2   :  { %v373_v34 = vadd.f32 %v372_v32, %v118_v31  ;;  %v150_v31 = vld [vmem:[%s4111_s0 + $0x440] sm:$0xff] }
  0xd4   :  { %v374_v36 = vadd.f32 %v373_v34, %v119_v33  ;;  %v151_v33 = vld [vmem:[%s4111_s0 + $0x448] sm:$0xff] }
  0xd6   :  { %v375_v38 = vadd.f32 %v374_v36, %v120_v35  ;;  %v152_v35 = vld [vmem:[%s4111_s0 + $0x450] sm:$0xff] }
  0xd8   :  { %v376_v40 = vadd.f32 %v375_v38, %v121_v37  ;;  %v153_v37 = vld [vmem:[%s4111_s0 + $0x458] sm:$0xff] }
  0xda   :  { %v377_v42 = vadd.f32 %v376_v40, %v122_v39  ;;  %v154_v39 = vld [vmem:[%s4111_s0 + $0x460] sm:$0xff] }
  0xdc   :  { %v378_v44 = vadd.f32 %v377_v42, %v123_v41  ;;  %v155_v41 = vld [vmem:[%s4111_s0 + $0x468] sm:$0xff] }
  0xde   :  { %v379_v46 = vadd.f32 %v378_v44, %v124_v43  ;;  %v156_v43 = vld [vmem:[%s4111_s0 + $0x470] sm:$0xff] }
  0xe0   :  { %v380_v48 = vadd.f32 %v379_v46, %v125_v45  ;;  %v157_v45 = vld [vmem:[%s4111_s0 + $0x478] sm:$0xff] }
  0xe2   :  { %v381_v50 = vadd.f32 %v380_v48, %v126_v47  ;;  %v158_v47 = vld [vmem:[%s4111_s0 + $0x480] sm:$0xff] }
  0xe4   :  { %v382_v52 = vadd.f32 %v381_v50, %v127_v49  ;;  %v159_v49 = vld [vmem:[%s4111_s0 + $0x488] sm:$0xff] }
  0xe6   :  { %v383_v54 = vadd.f32 %v382_v52, %v128_v51  ;;  %v160_v51 = vld [vmem:[%s4111_s0 + $0x490] sm:$0xff] }
  0xe8   :  { %v384_v56 = vadd.f32 %v383_v54, %v129_v53  ;;  %v161_v53 = vld [vmem:[%s4111_s0 + $0x498] sm:$0xff] }
  0xea   :  { %v385_v58 = vadd.f32 %v384_v56, %v130_v55  ;;  %v162_v55 = vld [vmem:[%s4111_s0 + $0x4a0] sm:$0xff] }
  0xec   :  { %v386_v60 = vadd.f32 %v385_v58, %v131_v57  ;;  %v163_v57 = vld [vmem:[%s4111_s0 + $0x4a8] sm:$0xff] }
  0xee   :  { %v387_v62 = vadd.f32 %v386_v60, %v132_v59  ;;  %v164_v59 = vld [vmem:[%s4111_s0 + $0x4b0] sm:$0xff] }
  0xf0   :  { %v388_v0 = vadd.f32 %v387_v62, %v133_v61  ;;  %v165_v61 = vld [vmem:[%s4111_s0 + $0x4b8] sm:$0xff] }
  0xf2   :  { %v389_v2 = vadd.f32 %v388_v0, %v134_v63  ;;  %v166_v63 = vld [vmem:[%s4111_s0 + $0x4c0] sm:$0xff] }
  0xf4   :  { %v390_v4 = vadd.f32 %v389_v2, %v135_v1  ;;  %v167_v1 = vld [vmem:[%s4111_s0 + $0x4c8] sm:$0xff] }
  0xf6   :  { %v391_v6 = vadd.f32 %v390_v4, %v136_v3  ;;  %v168_v3 = vld [vmem:[%s4111_s0 + $0x4d0] sm:$0xff] }
  0xf8   :  { %v392_v8 = vadd.f32 %v391_v6, %v137_v5  ;;  %v169_v5 = vld [vmem:[%s4111_s0 + $0x4d8] sm:$0xff] }
  0xfa   :  { %v393_v10 = vadd.f32 %v392_v8, %v138_v7  ;;  %v170_v7 = vld [vmem:[%s4111_s0 + $0x4e0] sm:$0xff] }
  0xfc   :  { %v394_v12 = vadd.f32 %v393_v10, %v139_v9  ;;  %v171_v9 = vld [vmem:[%s4111_s0 + $0x4e8] sm:$0xff] }
  0xfe   :  { %v395_v14 = vadd.f32 %v394_v12, %v140_v11  ;;  %v172_v11 = vld [vmem:[%s4111_s0 + $0x4f0] sm:$0xff] }
 0x100   :  { %v396_v16 = vadd.f32 %v395_v14, %v141_v13  ;;  %v173_v13 = vld [vmem:[%s4111_s0 + $0x4f8] sm:$0xff] }
 0x102   :  { %v397_v18 = vadd.f32 %v396_v16, %v142_v15  ;;  %v174_v15 = vld [vmem:[%s4111_s0 + $0x500] sm:$0xff] }
 0x104   :  { %v398_v20 = vadd.f32 %v397_v18, %v143_v17  ;;  %v175_v17 = vld [vmem:[%s4111_s0 + $0x508] sm:$0xff] }
 0x106   :  { %v399_v22 = vadd.f32 %v398_v20, %v144_v19  ;;  %v176_v19 = vld [vmem:[%s4111_s0 + $0x510] sm:$0xff] }
 0x108   :  { %v400_v24 = vadd.f32 %v399_v22, %v145_v21  ;;  %v177_v21 = vld [vmem:[%s4111_s0 + $0x518] sm:$0xff] }
 0x10a   :  { %v401_v26 = vadd.f32 %v400_v24, %v146_v23  ;;  %v178_v23 = vld [vmem:[%s4111_s0 + $0x520] sm:$0xff] }
 0x10c   :  { %v402_v28 = vadd.f32 %v401_v26, %v147_v25  ;;  %v179_v25 = vld [vmem:[%s4111_s0 + $0x528] sm:$0xff] }
 0x10e   :  { %v403_v30 = vadd.f32 %v402_v28, %v148_v27  ;;  %v180_v27 = vld [vmem:[%s4111_s0 + $0x530] sm:$0xff] }
 0x110   :  { %v404_v32 = vadd.f32 %v403_v30, %v149_v29  ;;  %v181_v29 = vld [vmem:[%s4111_s0 + $0x538] sm:$0xff] }
 0x112   :  { %v405_v34 = vadd.f32 %v404_v32, %v150_v31  ;;  %v182_v31 = vld [vmem:[%s4111_s0 + $0x540] sm:$0xff] }
 0x114   :  { %v406_v36 = vadd.f32 %v405_v34, %v151_v33  ;;  %v183_v33 = vld [vmem:[%s4111_s0 + $0x548] sm:$0xff] }
 0x116   :  { %v407_v38 = vadd.f32 %v406_v36, %v152_v35  ;;  %v184_v35 = vld [vmem:[%s4111_s0 + $0x550] sm:$0xff] }
 0x118   :  { %v408_v40 = vadd.f32 %v407_v38, %v153_v37  ;;  %v185_v37 = vld [vmem:[%s4111_s0 + $0x558] sm:$0xff] }
 0x11a   :  { %v409_v42 = vadd.f32 %v408_v40, %v154_v39  ;;  %v186_v39 = vld [vmem:[%s4111_s0 + $0x560] sm:$0xff] }
 0x11c   :  { %v410_v44 = vadd.f32 %v409_v42, %v155_v41  ;;  %v187_v41 = vld [vmem:[%s4111_s0 + $0x568] sm:$0xff] }
 0x11e   :  { %v411_v46 = vadd.f32 %v410_v44, %v156_v43  ;;  %v188_v43 = vld [vmem:[%s4111_s0 + $0x570] sm:$0xff] }
 0x120   :  { %v412_v48 = vadd.f32 %v411_v46, %v157_v45  ;;  %v189_v45 = vld [vmem:[%s4111_s0 + $0x578] sm:$0xff] }
 0x122   :  { %v413_v50 = vadd.f32 %v412_v48, %v158_v47  ;;  %v190_v47 = vld [vmem:[%s4111_s0 + $0x580] sm:$0xff] }
 0x124   :  { %v414_v52 = vadd.f32 %v413_v50, %v159_v49  ;;  %v191_v49 = vld [vmem:[%s4111_s0 + $0x588] sm:$0xff] }
 0x126   :  { %v415_v54 = vadd.f32 %v414_v52, %v160_v51  ;;  %v192_v51 = vld [vmem:[%s4111_s0 + $0x590] sm:$0xff] }
 0x128   :  { %v416_v56 = vadd.f32 %v415_v54, %v161_v53  ;;  %v193_v53 = vld [vmem:[%s4111_s0 + $0x598] sm:$0xff] }
 0x12a   :  { %v417_v58 = vadd.f32 %v416_v56, %v162_v55  ;;  %v194_v55 = vld [vmem:[%s4111_s0 + $0x5a0] sm:$0xff] }
 0x12c   :  { %v418_v60 = vadd.f32 %v417_v58, %v163_v57  ;;  %v195_v57 = vld [vmem:[%s4111_s0 + $0x5a8] sm:$0xff] }
 0x12e   :  { %v419_v62 = vadd.f32 %v418_v60, %v164_v59  ;;  %v196_v59 = vld [vmem:[%s4111_s0 + $0x5b0] sm:$0xff] }
 0x130   :  { %v420_v0 = vadd.f32 %v419_v62, %v165_v61  ;;  %v197_v61 = vld [vmem:[%s4111_s0 + $0x5b8] sm:$0xff] }
 0x132   :  { %v421_v2 = vadd.f32 %v420_v0, %v166_v63  ;;  %v198_v63 = vld [vmem:[%s4111_s0 + $0x5c0] sm:$0xff] }
 0x134   :  { %v422_v4 = vadd.f32 %v421_v2, %v167_v1  ;;  %v199_v1 = vld [vmem:[%s4111_s0 + $0x5c8] sm:$0xff] }
 0x136   :  { %v423_v6 = vadd.f32 %v422_v4, %v168_v3  ;;  %v200_v3 = vld [vmem:[%s4111_s0 + $0x5d0] sm:$0xff] }
 0x138   :  { %v424_v8 = vadd.f32 %v423_v6, %v169_v5  ;;  %v201_v5 = vld [vmem:[%s4111_s0 + $0x5d8] sm:$0xff] }
 0x13a   :  { %v425_v10 = vadd.f32 %v424_v8, %v170_v7  ;;  %v202_v7 = vld [vmem:[%s4111_s0 + $0x5e0] sm:$0xff] }
 0x13c   :  { %v426_v12 = vadd.f32 %v425_v10, %v171_v9  ;;  %v203_v9 = vld [vmem:[%s4111_s0 + $0x5e8] sm:$0xff] }
 0x13e   :  { %v427_v14 = vadd.f32 %v426_v12, %v172_v11  ;;  %v204_v11 = vld [vmem:[%s4111_s0 + $0x5f0] sm:$0xff] }
 0x140   :  { %v428_v16 = vadd.f32 %v427_v14, %v173_v13  ;;  %v205_v13 = vld [vmem:[%s4111_s0 + $0x5f8] sm:$0xff] }
 0x142   :  { %v429_v18 = vadd.f32 %v428_v16, %v174_v15  ;;  %v206_v15 = vld [vmem:[%s4111_s0 + $0x600] sm:$0xff] }
 0x144   :  { %v430_v20 = vadd.f32 %v429_v18, %v175_v17  ;;  %v207_v17 = vld [vmem:[%s4111_s0 + $0x608] sm:$0xff] }
 0x146   :  { %v431_v22 = vadd.f32 %v430_v20, %v176_v19  ;;  %v208_v19 = vld [vmem:[%s4111_s0 + $0x610] sm:$0xff] }
 0x148   :  { %v432_v24 = vadd.f32 %v431_v22, %v177_v21  ;;  %v209_v21 = vld [vmem:[%s4111_s0 + $0x618] sm:$0xff] }
 0x14a   :  { %v433_v26 = vadd.f32 %v432_v24, %v178_v23  ;;  %v210_v23 = vld [vmem:[%s4111_s0 + $0x620] sm:$0xff] }
 0x14c   :  { %v434_v28 = vadd.f32 %v433_v26, %v179_v25  ;;  %v211_v25 = vld [vmem:[%s4111_s0 + $0x628] sm:$0xff] }
 0x14e   :  { %v435_v30 = vadd.f32 %v434_v28, %v180_v27  ;;  %v212_v27 = vld [vmem:[%s4111_s0 + $0x630] sm:$0xff] }
 0x150   :  { %v436_v32 = vadd.f32 %v435_v30, %v181_v29  ;;  %v213_v29 = vld [vmem:[%s4111_s0 + $0x638] sm:$0xff] }
 0x152   :  { %v437_v34 = vadd.f32 %v436_v32, %v182_v31  ;;  %v214_v31 = vld [vmem:[%s4111_s0 + $0x640] sm:$0xff] }
 0x154   :  { %v438_v36 = vadd.f32 %v437_v34, %v183_v33  ;;  %v215_v33 = vld [vmem:[%s4111_s0 + $0x648] sm:$0xff] }
 0x156   :  { %v439_v38 = vadd.f32 %v438_v36, %v184_v35  ;;  %v216_v35 = vld [vmem:[%s4111_s0 + $0x650] sm:$0xff] }
 0x158   :  { %v440_v40 = vadd.f32 %v439_v38, %v185_v37  ;;  %v217_v37 = vld [vmem:[%s4111_s0 + $0x658] sm:$0xff] }
 0x15a   :  { %v441_v42 = vadd.f32 %v440_v40, %v186_v39  ;;  %v218_v39 = vld [vmem:[%s4111_s0 + $0x660] sm:$0xff] }
 0x15c   :  { %v442_v44 = vadd.f32 %v441_v42, %v187_v41  ;;  %v219_v41 = vld [vmem:[%s4111_s0 + $0x668] sm:$0xff] }
 0x15e   :  { %v443_v46 = vadd.f32 %v442_v44, %v188_v43  ;;  %v220_v43 = vld [vmem:[%s4111_s0 + $0x670] sm:$0xff] }
 0x160   :  { %v444_v48 = vadd.f32 %v443_v46, %v189_v45  ;;  %v221_v45 = vld [vmem:[%s4111_s0 + $0x678] sm:$0xff] }
 0x162   :  { %v445_v50 = vadd.f32 %v444_v48, %v190_v47  ;;  %v222_v47 = vld [vmem:[%s4111_s0 + $0x680] sm:$0xff] }
 0x164   :  { %v446_v52 = vadd.f32 %v445_v50, %v191_v49  ;;  %v223_v49 = vld [vmem:[%s4111_s0 + $0x688] sm:$0xff] }
 0x166   :  { %v447_v54 = vadd.f32 %v446_v52, %v192_v51  ;;  %v224_v51 = vld [vmem:[%s4111_s0 + $0x690] sm:$0xff] }
 0x168   :  { %v448_v56 = vadd.f32 %v447_v54, %v193_v53  ;;  %v225_v53 = vld [vmem:[%s4111_s0 + $0x698] sm:$0xff] }
 0x16a   :  { %v449_v58 = vadd.f32 %v448_v56, %v194_v55  ;;  %v226_v55 = vld [vmem:[%s4111_s0 + $0x6a0] sm:$0xff] }
 0x16c   :  { %v450_v60 = vadd.f32 %v449_v58, %v195_v57  ;;  %v227_v57 = vld [vmem:[%s4111_s0 + $0x6a8] sm:$0xff] }
 0x16e   :  { %v451_v62 = vadd.f32 %v450_v60, %v196_v59  ;;  %v228_v59 = vld [vmem:[%s4111_s0 + $0x6b0] sm:$0xff] }
 0x170   :  { %v452_v0 = vadd.f32 %v451_v62, %v197_v61  ;;  %v229_v61 = vld [vmem:[%s4111_s0 + $0x6b8] sm:$0xff] }
 0x172   :  { %v453_v2 = vadd.f32 %v452_v0, %v198_v63  ;;  %v230_v63 = vld [vmem:[%s4111_s0 + $0x6c0] sm:$0xff] }
 0x174   :  { %v454_v4 = vadd.f32 %v453_v2, %v199_v1  ;;  %v231_v1 = vld [vmem:[%s4111_s0 + $0x6c8] sm:$0xff] }
 0x176   :  { %v455_v6 = vadd.f32 %v454_v4, %v200_v3  ;;  %v232_v3 = vld [vmem:[%s4111_s0 + $0x6d0] sm:$0xff] }
 0x178   :  { %v456_v8 = vadd.f32 %v455_v6, %v201_v5  ;;  %v233_v5 = vld [vmem:[%s4111_s0 + $0x6d8] sm:$0xff] }
 0x17a   :  { %v457_v10 = vadd.f32 %v456_v8, %v202_v7  ;;  %v234_v7 = vld [vmem:[%s4111_s0 + $0x6e0] sm:$0xff] }
 0x17c   :  { %v458_v12 = vadd.f32 %v457_v10, %v203_v9  ;;  %v235_v9 = vld [vmem:[%s4111_s0 + $0x6e8] sm:$0xff] }
 0x17e   :  { %v459_v14 = vadd.f32 %v458_v12, %v204_v11  ;;  %v236_v11 = vld [vmem:[%s4111_s0 + $0x6f0] sm:$0xff] }
 0x180   :  { %v460_v16 = vadd.f32 %v459_v14, %v205_v13  ;;  %v237_v13 = vld [vmem:[%s4111_s0 + $0x6f8] sm:$0xff] }
 0x182   :  { %v461_v18 = vadd.f32 %v460_v16, %v206_v15  ;;  %v238_v15 = vld [vmem:[%s4111_s0 + $0x700] sm:$0xff] }
 0x184   :  { %v462_v20 = vadd.f32 %v461_v18, %v207_v17  ;;  %v239_v17 = vld [vmem:[%s4111_s0 + $0x708] sm:$0xff] }
 0x186   :  { %v463_v22 = vadd.f32 %v462_v20, %v208_v19  ;;  %v240_v19 = vld [vmem:[%s4111_s0 + $0x710] sm:$0xff] }
 0x188   :  { %v464_v24 = vadd.f32 %v463_v22, %v209_v21  ;;  %v241_v21 = vld [vmem:[%s4111_s0 + $0x718] sm:$0xff] }
 0x18a   :  { %v465_v26 = vadd.f32 %v464_v24, %v210_v23  ;;  %v242_v23 = vld [vmem:[%s4111_s0 + $0x720] sm:$0xff] }
 0x18c   :  { %v466_v28 = vadd.f32 %v465_v26, %v211_v25  ;;  %v243_v25 = vld [vmem:[%s4111_s0 + $0x728] sm:$0xff] }
 0x18e   :  { %v467_v30 = vadd.f32 %v466_v28, %v212_v27  ;;  %v244_v27 = vld [vmem:[%s4111_s0 + $0x730] sm:$0xff] }
 0x190   :  { %v468_v32 = vadd.f32 %v467_v30, %v213_v29  ;;  %v245_v29 = vld [vmem:[%s4111_s0 + $0x738] sm:$0xff] }
 0x192   :  { %v469_v34 = vadd.f32 %v468_v32, %v214_v31  ;;  %v246_v31 = vld [vmem:[%s4111_s0 + $0x740] sm:$0xff] }
 0x194   :  { %v470_v36 = vadd.f32 %v469_v34, %v215_v33  ;;  %v247_v33 = vld [vmem:[%s4111_s0 + $0x748] sm:$0xff] }
 0x196   :  { %v471_v38 = vadd.f32 %v470_v36, %v216_v35  ;;  %v248_v35 = vld [vmem:[%s4111_s0 + $0x750] sm:$0xff] }
 0x198   :  { %v472_v40 = vadd.f32 %v471_v38, %v217_v37  ;;  %v249_v37 = vld [vmem:[%s4111_s0 + $0x758] sm:$0xff] }
 0x19a   :  { %v473_v42 = vadd.f32 %v472_v40, %v218_v39  ;;  %v250_v39 = vld [vmem:[%s4111_s0 + $0x760] sm:$0xff] }
 0x19c   :  { %v474_v44 = vadd.f32 %v473_v42, %v219_v41  ;;  %v251_v41 = vld [vmem:[%s4111_s0 + $0x768] sm:$0xff] }
 0x19e   :  { %v475_v46 = vadd.f32 %v474_v44, %v220_v43  ;;  %v252_v43 = vld [vmem:[%s4111_s0 + $0x770] sm:$0xff] }
 0x1a0   :  { %v476_v48 = vadd.f32 %v475_v46, %v221_v45  ;;  %v253_v45 = vld [vmem:[%s4111_s0 + $0x778] sm:$0xff] }
 0x1a2   :  { %v477_v50 = vadd.f32 %v476_v48, %v222_v47  ;;  %v254_v47 = vld [vmem:[%s4111_s0 + $0x780] sm:$0xff] }
 0x1a4   :  { %v478_v52 = vadd.f32 %v477_v50, %v223_v49  ;;  %v255_v49 = vld [vmem:[%s4111_s0 + $0x788] sm:$0xff] }
 0x1a6   :  { %v479_v54 = vadd.f32 %v478_v52, %v224_v51  ;;  %v256_v51 = vld [vmem:[%s4111_s0 + $0x790] sm:$0xff] }
 0x1a8   :  { %v480_v56 = vadd.f32 %v479_v54, %v225_v53  ;;  %v257_v53 = vld [vmem:[%s4111_s0 + $0x798] sm:$0xff] }
 0x1aa   :  { %v481_v58 = vadd.f32 %v480_v56, %v226_v55  ;;  %v258_v55 = vld [vmem:[%s4111_s0 + $0x7a0] sm:$0xff] }
 0x1ac   :  { %v482_v60 = vadd.f32 %v481_v58, %v227_v57  ;;  %v259_v57 = vld [vmem:[%s4111_s0 + $0x7a8] sm:$0xff] }
 0x1ae   :  { %v483_v62 = vadd.f32 %v482_v60, %v228_v59  ;;  %v260_v59 = vld [vmem:[%s4111_s0 + $0x7b0] sm:$0xff] }
 0x1b0   :  { %v484_v0 = vadd.f32 %v483_v62, %v229_v61  ;;  %v261_v61 = vld [vmem:[%s4111_s0 + $0x7b8] sm:$0xff] }
 0x1b2   :  { %v485_v2 = vadd.f32 %v484_v0, %v230_v63  ;;  %v262_v63 = vld [vmem:[%s4111_s0 + $0x7c0] sm:$0xff] }
 0x1b4   :  { %v486_v4 = vadd.f32 %v485_v2, %v231_v1  ;;  %v263_v1 = vld [vmem:[%s4111_s0 + $0x7c8] sm:$0xff] }
 0x1b6   :  { %v487_v6 = vadd.f32 %v486_v4, %v232_v3  ;;  %v264_v3 = vld [vmem:[%s4111_s0 + $0x7d0] sm:$0xff] }
 0x1b8   :  { %v488_v8 = vadd.f32 %v487_v6, %v233_v5  ;;  %v265_v5 = vld [vmem:[%s4111_s0 + $0x7d8] sm:$0xff] }
 0x1ba   :  { %v489_v10 = vadd.f32 %v488_v8, %v234_v7  ;;  %v266_v7 = vld [vmem:[%s4111_s0 + $0x7e0] sm:$0xff] }
 0x1bc   :  { %v490_v12 = vadd.f32 %v489_v10, %v235_v9  ;;  %v267_v9 = vld [vmem:[%s4111_s0 + $0x7e8] sm:$0xff] }
 0x1be   :  { %v491_v14 = vadd.f32 %v490_v12, %v236_v11  ;;  %v268_v11 = vld [vmem:[%s4111_s0 + $0x7f0] sm:$0xff] }
 0x1c0   :  { %v492_v16 = vadd.f32 %v491_v14, %v237_v13  ;;  %v269_v13 = vld [vmem:[%s4111_s0 + $0x7f8] sm:$0xff] }
 0x1c2   :  { %v493_v18 = vadd.f32 %v492_v16, %v238_v15 }
 0x1c4   :  { %v494_v20 = vadd.f32 %v493_v18, %v239_v17 }
 0x1c6   :  { %v495_v22 = vadd.f32 %v494_v20, %v240_v19 }
 0x1c8   :  { %v496_v24 = vadd.f32 %v495_v22, %v241_v21 }
 0x1ca   :  { %v497_v26 = vadd.f32 %v496_v24, %v242_v23  ;;  %v548_v23 = vld [vmem:[%s4112_s2] sm:$0x1] }
 0x1cc   :  { %v498_v28 = vadd.f32 %v497_v26, %v243_v25 }
 0x1ce   :  { %v499_v30 = vadd.f32 %v498_v28, %v244_v27 }
 0x1d0   :  { %v500_v32 = vadd.f32 %v499_v30, %v245_v29 }
 0x1d2   :  { %v501_v34 = vadd.f32 %v500_v32, %v246_v31  ;;  %v624_v31 = vlaneseq }
 0x1d4   :  { %v502_v36 = vadd.f32 %v501_v34, %v247_v33  ;;  %v625_v32 = vshrl.u32 %v624_v31, 7 }
 0x1d6   :  { %v503_v38 = vadd.f32 %v502_v36, %v248_v35  ;;  %v626_v33 = vsub.s32 0, %v625_v32  ;;  %v1202_v36 = vld [vmem:[%s4111_s0] sm:$0xff]  ;;  %v1232_v32 = vld [vmem:[%s4111_s0 + $0xf0] sm:$0xff] }
 0x1d8   :  { %v504_v40 = vadd.f32 %v503_v38, %v249_v37  ;;  %v1203_v38 = vld [vmem:[%s4111_s0 + $0x8] sm:$0xff] }
 0x1da   :  { %v505_v42 = vadd.f32 %v504_v40, %v250_v39  ;;  %v1204_v40 = vld [vmem:[%s4111_s0 + $0x10] sm:$0xff] }
 0x1dc   :  { %v506_v44 = vadd.f32 %v505_v42, %v251_v41  ;;  %v1205_v42 = vld [vmem:[%s4111_s0 + $0x18] sm:$0xff] }
 0x1de   :  { %v507_v46 = vadd.f32 %v506_v44, %v252_v43  ;;  %v1206_v44 = vld [vmem:[%s4111_s0 + $0x20] sm:$0xff] }
 0x1e0   :  { %v508_v48 = vadd.f32 %v507_v46, %v253_v45  ;;  %v1207_v46 = vld [vmem:[%s4111_s0 + $0x28] sm:$0xff] }
 0x1e2   :  { %v509_v50 = vadd.f32 %v508_v48, %v254_v47  ;;  %v1208_v48 = vld [vmem:[%s4111_s0 + $0x30] sm:$0xff] }
 0x1e4   :  { %v510_v52 = vadd.f32 %v509_v50, %v255_v49  ;;  %v1209_v50 = vld [vmem:[%s4111_s0 + $0x38] sm:$0xff] }
 0x1e6   :  { %v511_v54 = vadd.f32 %v510_v52, %v256_v51  ;;  %v1210_v52 = vld [vmem:[%s4111_s0 + $0x40] sm:$0xff] }
 0x1e8   :  { %v512_v56 = vadd.f32 %v511_v54, %v257_v53  ;;  %v1211_v54 = vld [vmem:[%s4111_s0 + $0x48] sm:$0xff] }
 0x1ea   :  { %v513_v58 = vadd.f32 %v512_v56, %v258_v55  ;;  %v1212_v56 = vld [vmem:[%s4111_s0 + $0x50] sm:$0xff] }
 0x1ec   :  { %v514_v60 = vadd.f32 %v513_v58, %v259_v57  ;;  %v1213_v58 = vld [vmem:[%s4111_s0 + $0x58] sm:$0xff] }
 0x1ee   :  { %v515_v62 = vadd.f32 %v514_v60, %v260_v59  ;;  %v1214_v60 = vld [vmem:[%s4111_s0 + $0x60] sm:$0xff] }
 0x1f0   :  { %v516_v0 = vadd.f32 %v515_v62, %v261_v61  ;;  %v1215_v62 = vld [vmem:[%s4111_s0 + $0x68] sm:$0xff] }
 0x1f2   :  { %v517_v2 = vadd.f32 %v516_v0, %v262_v63  ;;  %v1216_v0 = vld [vmem:[%s4111_s0 + $0x70] sm:$0xff] }
 0x1f4   :  { %v518_v4 = vadd.f32 %v517_v2, %v263_v1  ;;  %v1217_v2 = vld [vmem:[%s4111_s0 + $0x78] sm:$0xff] }
 0x1f6   :  { %v519_v6 = vadd.f32 %v518_v4, %v264_v3  ;;  %v1218_v4 = vld [vmem:[%s4111_s0 + $0x80] sm:$0xff] }
 0x1f8   :  { %v520_v8 = vadd.f32 %v519_v6, %v265_v5  ;;  %v1219_v6 = vld [vmem:[%s4111_s0 + $0x88] sm:$0xff] }
 0x1fa   :  { %v521_v10 = vadd.f32 %v520_v8, %v266_v7  ;;  %v1220_v8 = vld [vmem:[%s4111_s0 + $0x90] sm:$0xff] }
 0x1fc   :  { %v522_v12 = vadd.f32 %v521_v10, %v267_v9  ;;  %v1221_v10 = vld [vmem:[%s4111_s0 + $0x98] sm:$0xff] }
 0x1fe   :  { %v523_v14 = vadd.f32 %v522_v12, %v268_v11  ;;  %v1222_v12 = vld [vmem:[%s4111_s0 + $0xa0] sm:$0xff] }
 0x200   :  { %v524_v15 = vadd.f32 %v523_v14, %v269_v13  ;;  %v1223_v14 = vld [vmem:[%s4111_s0 + $0xa8] sm:$0xff] }
 0x202   :  { %v525_v16 = vrot.slane %v524_v15, 4 }
 0x204   :  { %v526_v17 = vadd.f32 %v525_v16, %v524_v15  ;;  %v1224_v16 = vld [vmem:[%s4111_s0 + $0xb0] sm:$0xff] }
 0x206   :  { %v527_v18 = vrot.slane %v526_v17, 2 }
 0x208   :  { %v528_v19 = vadd.f32 %v527_v18, %v526_v17  ;;  %v1225_v18 = vld [vmem:[%s4111_s0 + $0xb8] sm:$0xff] }
 0x20a   :  { %v529_v20 = vrot.slane %v528_v19, 1 }
 0x20c   :  { %v530_v21 = vadd.f32 %v529_v20, %v528_v19  ;;  %v1226_v20 = vld [vmem:[%s4111_s0 + $0xc0] sm:$0xff] }
 0x20e   :  { %v531_v22 = vmul.f32 0.00048828125, %v530_v21 }
 0x210   :  { %1194 = vmatmul.mubr.f32.vlgmr.msra.gmra.mxu0 %v531_v22  ;;  %v1227_v22 = vld [vmem:[%s4111_s0 + $0xc8] sm:$0xff] }
 0x2d0   :  { %v615_v24 = vpop.f32.mrf.mxu0 }
 0x2d1   :  { %v616_v25 = vadd.f32 %v615_v24, %v548_v23  ;;  %v1228_v24 = vld [vmem:[%s4111_s0 + $0xd0] sm:$0xff] }
 0x2d2   :  { %v1195_v26 = vpop.f32.mrf.mxu0 }
 0x2d3   :  { %v619_v27 = vsub.f32 0.0, %v616_v25  ;;  %v1229_v26 = vld [vmem:[%s4111_s0 + $0xd8] sm:$0xff] }
 0x2d5   :  { %v620_v28 = vmul.f32 1.442695, %v619_v27 }
 0x2d7   :  { %1198 = vpow2.f32 %v620_v28  ;;  %v1230_v28 = vld [vmem:[%s4111_s0 + $0xe0] sm:$0xff] }
 0x2e4   :  { %v1199_v29 = vpop.eup %1198 }
 0x2e5   :  { %v622_v30 = vadd.f32 1.0, %v1199_v29 }
 0x2e7   :  { %1200 = vrcp.f32 %v622_v30  ;;  %v1231_v30 = vld [vmem:[%s4111_s0 + $0xe8] sm:$0xff] }
 0x2f4   :  { %v1201_v34 = vpop.eup %1200 }
 0x2f5   :  { %v2316_v35 = vrot.slane %v1201_v34, %v626_v33  ;;  %v1233_v34 = vld [vmem:[%s4111_s0 + $0xf8] sm:$0xff] }
 0x2f7   :  { %v628_v37 = vmul.f32 %v1202_v36, %v2316_v35  ;;  %v629_v39 = vmul.f32 %v1203_v38, %v2316_v35  ;;  %v630_v41 = vmul.f32 %v1204_v40, %v2316_v35  ;;  %v631_v43 = vmul.f32 %v1205_v42, %v2316_v35 }
 0x2f8   :  { %v632_v45 = vmul.f32 %v1206_v44, %v2316_v35  ;;  %v633_v47 = vmul.f32 %v1207_v46, %v2316_v35  ;;  %v634_v49 = vmul.f32 %v1208_v48, %v2316_v35  ;;  %v635_v51 = vmul.f32 %v1209_v50, %v2316_v35 }
 0x2f9   :  { %v636_v53 = vmul.f32 %v1210_v52, %v2316_v35  ;;  %v637_v55 = vmul.f32 %v1211_v54, %v2316_v35  ;;  %v638_v57 = vmul.f32 %v1212_v56, %v2316_v35  ;;  %v639_v59 = vmul.f32 %v1213_v58, %v2316_v35  ;;  %884 = vst [vmem:[%s4113_s3] sm:$0xff] %v628_v37  ;;  %v1234_v37 = vld [vmem:[%s4111_s0 + $0x100] sm:$0xff] }
 0x2fa   :  { %885 = vst [vmem:[%s4113_s3 + $0x8] sm:$0xff] %v629_v39  ;;  %886 = vst [vmem:[%s4113_s3 + $0x10] sm:$0xff] %v630_v41  ;;  %v640_v61 = vmul.f32 %v1214_v60, %v2316_v35  ;;  %v641_v63 = vmul.f32 %v1215_v62, %v2316_v35  ;;  %v642_v1 = vmul.f32 %v1216_v0, %v2316_v35  ;;  %v1235_v39 = vld [vmem:[%s4111_s0 + $0x108] sm:$0xff]  ;;  %v1236_v41 = vld [vmem:[%s4111_s0 + $0x110] sm:$0xff] }
 0x2fb   :  { %887 = vst [vmem:[%s4113_s3 + $0x18] sm:$0xff] %v631_v43  ;;  %v643_v3 = vmul.f32 %v1217_v2, %v2316_v35  ;;  %888 = vst [vmem:[%s4113_s3 + $0x20] sm:$0xff] %v632_v45  ;;  %v644_v5 = vmul.f32 %v1218_v4, %v2316_v35  ;;  %v645_v7 = vmul.f32 %v1219_v6, %v2316_v35  ;;  %v1237_v43 = vld [vmem:[%s4111_s0 + $0x118] sm:$0xff]  ;;  %v1238_v45 = vld [vmem:[%s4111_s0 + $0x120] sm:$0xff] }
 0x2fc   :  { %889 = vst [vmem:[%s4113_s3 + $0x28] sm:$0xff] %v633_v47  ;;  %890 = vst [vmem:[%s4113_s3 + $0x30] sm:$0xff] %v634_v49  ;;  %v646_v9 = vmul.f32 %v1220_v8, %v2316_v35  ;;  %v647_v11 = vmul.f32 %v1221_v10, %v2316_v35  ;;  %v648_v13 = vmul.f32 %v1222_v12, %v2316_v35  ;;  %v1239_v47 = vld [vmem:[%s4111_s0 + $0x128] sm:$0xff]  ;;  %v1240_v49 = vld [vmem:[%s4111_s0 + $0x130] sm:$0xff] }
 0x2fd   :  { %891 = vst [vmem:[%s4113_s3 + $0x38] sm:$0xff] %v635_v51  ;;  %892 = vst [vmem:[%s4113_s3 + $0x40] sm:$0xff] %v636_v53  ;;  %v649_v15 = vmul.f32 %v1223_v14, %v2316_v35  ;;  %v650_v17 = vmul.f32 %v1224_v16, %v2316_v35  ;;  %v651_v19 = vmul.f32 %v1225_v18, %v2316_v35  ;;  %v1241_v51 = vld [vmem:[%s4111_s0 + $0x138] sm:$0xff]  ;;  %v1242_v53 = vld [vmem:[%s4111_s0 + $0x140] sm:$0xff] }
 0x2fe   :  { %893 = vst [vmem:[%s4113_s3 + $0x48] sm:$0xff] %v637_v55  ;;  %894 = vst [vmem:[%s4113_s3 + $0x50] sm:$0xff] %v638_v57  ;;  %v652_v21 = vmul.f32 %v1226_v20, %v2316_v35  ;;  %v653_v23 = vmul.f32 %v1227_v22, %v2316_v35  ;;  %v654_v25 = vmul.f32 %v1228_v24, %v2316_v35  ;;  %v1243_v55 = vld [vmem:[%s4111_s0 + $0x148] sm:$0xff]  ;;  %v1244_v57 = vld [vmem:[%s4111_s0 + $0x150] sm:$0xff] }
 0x2ff   :  { %895 = vst [vmem:[%s4113_s3 + $0x58] sm:$0xff] %v639_v59  ;;  %896 = vst [vmem:[%s4113_s3 + $0x60] sm:$0xff] %v640_v61  ;;  %v655_v27 = vmul.f32 %v1229_v26, %v2316_v35  ;;  %v656_v29 = vmul.f32 %v1230_v28, %v2316_v35  ;;  %v657_v31 = vmul.f32 %v1231_v30, %v2316_v35  ;;  %v1245_v59 = vld [vmem:[%s4111_s0 + $0x158] sm:$0xff]  ;;  %v1246_v61 = vld [vmem:[%s4111_s0 + $0x160] sm:$0xff] }
 0x300   :  { %897 = vst [vmem:[%s4113_s3 + $0x68] sm:$0xff] %v641_v63  ;;  %898 = vst [vmem:[%s4113_s3 + $0x70] sm:$0xff] %v642_v1  ;;  %v658_v33 = vmul.f32 %v1232_v32, %v2316_v35  ;;  %v659_v36 = vmul.f32 %v1233_v34, %v2316_v35  ;;  %v660_v38 = vmul.f32 %v1234_v37, %v2316_v35  ;;  %v1247_v63 = vld [vmem:[%s4111_s0 + $0x168] sm:$0xff]  ;;  %v1248_v1 = vld [vmem:[%s4111_s0 + $0x170] sm:$0xff] }
 0x301   :  { %899 = vst [vmem:[%s4113_s3 + $0x78] sm:$0xff] %v643_v3  ;;  %900 = vst [vmem:[%s4113_s3 + $0x80] sm:$0xff] %v644_v5  ;;  %v661_v40 = vmul.f32 %v1235_v39, %v2316_v35  ;;  %v662_v42 = vmul.f32 %v1236_v41, %v2316_v35  ;;  %v663_v44 = vmul.f32 %v1237_v43, %v2316_v35  ;;  %v1249_v3 = vld [vmem:[%s4111_s0 + $0x178] sm:$0xff]  ;;  %v1250_v5 = vld [vmem:[%s4111_s0 + $0x180] sm:$0xff] }
 0x302   :  { %901 = vst [vmem:[%s4113_s3 + $0x88] sm:$0xff] %v645_v7  ;;  %902 = vst [vmem:[%s4113_s3 + $0x90] sm:$0xff] %v646_v9  ;;  %v664_v46 = vmul.f32 %v1238_v45, %v2316_v35  ;;  %v665_v48 = vmul.f32 %v1239_v47, %v2316_v35  ;;  %v666_v50 = vmul.f32 %v1240_v49, %v2316_v35  ;;  %v1251_v7 = vld [vmem:[%s4111_s0 + $0x188] sm:$0xff]  ;;  %v1252_v9 = vld [vmem:[%s4111_s0 + $0x190] sm:$0xff] }
 0x303   :  { %903 = vst [vmem:[%s4113_s3 + $0x98] sm:$0xff] %v647_v11  ;;  %904 = vst [vmem:[%s4113_s3 + $0xa0] sm:$0xff] %v648_v13  ;;  %v667_v52 = vmul.f32 %v1241_v51, %v2316_v35  ;;  %v668_v54 = vmul.f32 %v1242_v53, %v2316_v35  ;;  %v669_v56 = vmul.f32 %v1243_v55, %v2316_v35  ;;  %v1253_v11 = vld [vmem:[%s4111_s0 + $0x198] sm:$0xff]  ;;  %v1254_v13 = vld [vmem:[%s4111_s0 + $0x1a0] sm:$0xff] }
 0x304   :  { %905 = vst [vmem:[%s4113_s3 + $0xa8] sm:$0xff] %v649_v15  ;;  %906 = vst [vmem:[%s4113_s3 + $0xb0] sm:$0xff] %v650_v17  ;;  %v670_v58 = vmul.f32 %v1244_v57, %v2316_v35  ;;  %v671_v60 = vmul.f32 %v1245_v59, %v2316_v35  ;;  %v672_v62 = vmul.f32 %v1246_v61, %v2316_v35  ;;  %v1255_v15 = vld [vmem:[%s4111_s0 + $0x1a8] sm:$0xff]  ;;  %v1256_v17 = vld [vmem:[%s4111_s0 + $0x1b0] sm:$0xff] }
 0x305   :  { %907 = vst [vmem:[%s4113_s3 + $0xb8] sm:$0xff] %v651_v19  ;;  %908 = vst [vmem:[%s4113_s3 + $0xc0] sm:$0xff] %v652_v21  ;;  %v673_v0 = vmul.f32 %v1247_v63, %v2316_v35  ;;  %v674_v2 = vmul.f32 %v1248_v1, %v2316_v35  ;;  %v675_v4 = vmul.f32 %v1249_v3, %v2316_v35  ;;  %v1257_v19 = vld [vmem:[%s4111_s0 + $0x1b8] sm:$0xff]  ;;  %v1258_v21 = vld [vmem:[%s4111_s0 + $0x1c0] sm:$0xff] }
 0x306   :  { %909 = vst [vmem:[%s4113_s3 + $0xc8] sm:$0xff] %v653_v23  ;;  %910 = vst [vmem:[%s4113_s3 + $0xd0] sm:$0xff] %v654_v25  ;;  %v676_v6 = vmul.f32 %v1250_v5, %v2316_v35  ;;  %v677_v8 = vmul.f32 %v1251_v7, %v2316_v35  ;;  %v678_v10 = vmul.f32 %v1252_v9, %v2316_v35  ;;  %v1259_v23 = vld [vmem:[%s4111_s0 + $0x1c8] sm:$0xff]  ;;  %v1260_v25 = vld [vmem:[%s4111_s0 + $0x1d0] sm:$0xff] }
 0x307   :  { %911 = vst [vmem:[%s4113_s3 + $0xd8] sm:$0xff] %v655_v27  ;;  %912 = vst [vmem:[%s4113_s3 + $0xe0] sm:$0xff] %v656_v29  ;;  %v679_v12 = vmul.f32 %v1253_v11, %v2316_v35  ;;  %v680_v14 = vmul.f32 %v1254_v13, %v2316_v35  ;;  %v681_v16 = vmul.f32 %v1255_v15, %v2316_v35  ;;  %v1261_v27 = vld [vmem:[%s4111_s0 + $0x1d8] sm:$0xff]  ;;  %v1262_v29 = vld [vmem:[%s4111_s0 + $0x1e0] sm:$0xff] }
 0x308   :  { %913 = vst [vmem:[%s4113_s3 + $0xe8] sm:$0xff] %v657_v31  ;;  %914 = vst [vmem:[%s4113_s3 + $0xf0] sm:$0xff] %v658_v33  ;;  %v682_v18 = vmul.f32 %v1256_v17, %v2316_v35  ;;  %v683_v20 = vmul.f32 %v1257_v19, %v2316_v35  ;;  %v684_v22 = vmul.f32 %v1258_v21, %v2316_v35  ;;  %v1263_v31 = vld [vmem:[%s4111_s0 + $0x1e8] sm:$0xff]  ;;  %v1264_v33 = vld [vmem:[%s4111_s0 + $0x1f0] sm:$0xff] }
 0x309   :  { %915 = vst [vmem:[%s4113_s3 + $0xf8] sm:$0xff] %v659_v36  ;;  %916 = vst [vmem:[%s4113_s3 + $0x100] sm:$0xff] %v660_v38  ;;  %v685_v24 = vmul.f32 %v1259_v23, %v2316_v35  ;;  %v686_v26 = vmul.f32 %v1260_v25, %v2316_v35  ;;  %v687_v28 = vmul.f32 %v1261_v27, %v2316_v35  ;;  %v1265_v36 = vld [vmem:[%s4111_s0 + $0x1f8] sm:$0xff]  ;;  %v1266_v38 = vld [vmem:[%s4111_s0 + $0x200] sm:$0xff] }
 0x30a   :  { %917 = vst [vmem:[%s4113_s3 + $0x108] sm:$0xff] %v661_v40  ;;  %918 = vst [vmem:[%s4113_s3 + $0x110] sm:$0xff] %v662_v42  ;;  %v688_v30 = vmul.f32 %v1262_v29, %v2316_v35  ;;  %v689_v32 = vmul.f32 %v1263_v31, %v2316_v35  ;;  %v690_v34 = vmul.f32 %v1264_v33, %v2316_v35  ;;  %v1267_v40 = vld [vmem:[%s4111_s0 + $0x208] sm:$0xff]  ;;  %v1268_v42 = vld [vmem:[%s4111_s0 + $0x210] sm:$0xff] }
 0x30b   :  { %919 = vst [vmem:[%s4113_s3 + $0x118] sm:$0xff] %v663_v44  ;;  %920 = vst [vmem:[%s4113_s3 + $0x120] sm:$0xff] %v664_v46  ;;  %v691_v37 = vmul.f32 %v1265_v36, %v2316_v35  ;;  %v692_v39 = vmul.f32 %v1266_v38, %v2316_v35  ;;  %v693_v41 = vmul.f32 %v1267_v40, %v2316_v35  ;;  %v1269_v44 = vld [vmem:[%s4111_s0 + $0x218] sm:$0xff]  ;;  %v1270_v46 = vld [vmem:[%s4111_s0 + $0x220] sm:$0xff] }
 0x30c   :  { %921 = vst [vmem:[%s4113_s3 + $0x128] sm:$0xff] %v665_v48  ;;  %922 = vst [vmem:[%s4113_s3 + $0x130] sm:$0xff] %v666_v50  ;;  %v694_v43 = vmul.f32 %v1268_v42, %v2316_v35  ;;  %v695_v45 = vmul.f32 %v1269_v44, %v2316_v35  ;;  %v696_v47 = vmul.f32 %v1270_v46, %v2316_v35  ;;  %v1271_v48 = vld [vmem:[%s4111_s0 + $0x228] sm:$0xff]  ;;  %v1272_v50 = vld [vmem:[%s4111_s0 + $0x230] sm:$0xff] }
 0x30d   :  { %923 = vst [vmem:[%s4113_s3 + $0x138] sm:$0xff] %v667_v52  ;;  %924 = vst [vmem:[%s4113_s3 + $0x140] sm:$0xff] %v668_v54  ;;  %v697_v49 = vmul.f32 %v1271_v48, %v2316_v35  ;;  %v698_v51 = vmul.f32 %v1272_v50, %v2316_v35  ;;  %v1273_v52 = vld [vmem:[%s4111_s0 + $0x238] sm:$0xff]  ;;  %v1274_v54 = vld [vmem:[%s4111_s0 + $0x240] sm:$0xff] }
 0x30e   :  { %925 = vst [vmem:[%s4113_s3 + $0x148] sm:$0xff] %v669_v56  ;;  %926 = vst [vmem:[%s4113_s3 + $0x150] sm:$0xff] %v670_v58  ;;  %v699_v53 = vmul.f32 %v1273_v52, %v2316_v35  ;;  %v700_v55 = vmul.f32 %v1274_v54, %v2316_v35  ;;  %v1275_v56 = vld [vmem:[%s4111_s0 + $0x248] sm:$0xff]  ;;  %v1276_v58 = vld [vmem:[%s4111_s0 + $0x250] sm:$0xff] }
 0x30f   :  { %927 = vst [vmem:[%s4113_s3 + $0x158] sm:$0xff] %v671_v60  ;;  %928 = vst [vmem:[%s4113_s3 + $0x160] sm:$0xff] %v672_v62  ;;  %v701_v57 = vmul.f32 %v1275_v56, %v2316_v35  ;;  %v702_v59 = vmul.f32 %v1276_v58, %v2316_v35  ;;  %v1277_v60 = vld [vmem:[%s4111_s0 + $0x258] sm:$0xff]  ;;  %v1278_v62 = vld [vmem:[%s4111_s0 + $0x260] sm:$0xff] }
 0x310   :  { %929 = vst [vmem:[%s4113_s3 + $0x168] sm:$0xff] %v673_v0  ;;  %930 = vst [vmem:[%s4113_s3 + $0x170] sm:$0xff] %v674_v2  ;;  %v703_v61 = vmul.f32 %v1277_v60, %v2316_v35  ;;  %v704_v63 = vmul.f32 %v1278_v62, %v2316_v35  ;;  %v1279_v0 = vld [vmem:[%s4111_s0 + $0x268] sm:$0xff]  ;;  %v1280_v2 = vld [vmem:[%s4111_s0 + $0x270] sm:$0xff] }
 0x311   :  { %931 = vst [vmem:[%s4113_s3 + $0x178] sm:$0xff] %v675_v4  ;;  %932 = vst [vmem:[%s4113_s3 + $0x180] sm:$0xff] %v676_v6  ;;  %v705_v1 = vmul.f32 %v1279_v0, %v2316_v35  ;;  %v706_v3 = vmul.f32 %v1280_v2, %v2316_v35  ;;  %v1281_v4 = vld [vmem:[%s4111_s0 + $0x278] sm:$0xff]  ;;  %v1282_v6 = vld [vmem:[%s4111_s0 + $0x280] sm:$0xff] }
 0x312   :  { %933 = vst [vmem:[%s4113_s3 + $0x188] sm:$0xff] %v677_v8  ;;  %934 = vst [vmem:[%s4113_s3 + $0x190] sm:$0xff] %v678_v10  ;;  %v707_v5 = vmul.f32 %v1281_v4, %v2316_v35  ;;  %v708_v7 = vmul.f32 %v1282_v6, %v2316_v35  ;;  %v1283_v8 = vld [vmem:[%s4111_s0 + $0x288] sm:$0xff]  ;;  %v1284_v10 = vld [vmem:[%s4111_s0 + $0x290] sm:$0xff] }
 0x313   :  { %935 = vst [vmem:[%s4113_s3 + $0x198] sm:$0xff] %v679_v12  ;;  %936 = vst [vmem:[%s4113_s3 + $0x1a0] sm:$0xff] %v680_v14  ;;  %v709_v9 = vmul.f32 %v1283_v8, %v2316_v35  ;;  %v710_v11 = vmul.f32 %v1284_v10, %v2316_v35  ;;  %v1285_v12 = vld [vmem:[%s4111_s0 + $0x298] sm:$0xff]  ;;  %v1286_v14 = vld [vmem:[%s4111_s0 + $0x2a0] sm:$0xff] }
 0x314   :  { %937 = vst [vmem:[%s4113_s3 + $0x1a8] sm:$0xff] %v681_v16  ;;  %938 = vst [vmem:[%s4113_s3 + $0x1b0] sm:$0xff] %v682_v18  ;;  %v711_v13 = vmul.f32 %v1285_v12, %v2316_v35  ;;  %v712_v15 = vmul.f32 %v1286_v14, %v2316_v35  ;;  %v1287_v16 = vld [vmem:[%s4111_s0 + $0x2a8] sm:$0xff]  ;;  %v1288_v18 = vld [vmem:[%s4111_s0 + $0x2b0] sm:$0xff] }
 0x315   :  { %939 = vst [vmem:[%s4113_s3 + $0x1b8] sm:$0xff] %v683_v20  ;;  %940 = vst [vmem:[%s4113_s3 + $0x1c0] sm:$0xff] %v684_v22  ;;  %v713_v17 = vmul.f32 %v1287_v16, %v2316_v35  ;;  %v714_v19 = vmul.f32 %v1288_v18, %v2316_v35  ;;  %v1289_v20 = vld [vmem:[%s4111_s0 + $0x2b8] sm:$0xff]  ;;  %v1290_v22 = vld [vmem:[%s4111_s0 + $0x2c0] sm:$0xff] }
 0x316   :  { %941 = vst [vmem:[%s4113_s3 + $0x1c8] sm:$0xff] %v685_v24  ;;  %942 = vst [vmem:[%s4113_s3 + $0x1d0] sm:$0xff] %v686_v26  ;;  %v715_v21 = vmul.f32 %v1289_v20, %v2316_v35  ;;  %v716_v23 = vmul.f32 %v1290_v22, %v2316_v35  ;;  %v1291_v24 = vld [vmem:[%s4111_s0 + $0x2c8] sm:$0xff]  ;;  %v1292_v26 = vld [vmem:[%s4111_s0 + $0x2d0] sm:$0xff] }
 0x317   :  { %943 = vst [vmem:[%s4113_s3 + $0x1d8] sm:$0xff] %v687_v28  ;;  %944 = vst [vmem:[%s4113_s3 + $0x1e0] sm:$0xff] %v688_v30  ;;  %v717_v25 = vmul.f32 %v1291_v24, %v2316_v35  ;;  %v718_v27 = vmul.f32 %v1292_v26, %v2316_v35  ;;  %v1293_v28 = vld [vmem:[%s4111_s0 + $0x2d8] sm:$0xff]  ;;  %v1294_v30 = vld [vmem:[%s4111_s0 + $0x2e0] sm:$0xff] }
 0x318   :  { %945 = vst [vmem:[%s4113_s3 + $0x1e8] sm:$0xff] %v689_v32  ;;  %946 = vst [vmem:[%s4113_s3 + $0x1f0] sm:$0xff] %v690_v34  ;;  %v719_v29 = vmul.f32 %v1293_v28, %v2316_v35  ;;  %v720_v31 = vmul.f32 %v1294_v30, %v2316_v35  ;;  %v1295_v32 = vld [vmem:[%s4111_s0 + $0x2e8] sm:$0xff]  ;;  %v1296_v34 = vld [vmem:[%s4111_s0 + $0x2f0] sm:$0xff] }
 0x319   :  { %947 = vst [vmem:[%s4113_s3 + $0x1f8] sm:$0xff] %v691_v37  ;;  %948 = vst [vmem:[%s4113_s3 + $0x200] sm:$0xff] %v692_v39  ;;  %v721_v33 = vmul.f32 %v1295_v32, %v2316_v35  ;;  %v722_v36 = vmul.f32 %v1296_v34, %v2316_v35  ;;  %v1297_v37 = vld [vmem:[%s4111_s0 + $0x2f8] sm:$0xff]  ;;  %v1298_v39 = vld [vmem:[%s4111_s0 + $0x300] sm:$0xff] }
 0x31a   :  { %949 = vst [vmem:[%s4113_s3 + $0x208] sm:$0xff] %v693_v41  ;;  %950 = vst [vmem:[%s4113_s3 + $0x210] sm:$0xff] %v694_v43  ;;  %v723_v38 = vmul.f32 %v1297_v37, %v2316_v35  ;;  %v724_v40 = vmul.f32 %v1298_v39, %v2316_v35  ;;  %v1299_v41 = vld [vmem:[%s4111_s0 + $0x308] sm:$0xff]  ;;  %v1300_v43 = vld [vmem:[%s4111_s0 + $0x310] sm:$0xff] }
 0x31b   :  { %951 = vst [vmem:[%s4113_s3 + $0x218] sm:$0xff] %v695_v45  ;;  %952 = vst [vmem:[%s4113_s3 + $0x220] sm:$0xff] %v696_v47  ;;  %v725_v42 = vmul.f32 %v1299_v41, %v2316_v35  ;;  %v726_v44 = vmul.f32 %v1300_v43, %v2316_v35  ;;  %v1301_v45 = vld [vmem:[%s4111_s0 + $0x318] sm:$0xff]  ;;  %v1302_v47 = vld [vmem:[%s4111_s0 + $0x320] sm:$0xff] }
 0x31c   :  { %953 = vst [vmem:[%s4113_s3 + $0x228] sm:$0xff] %v697_v49  ;;  %954 = vst [vmem:[%s4113_s3 + $0x230] sm:$0xff] %v698_v51  ;;  %v727_v46 = vmul.f32 %v1301_v45, %v2316_v35  ;;  %v728_v48 = vmul.f32 %v1302_v47, %v2316_v35  ;;  %v1303_v49 = vld [vmem:[%s4111_s0 + $0x328] sm:$0xff]  ;;  %v1304_v51 = vld [vmem:[%s4111_s0 + $0x330] sm:$0xff] }
 0x31d   :  { %955 = vst [vmem:[%s4113_s3 + $0x238] sm:$0xff] %v699_v53  ;;  %956 = vst [vmem:[%s4113_s3 + $0x240] sm:$0xff] %v700_v55  ;;  %v729_v50 = vmul.f32 %v1303_v49, %v2316_v35  ;;  %v730_v52 = vmul.f32 %v1304_v51, %v2316_v35  ;;  %v1305_v53 = vld [vmem:[%s4111_s0 + $0x338] sm:$0xff]  ;;  %v1306_v55 = vld [vmem:[%s4111_s0 + $0x340] sm:$0xff] }
 0x31e   :  { %957 = vst [vmem:[%s4113_s3 + $0x248] sm:$0xff] %v701_v57  ;;  %958 = vst [vmem:[%s4113_s3 + $0x250] sm:$0xff] %v702_v59  ;;  %v731_v54 = vmul.f32 %v1305_v53, %v2316_v35  ;;  %v732_v56 = vmul.f32 %v1306_v55, %v2316_v35  ;;  %v1307_v57 = vld [vmem:[%s4111_s0 + $0x348] sm:$0xff]  ;;  %v1308_v59 = vld [vmem:[%s4111_s0 + $0x350] sm:$0xff] }
 0x31f   :  { %959 = vst [vmem:[%s4113_s3 + $0x258] sm:$0xff] %v703_v61  ;;  %960 = vst [vmem:[%s4113_s3 + $0x260] sm:$0xff] %v704_v63  ;;  %v733_v58 = vmul.f32 %v1307_v57, %v2316_v35  ;;  %v734_v60 = vmul.f32 %v1308_v59, %v2316_v35  ;;  %v1309_v61 = vld [vmem:[%s4111_s0 + $0x358] sm:$0xff]  ;;  %v1310_v63 = vld [vmem:[%s4111_s0 + $0x360] sm:$0xff] }
 0x320   :  { %961 = vst [vmem:[%s4113_s3 + $0x268] sm:$0xff] %v705_v1  ;;  %962 = vst [vmem:[%s4113_s3 + $0x270] sm:$0xff] %v706_v3  ;;  %v735_v62 = vmul.f32 %v1309_v61, %v2316_v35  ;;  %v736_v0 = vmul.f32 %v1310_v63, %v2316_v35  ;;  %v1311_v1 = vld [vmem:[%s4111_s0 + $0x368] sm:$0xff]  ;;  %v1312_v3 = vld [vmem:[%s4111_s0 + $0x370] sm:$0xff] }
 0x321   :  { %963 = vst [vmem:[%s4113_s3 + $0x278] sm:$0xff] %v707_v5  ;;  %964 = vst [vmem:[%s4113_s3 + $0x280] sm:$0xff] %v708_v7  ;;  %v737_v2 = vmul.f32 %v1311_v1, %v2316_v35  ;;  %v738_v4 = vmul.f32 %v1312_v3, %v2316_v35  ;;  %v1313_v5 = vld [vmem:[%s4111_s0 + $0x378] sm:$0xff]  ;;  %v1314_v7 = vld [vmem:[%s4111_s0 + $0x380] sm:$0xff] }
 0x322   :  { %965 = vst [vmem:[%s4113_s3 + $0x288] sm:$0xff] %v709_v9  ;;  %966 = vst [vmem:[%s4113_s3 + $0x290] sm:$0xff] %v710_v11  ;;  %v739_v6 = vmul.f32 %v1313_v5, %v2316_v35  ;;  %v740_v8 = vmul.f32 %v1314_v7, %v2316_v35  ;;  %v1315_v9 = vld [vmem:[%s4111_s0 + $0x388] sm:$0xff]  ;;  %v1316_v11 = vld [vmem:[%s4111_s0 + $0x390] sm:$0xff] }
 0x323   :  { %967 = vst [vmem:[%s4113_s3 + $0x298] sm:$0xff] %v711_v13  ;;  %968 = vst [vmem:[%s4113_s3 + $0x2a0] sm:$0xff] %v712_v15  ;;  %v741_v10 = vmul.f32 %v1315_v9, %v2316_v35  ;;  %v742_v12 = vmul.f32 %v1316_v11, %v2316_v35  ;;  %v1317_v13 = vld [vmem:[%s4111_s0 + $0x398] sm:$0xff]  ;;  %v1318_v15 = vld [vmem:[%s4111_s0 + $0x3a0] sm:$0xff] }
 0x324   :  { %969 = vst [vmem:[%s4113_s3 + $0x2a8] sm:$0xff] %v713_v17  ;;  %970 = vst [vmem:[%s4113_s3 + $0x2b0] sm:$0xff] %v714_v19  ;;  %v743_v14 = vmul.f32 %v1317_v13, %v2316_v35  ;;  %v744_v16 = vmul.f32 %v1318_v15, %v2316_v35  ;;  %v1319_v17 = vld [vmem:[%s4111_s0 + $0x3a8] sm:$0xff]  ;;  %v1320_v19 = vld [vmem:[%s4111_s0 + $0x3b0] sm:$0xff] }
 0x325   :  { %971 = vst [vmem:[%s4113_s3 + $0x2b8] sm:$0xff] %v715_v21  ;;  %972 = vst [vmem:[%s4113_s3 + $0x2c0] sm:$0xff] %v716_v23  ;;  %v745_v18 = vmul.f32 %v1319_v17, %v2316_v35  ;;  %v746_v20 = vmul.f32 %v1320_v19, %v2316_v35  ;;  %v1321_v21 = vld [vmem:[%s4111_s0 + $0x3b8] sm:$0xff]  ;;  %v1322_v23 = vld [vmem:[%s4111_s0 + $0x3c0] sm:$0xff] }
 0x326   :  { %973 = vst [vmem:[%s4113_s3 + $0x2c8] sm:$0xff] %v717_v25  ;;  %974 = vst [vmem:[%s4113_s3 + $0x2d0] sm:$0xff] %v718_v27  ;;  %v747_v22 = vmul.f32 %v1321_v21, %v2316_v35  ;;  %v748_v24 = vmul.f32 %v1322_v23, %v2316_v35  ;;  %v1323_v25 = vld [vmem:[%s4111_s0 + $0x3c8] sm:$0xff]  ;;  %v1324_v27 = vld [vmem:[%s4111_s0 + $0x3d0] sm:$0xff] }
 0x327   :  { %975 = vst [vmem:[%s4113_s3 + $0x2d8] sm:$0xff] %v719_v29  ;;  %976 = vst [vmem:[%s4113_s3 + $0x2e0] sm:$0xff] %v720_v31  ;;  %v749_v26 = vmul.f32 %v1323_v25, %v2316_v35  ;;  %v750_v28 = vmul.f32 %v1324_v27, %v2316_v35  ;;  %v1325_v29 = vld [vmem:[%s4111_s0 + $0x3d8] sm:$0xff]  ;;  %v1326_v31 = vld [vmem:[%s4111_s0 + $0x3e0] sm:$0xff] }
 0x328   :  { %977 = vst [vmem:[%s4113_s3 + $0x2e8] sm:$0xff] %v721_v33  ;;  %978 = vst [vmem:[%s4113_s3 + $0x2f0] sm:$0xff] %v722_v36  ;;  %v751_v30 = vmul.f32 %v1325_v29, %v2316_v35  ;;  %v752_v32 = vmul.f32 %v1326_v31, %v2316_v35  ;;  %v1327_v33 = vld [vmem:[%s4111_s0 + $0x3e8] sm:$0xff]  ;;  %v1328_v36 = vld [vmem:[%s4111_s0 + $0x3f0] sm:$0xff] }
 0x329   :  { %979 = vst [vmem:[%s4113_s3 + $0x2f8] sm:$0xff] %v723_v38  ;;  %980 = vst [vmem:[%s4113_s3 + $0x300] sm:$0xff] %v724_v40  ;;  %v753_v34 = vmul.f32 %v1327_v33, %v2316_v35  ;;  %v754_v37 = vmul.f32 %v1328_v36, %v2316_v35  ;;  %v1329_v38 = vld [vmem:[%s4111_s0 + $0x3f8] sm:$0xff]  ;;  %v1330_v40 = vld [vmem:[%s4111_s0 + $0x400] sm:$0xff] }
 0x32a   :  { %981 = vst [vmem:[%s4113_s3 + $0x308] sm:$0xff] %v725_v42  ;;  %982 = vst [vmem:[%s4113_s3 + $0x310] sm:$0xff] %v726_v44  ;;  %v755_v39 = vmul.f32 %v1329_v38, %v2316_v35  ;;  %v756_v41 = vmul.f32 %v1330_v40, %v2316_v35  ;;  %v1331_v42 = vld [vmem:[%s4111_s0 + $0x408] sm:$0xff]  ;;  %v1332_v44 = vld [vmem:[%s4111_s0 + $0x410] sm:$0xff] }
 0x32b   :  { %983 = vst [vmem:[%s4113_s3 + $0x318] sm:$0xff] %v727_v46  ;;  %984 = vst [vmem:[%s4113_s3 + $0x320] sm:$0xff] %v728_v48  ;;  %v757_v43 = vmul.f32 %v1331_v42, %v2316_v35  ;;  %v758_v45 = vmul.f32 %v1332_v44, %v2316_v35  ;;  %v1333_v46 = vld [vmem:[%s4111_s0 + $0x418] sm:$0xff]  ;;  %v1334_v48 = vld [vmem:[%s4111_s0 + $0x420] sm:$0xff] }
 0x32c   :  { %985 = vst [vmem:[%s4113_s3 + $0x328] sm:$0xff] %v729_v50  ;;  %986 = vst [vmem:[%s4113_s3 + $0x330] sm:$0xff] %v730_v52  ;;  %v759_v47 = vmul.f32 %v1333_v46, %v2316_v35  ;;  %v760_v49 = vmul.f32 %v1334_v48, %v2316_v35  ;;  %v1335_v50 = vld [vmem:[%s4111_s0 + $0x428] sm:$0xff]  ;;  %v1336_v52 = vld [vmem:[%s4111_s0 + $0x430] sm:$0xff] }
 0x32d   :  { %987 = vst [vmem:[%s4113_s3 + $0x338] sm:$0xff] %v731_v54  ;;  %988 = vst [vmem:[%s4113_s3 + $0x340] sm:$0xff] %v732_v56  ;;  %v761_v51 = vmul.f32 %v1335_v50, %v2316_v35  ;;  %v762_v53 = vmul.f32 %v1336_v52, %v2316_v35  ;;  %v1337_v54 = vld [vmem:[%s4111_s0 + $0x438] sm:$0xff]  ;;  %v1338_v56 = vld [vmem:[%s4111_s0 + $0x440] sm:$0xff] }
 0x32e   :  { %989 = vst [vmem:[%s4113_s3 + $0x348] sm:$0xff] %v733_v58  ;;  %990 = vst [vmem:[%s4113_s3 + $0x350] sm:$0xff] %v734_v60  ;;  %v763_v55 = vmul.f32 %v1337_v54, %v2316_v35  ;;  %v764_v57 = vmul.f32 %v1338_v56, %v2316_v35  ;;  %v1339_v58 = vld [vmem:[%s4111_s0 + $0x448] sm:$0xff]  ;;  %v1340_v60 = vld [vmem:[%s4111_s0 + $0x450] sm:$0xff] }
 0x32f   :  { %991 = vst [vmem:[%s4113_s3 + $0x358] sm:$0xff] %v735_v62  ;;  %992 = vst [vmem:[%s4113_s3 + $0x360] sm:$0xff] %v736_v0  ;;  %v765_v59 = vmul.f32 %v1339_v58, %v2316_v35  ;;  %v766_v61 = vmul.f32 %v1340_v60, %v2316_v35  ;;  %v1341_v62 = vld [vmem:[%s4111_s0 + $0x458] sm:$0xff]  ;;  %v1342_v0 = vld [vmem:[%s4111_s0 + $0x460] sm:$0xff] }
 0x330   :  { %993 = vst [vmem:[%s4113_s3 + $0x368] sm:$0xff] %v737_v2  ;;  %994 = vst [vmem:[%s4113_s3 + $0x370] sm:$0xff] %v738_v4  ;;  %v767_v63 = vmul.f32 %v1341_v62, %v2316_v35  ;;  %v768_v1 = vmul.f32 %v1342_v0, %v2316_v35  ;;  %v1343_v2 = vld [vmem:[%s4111_s0 + $0x468] sm:$0xff]  ;;  %v1344_v4 = vld [vmem:[%s4111_s0 + $0x470] sm:$0xff] }
 0x331   :  { %995 = vst [vmem:[%s4113_s3 + $0x378] sm:$0xff] %v739_v6  ;;  %996 = vst [vmem:[%s4113_s3 + $0x380] sm:$0xff] %v740_v8  ;;  %v769_v3 = vmul.f32 %v1343_v2, %v2316_v35  ;;  %v770_v5 = vmul.f32 %v1344_v4, %v2316_v35  ;;  %v1345_v6 = vld [vmem:[%s4111_s0 + $0x478] sm:$0xff]  ;;  %v1346_v8 = vld [vmem:[%s4111_s0 + $0x480] sm:$0xff] }
 0x332   :  { %997 = vst [vmem:[%s4113_s3 + $0x388] sm:$0xff] %v741_v10  ;;  %998 = vst [vmem:[%s4113_s3 + $0x390] sm:$0xff] %v742_v12  ;;  %v771_v7 = vmul.f32 %v1345_v6, %v2316_v35  ;;  %v772_v9 = vmul.f32 %v1346_v8, %v2316_v35  ;;  %v1347_v10 = vld [vmem:[%s4111_s0 + $0x488] sm:$0xff]  ;;  %v1348_v12 = vld [vmem:[%s4111_s0 + $0x490] sm:$0xff] }
 0x333   :  { %999 = vst [vmem:[%s4113_s3 + $0x398] sm:$0xff] %v743_v14  ;;  %1000 = vst [vmem:[%s4113_s3 + $0x3a0] sm:$0xff] %v744_v16  ;;  %v773_v11 = vmul.f32 %v1347_v10, %v2316_v35  ;;  %v774_v13 = vmul.f32 %v1348_v12, %v2316_v35  ;;  %v1349_v14 = vld [vmem:[%s4111_s0 + $0x498] sm:$0xff]  ;;  %v1350_v16 = vld [vmem:[%s4111_s0 + $0x4a0] sm:$0xff] }
 0x334   :  { %1001 = vst [vmem:[%s4113_s3 + $0x3a8] sm:$0xff] %v745_v18  ;;  %1002 = vst [vmem:[%s4113_s3 + $0x3b0] sm:$0xff] %v746_v20  ;;  %v775_v15 = vmul.f32 %v1349_v14, %v2316_v35  ;;  %v776_v17 = vmul.f32 %v1350_v16, %v2316_v35  ;;  %v1351_v18 = vld [vmem:[%s4111_s0 + $0x4a8] sm:$0xff]  ;;  %v1352_v20 = vld [vmem:[%s4111_s0 + $0x4b0] sm:$0xff] }
 0x335   :  { %1003 = vst [vmem:[%s4113_s3 + $0x3b8] sm:$0xff] %v747_v22  ;;  %1004 = vst [vmem:[%s4113_s3 + $0x3c0] sm:$0xff] %v748_v24  ;;  %v777_v19 = vmul.f32 %v1351_v18, %v2316_v35  ;;  %v778_v21 = vmul.f32 %v1352_v20, %v2316_v35  ;;  %v1353_v22 = vld [vmem:[%s4111_s0 + $0x4b8] sm:$0xff]  ;;  %v1354_v24 = vld [vmem:[%s4111_s0 + $0x4c0] sm:$0xff] }
 0x336   :  { %1005 = vst [vmem:[%s4113_s3 + $0x3c8] sm:$0xff] %v749_v26  ;;  %1006 = vst [vmem:[%s4113_s3 + $0x3d0] sm:$0xff] %v750_v28  ;;  %v779_v23 = vmul.f32 %v1353_v22, %v2316_v35  ;;  %v780_v25 = vmul.f32 %v1354_v24, %v2316_v35  ;;  %v1355_v26 = vld [vmem:[%s4111_s0 + $0x4c8] sm:$0xff]  ;;  %v1356_v28 = vld [vmem:[%s4111_s0 + $0x4d0] sm:$0xff] }
 0x337   :  { %1007 = vst [vmem:[%s4113_s3 + $0x3d8] sm:$0xff] %v751_v30  ;;  %1008 = vst [vmem:[%s4113_s3 + $0x3e0] sm:$0xff] %v752_v32  ;;  %v781_v27 = vmul.f32 %v1355_v26, %v2316_v35  ;;  %v782_v29 = vmul.f32 %v1356_v28, %v2316_v35  ;;  %v1357_v30 = vld [vmem:[%s4111_s0 + $0x4d8] sm:$0xff]  ;;  %v1358_v32 = vld [vmem:[%s4111_s0 + $0x4e0] sm:$0xff] }
 0x338   :  { %1009 = vst [vmem:[%s4113_s3 + $0x3e8] sm:$0xff] %v753_v34  ;;  %1010 = vst [vmem:[%s4113_s3 + $0x3f0] sm:$0xff] %v754_v37  ;;  %v783_v31 = vmul.f32 %v1357_v30, %v2316_v35  ;;  %v784_v33 = vmul.f32 %v1358_v32, %v2316_v35  ;;  %v1359_v34 = vld [vmem:[%s4111_s0 + $0x4e8] sm:$0xff]  ;;  %v1360_v37 = vld [vmem:[%s4111_s0 + $0x4f0] sm:$0xff] }
 0x339   :  { %1011 = vst [vmem:[%s4113_s3 + $0x3f8] sm:$0xff] %v755_v39  ;;  %1012 = vst [vmem:[%s4113_s3 + $0x400] sm:$0xff] %v756_v41  ;;  %v785_v36 = vmul.f32 %v1359_v34, %v2316_v35  ;;  %v786_v38 = vmul.f32 %v1360_v37, %v2316_v35  ;;  %v1361_v39 = vld [vmem:[%s4111_s0 + $0x4f8] sm:$0xff]  ;;  %v1362_v41 = vld [vmem:[%s4111_s0 + $0x500] sm:$0xff] }
 0x33a   :  { %1013 = vst [vmem:[%s4113_s3 + $0x408] sm:$0xff] %v757_v43  ;;  %1014 = vst [vmem:[%s4113_s3 + $0x410] sm:$0xff] %v758_v45  ;;  %v787_v40 = vmul.f32 %v1361_v39, %v2316_v35  ;;  %v788_v42 = vmul.f32 %v1362_v41, %v2316_v35  ;;  %v1363_v43 = vld [vmem:[%s4111_s0 + $0x508] sm:$0xff]  ;;  %v1364_v45 = vld [vmem:[%s4111_s0 + $0x510] sm:$0xff] }
 0x33b   :  { %1015 = vst [vmem:[%s4113_s3 + $0x418] sm:$0xff] %v759_v47  ;;  %1016 = vst [vmem:[%s4113_s3 + $0x420] sm:$0xff] %v760_v49  ;;  %v789_v44 = vmul.f32 %v1363_v43, %v2316_v35  ;;  %v790_v46 = vmul.f32 %v1364_v45, %v2316_v35  ;;  %v1365_v47 = vld [vmem:[%s4111_s0 + $0x518] sm:$0xff]  ;;  %v1366_v49 = vld [vmem:[%s4111_s0 + $0x520] sm:$0xff] }
 0x33c   :  { %1017 = vst [vmem:[%s4113_s3 + $0x428] sm:$0xff] %v761_v51  ;;  %1018 = vst [vmem:[%s4113_s3 + $0x430] sm:$0xff] %v762_v53  ;;  %v791_v48 = vmul.f32 %v1365_v47, %v2316_v35  ;;  %v792_v50 = vmul.f32 %v1366_v49, %v2316_v35  ;;  %v1367_v51 = vld [vmem:[%s4111_s0 + $0x528] sm:$0xff]  ;;  %v1368_v53 = vld [vmem:[%s4111_s0 + $0x530] sm:$0xff] }
 0x33d   :  { %1019 = vst [vmem:[%s4113_s3 + $0x438] sm:$0xff] %v763_v55  ;;  %1020 = vst [vmem:[%s4113_s3 + $0x440] sm:$0xff] %v764_v57  ;;  %v793_v52 = vmul.f32 %v1367_v51, %v2316_v35  ;;  %v794_v54 = vmul.f32 %v1368_v53, %v2316_v35  ;;  %v1369_v55 = vld [vmem:[%s4111_s0 + $0x538] sm:$0xff]  ;;  %v1370_v57 = vld [vmem:[%s4111_s0 + $0x540] sm:$0xff] }
 0x33e   :  { %1021 = vst [vmem:[%s4113_s3 + $0x448] sm:$0xff] %v765_v59  ;;  %1022 = vst [vmem:[%s4113_s3 + $0x450] sm:$0xff] %v766_v61  ;;  %v795_v56 = vmul.f32 %v1369_v55, %v2316_v35  ;;  %v796_v58 = vmul.f32 %v1370_v57, %v2316_v35  ;;  %v1371_v59 = vld [vmem:[%s4111_s0 + $0x548] sm:$0xff]  ;;  %v1372_v61 = vld [vmem:[%s4111_s0 + $0x550] sm:$0xff] }
 0x33f   :  { %1023 = vst [vmem:[%s4113_s3 + $0x458] sm:$0xff] %v767_v63  ;;  %1024 = vst [vmem:[%s4113_s3 + $0x460] sm:$0xff] %v768_v1  ;;  %v797_v60 = vmul.f32 %v1371_v59, %v2316_v35  ;;  %v798_v62 = vmul.f32 %v1372_v61, %v2316_v35  ;;  %v1373_v63 = vld [vmem:[%s4111_s0 + $0x558] sm:$0xff]  ;;  %v1374_v1 = vld [vmem:[%s4111_s0 + $0x560] sm:$0xff] }
 0x340   :  { %1025 = vst [vmem:[%s4113_s3 + $0x468] sm:$0xff] %v769_v3  ;;  %1026 = vst [vmem:[%s4113_s3 + $0x470] sm:$0xff] %v770_v5  ;;  %v799_v0 = vmul.f32 %v1373_v63, %v2316_v35  ;;  %v800_v2 = vmul.f32 %v1374_v1, %v2316_v35  ;;  %v1375_v3 = vld [vmem:[%s4111_s0 + $0x568] sm:$0xff]  ;;  %v1376_v5 = vld [vmem:[%s4111_s0 + $0x570] sm:$0xff] }
 0x341   :  { %1027 = vst [vmem:[%s4113_s3 + $0x478] sm:$0xff] %v771_v7  ;;  %1028 = vst [vmem:[%s4113_s3 + $0x480] sm:$0xff] %v772_v9  ;;  %v801_v4 = vmul.f32 %v1375_v3, %v2316_v35  ;;  %v802_v6 = vmul.f32 %v1376_v5, %v2316_v35  ;;  %v1377_v7 = vld [vmem:[%s4111_s0 + $0x578] sm:$0xff]  ;;  %v1378_v9 = vld [vmem:[%s4111_s0 + $0x580] sm:$0xff] }
 0x342   :  { %1029 = vst [vmem:[%s4113_s3 + $0x488] sm:$0xff] %v773_v11  ;;  %1030 = vst [vmem:[%s4113_s3 + $0x490] sm:$0xff] %v774_v13  ;;  %v803_v8 = vmul.f32 %v1377_v7, %v2316_v35  ;;  %v804_v10 = vmul.f32 %v1378_v9, %v2316_v35  ;;  %v1379_v11 = vld [vmem:[%s4111_s0 + $0x588] sm:$0xff]  ;;  %v1380_v13 = vld [vmem:[%s4111_s0 + $0x590] sm:$0xff] }
 0x343   :  { %1031 = vst [vmem:[%s4113_s3 + $0x498] sm:$0xff] %v775_v15  ;;  %1032 = vst [vmem:[%s4113_s3 + $0x4a0] sm:$0xff] %v776_v17  ;;  %v805_v12 = vmul.f32 %v1379_v11, %v2316_v35  ;;  %v806_v14 = vmul.f32 %v1380_v13, %v2316_v35  ;;  %v1381_v15 = vld [vmem:[%s4111_s0 + $0x598] sm:$0xff]  ;;  %v1382_v17 = vld [vmem:[%s4111_s0 + $0x5a0] sm:$0xff] }
 0x344   :  { %1033 = vst [vmem:[%s4113_s3 + $0x4a8] sm:$0xff] %v777_v19  ;;  %1034 = vst [vmem:[%s4113_s3 + $0x4b0] sm:$0xff] %v778_v21  ;;  %v807_v16 = vmul.f32 %v1381_v15, %v2316_v35  ;;  %v808_v18 = vmul.f32 %v1382_v17, %v2316_v35  ;;  %v1383_v19 = vld [vmem:[%s4111_s0 + $0x5a8] sm:$0xff]  ;;  %v1384_v21 = vld [vmem:[%s4111_s0 + $0x5b0] sm:$0xff] }
 0x345   :  { %1035 = vst [vmem:[%s4113_s3 + $0x4b8] sm:$0xff] %v779_v23  ;;  %1036 = vst [vmem:[%s4113_s3 + $0x4c0] sm:$0xff] %v780_v25  ;;  %v809_v20 = vmul.f32 %v1383_v19, %v2316_v35  ;;  %v810_v22 = vmul.f32 %v1384_v21, %v2316_v35  ;;  %v1385_v23 = vld [vmem:[%s4111_s0 + $0x5b8] sm:$0xff]  ;;  %v1386_v25 = vld [vmem:[%s4111_s0 + $0x5c0] sm:$0xff] }
 0x346   :  { %1037 = vst [vmem:[%s4113_s3 + $0x4c8] sm:$0xff] %v781_v27  ;;  %1038 = vst [vmem:[%s4113_s3 + $0x4d0] sm:$0xff] %v782_v29  ;;  %v811_v24 = vmul.f32 %v1385_v23, %v2316_v35  ;;  %v812_v26 = vmul.f32 %v1386_v25, %v2316_v35  ;;  %v1387_v27 = vld [vmem:[%s4111_s0 + $0x5c8] sm:$0xff]  ;;  %v1388_v29 = vld [vmem:[%s4111_s0 + $0x5d0] sm:$0xff] }
 0x347   :  { %1039 = vst [vmem:[%s4113_s3 + $0x4d8] sm:$0xff] %v783_v31  ;;  %1040 = vst [vmem:[%s4113_s3 + $0x4e0] sm:$0xff] %v784_v33  ;;  %v813_v28 = vmul.f32 %v1387_v27, %v2316_v35  ;;  %v814_v30 = vmul.f32 %v1388_v29, %v2316_v35  ;;  %v1389_v31 = vld [vmem:[%s4111_s0 + $0x5d8] sm:$0xff]  ;;  %v1390_v33 = vld [vmem:[%s4111_s0 + $0x5e0] sm:$0xff] }
 0x348   :  { %1041 = vst [vmem:[%s4113_s3 + $0x4e8] sm:$0xff] %v785_v36  ;;  %1042 = vst [vmem:[%s4113_s3 + $0x4f0] sm:$0xff] %v786_v38  ;;  %v815_v32 = vmul.f32 %v1389_v31, %v2316_v35  ;;  %v816_v34 = vmul.f32 %v1390_v33, %v2316_v35  ;;  %v1391_v36 = vld [vmem:[%s4111_s0 + $0x5e8] sm:$0xff]  ;;  %v1392_v38 = vld [vmem:[%s4111_s0 + $0x5f0] sm:$0xff] }
 0x349   :  { %1043 = vst [vmem:[%s4113_s3 + $0x4f8] sm:$0xff] %v787_v40  ;;  %1044 = vst [vmem:[%s4113_s3 + $0x500] sm:$0xff] %v788_v42  ;;  %v817_v37 = vmul.f32 %v1391_v36, %v2316_v35  ;;  %v818_v39 = vmul.f32 %v1392_v38, %v2316_v35  ;;  %v1393_v40 = vld [vmem:[%s4111_s0 + $0x5f8] sm:$0xff]  ;;  %v1394_v42 = vld [vmem:[%s4111_s0 + $0x600] sm:$0xff] }
 0x34a   :  { %1045 = vst [vmem:[%s4113_s3 + $0x508] sm:$0xff] %v789_v44  ;;  %1046 = vst [vmem:[%s4113_s3 + $0x510] sm:$0xff] %v790_v46  ;;  %v819_v41 = vmul.f32 %v1393_v40, %v2316_v35  ;;  %v820_v43 = vmul.f32 %v1394_v42, %v2316_v35  ;;  %v1395_v44 = vld [vmem:[%s4111_s0 + $0x608] sm:$0xff]  ;;  %v1396_v46 = vld [vmem:[%s4111_s0 + $0x610] sm:$0xff] }
 0x34b   :  { %1047 = vst [vmem:[%s4113_s3 + $0x518] sm:$0xff] %v791_v48  ;;  %1048 = vst [vmem:[%s4113_s3 + $0x520] sm:$0xff] %v792_v50  ;;  %v821_v45 = vmul.f32 %v1395_v44, %v2316_v35  ;;  %v822_v47 = vmul.f32 %v1396_v46, %v2316_v35  ;;  %v1397_v48 = vld [vmem:[%s4111_s0 + $0x618] sm:$0xff]  ;;  %v1398_v50 = vld [vmem:[%s4111_s0 + $0x620] sm:$0xff] }
 0x34c   :  { %1049 = vst [vmem:[%s4113_s3 + $0x528] sm:$0xff] %v793_v52  ;;  %1050 = vst [vmem:[%s4113_s3 + $0x530] sm:$0xff] %v794_v54  ;;  %v823_v49 = vmul.f32 %v1397_v48, %v2316_v35  ;;  %v824_v51 = vmul.f32 %v1398_v50, %v2316_v35  ;;  %v1399_v52 = vld [vmem:[%s4111_s0 + $0x628] sm:$0xff]  ;;  %v1400_v54 = vld [vmem:[%s4111_s0 + $0x630] sm:$0xff] }
 0x34d   :  { %1051 = vst [vmem:[%s4113_s3 + $0x538] sm:$0xff] %v795_v56  ;;  %1052 = vst [vmem:[%s4113_s3 + $0x540] sm:$0xff] %v796_v58  ;;  %v825_v53 = vmul.f32 %v1399_v52, %v2316_v35  ;;  %v826_v55 = vmul.f32 %v1400_v54, %v2316_v35  ;;  %v1401_v56 = vld [vmem:[%s4111_s0 + $0x638] sm:$0xff]  ;;  %v1402_v58 = vld [vmem:[%s4111_s0 + $0x640] sm:$0xff] }
 0x34e   :  { %1053 = vst [vmem:[%s4113_s3 + $0x548] sm:$0xff] %v797_v60  ;;  %1054 = vst [vmem:[%s4113_s3 + $0x550] sm:$0xff] %v798_v62  ;;  %v827_v57 = vmul.f32 %v1401_v56, %v2316_v35  ;;  %v828_v59 = vmul.f32 %v1402_v58, %v2316_v35  ;;  %v1403_v60 = vld [vmem:[%s4111_s0 + $0x648] sm:$0xff]  ;;  %v1404_v62 = vld [vmem:[%s4111_s0 + $0x650] sm:$0xff] }
 0x34f   :  { %1055 = vst [vmem:[%s4113_s3 + $0x558] sm:$0xff] %v799_v0  ;;  %1056 = vst [vmem:[%s4113_s3 + $0x560] sm:$0xff] %v800_v2  ;;  %v829_v61 = vmul.f32 %v1403_v60, %v2316_v35  ;;  %v830_v63 = vmul.f32 %v1404_v62, %v2316_v35  ;;  %v1405_v0 = vld [vmem:[%s4111_s0 + $0x658] sm:$0xff]  ;;  %v1406_v2 = vld [vmem:[%s4111_s0 + $0x660] sm:$0xff] }
 0x350   :  { %1057 = vst [vmem:[%s4113_s3 + $0x568] sm:$0xff] %v801_v4  ;;  %1058 = vst [vmem:[%s4113_s3 + $0x570] sm:$0xff] %v802_v6  ;;  %v831_v1 = vmul.f32 %v1405_v0, %v2316_v35  ;;  %v832_v3 = vmul.f32 %v1406_v2, %v2316_v35  ;;  %v1407_v4 = vld [vmem:[%s4111_s0 + $0x668] sm:$0xff]  ;;  %v1408_v6 = vld [vmem:[%s4111_s0 + $0x670] sm:$0xff] }
 0x351   :  { %1059 = vst [vmem:[%s4113_s3 + $0x578] sm:$0xff] %v803_v8  ;;  %1060 = vst [vmem:[%s4113_s3 + $0x580] sm:$0xff] %v804_v10  ;;  %v833_v5 = vmul.f32 %v1407_v4, %v2316_v35  ;;  %v834_v7 = vmul.f32 %v1408_v6, %v2316_v35  ;;  %v1409_v8 = vld [vmem:[%s4111_s0 + $0x678] sm:$0xff]  ;;  %v1410_v10 = vld [vmem:[%s4111_s0 + $0x680] sm:$0xff] }
 0x352   :  { %1061 = vst [vmem:[%s4113_s3 + $0x588] sm:$0xff] %v805_v12  ;;  %1062 = vst [vmem:[%s4113_s3 + $0x590] sm:$0xff] %v806_v14  ;;  %v835_v9 = vmul.f32 %v1409_v8, %v2316_v35  ;;  %v836_v11 = vmul.f32 %v1410_v10, %v2316_v35  ;;  %v1411_v12 = vld [vmem:[%s4111_s0 + $0x688] sm:$0xff]  ;;  %v1412_v14 = vld [vmem:[%s4111_s0 + $0x690] sm:$0xff] }
 0x353   :  { %1063 = vst [vmem:[%s4113_s3 + $0x598] sm:$0xff] %v807_v16  ;;  %1064 = vst [vmem:[%s4113_s3 + $0x5a0] sm:$0xff] %v808_v18  ;;  %v837_v13 = vmul.f32 %v1411_v12, %v2316_v35  ;;  %v838_v15 = vmul.f32 %v1412_v14, %v2316_v35  ;;  %v1413_v16 = vld [vmem:[%s4111_s0 + $0x698] sm:$0xff]  ;;  %v1414_v18 = vld [vmem:[%s4111_s0 + $0x6a0] sm:$0xff] }
 0x354   :  { %1065 = vst [vmem:[%s4113_s3 + $0x5a8] sm:$0xff] %v809_v20  ;;  %1066 = vst [vmem:[%s4113_s3 + $0x5b0] sm:$0xff] %v810_v22  ;;  %v839_v17 = vmul.f32 %v1413_v16, %v2316_v35  ;;  %v840_v19 = vmul.f32 %v1414_v18, %v2316_v35  ;;  %v1415_v20 = vld [vmem:[%s4111_s0 + $0x6a8] sm:$0xff]  ;;  %v1416_v22 = vld [vmem:[%s4111_s0 + $0x6b0] sm:$0xff] }
 0x355   :  { %1067 = vst [vmem:[%s4113_s3 + $0x5b8] sm:$0xff] %v811_v24  ;;  %1068 = vst [vmem:[%s4113_s3 + $0x5c0] sm:$0xff] %v812_v26  ;;  %v841_v21 = vmul.f32 %v1415_v20, %v2316_v35  ;;  %v842_v23 = vmul.f32 %v1416_v22, %v2316_v35  ;;  %v1417_v24 = vld [vmem:[%s4111_s0 + $0x6b8] sm:$0xff]  ;;  %v1418_v26 = vld [vmem:[%s4111_s0 + $0x6c0] sm:$0xff] }
 0x356   :  { %1069 = vst [vmem:[%s4113_s3 + $0x5c8] sm:$0xff] %v813_v28  ;;  %1070 = vst [vmem:[%s4113_s3 + $0x5d0] sm:$0xff] %v814_v30  ;;  %v843_v25 = vmul.f32 %v1417_v24, %v2316_v35  ;;  %v844_v27 = vmul.f32 %v1418_v26, %v2316_v35  ;;  %v1419_v28 = vld [vmem:[%s4111_s0 + $0x6c8] sm:$0xff]  ;;  %v1420_v30 = vld [vmem:[%s4111_s0 + $0x6d0] sm:$0xff] }
 0x357   :  { %1071 = vst [vmem:[%s4113_s3 + $0x5d8] sm:$0xff] %v815_v32  ;;  %1072 = vst [vmem:[%s4113_s3 + $0x5e0] sm:$0xff] %v816_v34  ;;  %v845_v29 = vmul.f32 %v1419_v28, %v2316_v35  ;;  %v846_v31 = vmul.f32 %v1420_v30, %v2316_v35  ;;  %v1421_v32 = vld [vmem:[%s4111_s0 + $0x6d8] sm:$0xff]  ;;  %v1422_v34 = vld [vmem:[%s4111_s0 + $0x6e0] sm:$0xff] }
 0x358   :  { %1073 = vst [vmem:[%s4113_s3 + $0x5e8] sm:$0xff] %v817_v37  ;;  %1074 = vst [vmem:[%s4113_s3 + $0x5f0] sm:$0xff] %v818_v39  ;;  %v847_v33 = vmul.f32 %v1421_v32, %v2316_v35  ;;  %v848_v36 = vmul.f32 %v1422_v34, %v2316_v35  ;;  %v1423_v37 = vld [vmem:[%s4111_s0 + $0x6e8] sm:$0xff]  ;;  %v1424_v39 = vld [vmem:[%s4111_s0 + $0x6f0] sm:$0xff] }
 0x359   :  { %1075 = vst [vmem:[%s4113_s3 + $0x5f8] sm:$0xff] %v819_v41  ;;  %1076 = vst [vmem:[%s4113_s3 + $0x600] sm:$0xff] %v820_v43  ;;  %v849_v38 = vmul.f32 %v1423_v37, %v2316_v35  ;;  %v850_v40 = vmul.f32 %v1424_v39, %v2316_v35  ;;  %v1425_v41 = vld [vmem:[%s4111_s0 + $0x6f8] sm:$0xff]  ;;  %v1426_v43 = vld [vmem:[%s4111_s0 + $0x700] sm:$0xff] }
 0x35a   :  { %1077 = vst [vmem:[%s4113_s3 + $0x608] sm:$0xff] %v821_v45  ;;  %1078 = vst [vmem:[%s4113_s3 + $0x610] sm:$0xff] %v822_v47  ;;  %v851_v42 = vmul.f32 %v1425_v41, %v2316_v35  ;;  %v852_v44 = vmul.f32 %v1426_v43, %v2316_v35  ;;  %v1427_v45 = vld [vmem:[%s4111_s0 + $0x708] sm:$0xff]  ;;  %v1428_v47 = vld [vmem:[%s4111_s0 + $0x710] sm:$0xff] }
 0x35b   :  { %1079 = vst [vmem:[%s4113_s3 + $0x618] sm:$0xff] %v823_v49  ;;  %1080 = vst [vmem:[%s4113_s3 + $0x620] sm:$0xff] %v824_v51  ;;  %v853_v46 = vmul.f32 %v1427_v45, %v2316_v35  ;;  %v854_v48 = vmul.f32 %v1428_v47, %v2316_v35  ;;  %v1429_v49 = vld [vmem:[%s4111_s0 + $0x718] sm:$0xff]  ;;  %v1430_v51 = vld [vmem:[%s4111_s0 + $0x720] sm:$0xff] }
 0x35c   :  { %1081 = vst [vmem:[%s4113_s3 + $0x628] sm:$0xff] %v825_v53  ;;  %1082 = vst [vmem:[%s4113_s3 + $0x630] sm:$0xff] %v826_v55  ;;  %v855_v50 = vmul.f32 %v1429_v49, %v2316_v35  ;;  %v856_v52 = vmul.f32 %v1430_v51, %v2316_v35  ;;  %v1431_v53 = vld [vmem:[%s4111_s0 + $0x728] sm:$0xff]  ;;  %v1432_v55 = vld [vmem:[%s4111_s0 + $0x730] sm:$0xff] }
 0x35d   :  { %1083 = vst [vmem:[%s4113_s3 + $0x638] sm:$0xff] %v827_v57  ;;  %1084 = vst [vmem:[%s4113_s3 + $0x640] sm:$0xff] %v828_v59  ;;  %v857_v54 = vmul.f32 %v1431_v53, %v2316_v35  ;;  %v858_v56 = vmul.f32 %v1432_v55, %v2316_v35  ;;  %v1433_v57 = vld [vmem:[%s4111_s0 + $0x738] sm:$0xff]  ;;  %v1434_v59 = vld [vmem:[%s4111_s0 + $0x740] sm:$0xff] }
 0x35e   :  { %1085 = vst [vmem:[%s4113_s3 + $0x648] sm:$0xff] %v829_v61  ;;  %1086 = vst [vmem:[%s4113_s3 + $0x650] sm:$0xff] %v830_v63  ;;  %v859_v58 = vmul.f32 %v1433_v57, %v2316_v35  ;;  %v860_v60 = vmul.f32 %v1434_v59, %v2316_v35  ;;  %v1435_v61 = vld [vmem:[%s4111_s0 + $0x748] sm:$0xff]  ;;  %v1436_v63 = vld [vmem:[%s4111_s0 + $0x750] sm:$0xff] }
 0x35f   :  { %1087 = vst [vmem:[%s4113_s3 + $0x658] sm:$0xff] %v831_v1  ;;  %1088 = vst [vmem:[%s4113_s3 + $0x660] sm:$0xff] %v832_v3  ;;  %v861_v62 = vmul.f32 %v1435_v61, %v2316_v35  ;;  %v862_v0 = vmul.f32 %v1436_v63, %v2316_v35  ;;  %v1437_v1 = vld [vmem:[%s4111_s0 + $0x758] sm:$0xff]  ;;  %v1438_v3 = vld [vmem:[%s4111_s0 + $0x760] sm:$0xff] }
 0x360   :  { %1089 = vst [vmem:[%s4113_s3 + $0x668] sm:$0xff] %v833_v5  ;;  %1090 = vst [vmem:[%s4113_s3 + $0x670] sm:$0xff] %v834_v7  ;;  %v863_v2 = vmul.f32 %v1437_v1, %v2316_v35  ;;  %v864_v4 = vmul.f32 %v1438_v3, %v2316_v35  ;;  %v1439_v5 = vld [vmem:[%s4111_s0 + $0x768] sm:$0xff]  ;;  %v1440_v7 = vld [vmem:[%s4111_s0 + $0x770] sm:$0xff] }
 0x361   :  { %1091 = vst [vmem:[%s4113_s3 + $0x678] sm:$0xff] %v835_v9  ;;  %1092 = vst [vmem:[%s4113_s3 + $0x680] sm:$0xff] %v836_v11  ;;  %v865_v6 = vmul.f32 %v1439_v5, %v2316_v35  ;;  %v866_v8 = vmul.f32 %v1440_v7, %v2316_v35  ;;  %v1441_v9 = vld [vmem:[%s4111_s0 + $0x778] sm:$0xff]  ;;  %v1442_v11 = vld [vmem:[%s4111_s0 + $0x780] sm:$0xff] }
 0x362   :  { %1093 = vst [vmem:[%s4113_s3 + $0x688] sm:$0xff] %v837_v13  ;;  %1094 = vst [vmem:[%s4113_s3 + $0x690] sm:$0xff] %v838_v15  ;;  %v867_v10 = vmul.f32 %v1441_v9, %v2316_v35  ;;  %v868_v12 = vmul.f32 %v1442_v11, %v2316_v35  ;;  %v1443_v13 = vld [vmem:[%s4111_s0 + $0x788] sm:$0xff]  ;;  %v1444_v15 = vld [vmem:[%s4111_s0 + $0x790] sm:$0xff] }
 0x363   :  { %1095 = vst [vmem:[%s4113_s3 + $0x698] sm:$0xff] %v839_v17  ;;  %1096 = vst [vmem:[%s4113_s3 + $0x6a0] sm:$0xff] %v840_v19  ;;  %v869_v14 = vmul.f32 %v1443_v13, %v2316_v35  ;;  %v870_v16 = vmul.f32 %v1444_v15, %v2316_v35  ;;  %v1445_v17 = vld [vmem:[%s4111_s0 + $0x798] sm:$0xff]  ;;  %v1446_v19 = vld [vmem:[%s4111_s0 + $0x7a0] sm:$0xff] }
 0x364   :  { %1097 = vst [vmem:[%s4113_s3 + $0x6a8] sm:$0xff] %v841_v21  ;;  %1098 = vst [vmem:[%s4113_s3 + $0x6b0] sm:$0xff] %v842_v23  ;;  %v871_v18 = vmul.f32 %v1445_v17, %v2316_v35  ;;  %v872_v20 = vmul.f32 %v1446_v19, %v2316_v35  ;;  %v1447_v21 = vld [vmem:[%s4111_s0 + $0x7a8] sm:$0xff]  ;;  %v1448_v23 = vld [vmem:[%s4111_s0 + $0x7b0] sm:$0xff] }
 0x365   :  { %1099 = vst [vmem:[%s4113_s3 + $0x6b8] sm:$0xff] %v843_v25  ;;  %1100 = vst [vmem:[%s4113_s3 + $0x6c0] sm:$0xff] %v844_v27  ;;  %v873_v22 = vmul.f32 %v1447_v21, %v2316_v35  ;;  %v874_v24 = vmul.f32 %v1448_v23, %v2316_v35  ;;  %v1449_v25 = vld [vmem:[%s4111_s0 + $0x7b8] sm:$0xff]  ;;  %v1450_v27 = vld [vmem:[%s4111_s0 + $0x7c0] sm:$0xff] }
 0x366   :  { %1101 = vst [vmem:[%s4113_s3 + $0x6c8] sm:$0xff] %v845_v29  ;;  %1102 = vst [vmem:[%s4113_s3 + $0x6d0] sm:$0xff] %v846_v31  ;;  %v875_v26 = vmul.f32 %v1449_v25, %v2316_v35  ;;  %v876_v28 = vmul.f32 %v1450_v27, %v2316_v35  ;;  %v1451_v29 = vld [vmem:[%s4111_s0 + $0x7c8] sm:$0xff]  ;;  %v1452_v31 = vld [vmem:[%s4111_s0 + $0x7d0] sm:$0xff] }
 0x367   :  { %1103 = vst [vmem:[%s4113_s3 + $0x6d8] sm:$0xff] %v847_v33  ;;  %1104 = vst [vmem:[%s4113_s3 + $0x6e0] sm:$0xff] %v848_v36  ;;  %v877_v30 = vmul.f32 %v1451_v29, %v2316_v35  ;;  %v878_v32 = vmul.f32 %v1452_v31, %v2316_v35  ;;  %v1453_v33 = vld [vmem:[%s4111_s0 + $0x7d8] sm:$0xff]  ;;  %v1454_v36 = vld [vmem:[%s4111_s0 + $0x7e0] sm:$0xff] }
 0x368   :  { %1105 = vst [vmem:[%s4113_s3 + $0x6e8] sm:$0xff] %v849_v38  ;;  %1106 = vst [vmem:[%s4113_s3 + $0x6f0] sm:$0xff] %v850_v40  ;;  %v879_v34 = vmul.f32 %v1453_v33, %v2316_v35  ;;  %v880_v37 = vmul.f32 %v1454_v36, %v2316_v35  ;;  %v1455_v38 = vld [vmem:[%s4111_s0 + $0x7e8] sm:$0xff]  ;;  %v1456_v40 = vld [vmem:[%s4111_s0 + $0x7f0] sm:$0xff] }
 0x369   :  { %1107 = vst [vmem:[%s4113_s3 + $0x6f8] sm:$0xff] %v851_v42  ;;  %1108 = vst [vmem:[%s4113_s3 + $0x700] sm:$0xff] %v852_v44  ;;  %v881_v39 = vmul.f32 %v1455_v38, %v2316_v35  ;;  %v882_v41 = vmul.f32 %v1456_v40, %v2316_v35  ;;  %v1457_v42 = vld [vmem:[%s4111_s0 + $0x7f8] sm:$0xff] }
 0x36a   :  { %1109 = vst [vmem:[%s4113_s3 + $0x708] sm:$0xff] %v853_v46  ;;  %1110 = vst [vmem:[%s4113_s3 + $0x710] sm:$0xff] %v854_v48  ;;  %v883_v43 = vmul.f32 %v1457_v42, %v2316_v35 }
 0x36b   :  { %1111 = vst [vmem:[%s4113_s3 + $0x718] sm:$0xff] %v855_v50  ;;  %1112 = vst [vmem:[%s4113_s3 + $0x720] sm:$0xff] %v856_v52 }
 0x36c   :  { %1113 = vst [vmem:[%s4113_s3 + $0x728] sm:$0xff] %v857_v54  ;;  %1114 = vst [vmem:[%s4113_s3 + $0x730] sm:$0xff] %v858_v56 }
 0x36d   :  { %1115 = vst [vmem:[%s4113_s3 + $0x738] sm:$0xff] %v859_v58  ;;  %1116 = vst [vmem:[%s4113_s3 + $0x740] sm:$0xff] %v860_v60 }
 0x36e   :  { %1117 = vst [vmem:[%s4113_s3 + $0x748] sm:$0xff] %v861_v62  ;;  %1118 = vst [vmem:[%s4113_s3 + $0x750] sm:$0xff] %v862_v0 }
 0x36f   :  { %1119 = vst [vmem:[%s4113_s3 + $0x758] sm:$0xff] %v863_v2  ;;  %1120 = vst [vmem:[%s4113_s3 + $0x760] sm:$0xff] %v864_v4 }
 0x370   :  { %1121 = vst [vmem:[%s4113_s3 + $0x768] sm:$0xff] %v865_v6  ;;  %1122 = vst [vmem:[%s4113_s3 + $0x770] sm:$0xff] %v866_v8 }
 0x371   :  { %1123 = vst [vmem:[%s4113_s3 + $0x778] sm:$0xff] %v867_v10  ;;  %1124 = vst [vmem:[%s4113_s3 + $0x780] sm:$0xff] %v868_v12 }
 0x372   :  { %1125 = vst [vmem:[%s4113_s3 + $0x788] sm:$0xff] %v869_v14  ;;  %1126 = vst [vmem:[%s4113_s3 + $0x790] sm:$0xff] %v870_v16 }
 0x373   :  { %1127 = vst [vmem:[%s4113_s3 + $0x798] sm:$0xff] %v871_v18  ;;  %1128 = vst [vmem:[%s4113_s3 + $0x7a0] sm:$0xff] %v872_v20 }
 0x374   :  { %1129 = vst [vmem:[%s4113_s3 + $0x7a8] sm:$0xff] %v873_v22  ;;  %1130 = vst [vmem:[%s4113_s3 + $0x7b0] sm:$0xff] %v874_v24 }
 0x375   :  { %1131 = vst [vmem:[%s4113_s3 + $0x7b8] sm:$0xff] %v875_v26  ;;  %1132 = vst [vmem:[%s4113_s3 + $0x7c0] sm:$0xff] %v876_v28 }
 0x376   :  { %1133 = vst [vmem:[%s4113_s3 + $0x7c8] sm:$0xff] %v877_v30  ;;  %1134 = vst [vmem:[%s4113_s3 + $0x7d0] sm:$0xff] %v878_v32 }
 0x377   :  { %1135 = vst [vmem:[%s4113_s3 + $0x7d8] sm:$0xff] %v879_v34  ;;  %1136 = vst [vmem:[%s4113_s3 + $0x7e0] sm:$0xff] %v880_v37 }
 0x378   :  { %1137 = vst [vmem:[%s4113_s3 + $0x7e8] sm:$0xff] %v881_v39  ;;  %1138 = vst [vmem:[%s4113_s3 + $0x7f0] sm:$0xff] %v882_v41 }
 0x379   :  { %1139 = vst [vmem:[%s4113_s3 + $0x7f8] sm:$0xff] %v883_v43 }

</bundles_post_ra>
